<compile_context>
chip_gen: v7x
topology: tpu7x:2x2x1
jax: 0.10.0
libtpu: 0.0.40
codegen_flags: <defaults>
</compile_context>

<pallas_src>
import functools

import jax
import jax.numpy as jnp
import numpy as np
from jax import lax
from jax.experimental import pallas as pl
from jax.experimental.pallas import tpu as pltpu

# ---------------------------------------------------------------------------
# Static model dimensions (SpeechToTextModel with 16x16 inputs)
# ---------------------------------------------------------------------------
NUM_CLASSES = 3                     # len({'<pad>', '<start>', '<end>'})
CIN, C1, C2 = 2, 32, 64
H1 = W1 = 16                        # input spatial size
H2 = W2 = H1 // 2 + 1               # 9  after MaxPool2d(k=2, s=2, p=1)
H3 = W3 = H2 // 2 + 1               # 5  after the second pool
PH1, PW1 = H1 + 2, W1 + 2           # 18x18  zero-padded conv1 grid
PH2, PW2 = H2 + 2, W2 + 2           # 11x11  zero-padded conv2 grid
L1 = PH1 * PW1                      # 324 padded positions (conv1 out / pool1 in)
L2 = PH2 * PW2                      # 121 padded positions (conv2 out / pool2 in)
MAR1 = PW1 + 1                      # 19: margin so conv1 tap slices stay in bounds
MAR2 = PW2 + 1                      # 12: margin for conv2 tap slices
Q2 = H3 * W3                        # 25
FLAT = C2 * Q2                      # 1600: the lazily-created fc1's in_features
FC1_OUT = 128
FC2_PAD = 128                       # fc2 output padded to a lane-dense 128 columns
COMPUTE_DT = jnp.bfloat16           # matmul operand dtype (accumulation stays f32)


# ---------------------------------------------------------------------------
# One-time weight prep (pre-transpose / pre-permute / pad / cast)
# ---------------------------------------------------------------------------
def prepare_params(params):
    f32, cdt = jnp.float32, COMPUTE_DT
    # conv taps: (Cout, Cin, 3, 3) -> (9, Cin, Cout), tap index t = ky*3 + kx
    w1 = jnp.transpose(params["w_conv1"], (2, 3, 1, 0)).reshape(9, CIN, C1).astype(cdt)
    w2 = jnp.transpose(params["w_conv2"], (2, 3, 1, 0)).reshape(9, C1, C2).astype(cdt)
    b1 = params["b_conv1"].reshape(1, C1).astype(f32)
    b2 = params["b_conv2"].reshape(1, C2).astype(f32)
    # fc1: PyTorch NCHW-flatten columns (c, p) -> rows ordered (p, c) so the kernel's
    # (B, 25*64) buffer (position-major, channel-minor) feeds ONE matmul directly.
    wf1 = jnp.transpose(params["w_fc1"].reshape(FC1_OUT, C2, Q2), (2, 1, 0))
    wf1 = wf1.reshape(FLAT, FC1_OUT).astype(cdt)
    bf1 = params["b_fc1"].reshape(1, FC1_OUT).astype(f32)
    # fc2: (num_classes, 128) -> (128, 128) zero-padded -> lane-dense output store.
    wf2 = jnp.zeros((FC1_OUT, FC2_PAD), f32).at[:, :NUM_CLASSES].set(params["w_fc2"].T)
    bf2 = jnp.zeros((1, FC2_PAD), f32).at[0, :NUM_CLASSES].set(params["b_fc2"])
    return {"w1": w1, "b1": b1, "w2": w2, "b2": b2,
            "wf1": wf1, "bf1": bf1, "wf2": wf2.astype(cdt), "bf2": bf2}


def _interior_mask(ph, pw):
    """1.0 at interior positions of a (ph, pw) zero-padded grid, 0.0 on the pad ring."""
    m = np.zeros((ph * pw,), np.float32)
    for y in range(1, ph - 1):
        for x in range(1, pw - 1):
            m[y * pw + x] = 1.0
    return m


# ---------------------------------------------------------------------------
# Fused Pallas kernel: one grid step == B images, everything stays in VMEM
# ---------------------------------------------------------------------------
def _make_kernel(B):
    f32, cdt = jnp.float32, COMPUTE_DT

    def kernel(x_ref, w1_ref, b1_ref, m1_ref, w2_ref, b2_ref, m2_ref,
               wf1_ref, bf1_ref, wf2_ref, bf2_ref, o_ref,
               scr1, scr2, scr3, fbuf):

        def conv3x3(in_ref, margin, npos, pw, w_ref):
            """sum_t  shifted_window_t @ W_t ; 3 partial f32 accumulators."""
            parts = [None, None, None]
            for t in range(9):
                dy, dx = t // 3 - 1, t % 3 - 1
                off = dy * pw + dx
                tap = in_ref[pl.ds((margin + off) * B, npos * B), :].astype(cdt)
                d = jnp.dot(tap, w_ref[t], preferred_element_type=f32)
                g = t % 3
                parts[g] = d if parts[g] is None else parts[g] + d
            return parts[0] + parts[1] + parts[2]

        def pool2x2(src, pw_in, h_out, w_out, store):
            """Per output position: max of 4 aligned (B, C) tile reads, then store."""
            for oy in range(h_out):
                for ox in range(w_out):
                    vals = []
                    for di in (0, 1):
                        for dj in (0, 1):
                            r = (2 * oy + di) * pw_in + (2 * ox + dj)
                            vals.append(src[pl.ds(r * B, B), :])
                    m = jnp.maximum(jnp.maximum(vals[0], vals[1]),
                                    jnp.maximum(vals[2], vals[3]))
                    store(oy, ox, m)

        # ---- conv1 + ReLU (output on the full 18x18 padded grid, ring masked to 0) --
        z1 = conv3x3(x_ref, MAR1, L1, PW1, w1_ref)                   # (L1*B, 32) f32
        scr1[...] = jnp.maximum(z1 + b1_ref[...], 0.0) * m1_ref[...]

        # ---- pool1 -> conv2 input buffer (11x11 padded layout, ring/margins = 0) ----
        scr2[...] = jnp.zeros_like(scr2)

        def store_pool1(oy, ox, m):
            dst = (MAR2 + (oy + 1) * PW2 + (ox + 1)) * B
            scr2[pl.ds(dst, B), :] = m

        pool2x2(scr1, PW1, H2, W2, store_pool1)

        # ---- conv2 + ReLU ----------------------------------------------------------
        z2 = conv3x3(scr2, MAR2, L2, PW2, w2_ref)                    # (L2*B, 64) f32
        scr3[...] = jnp.maximum(z2 + b2_ref[...], 0.0) * m2_ref[...]

        # ---- pool2 -> (B, 1600) fc1 input buffer, already in (p, c) weight order ----
        def store_pool2(oy, ox, m):
            p = oy * W3 + ox
            fbuf[:, pl.ds(p * C2, C2)] = m

        pool2x2(scr3, PW2, H3, W3, store_pool2)

        # ---- fc1 (single K=1600 matmul) and fc2 (lane-dense padded output) ----------
        h = jnp.dot(fbuf[...].astype(cdt), wf1_ref[...],
                    preferred_element_type=f32) + bf1_ref[...]
        out = jnp.dot(h.astype(cdt), wf2_ref[...],
                      preferred_element_type=f32) + bf2_ref[...]
        o_ref[...] = out.astype(o_ref.dtype)

    return kernel


@jax.jit
def speech_to_text_forward(x_nchw, kp):
    """Forward pass matching SpeechToTextModel; x_nchw: (N, 2, 16, 16) float32."""
    N = x_nchw.shape[0]
    B = max(1, min(8, N // 2))            # images per grid step; keeps grid >= 2
    steps = -(-N // B)
    npad = steps * B
    xin_rows = (L1 + 2 * MAR1) * B        # padded grid + zero margins for tap slices

    # NCHW -> zero-padded NHWC, packed (padded-position-major, batch-minor) per step.
    x = jnp.transpose(x_nchw, (0, 2, 3, 1))                              # (N,16,16,2)
    x = jnp.pad(x, ((0, npad - N), (1, 1), (1, 1), (0, 0)))              # (npad,18,18,2)
    x = x.reshape(steps, B, L1, CIN)
    x = jnp.transpose(x, (0, 2, 1, 3)).reshape(steps, L1 * B, CIN)
    x = jnp.pad(x, ((0, 0), (MAR1 * B, MAR1 * B), (0, 0))).astype(COMPUTE_DT)

    # Interior masks (zero the pad ring after bias+ReLU), tiled for batch-minor rows.
    m1 = jnp.asarray(np.repeat(_interior_mask(PH1, PW1), B).reshape(L1 * B, 1))
    m2 = jnp.asarray(np.repeat(_interior_mask(PH2, PW2), B).reshape(L2 * B, 1))

    def full(shape):
        nd = len(shape)
        return pl.BlockSpec(shape, lambda s, _nd=nd: (0,) * _nd)

    operands = (x, kp["w1"], kp["b1"], m1, kp["w2"], kp["b2"], m2,
                kp["wf1"], kp["bf1"], kp["wf2"], kp["bf2"])

    flops = 2 * steps * B * (9 * L1 * CIN * C1 + 9 * L2 * C1 * C2
                             + FLAT * FC1_OUT + FC1_OUT * FC2_PAD)
    bytes_accessed = sum(int(np.prod(a.shape)) * a.dtype.itemsize for a in operands)
    bytes_accessed += npad * FC2_PAD * 4

    out = pl.pallas_call(
        _make_kernel(B),
        out_shape=jax.ShapeDtypeStruct((steps, B, FC2_PAD), jnp.float32),
        grid=(steps,),
        in_specs=[
            pl.BlockSpec((None, xin_rows, CIN), lambda s: (s, 0, 0)),  # B images / step
            full((9, CIN, C1)), full((1, C1)), full((L1 * B, 1)),
            full((9, C1, C2)), full((1, C2)), full((L2 * B, 1)),
            full((FLAT, FC1_OUT)), full((1, FC1_OUT)),
            full((FC1_OUT, FC2_PAD)), full((1, FC2_PAD)),
        ],
        out_specs=pl.BlockSpec((None, B, FC2_PAD), lambda s: (s, 0, 0)),
        scratch_shapes=[
            pltpu.VMEM((L1 * B, C1), jnp.float32),                 # conv1 out / pool1 in
            pltpu.VMEM(((L2 + 2 * MAR2) * B, C1), jnp.float32),    # pool1 out / conv2 in
            pltpu.VMEM((L2 * B, C2), jnp.float32),                 # conv2 out / pool2 in
            pltpu.VMEM((B, FLAT), jnp.float32),                    # fc1 input (B, 1600)
        ],
        compiler_params=pltpu.CompilerParams(
            dimension_semantics=("parallel",),    # batch steps shard across v7x's 2 TCs
            vmem_limit_bytes=32 * 1024 * 1024,
        ),
        cost_estimate=pl.CostEstimate(flops=flops, transcendentals=0,
                                      bytes_accessed=bytes_accessed),
    )(*operands)

    return out.reshape(npad, FC2_PAD)[:N, :NUM_CLASSES]


# ---------------------------------------------------------------------------
# Pure-JAX f32 reference (PyTorch semantics) for the correctness check
# ---------------------------------------------------------------------------
def ref_forward(x_nchw, p):
    def conv_relu(x, w, b):
        y = lax.conv_general_dilated(
            x, jnp.transpose(w, (2, 3, 1, 0)), (1, 1), ((1, 1), (1, 1)),
            dimension_numbers=("NHWC", "HWIO", "NHWC"))
        return jnp.maximum(y + b, 0.0)

    def pool(x):
        return lax.reduce_window(x, -jnp.inf, lax.max, (1, 2, 2, 1), (1, 2, 2, 1),
                                 ((0, 0), (1, 1), (1, 1), (0, 0)))

    x = jnp.transpose(x_nchw, (0, 2, 3, 1))
    x = pool(conv_relu(x, p["w_conv1"], p["b_conv1"]))
    x = pool(conv_relu(x, p["w_conv2"], p["b_conv2"]))
    n = x.shape[0]
    x = jnp.transpose(x, (0, 3, 1, 2)).reshape(n, -1)        # PyTorch NCHW flatten
    x = x @ p["w_fc1"].T + p["b_fc1"]
    return x @ p["w_fc2"].T + p["b_fc2"]


# ---------------------------------------------------------------------------
if __name__ == "__main__":
    N = 2
    key = jax.random.PRNGKey(0)
    ks = jax.random.split(key, 9)
    params = {
        "w_conv1": 0.10 * jax.random.normal(ks[0], (C1, CIN, 3, 3), jnp.float32),
        "b_conv1": 0.10 * jax.random.normal(ks[1], (C1,), jnp.float32),
        "w_conv2": 0.05 * jax.random.normal(ks[2], (C2, C1, 3, 3), jnp.float32),
        "b_conv2": 0.10 * jax.random.normal(ks[3], (C2,), jnp.float32),
        "w_fc1":   0.02 * jax.random.normal(ks[4], (FC1_OUT, FLAT), jnp.float32),
        "b_fc1":   0.10 * jax.random.normal(ks[5], (FC1_OUT,), jnp.float32),
        "w_fc2":   0.10 * jax.random.normal(ks[6], (NUM_CLASSES, FC1_OUT), jnp.float32),
        "b_fc2":   0.10 * jax.random.normal(ks[7], (NUM_CLASSES,), jnp.float32),
    }
    x = jax.random.normal(ks[8], (N, CIN, H1, W1), jnp.float32)

    kparams = prepare_params(params)                          # one-time weight prep

    out = jax.block_until_ready(speech_to_text_forward(x, kparams))
    ref = jax.block_until_ready(ref_forward(x, params))

    assert out.shape == (N, NUM_CLASSES), out.shape
    # Kernel uses bf16 matmul operands with f32 accumulation, reference is pure f32.
    np.testing.assert_allclose(np.asarray(out), np.asarray(ref), rtol=2e-2, atol=2e-2)
    print("KERNEL_OK")
</pallas_src>

<mosaic_0001>
module attributes {stable_mosaic.version = 11 : i64} {
  func.func @kernel(%arg0: i32, %arg1: memref<1x362x2xbf16, #tpu.memory_space<vmem>>, %arg2: memref<9x2x32xbf16, #tpu.memory_space<vmem>>, %arg3: memref<1x32xf32, #tpu.memory_space<vmem>>, %arg4: memref<324x1xf32, #tpu.memory_space<vmem>>, %arg5: memref<9x32x64xbf16, #tpu.memory_space<vmem>>, %arg6: memref<1x64xf32, #tpu.memory_space<vmem>>, %arg7: memref<121x1xf32, #tpu.memory_space<vmem>>, %arg8: memref<1600x128xbf16, #tpu.memory_space<vmem>>, %arg9: memref<1x128xf32, #tpu.memory_space<vmem>>, %arg10: memref<128x128xbf16, #tpu.memory_space<vmem>>, %arg11: memref<1x128xf32, #tpu.memory_space<vmem>>, %arg12: memref<1x1x128xf32, #tpu.memory_space<vmem>>, %arg13: memref<324x32xf32, #tpu.memory_space<vmem>>, %arg14: memref<145x32xf32, #tpu.memory_space<vmem>>, %arg15: memref<121x64xf32, #tpu.memory_space<vmem>>, %arg16: memref<1x1600xf32, #tpu.memory_space<vmem>>) attributes {dimension_semantics = [#tpu.dimension_semantics<parallel>], iteration_bounds = array<i64: 2>, scalar_prefetch = 0 : i64, scratch_operands = 4 : i64, tpu.core_type = #tpu.core_type<tc>, window_params = [{transform_indices = @transform_0, window_bounds = array<i64: 1, 362, 2>}, {pipeline_mode = #tpu.pipeline_mode<synchronous>, transform_indices = @transform_1, window_bounds = array<i64: 9, 2, 32>}, {pipeline_mode = #tpu.pipeline_mode<synchronous>, transform_indices = @transform_2, window_bounds = array<i64: 1, 32>}, {pipeline_mode = #tpu.pipeline_mode<synchronous>, transform_indices = @transform_3, window_bounds = array<i64: 324, 1>}, {pipeline_mode = #tpu.pipeline_mode<synchronous>, transform_indices = @transform_4, window_bounds = array<i64: 9, 32, 64>}, {pipeline_mode = #tpu.pipeline_mode<synchronous>, transform_indices = @transform_5, window_bounds = array<i64: 1, 64>}, {pipeline_mode = #tpu.pipeline_mode<synchronous>, transform_indices = @transform_6, window_bounds = array<i64: 121, 1>}, {pipeline_mode = #tpu.pipeline_mode<synchronous>, transform_indices = @transform_7, window_bounds = array<i64: 1600, 128>}, {pipeline_mode = #tpu.pipeline_mode<synchronous>, transform_indices = @transform_8, window_bounds = array<i64: 1, 128>}, {pipeline_mode = #tpu.pipeline_mode<synchronous>, transform_indices = @transform_9, window_bounds = array<i64: 128, 128>}, {pipeline_mode = #tpu.pipeline_mode<synchronous>, transform_indices = @transform_10, window_bounds = array<i64: 1, 128>}, {transform_indices = @transform_11, window_bounds = array<i64: 1, 1, 128>}]} {
    %c0 = arith.constant 0 : index
    %c0_0 = arith.constant 0 : index
    %c0_1 = arith.constant 0 : index
    %0 = vector.load %arg1[%c0, %c0_0, %c0_1] : memref<1x362x2xbf16, #tpu.memory_space<vmem>>, vector<1x324x2xbf16>
    %1 = vector.shape_cast %0 : vector<1x324x2xbf16> to vector<324x2xbf16>
    %c0_2 = arith.constant 0 : index
    %c0_3 = arith.constant 0 : index
    %c0_4 = arith.constant 0 : index
    %2 = vector.load %arg2[%c0_2, %c0_3, %c0_4] : memref<9x2x32xbf16, #tpu.memory_space<vmem>>, vector<1x2x32xbf16>
    %3 = vector.shape_cast %2 : vector<1x2x32xbf16> to vector<2x32xbf16>
    %cst = arith.constant dense<0.000000e+00> : vector<324x32xf32>
    %4 = tpu.matmul %1, %3, %cst {dimension_numbers = #tpu.dot_dimension_numbers<[1], [0], [0], [1], [0, 0, 1, 1], [], []>} : vector<324x2xbf16>, vector<2x32xbf16>, vector<324x32xf32> -> vector<324x32xf32>
    %c0_5 = arith.constant 0 : index
    %c1 = arith.constant 1 : index
    %c0_6 = arith.constant 0 : index
    %5 = vector.load %arg1[%c0_5, %c1, %c0_6] : memref<1x362x2xbf16, #tpu.memory_space<vmem>>, vector<1x324x2xbf16>
    %6 = vector.shape_cast %5 : vector<1x324x2xbf16> to vector<324x2xbf16>
    %c1_7 = arith.constant 1 : index
    %c0_8 = arith.constant 0 : index
    %c0_9 = arith.constant 0 : index
    %7 = vector.load %arg2[%c1_7, %c0_8, %c0_9] : memref<9x2x32xbf16, #tpu.memory_space<vmem>>, vector<1x2x32xbf16>
    %8 = vector.shape_cast %7 : vector<1x2x32xbf16> to vector<2x32xbf16>
    %cst_10 = arith.constant dense<0.000000e+00> : vector<324x32xf32>
    %9 = tpu.matmul %6, %8, %cst_10 {dimension_numbers = #tpu.dot_dimension_numbers<[1], [0], [0], [1], [0, 0, 1, 1], [], []>} : vector<324x2xbf16>, vector<2x32xbf16>, vector<324x32xf32> -> vector<324x32xf32>
    %c0_11 = arith.constant 0 : index
    %c2 = arith.constant 2 : index
    %c0_12 = arith.constant 0 : index
    %10 = vector.load %arg1[%c0_11, %c2, %c0_12] : memref<1x362x2xbf16, #tpu.memory_space<vmem>>, vector<1x324x2xbf16>
    %11 = vector.shape_cast %10 : vector<1x324x2xbf16> to vector<324x2xbf16>
    %c2_13 = arith.constant 2 : index
    %c0_14 = arith.constant 0 : index
    %c0_15 = arith.constant 0 : index
    %12 = vector.load %arg2[%c2_13, %c0_14, %c0_15] : memref<9x2x32xbf16, #tpu.memory_space<vmem>>, vector<1x2x32xbf16>
    %13 = vector.shape_cast %12 : vector<1x2x32xbf16> to vector<2x32xbf16>
    %cst_16 = arith.constant dense<0.000000e+00> : vector<324x32xf32>
    %14 = tpu.matmul %11, %13, %cst_16 {dimension_numbers = #tpu.dot_dimension_numbers<[1], [0], [0], [1], [0, 0, 1, 1], [], []>} : vector<324x2xbf16>, vector<2x32xbf16>, vector<324x32xf32> -> vector<324x32xf32>
    %c0_17 = arith.constant 0 : index
    %c18 = arith.constant 18 : index
    %c0_18 = arith.constant 0 : index
    %15 = vector.load %arg1[%c0_17, %c18, %c0_18] : memref<1x362x2xbf16, #tpu.memory_space<vmem>>, vector<1x324x2xbf16>
    %16 = vector.shape_cast %15 : vector<1x324x2xbf16> to vector<324x2xbf16>
    %c3 = arith.constant 3 : index
    %c0_19 = arith.constant 0 : index
    %c0_20 = arith.constant 0 : index
    %17 = vector.load %arg2[%c3, %c0_19, %c0_20] : memref<9x2x32xbf16, #tpu.memory_space<vmem>>, vector<1x2x32xbf16>
    %18 = vector.shape_cast %17 : vector<1x2x32xbf16> to vector<2x32xbf16>
    %cst_21 = arith.constant dense<0.000000e+00> : vector<324x32xf32>
    %19 = tpu.matmul %16, %18, %cst_21 {dimension_numbers = #tpu.dot_dimension_numbers<[1], [0], [0], [1], [0, 0, 1, 1], [], []>} : vector<324x2xbf16>, vector<2x32xbf16>, vector<324x32xf32> -> vector<324x32xf32>
    %20 = arith.addf %4, %19 : vector<324x32xf32>
    %c0_22 = arith.constant 0 : index
    %c19 = arith.constant 19 : index
    %c0_23 = arith.constant 0 : index
    %21 = vector.load %arg1[%c0_22, %c19, %c0_23] : memref<1x362x2xbf16, #tpu.memory_space<vmem>>, vector<1x324x2xbf16>
    %22 = vector.shape_cast %21 : vector<1x324x2xbf16> to vector<324x2xbf16>
    %c4 = arith.constant 4 : index
    %c0_24 = arith.constant 0 : index
    %c0_25 = arith.constant 0 : index
    %23 = vector.load %arg2[%c4, %c0_24, %c0_25] : memref<9x2x32xbf16, #tpu.memory_space<vmem>>, vector<1x2x32xbf16>
    %24 = vector.shape_cast %23 : vector<1x2x32xbf16> to vector<2x32xbf16>
    %cst_26 = arith.constant dense<0.000000e+00> : vector<324x32xf32>
    %25 = tpu.matmul %22, %24, %cst_26 {dimension_numbers = #tpu.dot_dimension_numbers<[1], [0], [0], [1], [0, 0, 1, 1], [], []>} : vector<324x2xbf16>, vector<2x32xbf16>, vector<324x32xf32> -> vector<324x32xf32>
    %26 = arith.addf %9, %25 : vector<324x32xf32>
    %c0_27 = arith.constant 0 : index
    %c20 = arith.constant 20 : index
    %c0_28 = arith.constant 0 : index
    %27 = vector.load %arg1[%c0_27, %c20, %c0_28] : memref<1x362x2xbf16, #tpu.memory_space<vmem>>, vector<1x324x2xbf16>
    %28 = vector.shape_cast %27 : vector<1x324x2xbf16> to vector<324x2xbf16>
    %c5 = arith.constant 5 : index
    %c0_29 = arith.constant 0 : index
    %c0_30 = arith.constant 0 : index
    %29 = vector.load %arg2[%c5, %c0_29, %c0_30] : memref<9x2x32xbf16, #tpu.memory_space<vmem>>, vector<1x2x32xbf16>
    %30 = vector.shape_cast %29 : vector<1x2x32xbf16> to vector<2x32xbf16>
    %cst_31 = arith.constant dense<0.000000e+00> : vector<324x32xf32>
    %31 = tpu.matmul %28, %30, %cst_31 {dimension_numbers = #tpu.dot_dimension_numbers<[1], [0], [0], [1], [0, 0, 1, 1], [], []>} : vector<324x2xbf16>, vector<2x32xbf16>, vector<324x32xf32> -> vector<324x32xf32>
    %32 = arith.addf %14, %31 : vector<324x32xf32>
    %c0_32 = arith.constant 0 : index
    %c36 = arith.constant 36 : index
    %c0_33 = arith.constant 0 : index
    %33 = vector.load %arg1[%c0_32, %c36, %c0_33] : memref<1x362x2xbf16, #tpu.memory_space<vmem>>, vector<1x324x2xbf16>
    %34 = vector.shape_cast %33 : vector<1x324x2xbf16> to vector<324x2xbf16>
    %c6 = arith.constant 6 : index
    %c0_34 = arith.constant 0 : index
    %c0_35 = arith.constant 0 : index
    %35 = vector.load %arg2[%c6, %c0_34, %c0_35] : memref<9x2x32xbf16, #tpu.memory_space<vmem>>, vector<1x2x32xbf16>
    %36 = vector.shape_cast %35 : vector<1x2x32xbf16> to vector<2x32xbf16>
    %cst_36 = arith.constant dense<0.000000e+00> : vector<324x32xf32>
    %37 = tpu.matmul %34, %36, %cst_36 {dimension_numbers = #tpu.dot_dimension_numbers<[1], [0], [0], [1], [0, 0, 1, 1], [], []>} : vector<324x2xbf16>, vector<2x32xbf16>, vector<324x32xf32> -> vector<324x32xf32>
    %38 = arith.addf %20, %37 : vector<324x32xf32>
    %c0_37 = arith.constant 0 : index
    %c37 = arith.constant 37 : index
    %c0_38 = arith.constant 0 : index
    %39 = vector.load %arg1[%c0_37, %c37, %c0_38] : memref<1x362x2xbf16, #tpu.memory_space<vmem>>, vector<1x324x2xbf16>
    %40 = vector.shape_cast %39 : vector<1x324x2xbf16> to vector<324x2xbf16>
    %c7 = arith.constant 7 : index
    %c0_39 = arith.constant 0 : index
    %c0_40 = arith.constant 0 : index
    %41 = vector.load %arg2[%c7, %c0_39, %c0_40] : memref<9x2x32xbf16, #tpu.memory_space<vmem>>, vector<1x2x32xbf16>
    %42 = vector.shape_cast %41 : vector<1x2x32xbf16> to vector<2x32xbf16>
    %cst_41 = arith.constant dense<0.000000e+00> : vector<324x32xf32>
    %43 = tpu.matmul %40, %42, %cst_41 {dimension_numbers = #tpu.dot_dimension_numbers<[1], [0], [0], [1], [0, 0, 1, 1], [], []>} : vector<324x2xbf16>, vector<2x32xbf16>, vector<324x32xf32> -> vector<324x32xf32>
    %44 = arith.addf %26, %43 : vector<324x32xf32>
    %c0_42 = arith.constant 0 : index
    %c38 = arith.constant 38 : index
    %c0_43 = arith.constant 0 : index
    %45 = vector.load %arg1[%c0_42, %c38, %c0_43] : memref<1x362x2xbf16, #tpu.memory_space<vmem>>, vector<1x324x2xbf16>
    %46 = vector.shape_cast %45 : vector<1x324x2xbf16> to vector<324x2xbf16>
    %c8 = arith.constant 8 : index
    %c0_44 = arith.constant 0 : index
    %c0_45 = arith.constant 0 : index
    %47 = vector.load %arg2[%c8, %c0_44, %c0_45] : memref<9x2x32xbf16, #tpu.memory_space<vmem>>, vector<1x2x32xbf16>
    %48 = vector.shape_cast %47 : vector<1x2x32xbf16> to vector<2x32xbf16>
    %cst_46 = arith.constant dense<0.000000e+00> : vector<324x32xf32>
    %49 = tpu.matmul %46, %48, %cst_46 {dimension_numbers = #tpu.dot_dimension_numbers<[1], [0], [0], [1], [0, 0, 1, 1], [], []>} : vector<324x2xbf16>, vector<2x32xbf16>, vector<324x32xf32> -> vector<324x32xf32>
    %50 = arith.addf %32, %49 : vector<324x32xf32>
    %51 = arith.addf %38, %44 : vector<324x32xf32>
    %52 = arith.addf %51, %50 : vector<324x32xf32>
    %c0_47 = arith.constant 0 : index
    %c0_48 = arith.constant 0 : index
    %53 = vector.load %arg3[%c0_47, %c0_48] : memref<1x32xf32, #tpu.memory_space<vmem>>, vector<1x32xf32>
    %54 = vector.broadcast %53 : vector<1x32xf32> to vector<324x32xf32>
    %55 = arith.addf %52, %54 : vector<324x32xf32>
    %cst_49 = arith.constant 0.000000e+00 : f32
    %56 = vector.broadcast %cst_49 : f32 to vector<324x32xf32>
    %57 = arith.maximumf %55, %56 : vector<324x32xf32>
    %c0_50 = arith.constant 0 : index
    %c0_51 = arith.constant 0 : index
    %58 = vector.load %arg4[%c0_50, %c0_51] : memref<324x1xf32, #tpu.memory_space<vmem>>, vector<324x1xf32>
    %59 = vector.broadcast %58 : vector<324x1xf32> to vector<324x32xf32>
    %60 = arith.mulf %57, %59 : vector<324x32xf32>
    %c0_52 = arith.constant 0 : index
    %c0_53 = arith.constant 0 : index
    %61 = vector.load %arg13[%c0_52, %c0_53] : memref<324x32xf32, #tpu.memory_space<vmem>>, vector<324x32xf32>
    tpu.vector_store %arg13[%c0_52, %c0_53], %60 {strides = array<i32>} : memref<324x32xf32, #tpu.memory_space<vmem>>, vector<324x32xf32>,
    %cst_54 = arith.constant 0.000000e+00 : f32
    %62 = vector.broadcast %cst_54 : f32 to vector<145x32xf32>
    %c0_55 = arith.constant 0 : index
    %c0_56 = arith.constant 0 : index
    %63 = vector.load %arg14[%c0_55, %c0_56] : memref<145x32xf32, #tpu.memory_space<vmem>>, vector<145x32xf32>
    tpu.vector_store %arg14[%c0_55, %c0_56], %62 {strides = array<i32>} : memref<145x32xf32, #tpu.memory_space<vmem>>, vector<145x32xf32>,
    %c0_57 = arith.constant 0 : index
    %c0_58 = arith.constant 0 : index
    %64 = vector.load %arg13[%c0_57, %c0_58] : memref<324x32xf32, #tpu.memory_space<vmem>>, vector<1x32xf32>
    %c1_59 = arith.constant 1 : index
    %c0_60 = arith.constant 0 : index
    %65 = vector.load %arg13[%c1_59, %c0_60] : memref<324x32xf32, #tpu.memory_space<vmem>>, vector<1x32xf32>
    %c18_61 = arith.constant 18 : index
    %c0_62 = arith.constant 0 : index
    %66 = vector.load %arg13[%c18_61, %c0_62] : memref<324x32xf32, #tpu.memory_space<vmem>>, vector<1x32xf32>
    %c19_63 = arith.constant 19 : index
    %c0_64 = arith.constant 0 : index
    %67 = vector.load %arg13[%c19_63, %c0_64] : memref<324x32xf32, #tpu.memory_space<vmem>>, vector<1x32xf32>
    %68 = arith.maximumf %64, %65 : vector<1x32xf32>
    %69 = arith.maximumf %66, %67 : vector<1x32xf32>
    %70 = arith.maximumf %68, %69 : vector<1x32xf32>
    %c24 = arith.constant 24 : index
    %c0_65 = arith.constant 0 : index
    %71 = vector.load %arg14[%c24, %c0_65] : memref<145x32xf32, #tpu.memory_space<vmem>>, vector<1x32xf32>
    tpu.vector_store %arg14[%c24, %c0_65], %70 {strides = array<i32>} : memref<145x32xf32, #tpu.memory_space<vmem>>, vector<1x32xf32>,
    %c2_66 = arith.constant 2 : index
    %c0_67 = arith.constant 0 : index
    %72 = vector.load %arg13[%c2_66, %c0_67] : memref<324x32xf32, #tpu.memory_space<vmem>>, vector<1x32xf32>
    %c3_68 = arith.constant 3 : index
    %c0_69 = arith.constant 0 : index
    %73 = vector.load %arg13[%c3_68, %c0_69] : memref<324x32xf32, #tpu.memory_space<vmem>>, vector<1x32xf32>
    %c20_70 = arith.constant 20 : index
    %c0_71 = arith.constant 0 : index
    %74 = vector.load %arg13[%c20_70, %c0_71] : memref<324x32xf32, #tpu.memory_space<vmem>>, vector<1x32xf32>
    %c21 = arith.constant 21 : index
    %c0_72 = arith.constant 0 : index
    %75 = vector.load %arg13[%c21, %c0_72] : memref<324x32xf32, #tpu.memory_space<vmem>>, vector<1x32xf32>
    %76 = arith.maximumf %72, %73 : vector<1x32xf32>
    %77 = arith.maximumf %74, %75 : vector<1x32xf32>
    %78 = arith.maximumf %76, %77 : vector<1x32xf32>
    %c25 = arith.constant 25 : index
    %c0_73 = arith.constant 0 : index
    %79 = vector.load %arg14[%c25, %c0_73] : memref<145x32xf32, #tpu.memory_space<vmem>>, vector<1x32xf32>
    tpu.vector_store %arg14[%c25, %c0_73], %78 {strides = array<i32>} : memref<145x32xf32, #tpu.memory_space<vmem>>, vector<1x32xf32>,
    %c4_74 = arith.constant 4 : index
    %c0_75 = arith.constant 0 : index
    %80 = vector.load %arg13[%c4_74, %c0_75] : memref<324x32xf32, #tpu.memory_space<vmem>>, vector<1x32xf32>
    %c5_76 = arith.constant 5 : index
    %c0_77 = arith.constant 0 : index
    %81 = vector.load %arg13[%c5_76, %c0_77] : memref<324x32xf32, #tpu.memory_space<vmem>>, vector<1x32xf32>
    %c22 = arith.constant 22 : index
    %c0_78 = arith.constant 0 : index
    %82 = vector.load %arg13[%c22, %c0_78] : memref<324x32xf32, #tpu.memory_space<vmem>>, vector<1x32xf32>
    %c23 = arith.constant 23 : index
    %c0_79 = arith.constant 0 : index
    %83 = vector.load %arg13[%c23, %c0_79] : memref<324x32xf32, #tpu.memory_space<vmem>>, vector<1x32xf32>
    %84 = arith.maximumf %80, %81 : vector<1x32xf32>
    %85 = arith.maximumf %82, %83 : vector<1x32xf32>
    %86 = arith.maximumf %84, %85 : vector<1x32xf32>
    %c26 = arith.constant 26 : index
    %c0_80 = arith.constant 0 : index
    %87 = vector.load %arg14[%c26, %c0_80] : memref<145x32xf32, #tpu.memory_space<vmem>>, vector<1x32xf32>
    tpu.vector_store %arg14[%c26, %c0_80], %86 {strides = array<i32>} : memref<145x32xf32, #tpu.memory_space<vmem>>, vector<1x32xf32>,
    %c6_81 = arith.constant 6 : index
    %c0_82 = arith.constant 0 : index
    %88 = vector.load %arg13[%c6_81, %c0_82] : memref<324x32xf32, #tpu.memory_space<vmem>>, vector<1x32xf32>
    %c7_83 = arith.constant 7 : index
    %c0_84 = arith.constant 0 : index
    %89 = vector.load %arg13[%c7_83, %c0_84] : memref<324x32xf32, #tpu.memory_space<vmem>>, vector<1x32xf32>
    %c24_85 = arith.constant 24 : index
    %c0_86 = arith.constant 0 : index
    %90 = vector.load %arg13[%c24_85, %c0_86] : memref<324x32xf32, #tpu.memory_space<vmem>>, vector<1x32xf32>
    %c25_87 = arith.constant 25 : index
    %c0_88 = arith.constant 0 : index
    %91 = vector.load %arg13[%c25_87, %c0_88] : memref<324x32xf32, #tpu.memory_space<vmem>>, vector<1x32xf32>
    %92 = arith.maximumf %88, %89 : vector<1x32xf32>
    %93 = arith.maximumf %90, %91 : vector<1x32xf32>
    %94 = arith.maximumf %92, %93 : vector<1x32xf32>
    %c27 = arith.constant 27 : index
    %c0_89 = arith.constant 0 : index
    %95 = vector.load %arg14[%c27, %c0_89] : memref<145x32xf32, #tpu.memory_space<vmem>>, vector<1x32xf32>
    tpu.vector_store %arg14[%c27, %c0_89], %94 {strides = array<i32>} : memref<145x32xf32, #tpu.memory_space<vmem>>, vector<1x32xf32>,
    %c8_90 = arith.constant 8 : index
    %c0_91 = arith.constant 0 : index
    %96 = vector.load %arg13[%c8_90, %c0_91] : memref<324x32xf32, #tpu.memory_space<vmem>>, vector<1x32xf32>
    %c9 = arith.constant 9 : index
    %c0_92 = arith.constant 0 : index
    %97 = vector.load %arg13[%c9, %c0_92] : memref<324x32xf32, #tpu.memory_space<vmem>>, vector<1x32xf32>
    %c26_93 = arith.constant 26 : index
    %c0_94 = arith.constant 0 : index
    %98 = vector.load %arg13[%c26_93, %c0_94] : memref<324x32xf32, #tpu.memory_space<vmem>>, vector<1x32xf32>
    %c27_95 = arith.constant 27 : index
    %c0_96 = arith.constant 0 : index
    %99 = vector.load %arg13[%c27_95, %c0_96] : memref<324x32xf32, #tpu.memory_space<vmem>>, vector<1x32xf32>
    %100 = arith.maximumf %96, %97 : vector<1x32xf32>
    %101 = arith.maximumf %98, %99 : vector<1x32xf32>
    %102 = arith.maximumf %100, %101 : vector<1x32xf32>
    %c28 = arith.constant 28 : index
    %c0_97 = arith.constant 0 : index
    %103 = vector.load %arg14[%c28, %c0_97] : memref<145x32xf32, #tpu.memory_space<vmem>>, vector<1x32xf32>
    tpu.vector_store %arg14[%c28, %c0_97], %102 {strides = array<i32>} : memref<145x32xf32, #tpu.memory_space<vmem>>, vector<1x32xf32>,
    %c10 = arith.constant 10 : index
    %c0_98 = arith.constant 0 : index
    %104 = vector.load %arg13[%c10, %c0_98] : memref<324x32xf32, #tpu.memory_space<vmem>>, vector<1x32xf32>
    %c11 = arith.constant 11 : index
    %c0_99 = arith.constant 0 : index
    %105 = vector.load %arg13[%c11, %c0_99] : memref<324x32xf32, #tpu.memory_space<vmem>>, vector<1x32xf32>
    %c28_100 = arith.constant 28 : index
    %c0_101 = arith.constant 0 : index
    %106 = vector.load %arg13[%c28_100, %c0_101] : memref<324x32xf32, #tpu.memory_space<vmem>>, vector<1x32xf32>
    %c29 = arith.constant 29 : index
    %c0_102 = arith.constant 0 : index
    %107 = vector.load %arg13[%c29, %c0_102] : memref<324x32xf32, #tpu.memory_space<vmem>>, vector<1x32xf32>
    %108 = arith.maximumf %104, %105 : vector<1x32xf32>
    %109 = arith.maximumf %106, %107 : vector<1x32xf32>
    %110 = arith.maximumf %108, %109 : vector<1x32xf32>
    %c29_103 = arith.constant 29 : index
    %c0_104 = arith.constant 0 : index
    %111 = vector.load %arg14[%c29_103, %c0_104] : memref<145x32xf32, #tpu.memory_space<vmem>>, vector<1x32xf32>
    tpu.vector_store %arg14[%c29_103, %c0_104], %110 {strides = array<i32>} : memref<145x32xf32, #tpu.memory_space<vmem>>, vector<1x32xf32>,
    %c12 = arith.constant 12 : index
    %c0_105 = arith.constant 0 : index
    %112 = vector.load %arg13[%c12, %c0_105] : memref<324x32xf32, #tpu.memory_space<vmem>>, vector<1x32xf32>
    %c13 = arith.constant 13 : index
    %c0_106 = arith.constant 0 : index
    %113 = vector.load %arg13[%c13, %c0_106] : memref<324x32xf32, #tpu.memory_space<vmem>>, vector<1x32xf32>
    %c30 = arith.constant 30 : index
    %c0_107 = arith.constant 0 : index
    %114 = vector.load %arg13[%c30, %c0_107] : memref<324x32xf32, #tpu.memory_space<vmem>>, vector<1x32xf32>
    %c31 = arith.constant 31 : index
    %c0_108 = arith.constant 0 : index
    %115 = vector.load %arg13[%c31, %c0_108] : memref<324x32xf32, #tpu.memory_space<vmem>>, vector<1x32xf32>
    %116 = arith.maximumf %112, %113 : vector<1x32xf32>
    %117 = arith.maximumf %114, %115 : vector<1x32xf32>
    %118 = arith.maximumf %116, %117 : vector<1x32xf32>
    %c30_109 = arith.constant 30 : index
    %c0_110 = arith.constant 0 : index
    %119 = vector.load %arg14[%c30_109, %c0_110] : memref<145x32xf32, #tpu.memory_space<vmem>>, vector<1x32xf32>
    tpu.vector_store %arg14[%c30_109, %c0_110], %118 {strides = array<i32>} : memref<145x32xf32, #tpu.memory_space<vmem>>, vector<1x32xf32>,
    %c14 = arith.constant 14 : index
    %c0_111 = arith.constant 0 : index
    %120 = vector.load %arg13[%c14, %c0_111] : memref<324x32xf32, #tpu.memory_space<vmem>>, vector<1x32xf32>
    %c15 = arith.constant 15 : index
    %c0_112 = arith.constant 0 : index
    %121 = vector.load %arg13[%c15, %c0_112] : memref<324x32xf32, #tpu.memory_space<vmem>>, vector<1x32xf32>
    %c32 = arith.constant 32 : index
    %c0_113 = arith.constant 0 : index
    %122 = vector.load %arg13[%c32, %c0_113] : memref<324x32xf32, #tpu.memory_space<vmem>>, vector<1x32xf32>
    %c33 = arith.constant 33 : index
    %c0_114 = arith.constant 0 : index
    %123 = vector.load %arg13[%c33, %c0_114] : memref<324x32xf32, #tpu.memory_space<vmem>>, vector<1x32xf32>
    %124 = arith.maximumf %120, %121 : vector<1x32xf32>
    %125 = arith.maximumf %122, %123 : vector<1x32xf32>
    %126 = arith.maximumf %124, %125 : vector<1x32xf32>
    %c31_115 = arith.constant 31 : index
    %c0_116 = arith.constant 0 : index
    %127 = vector.load %arg14[%c31_115, %c0_116] : memref<145x32xf32, #tpu.memory_space<vmem>>, vector<1x32xf32>
    tpu.vector_store %arg14[%c31_115, %c0_116], %126 {strides = array<i32>} : memref<145x32xf32, #tpu.memory_space<vmem>>, vector<1x32xf32>,
    %c16 = arith.constant 16 : index
    %c0_117 = arith.constant 0 : index
    %128 = vector.load %arg13[%c16, %c0_117] : memref<324x32xf32, #tpu.memory_space<vmem>>, vector<1x32xf32>
    %c17 = arith.constant 17 : index
    %c0_118 = arith.constant 0 : index
    %129 = vector.load %arg13[%c17, %c0_118] : memref<324x32xf32, #tpu.memory_space<vmem>>, vector<1x32xf32>
    %c34 = arith.constant 34 : index
    %c0_119 = arith.constant 0 : index
    %130 = vector.load %arg13[%c34, %c0_119] : memref<324x32xf32, #tpu.memory_space<vmem>>, vector<1x32xf32>
    %c35 = arith.constant 35 : index
    %c0_120 = arith.constant 0 : index
    %131 = vector.load %arg13[%c35, %c0_120] : memref<324x32xf32, #tpu.memory_space<vmem>>, vector<1x32xf32>
    %132 = arith.maximumf %128, %129 : vector<1x32xf32>
    %133 = arith.maximumf %130, %131 : vector<1x32xf32>
    %134 = arith.maximumf %132, %133 : vector<1x32xf32>
    %c32_121 = arith.constant 32 : index
    %c0_122 = arith.constant 0 : index
    %135 = vector.load %arg14[%c32_121, %c0_122] : memref<145x32xf32, #tpu.memory_space<vmem>>, vector<1x32xf32>
    tpu.vector_store %arg14[%c32_121, %c0_122], %134 {strides = array<i32>} : memref<145x32xf32, #tpu.memory_space<vmem>>, vector<1x32xf32>,
    %c36_123 = arith.constant 36 : index
    %c0_124 = arith.constant 0 : index
    %136 = vector.load %arg13[%c36_123, %c0_124] : memref<324x32xf32, #tpu.memory_space<vmem>>, vector<1x32xf32>
    %c37_125 = arith.constant 37 : index
    %c0_126 = arith.constant 0 : index
    %137 = vector.load %arg13[%c37_125, %c0_126] : memref<324x32xf32, #tpu.memory_space<vmem>>, vector<1x32xf32>
    %c54 = arith.constant 54 : index
    %c0_127 = arith.constant 0 : index
    %138 = vector.load %arg13[%c54, %c0_127] : memref<324x32xf32, #tpu.memory_space<vmem>>, vector<1x32xf32>
    %c55 = arith.constant 55 : index
    %c0_128 = arith.constant 0 : index
    %139 = vector.load %arg13[%c55, %c0_128] : memref<324x32xf32, #tpu.memory_space<vmem>>, vector<1x32xf32>
    %140 = arith.maximumf %136, %137 : vector<1x32xf32>
    %141 = arith.maximumf %138, %139 : vector<1x32xf32>
    %142 = arith.maximumf %140, %141 : vector<1x32xf32>
    %c35_129 = arith.constant 35 : index
    %c0_130 = arith.constant 0 : index
    %143 = vector.load %arg14[%c35_129, %c0_130] : memref<145x32xf32, #tpu.memory_space<vmem>>, vector<1x32xf32>
    tpu.vector_store %arg14[%c35_129, %c0_130], %142 {strides = array<i32>} : memref<145x32xf32, #tpu.memory_space<vmem>>, vector<1x32xf32>,
    %c38_131 = arith.constant 38 : index
    %c0_132 = arith.constant 0 : index
    %144 = vector.load %arg13[%c38_131, %c0_132] : memref<324x32xf32, #tpu.memory_space<vmem>>, vector<1x32xf32>
    %c39 = arith.constant 39 : index
    %c0_133 = arith.constant 0 : index
    %145 = vector.load %arg13[%c39, %c0_133] : memref<324x32xf32, #tpu.memory_space<vmem>>, vector<1x32xf32>
    %c56 = arith.constant 56 : index
    %c0_134 = arith.constant 0 : index
    %146 = vector.load %arg13[%c56, %c0_134] : memref<324x32xf32, #tpu.memory_space<vmem>>, vector<1x32xf32>
    %c57 = arith.constant 57 : index
    %c0_135 = arith.constant 0 : index
    %147 = vector.load %arg13[%c57, %c0_135] : memref<324x32xf32, #tpu.memory_space<vmem>>, vector<1x32xf32>
    %148 = arith.maximumf %144, %145 : vector<1x32xf32>
    %149 = arith.maximumf %146, %147 : vector<1x32xf32>
    %150 = arith.maximumf %148, %149 : vector<1x32xf32>
    %c36_136 = arith.constant 36 : index
    %c0_137 = arith.constant 0 : index
    %151 = vector.load %arg14[%c36_136, %c0_137] : memref<145x32xf32, #tpu.memory_space<vmem>>, vector<1x32xf32>
    tpu.vector_store %arg14[%c36_136, %c0_137], %150 {strides = array<i32>} : memref<145x32xf32, #tpu.memory_space<vmem>>, vector<1x32xf32>,
    %c40 = arith.constant 40 : index
    %c0_138 = arith.constant 0 : index
    %152 = vector.load %arg13[%c40, %c0_138] : memref<324x32xf32, #tpu.memory_space<vmem>>, vector<1x32xf32>
    %c41 = arith.constant 41 : index
    %c0_139 = arith.constant 0 : index
    %153 = vector.load %arg13[%c41, %c0_139] : memref<324x32xf32, #tpu.memory_space<vmem>>, vector<1x32xf32>
    %c58 = arith.constant 58 : index
    %c0_140 = arith.constant 0 : index
    %154 = vector.load %arg13[%c58, %c0_140] : memref<324x32xf32, #tpu.memory_space<vmem>>, vector<1x32xf32>
    %c59 = arith.constant 59 : index
    %c0_141 = arith.constant 0 : index
    %155 = vector.load %arg13[%c59, %c0_141] : memref<324x32xf32, #tpu.memory_space<vmem>>, vector<1x32xf32>
    %156 = arith.maximumf %152, %153 : vector<1x32xf32>
    %157 = arith.maximumf %154, %155 : vector<1x32xf32>
    %158 = arith.maximumf %156, %157 : vector<1x32xf32>
    %c37_142 = arith.constant 37 : index
    %c0_143 = arith.constant 0 : index
    %159 = vector.load %arg14[%c37_142, %c0_143] : memref<145x32xf32, #tpu.memory_space<vmem>>, vector<1x32xf32>
    tpu.vector_store %arg14[%c37_142, %c0_143], %158 {strides = array<i32>} : memref<145x32xf32, #tpu.memory_space<vmem>>, vector<1x32xf32>,
    %c42 = arith.constant 42 : index
    %c0_144 = arith.constant 0 : index
    %160 = vector.load %arg13[%c42, %c0_144] : memref<324x32xf32, #tpu.memory_space<vmem>>, vector<1x32xf32>
    %c43 = arith.constant 43 : index
    %c0_145 = arith.constant 0 : index
    %161 = vector.load %arg13[%c43, %c0_145] : memref<324x32xf32, #tpu.memory_space<vmem>>, vector<1x32xf32>
    %c60 = arith.constant 60 : index
    %c0_146 = arith.constant 0 : index
    %162 = vector.load %arg13[%c60, %c0_146] : memref<324x32xf32, #tpu.memory_space<vmem>>, vector<1x32xf32>
    %c61 = arith.constant 61 : index
    %c0_147 = arith.constant 0 : index
    %163 = vector.load %arg13[%c61, %c0_147] : memref<324x32xf32, #tpu.memory_space<vmem>>, vector<1x32xf32>
    %164 = arith.maximumf %160, %161 : vector<1x32xf32>
    %165 = arith.maximumf %162, %163 : vector<1x32xf32>
    %166 = arith.maximumf %164, %165 : vector<1x32xf32>
    %c38_148 = arith.constant 38 : index
    %c0_149 = arith.constant 0 : index
    %167 = vector.load %arg14[%c38_148, %c0_149] : memref<145x32xf32, #tpu.memory_space<vmem>>, vector<1x32xf32>
    tpu.vector_store %arg14[%c38_148, %c0_149], %166 {strides = array<i32>} : memref<145x32xf32, #tpu.memory_space<vmem>>, vector<1x32xf32>,
    %c44 = arith.constant 44 : index
    %c0_150 = arith.constant 0 : index
    %168 = vector.load %arg13[%c44, %c0_150] : memref<324x32xf32, #tpu.memory_space<vmem>>, vector<1x32xf32>
    %c45 = arith.constant 45 : index
    %c0_151 = arith.constant 0 : index
    %169 = vector.load %arg13[%c45, %c0_151] : memref<324x32xf32, #tpu.memory_space<vmem>>, vector<1x32xf32>
    %c62 = arith.constant 62 : index
    %c0_152 = arith.constant 0 : index
    %170 = vector.load %arg13[%c62, %c0_152] : memref<324x32xf32, #tpu.memory_space<vmem>>, vector<1x32xf32>
    %c63 = arith.constant 63 : index
    %c0_153 = arith.constant 0 : index
    %171 = vector.load %arg13[%c63, %c0_153] : memref<324x32xf32, #tpu.memory_space<vmem>>, vector<1x32xf32>
    %172 = arith.maximumf %168, %169 : vector<1x32xf32>
    %173 = arith.maximumf %170, %171 : vector<1x32xf32>
    %174 = arith.maximumf %172, %173 : vector<1x32xf32>
    %c39_154 = arith.constant 39 : index
    %c0_155 = arith.constant 0 : index
    %175 = vector.load %arg14[%c39_154, %c0_155] : memref<145x32xf32, #tpu.memory_space<vmem>>, vector<1x32xf32>
    tpu.vector_store %arg14[%c39_154, %c0_155], %174 {strides = array<i32>} : memref<145x32xf32, #tpu.memory_space<vmem>>, vector<1x32xf32>,
    %c46 = arith.constant 46 : index
    %c0_156 = arith.constant 0 : index
    %176 = vector.load %arg13[%c46, %c0_156] : memref<324x32xf32, #tpu.memory_space<vmem>>, vector<1x32xf32>
    %c47 = arith.constant 47 : index
    %c0_157 = arith.constant 0 : index
    %177 = vector.load %arg13[%c47, %c0_157] : memref<324x32xf32, #tpu.memory_space<vmem>>, vector<1x32xf32>
    %c64 = arith.constant 64 : index
    %c0_158 = arith.constant 0 : index
    %178 = vector.load %arg13[%c64, %c0_158] : memref<324x32xf32, #tpu.memory_space<vmem>>, vector<1x32xf32>
    %c65 = arith.constant 65 : index
    %c0_159 = arith.constant 0 : index
    %179 = vector.load %arg13[%c65, %c0_159] : memref<324x32xf32, #tpu.memory_space<vmem>>, vector<1x32xf32>
    %180 = arith.maximumf %176, %177 : vector<1x32xf32>
    %181 = arith.maximumf %178, %179 : vector<1x32xf32>
    %182 = arith.maximumf %180, %181 : vector<1x32xf32>
    %c40_160 = arith.constant 40 : index
    %c0_161 = arith.constant 0 : index
    %183 = vector.load %arg14[%c40_160, %c0_161] : memref<145x32xf32, #tpu.memory_space<vmem>>, vector<1x32xf32>
    tpu.vector_store %arg14[%c40_160, %c0_161], %182 {strides = array<i32>} : memref<145x32xf32, #tpu.memory_space<vmem>>, vector<1x32xf32>,
    %c48 = arith.constant 48 : index
    %c0_162 = arith.constant 0 : index
    %184 = vector.load %arg13[%c48, %c0_162] : memref<324x32xf32, #tpu.memory_space<vmem>>, vector<1x32xf32>
    %c49 = arith.constant 49 : index
    %c0_163 = arith.constant 0 : index
    %185 = vector.load %arg13[%c49, %c0_163] : memref<324x32xf32, #tpu.memory_space<vmem>>, vector<1x32xf32>
    %c66 = arith.constant 66 : index
    %c0_164 = arith.constant 0 : index
    %186 = vector.load %arg13[%c66, %c0_164] : memref<324x32xf32, #tpu.memory_space<vmem>>, vector<1x32xf32>
    %c67 = arith.constant 67 : index
    %c0_165 = arith.constant 0 : index
    %187 = vector.load %arg13[%c67, %c0_165] : memref<324x32xf32, #tpu.memory_space<vmem>>, vector<1x32xf32>
    %188 = arith.maximumf %184, %185 : vector<1x32xf32>
    %189 = arith.maximumf %186, %187 : vector<1x32xf32>
    %190 = arith.maximumf %188, %189 : vector<1x32xf32>
    %c41_166 = arith.constant 41 : index
    %c0_167 = arith.constant 0 : index
    %191 = vector.load %arg14[%c41_166, %c0_167] : memref<145x32xf32, #tpu.memory_space<vmem>>, vector<1x32xf32>
    tpu.vector_store %arg14[%c41_166, %c0_167], %190 {strides = array<i32>} : memref<145x32xf32, #tpu.memory_space<vmem>>, vector<1x32xf32>,
    %c50 = arith.constant 50 : index
    %c0_168 = arith.constant 0 : index
    %192 = vector.load %arg13[%c50, %c0_168] : memref<324x32xf32, #tpu.memory_space<vmem>>, vector<1x32xf32>
    %c51 = arith.constant 51 : index
    %c0_169 = arith.constant 0 : index
    %193 = vector.load %arg13[%c51, %c0_169] : memref<324x32xf32, #tpu.memory_space<vmem>>, vector<1x32xf32>
    %c68 = arith.constant 68 : index
    %c0_170 = arith.constant 0 : index
    %194 = vector.load %arg13[%c68, %c0_170] : memref<324x32xf32, #tpu.memory_space<vmem>>, vector<1x32xf32>
    %c69 = arith.constant 69 : index
    %c0_171 = arith.constant 0 : index
    %195 = vector.load %arg13[%c69, %c0_171] : memref<324x32xf32, #tpu.memory_space<vmem>>, vector<1x32xf32>
    %196 = arith.maximumf %192, %193 : vector<1x32xf32>
    %197 = arith.maximumf %194, %195 : vector<1x32xf32>
    %198 = arith.maximumf %196, %197 : vector<1x32xf32>
    %c42_172 = arith.constant 42 : index
    %c0_173 = arith.constant 0 : index
    %199 = vector.load %arg14[%c42_172, %c0_173] : memref<145x32xf32, #tpu.memory_space<vmem>>, vector<1x32xf32>
    tpu.vector_store %arg14[%c42_172, %c0_173], %198 {strides = array<i32>} : memref<145x32xf32, #tpu.memory_space<vmem>>, vector<1x32xf32>,
    %c52 = arith.constant 52 : index
    %c0_174 = arith.constant 0 : index
    %200 = vector.load %arg13[%c52, %c0_174] : memref<324x32xf32, #tpu.memory_space<vmem>>, vector<1x32xf32>
    %c53 = arith.constant 53 : index
    %c0_175 = arith.constant 0 : index
    %201 = vector.load %arg13[%c53, %c0_175] : memref<324x32xf32, #tpu.memory_space<vmem>>, vector<1x32xf32>
    %c70 = arith.constant 70 : index
    %c0_176 = arith.constant 0 : index
    %202 = vector.load %arg13[%c70, %c0_176] : memref<324x32xf32, #tpu.memory_space<vmem>>, vector<1x32xf32>
    %c71 = arith.constant 71 : index
    %c0_177 = arith.constant 0 : index
    %203 = vector.load %arg13[%c71, %c0_177] : memref<324x32xf32, #tpu.memory_space<vmem>>, vector<1x32xf32>
    %204 = arith.maximumf %200, %201 : vector<1x32xf32>
    %205 = arith.maximumf %202, %203 : vector<1x32xf32>
    %206 = arith.maximumf %204, %205 : vector<1x32xf32>
    %c43_178 = arith.constant 43 : index
    %c0_179 = arith.constant 0 : index
    %207 = vector.load %arg14[%c43_178, %c0_179] : memref<145x32xf32, #tpu.memory_space<vmem>>, vector<1x32xf32>
    tpu.vector_store %arg14[%c43_178, %c0_179], %206 {strides = array<i32>} : memref<145x32xf32, #tpu.memory_space<vmem>>, vector<1x32xf32>,
    %c72 = arith.constant 72 : index
    %c0_180 = arith.constant 0 : index
    %208 = vector.load %arg13[%c72, %c0_180] : memref<324x32xf32, #tpu.memory_space<vmem>>, vector<1x32xf32>
    %c73 = arith.constant 73 : index
    %c0_181 = arith.constant 0 : index
    %209 = vector.load %arg13[%c73, %c0_181] : memref<324x32xf32, #tpu.memory_space<vmem>>, vector<1x32xf32>
    %c90 = arith.constant 90 : index
    %c0_182 = arith.constant 0 : index
    %210 = vector.load %arg13[%c90, %c0_182] : memref<324x32xf32, #tpu.memory_space<vmem>>, vector<1x32xf32>
    %c91 = arith.constant 91 : index
    %c0_183 = arith.constant 0 : index
    %211 = vector.load %arg13[%c91, %c0_183] : memref<324x32xf32, #tpu.memory_space<vmem>>, vector<1x32xf32>
    %212 = arith.maximumf %208, %209 : vector<1x32xf32>
    %213 = arith.maximumf %210, %211 : vector<1x32xf32>
    %214 = arith.maximumf %212, %213 : vector<1x32xf32>
    %c46_184 = arith.constant 46 : index
    %c0_185 = arith.constant 0 : index
    %215 = vector.load %arg14[%c46_184, %c0_185] : memref<145x32xf32, #tpu.memory_space<vmem>>, vector<1x32xf32>
    tpu.vector_store %arg14[%c46_184, %c0_185], %214 {strides = array<i32>} : memref<145x32xf32, #tpu.memory_space<vmem>>, vector<1x32xf32>,
    %c74 = arith.constant 74 : index
    %c0_186 = arith.constant 0 : index
    %216 = vector.load %arg13[%c74, %c0_186] : memref<324x32xf32, #tpu.memory_space<vmem>>, vector<1x32xf32>
    %c75 = arith.constant 75 : index
    %c0_187 = arith.constant 0 : index
    %217 = vector.load %arg13[%c75, %c0_187] : memref<324x32xf32, #tpu.memory_space<vmem>>, vector<1x32xf32>
    %c92 = arith.constant 92 : index
    %c0_188 = arith.constant 0 : index
    %218 = vector.load %arg13[%c92, %c0_188] : memref<324x32xf32, #tpu.memory_space<vmem>>, vector<1x32xf32>
    %c93 = arith.constant 93 : index
    %c0_189 = arith.constant 0 : index
    %219 = vector.load %arg13[%c93, %c0_189] : memref<324x32xf32, #tpu.memory_space<vmem>>, vector<1x32xf32>
    %220 = arith.maximumf %216, %217 : vector<1x32xf32>
    %221 = arith.maximumf %218, %219 : vector<1x32xf32>
    %222 = arith.maximumf %220, %221 : vector<1x32xf32>
    %c47_190 = arith.constant 47 : index
    %c0_191 = arith.constant 0 : index
    %223 = vector.load %arg14[%c47_190, %c0_191] : memref<145x32xf32, #tpu.memory_space<vmem>>, vector<1x32xf32>
    tpu.vector_store %arg14[%c47_190, %c0_191], %222 {strides = array<i32>} : memref<145x32xf32, #tpu.memory_space<vmem>>, vector<1x32xf32>,
    %c76 = arith.constant 76 : index
    %c0_192 = arith.constant 0 : index
    %224 = vector.load %arg13[%c76, %c0_192] : memref<324x32xf32, #tpu.memory_space<vmem>>, vector<1x32xf32>
    %c77 = arith.constant 77 : index
    %c0_193 = arith.constant 0 : index
    %225 = vector.load %arg13[%c77, %c0_193] : memref<324x32xf32, #tpu.memory_space<vmem>>, vector<1x32xf32>
    %c94 = arith.constant 94 : index
    %c0_194 = arith.constant 0 : index
    %226 = vector.load %arg13[%c94, %c0_194] : memref<324x32xf32, #tpu.memory_space<vmem>>, vector<1x32xf32>
    %c95 = arith.constant 95 : index
    %c0_195 = arith.constant 0 : index
    %227 = vector.load %arg13[%c95, %c0_195] : memref<324x32xf32, #tpu.memory_space<vmem>>, vector<1x32xf32>
    %228 = arith.maximumf %224, %225 : vector<1x32xf32>
    %229 = arith.maximumf %226, %227 : vector<1x32xf32>
    %230 = arith.maximumf %228, %229 : vector<1x32xf32>
    %c48_196 = arith.constant 48 : index
    %c0_197 = arith.constant 0 : index
    %231 = vector.load %arg14[%c48_196, %c0_197] : memref<145x32xf32, #tpu.memory_space<vmem>>, vector<1x32xf32>
    tpu.vector_store %arg14[%c48_196, %c0_197], %230 {strides = array<i32>} : memref<145x32xf32, #tpu.memory_space<vmem>>, vector<1x32xf32>,
    %c78 = arith.constant 78 : index
    %c0_198 = arith.constant 0 : index
    %232 = vector.load %arg13[%c78, %c0_198] : memref<324x32xf32, #tpu.memory_space<vmem>>, vector<1x32xf32>
    %c79 = arith.constant 79 : index
    %c0_199 = arith.constant 0 : index
    %233 = vector.load %arg13[%c79, %c0_199] : memref<324x32xf32, #tpu.memory_space<vmem>>, vector<1x32xf32>
    %c96 = arith.constant 96 : index
    %c0_200 = arith.constant 0 : index
    %234 = vector.load %arg13[%c96, %c0_200] : memref<324x32xf32, #tpu.memory_space<vmem>>, vector<1x32xf32>
    %c97 = arith.constant 97 : index
    %c0_201 = arith.constant 0 : index
    %235 = vector.load %arg13[%c97, %c0_201] : memref<324x32xf32, #tpu.memory_space<vmem>>, vector<1x32xf32>
    %236 = arith.maximumf %232, %233 : vector<1x32xf32>
    %237 = arith.maximumf %234, %235 : vector<1x32xf32>
    %238 = arith.maximumf %236, %237 : vector<1x32xf32>
    %c49_202 = arith.constant 49 : index
    %c0_203 = arith.constant 0 : index
    %239 = vector.load %arg14[%c49_202, %c0_203] : memref<145x32xf32, #tpu.memory_space<vmem>>, vector<1x32xf32>
    tpu.vector_store %arg14[%c49_202, %c0_203], %238 {strides = array<i32>} : memref<145x32xf32, #tpu.memory_space<vmem>>, vector<1x32xf32>,
    %c80 = arith.constant 80 : index
    %c0_204 = arith.constant 0 : index
    %240 = vector.load %arg13[%c80, %c0_204] : memref<324x32xf32, #tpu.memory_space<vmem>>, vector<1x32xf32>
    %c81 = arith.constant 81 : index
    %c0_205 = arith.constant 0 : index
    %241 = vector.load %arg13[%c81, %c0_205] : memref<324x32xf32, #tpu.memory_space<vmem>>, vector<1x32xf32>
    %c98 = arith.constant 98 : index
    %c0_206 = arith.constant 0 : index
    %242 = vector.load %arg13[%c98, %c0_206] : memref<324x32xf32, #tpu.memory_space<vmem>>, vector<1x32xf32>
    %c99 = arith.constant 99 : index
    %c0_207 = arith.constant 0 : index
    %243 = vector.load %arg13[%c99, %c0_207] : memref<324x32xf32, #tpu.memory_space<vmem>>, vector<1x32xf32>
    %244 = arith.maximumf %240, %241 : vector<1x32xf32>
    %245 = arith.maximumf %242, %243 : vector<1x32xf32>
    %246 = arith.maximumf %244, %245 : vector<1x32xf32>
    %c50_208 = arith.constant 50 : index
    %c0_209 = arith.constant 0 : index
    %247 = vector.load %arg14[%c50_208, %c0_209] : memref<145x32xf32, #tpu.memory_space<vmem>>, vector<1x32xf32>
    tpu.vector_store %arg14[%c50_208, %c0_209], %246 {strides = array<i32>} : memref<145x32xf32, #tpu.memory_space<vmem>>, vector<1x32xf32>,
    %c82 = arith.constant 82 : index
    %c0_210 = arith.constant 0 : index
    %248 = vector.load %arg13[%c82, %c0_210] : memref<324x32xf32, #tpu.memory_space<vmem>>, vector<1x32xf32>
    %c83 = arith.constant 83 : index
    %c0_211 = arith.constant 0 : index
    %249 = vector.load %arg13[%c83, %c0_211] : memref<324x32xf32, #tpu.memory_space<vmem>>, vector<1x32xf32>
    %c100 = arith.constant 100 : index
    %c0_212 = arith.constant 0 : index
    %250 = vector.load %arg13[%c100, %c0_212] : memref<324x32xf32, #tpu.memory_space<vmem>>, vector<1x32xf32>
    %c101 = arith.constant 101 : index
    %c0_213 = arith.constant 0 : index
    %251 = vector.load %arg13[%c101, %c0_213] : memref<324x32xf32, #tpu.memory_space<vmem>>, vector<1x32xf32>
    %252 = arith.maximumf %248, %249 : vector<1x32xf32>
    %253 = arith.maximumf %250, %251 : vector<1x32xf32>
    %254 = arith.maximumf %252, %253 : vector<1x32xf32>
    %c51_214 = arith.constant 51 : index
    %c0_215 = arith.constant 0 : index
    %255 = vector.load %arg14[%c51_214, %c0_215] : memref<145x32xf32, #tpu.memory_space<vmem>>, vector<1x32xf32>
    tpu.vector_store %arg14[%c51_214, %c0_215], %254 {strides = array<i32>} : memref<145x32xf32, #tpu.memory_space<vmem>>, vector<1x32xf32>,
    %c84 = arith.constant 84 : index
    %c0_216 = arith.constant 0 : index
    %256 = vector.load %arg13[%c84, %c0_216] : memref<324x32xf32, #tpu.memory_space<vmem>>, vector<1x32xf32>
    %c85 = arith.constant 85 : index
    %c0_217 = arith.constant 0 : index
    %257 = vector.load %arg13[%c85, %c0_217] : memref<324x32xf32, #tpu.memory_space<vmem>>, vector<1x32xf32>
    %c102 = arith.constant 102 : index
    %c0_218 = arith.constant 0 : index
    %258 = vector.load %arg13[%c102, %c0_218] : memref<324x32xf32, #tpu.memory_space<vmem>>, vector<1x32xf32>
    %c103 = arith.constant 103 : index
    %c0_219 = arith.constant 0 : index
    %259 = vector.load %arg13[%c103, %c0_219] : memref<324x32xf32, #tpu.memory_space<vmem>>, vector<1x32xf32>
    %260 = arith.maximumf %256, %257 : vector<1x32xf32>
    %261 = arith.maximumf %258, %259 : vector<1x32xf32>
    %262 = arith.maximumf %260, %261 : vector<1x32xf32>
    %c52_220 = arith.constant 52 : index
    %c0_221 = arith.constant 0 : index
    %263 = vector.load %arg14[%c52_220, %c0_221] : memref<145x32xf32, #tpu.memory_space<vmem>>, vector<1x32xf32>
    tpu.vector_store %arg14[%c52_220, %c0_221], %262 {strides = array<i32>} : memref<145x32xf32, #tpu.memory_space<vmem>>, vector<1x32xf32>,
    %c86 = arith.constant 86 : index
    %c0_222 = arith.constant 0 : index
    %264 = vector.load %arg13[%c86, %c0_222] : memref<324x32xf32, #tpu.memory_space<vmem>>, vector<1x32xf32>
    %c87 = arith.constant 87 : index
    %c0_223 = arith.constant 0 : index
    %265 = vector.load %arg13[%c87, %c0_223] : memref<324x32xf32, #tpu.memory_space<vmem>>, vector<1x32xf32>
    %c104 = arith.constant 104 : index
    %c0_224 = arith.constant 0 : index
    %266 = vector.load %arg13[%c104, %c0_224] : memref<324x32xf32, #tpu.memory_space<vmem>>, vector<1x32xf32>
    %c105 = arith.constant 105 : index
    %c0_225 = arith.constant 0 : index
    %267 = vector.load %arg13[%c105, %c0_225] : memref<324x32xf32, #tpu.memory_space<vmem>>, vector<1x32xf32>
    %268 = arith.maximumf %264, %265 : vector<1x32xf32>
    %269 = arith.maximumf %266, %267 : vector<1x32xf32>
    %270 = arith.maximumf %268, %269 : vector<1x32xf32>
    %c53_226 = arith.constant 53 : index
    %c0_227 = arith.constant 0 : index
    %271 = vector.load %arg14[%c53_226, %c0_227] : memref<145x32xf32, #tpu.memory_space<vmem>>, vector<1x32xf32>
    tpu.vector_store %arg14[%c53_226, %c0_227], %270 {strides = array<i32>} : memref<145x32xf32, #tpu.memory_space<vmem>>, vector<1x32xf32>,
    %c88 = arith.constant 88 : index
    %c0_228 = arith.constant 0 : index
    %272 = vector.load %arg13[%c88, %c0_228] : memref<324x32xf32, #tpu.memory_space<vmem>>, vector<1x32xf32>
    %c89 = arith.constant 89 : index
    %c0_229 = arith.constant 0 : index
    %273 = vector.load %arg13[%c89, %c0_229] : memref<324x32xf32, #tpu.memory_space<vmem>>, vector<1x32xf32>
    %c106 = arith.constant 106 : index
    %c0_230 = arith.constant 0 : index
    %274 = vector.load %arg13[%c106, %c0_230] : memref<324x32xf32, #tpu.memory_space<vmem>>, vector<1x32xf32>
    %c107 = arith.constant 107 : index
    %c0_231 = arith.constant 0 : index
    %275 = vector.load %arg13[%c107, %c0_231] : memref<324x32xf32, #tpu.memory_space<vmem>>, vector<1x32xf32>
    %276 = arith.maximumf %272, %273 : vector<1x32xf32>
    %277 = arith.maximumf %274, %275 : vector<1x32xf32>
    %278 = arith.maximumf %276, %277 : vector<1x32xf32>
    %c54_232 = arith.constant 54 : index
    %c0_233 = arith.constant 0 : index
    %279 = vector.load %arg14[%c54_232, %c0_233] : memref<145x32xf32, #tpu.memory_space<vmem>>, vector<1x32xf32>
    tpu.vector_store %arg14[%c54_232, %c0_233], %278 {strides = array<i32>} : memref<145x32xf32, #tpu.memory_space<vmem>>, vector<1x32xf32>,
    %c108 = arith.constant 108 : index
    %c0_234 = arith.constant 0 : index
    %280 = vector.load %arg13[%c108, %c0_234] : memref<324x32xf32, #tpu.memory_space<vmem>>, vector<1x32xf32>
    %c109 = arith.constant 109 : index
    %c0_235 = arith.constant 0 : index
    %281 = vector.load %arg13[%c109, %c0_235] : memref<324x32xf32, #tpu.memory_space<vmem>>, vector<1x32xf32>
    %c126 = arith.constant 126 : index
    %c0_236 = arith.constant 0 : index
    %282 = vector.load %arg13[%c126, %c0_236] : memref<324x32xf32, #tpu.memory_space<vmem>>, vector<1x32xf32>
    %c127 = arith.constant 127 : index
    %c0_237 = arith.constant 0 : index
    %283 = vector.load %arg13[%c127, %c0_237] : memref<324x32xf32, #tpu.memory_space<vmem>>, vector<1x32xf32>
    %284 = arith.maximumf %280, %281 : vector<1x32xf32>
    %285 = arith.maximumf %282, %283 : vector<1x32xf32>
    %286 = arith.maximumf %284, %285 : vector<1x32xf32>
    %c57_238 = arith.constant 57 : index
    %c0_239 = arith.constant 0 : index
    %287 = vector.load %arg14[%c57_238, %c0_239] : memref<145x32xf32, #tpu.memory_space<vmem>>, vector<1x32xf32>
    tpu.vector_store %arg14[%c57_238, %c0_239], %286 {strides = array<i32>} : memref<145x32xf32, #tpu.memory_space<vmem>>, vector<1x32xf32>,
    %c110 = arith.constant 110 : index
    %c0_240 = arith.constant 0 : index
    %288 = vector.load %arg13[%c110, %c0_240] : memref<324x32xf32, #tpu.memory_space<vmem>>, vector<1x32xf32>
    %c111 = arith.constant 111 : index
    %c0_241 = arith.constant 0 : index
    %289 = vector.load %arg13[%c111, %c0_241] : memref<324x32xf32, #tpu.memory_space<vmem>>, vector<1x32xf32>
    %c128 = arith.constant 128 : index
    %c0_242 = arith.constant 0 : index
    %290 = vector.load %arg13[%c128, %c0_242] : memref<324x32xf32, #tpu.memory_space<vmem>>, vector<1x32xf32>
    %c129 = arith.constant 129 : index
    %c0_243 = arith.constant 0 : index
    %291 = vector.load %arg13[%c129, %c0_243] : memref<324x32xf32, #tpu.memory_space<vmem>>, vector<1x32xf32>
    %292 = arith.maximumf %288, %289 : vector<1x32xf32>
    %293 = arith.maximumf %290, %291 : vector<1x32xf32>
    %294 = arith.maximumf %292, %293 : vector<1x32xf32>
    %c58_244 = arith.constant 58 : index
    %c0_245 = arith.constant 0 : index
    %295 = vector.load %arg14[%c58_244, %c0_245] : memref<145x32xf32, #tpu.memory_space<vmem>>, vector<1x32xf32>
    tpu.vector_store %arg14[%c58_244, %c0_245], %294 {strides = array<i32>} : memref<145x32xf32, #tpu.memory_space<vmem>>, vector<1x32xf32>,
    %c112 = arith.constant 112 : index
    %c0_246 = arith.constant 0 : index
    %296 = vector.load %arg13[%c112, %c0_246] : memref<324x32xf32, #tpu.memory_space<vmem>>, vector<1x32xf32>
    %c113 = arith.constant 113 : index
    %c0_247 = arith.constant 0 : index
    %297 = vector.load %arg13[%c113, %c0_247] : memref<324x32xf32, #tpu.memory_space<vmem>>, vector<1x32xf32>
    %c130 = arith.constant 130 : index
    %c0_248 = arith.constant 0 : index
    %298 = vector.load %arg13[%c130, %c0_248] : memref<324x32xf32, #tpu.memory_space<vmem>>, vector<1x32xf32>
    %c131 = arith.constant 131 : index
    %c0_249 = arith.constant 0 : index
    %299 = vector.load %arg13[%c131, %c0_249] : memref<324x32xf32, #tpu.memory_space<vmem>>, vector<1x32xf32>
    %300 = arith.maximumf %296, %297 : vector<1x32xf32>
    %301 = arith.maximumf %298, %299 : vector<1x32xf32>
    %302 = arith.maximumf %300, %301 : vector<1x32xf32>
    %c59_250 = arith.constant 59 : index
    %c0_251 = arith.constant 0 : index
    %303 = vector.load %arg14[%c59_250, %c0_251] : memref<145x32xf32, #tpu.memory_space<vmem>>, vector<1x32xf32>
    tpu.vector_store %arg14[%c59_250, %c0_251], %302 {strides = array<i32>} : memref<145x32xf32, #tpu.memory_space<vmem>>, vector<1x32xf32>,
    %c114 = arith.constant 114 : index
    %c0_252 = arith.constant 0 : index
    %304 = vector.load %arg13[%c114, %c0_252] : memref<324x32xf32, #tpu.memory_space<vmem>>, vector<1x32xf32>
    %c115 = arith.constant 115 : index
    %c0_253 = arith.constant 0 : index
    %305 = vector.load %arg13[%c115, %c0_253] : memref<324x32xf32, #tpu.memory_space<vmem>>, vector<1x32xf32>
    %c132 = arith.constant 132 : index
    %c0_254 = arith.constant 0 : index
    %306 = vector.load %arg13[%c132, %c0_254] : memref<324x32xf32, #tpu.memory_space<vmem>>, vector<1x32xf32>
    %c133 = arith.constant 133 : index
    %c0_255 = arith.constant 0 : index
    %307 = vector.load %arg13[%c133, %c0_255] : memref<324x32xf32, #tpu.memory_space<vmem>>, vector<1x32xf32>
    %308 = arith.maximumf %304, %305 : vector<1x32xf32>
    %309 = arith.maximumf %306, %307 : vector<1x32xf32>
    %310 = arith.maximumf %308, %309 : vector<1x32xf32>
    %c60_256 = arith.constant 60 : index
    %c0_257 = arith.constant 0 : index
    %311 = vector.load %arg14[%c60_256, %c0_257] : memref<145x32xf32, #tpu.memory_space<vmem>>, vector<1x32xf32>
    tpu.vector_store %arg14[%c60_256, %c0_257], %310 {strides = array<i32>} : memref<145x32xf32, #tpu.memory_space<vmem>>, vector<1x32xf32>,
    %c116 = arith.constant 116 : index
    %c0_258 = arith.constant 0 : index
    %312 = vector.load %arg13[%c116, %c0_258] : memref<324x32xf32, #tpu.memory_space<vmem>>, vector<1x32xf32>
    %c117 = arith.constant 117 : index
    %c0_259 = arith.constant 0 : index
    %313 = vector.load %arg13[%c117, %c0_259] : memref<324x32xf32, #tpu.memory_space<vmem>>, vector<1x32xf32>
    %c134 = arith.constant 134 : index
    %c0_260 = arith.constant 0 : index
    %314 = vector.load %arg13[%c134, %c0_260] : memref<324x32xf32, #tpu.memory_space<vmem>>, vector<1x32xf32>
    %c135 = arith.constant 135 : index
    %c0_261 = arith.constant 0 : index
    %315 = vector.load %arg13[%c135, %c0_261] : memref<324x32xf32, #tpu.memory_space<vmem>>, vector<1x32xf32>
    %316 = arith.maximumf %312, %313 : vector<1x32xf32>
    %317 = arith.maximumf %314, %315 : vector<1x32xf32>
    %318 = arith.maximumf %316, %317 : vector<1x32xf32>
    %c61_262 = arith.constant 61 : index
    %c0_263 = arith.constant 0 : index
    %319 = vector.load %arg14[%c61_262, %c0_263] : memref<145x32xf32, #tpu.memory_space<vmem>>, vector<1x32xf32>
    tpu.vector_store %arg14[%c61_262, %c0_263], %318 {strides = array<i32>} : memref<145x32xf32, #tpu.memory_space<vmem>>, vector<1x32xf32>,
    %c118 = arith.constant 118 : index
    %c0_264 = arith.constant 0 : index
    %320 = vector.load %arg13[%c118, %c0_264] : memref<324x32xf32, #tpu.memory_space<vmem>>, vector<1x32xf32>
    %c119 = arith.constant 119 : index
    %c0_265 = arith.constant 0 : index
    %321 = vector.load %arg13[%c119, %c0_265] : memref<324x32xf32, #tpu.memory_space<vmem>>, vector<1x32xf32>
    %c136 = arith.constant 136 : index
    %c0_266 = arith.constant 0 : index
    %322 = vector.load %arg13[%c136, %c0_266] : memref<324x32xf32, #tpu.memory_space<vmem>>, vector<1x32xf32>
    %c137 = arith.constant 137 : index
    %c0_267 = arith.constant 0 : index
    %323 = vector.load %arg13[%c137, %c0_267] : memref<324x32xf32, #tpu.memory_space<vmem>>, vector<1x32xf32>
    %324 = arith.maximumf %320, %321 : vector<1x32xf32>
    %325 = arith.maximumf %322, %323 : vector<1x32xf32>
    %326 = arith.maximumf %324, %325 : vector<1x32xf32>
    %c62_268 = arith.constant 62 : index
    %c0_269 = arith.constant 0 : index
    %327 = vector.load %arg14[%c62_268, %c0_269] : memref<145x32xf32, #tpu.memory_space<vmem>>, vector<1x32xf32>
    tpu.vector_store %arg14[%c62_268, %c0_269], %326 {strides = array<i32>} : memref<145x32xf32, #tpu.memory_space<vmem>>, vector<1x32xf32>,
    %c120 = arith.constant 120 : index
    %c0_270 = arith.constant 0 : index
    %328 = vector.load %arg13[%c120, %c0_270] : memref<324x32xf32, #tpu.memory_space<vmem>>, vector<1x32xf32>
    %c121 = arith.constant 121 : index
    %c0_271 = arith.constant 0 : index
    %329 = vector.load %arg13[%c121, %c0_271] : memref<324x32xf32, #tpu.memory_space<vmem>>, vector<1x32xf32>
    %c138 = arith.constant 138 : index
    %c0_272 = arith.constant 0 : index
    %330 = vector.load %arg13[%c138, %c0_272] : memref<324x32xf32, #tpu.memory_space<vmem>>, vector<1x32xf32>
    %c139 = arith.constant 139 : index
    %c0_273 = arith.constant 0 : index
    %331 = vector.load %arg13[%c139, %c0_273] : memref<324x32xf32, #tpu.memory_space<vmem>>, vector<1x32xf32>
    %332 = arith.maximumf %328, %329 : vector<1x32xf32>
    %333 = arith.maximumf %330, %331 : vector<1x32xf32>
    %334 = arith.maximumf %332, %333 : vector<1x32xf32>
    %c63_274 = arith.constant 63 : index
    %c0_275 = arith.constant 0 : index
    %335 = vector.load %arg14[%c63_274, %c0_275] : memref<145x32xf32, #tpu.memory_space<vmem>>, vector<1x32xf32>
    tpu.vector_store %arg14[%c63_274, %c0_275], %334 {strides = array<i32>} : memref<145x32xf32, #tpu.memory_space<vmem>>, vector<1x32xf32>,
    %c122 = arith.constant 122 : index
    %c0_276 = arith.constant 0 : index
    %336 = vector.load %arg13[%c122, %c0_276] : memref<324x32xf32, #tpu.memory_space<vmem>>, vector<1x32xf32>
    %c123 = arith.constant 123 : index
    %c0_277 = arith.constant 0 : index
    %337 = vector.load %arg13[%c123, %c0_277] : memref<324x32xf32, #tpu.memory_space<vmem>>, vector<1x32xf32>
    %c140 = arith.constant 140 : index
    %c0_278 = arith.constant 0 : index
    %338 = vector.load %arg13[%c140, %c0_278] : memref<324x32xf32, #tpu.memory_space<vmem>>, vector<1x32xf32>
    %c141 = arith.constant 141 : index
    %c0_279 = arith.constant 0 : index
    %339 = vector.load %arg13[%c141, %c0_279] : memref<324x32xf32, #tpu.memory_space<vmem>>, vector<1x32xf32>
    %340 = arith.maximumf %336, %337 : vector<1x32xf32>
    %341 = arith.maximumf %338, %339 : vector<1x32xf32>
    %342 = arith.maximumf %340, %341 : vector<1x32xf32>
    %c64_280 = arith.constant 64 : index
    %c0_281 = arith.constant 0 : index
    %343 = vector.load %arg14[%c64_280, %c0_281] : memref<145x32xf32, #tpu.memory_space<vmem>>, vector<1x32xf32>
    tpu.vector_store %arg14[%c64_280, %c0_281], %342 {strides = array<i32>} : memref<145x32xf32, #tpu.memory_space<vmem>>, vector<1x32xf32>,
    %c124 = arith.constant 124 : index
    %c0_282 = arith.constant 0 : index
    %344 = vector.load %arg13[%c124, %c0_282] : memref<324x32xf32, #tpu.memory_space<vmem>>, vector<1x32xf32>
    %c125 = arith.constant 125 : index
    %c0_283 = arith.constant 0 : index
    %345 = vector.load %arg13[%c125, %c0_283] : memref<324x32xf32, #tpu.memory_space<vmem>>, vector<1x32xf32>
    %c142 = arith.constant 142 : index
    %c0_284 = arith.constant 0 : index
    %346 = vector.load %arg13[%c142, %c0_284] : memref<324x32xf32, #tpu.memory_space<vmem>>, vector<1x32xf32>
    %c143 = arith.constant 143 : index
    %c0_285 = arith.constant 0 : index
    %347 = vector.load %arg13[%c143, %c0_285] : memref<324x32xf32, #tpu.memory_space<vmem>>, vector<1x32xf32>
    %348 = arith.maximumf %344, %345 : vector<1x32xf32>
    %349 = arith.maximumf %346, %347 : vector<1x32xf32>
    %350 = arith.maximumf %348, %349 : vector<1x32xf32>
    %c65_286 = arith.constant 65 : index
    %c0_287 = arith.constant 0 : index
    %351 = vector.load %arg14[%c65_286, %c0_287] : memref<145x32xf32, #tpu.memory_space<vmem>>, vector<1x32xf32>
    tpu.vector_store %arg14[%c65_286, %c0_287], %350 {strides = array<i32>} : memref<145x32xf32, #tpu.memory_space<vmem>>, vector<1x32xf32>,
    %c144 = arith.constant 144 : index
    %c0_288 = arith.constant 0 : index
    %352 = vector.load %arg13[%c144, %c0_288] : memref<324x32xf32, #tpu.memory_space<vmem>>, vector<1x32xf32>
    %c145 = arith.constant 145 : index
    %c0_289 = arith.constant 0 : index
    %353 = vector.load %arg13[%c145, %c0_289] : memref<324x32xf32, #tpu.memory_space<vmem>>, vector<1x32xf32>
    %c162 = arith.constant 162 : index
    %c0_290 = arith.constant 0 : index
    %354 = vector.load %arg13[%c162, %c0_290] : memref<324x32xf32, #tpu.memory_space<vmem>>, vector<1x32xf32>
    %c163 = arith.constant 163 : index
    %c0_291 = arith.constant 0 : index
    %355 = vector.load %arg13[%c163, %c0_291] : memref<324x32xf32, #tpu.memory_space<vmem>>, vector<1x32xf32>
    %356 = arith.maximumf %352, %353 : vector<1x32xf32>
    %357 = arith.maximumf %354, %355 : vector<1x32xf32>
    %358 = arith.maximumf %356, %357 : vector<1x32xf32>
    %c68_292 = arith.constant 68 : index
    %c0_293 = arith.constant 0 : index
    %359 = vector.load %arg14[%c68_292, %c0_293] : memref<145x32xf32, #tpu.memory_space<vmem>>, vector<1x32xf32>
    tpu.vector_store %arg14[%c68_292, %c0_293], %358 {strides = array<i32>} : memref<145x32xf32, #tpu.memory_space<vmem>>, vector<1x32xf32>,
    %c146 = arith.constant 146 : index
    %c0_294 = arith.constant 0 : index
    %360 = vector.load %arg13[%c146, %c0_294] : memref<324x32xf32, #tpu.memory_space<vmem>>, vector<1x32xf32>
    %c147 = arith.constant 147 : index
    %c0_295 = arith.constant 0 : index
    %361 = vector.load %arg13[%c147, %c0_295] : memref<324x32xf32, #tpu.memory_space<vmem>>, vector<1x32xf32>
    %c164 = arith.constant 164 : index
    %c0_296 = arith.constant 0 : index
    %362 = vector.load %arg13[%c164, %c0_296] : memref<324x32xf32, #tpu.memory_space<vmem>>, vector<1x32xf32>
    %c165 = arith.constant 165 : index
    %c0_297 = arith.constant 0 : index
    %363 = vector.load %arg13[%c165, %c0_297] : memref<324x32xf32, #tpu.memory_space<vmem>>, vector<1x32xf32>
    %364 = arith.maximumf %360, %361 : vector<1x32xf32>
    %365 = arith.maximumf %362, %363 : vector<1x32xf32>
    %366 = arith.maximumf %364, %365 : vector<1x32xf32>
    %c69_298 = arith.constant 69 : index
    %c0_299 = arith.constant 0 : index
    %367 = vector.load %arg14[%c69_298, %c0_299] : memref<145x32xf32, #tpu.memory_space<vmem>>, vector<1x32xf32>
    tpu.vector_store %arg14[%c69_298, %c0_299], %366 {strides = array<i32>} : memref<145x32xf32, #tpu.memory_space<vmem>>, vector<1x32xf32>,
    %c148 = arith.constant 148 : index
    %c0_300 = arith.constant 0 : index
    %368 = vector.load %arg13[%c148, %c0_300] : memref<324x32xf32, #tpu.memory_space<vmem>>, vector<1x32xf32>
    %c149 = arith.constant 149 : index
    %c0_301 = arith.constant 0 : index
    %369 = vector.load %arg13[%c149, %c0_301] : memref<324x32xf32, #tpu.memory_space<vmem>>, vector<1x32xf32>
    %c166 = arith.constant 166 : index
    %c0_302 = arith.constant 0 : index
    %370 = vector.load %arg13[%c166, %c0_302] : memref<324x32xf32, #tpu.memory_space<vmem>>, vector<1x32xf32>
    %c167 = arith.constant 167 : index
    %c0_303 = arith.constant 0 : index
    %371 = vector.load %arg13[%c167, %c0_303] : memref<324x32xf32, #tpu.memory_space<vmem>>, vector<1x32xf32>
    %372 = arith.maximumf %368, %369 : vector<1x32xf32>
    %373 = arith.maximumf %370, %371 : vector<1x32xf32>
    %374 = arith.maximumf %372, %373 : vector<1x32xf32>
    %c70_304 = arith.constant 70 : index
    %c0_305 = arith.constant 0 : index
    %375 = vector.load %arg14[%c70_304, %c0_305] : memref<145x32xf32, #tpu.memory_space<vmem>>, vector<1x32xf32>
    tpu.vector_store %arg14[%c70_304, %c0_305], %374 {strides = array<i32>} : memref<145x32xf32, #tpu.memory_space<vmem>>, vector<1x32xf32>,
    %c150 = arith.constant 150 : index
    %c0_306 = arith.constant 0 : index
    %376 = vector.load %arg13[%c150, %c0_306] : memref<324x32xf32, #tpu.memory_space<vmem>>, vector<1x32xf32>
    %c151 = arith.constant 151 : index
    %c0_307 = arith.constant 0 : index
    %377 = vector.load %arg13[%c151, %c0_307] : memref<324x32xf32, #tpu.memory_space<vmem>>, vector<1x32xf32>
    %c168 = arith.constant 168 : index
    %c0_308 = arith.constant 0 : index
    %378 = vector.load %arg13[%c168, %c0_308] : memref<324x32xf32, #tpu.memory_space<vmem>>, vector<1x32xf32>
    %c169 = arith.constant 169 : index
    %c0_309 = arith.constant 0 : index
    %379 = vector.load %arg13[%c169, %c0_309] : memref<324x32xf32, #tpu.memory_space<vmem>>, vector<1x32xf32>
    %380 = arith.maximumf %376, %377 : vector<1x32xf32>
    %381 = arith.maximumf %378, %379 : vector<1x32xf32>
    %382 = arith.maximumf %380, %381 : vector<1x32xf32>
    %c71_310 = arith.constant 71 : index
    %c0_311 = arith.constant 0 : index
    %383 = vector.load %arg14[%c71_310, %c0_311] : memref<145x32xf32, #tpu.memory_space<vmem>>, vector<1x32xf32>
    tpu.vector_store %arg14[%c71_310, %c0_311], %382 {strides = array<i32>} : memref<145x32xf32, #tpu.memory_space<vmem>>, vector<1x32xf32>,
    %c152 = arith.constant 152 : index
    %c0_312 = arith.constant 0 : index
    %384 = vector.load %arg13[%c152, %c0_312] : memref<324x32xf32, #tpu.memory_space<vmem>>, vector<1x32xf32>
    %c153 = arith.constant 153 : index
    %c0_313 = arith.constant 0 : index
    %385 = vector.load %arg13[%c153, %c0_313] : memref<324x32xf32, #tpu.memory_space<vmem>>, vector<1x32xf32>
    %c170 = arith.constant 170 : index
    %c0_314 = arith.constant 0 : index
    %386 = vector.load %arg13[%c170, %c0_314] : memref<324x32xf32, #tpu.memory_space<vmem>>, vector<1x32xf32>
    %c171 = arith.constant 171 : index
    %c0_315 = arith.constant 0 : index
    %387 = vector.load %arg13[%c171, %c0_315] : memref<324x32xf32, #tpu.memory_space<vmem>>, vector<1x32xf32>
    %388 = arith.maximumf %384, %385 : vector<1x32xf32>
    %389 = arith.maximumf %386, %387 : vector<1x32xf32>
    %390 = arith.maximumf %388, %389 : vector<1x32xf32>
    %c72_316 = arith.constant 72 : index
    %c0_317 = arith.constant 0 : index
    %391 = vector.load %arg14[%c72_316, %c0_317] : memref<145x32xf32, #tpu.memory_space<vmem>>, vector<1x32xf32>
    tpu.vector_store %arg14[%c72_316, %c0_317], %390 {strides = array<i32>} : memref<145x32xf32, #tpu.memory_space<vmem>>, vector<1x32xf32>,
    %c154 = arith.constant 154 : index
    %c0_318 = arith.constant 0 : index
    %392 = vector.load %arg13[%c154, %c0_318] : memref<324x32xf32, #tpu.memory_space<vmem>>, vector<1x32xf32>
    %c155 = arith.constant 155 : index
    %c0_319 = arith.constant 0 : index
    %393 = vector.load %arg13[%c155, %c0_319] : memref<324x32xf32, #tpu.memory_space<vmem>>, vector<1x32xf32>
    %c172 = arith.constant 172 : index
    %c0_320 = arith.constant 0 : index
    %394 = vector.load %arg13[%c172, %c0_320] : memref<324x32xf32, #tpu.memory_space<vmem>>, vector<1x32xf32>
    %c173 = arith.constant 173 : index
    %c0_321 = arith.constant 0 : index
    %395 = vector.load %arg13[%c173, %c0_321] : memref<324x32xf32, #tpu.memory_space<vmem>>, vector<1x32xf32>
    %396 = arith.maximumf %392, %393 : vector<1x32xf32>
    %397 = arith.maximumf %394, %395 : vector<1x32xf32>
    %398 = arith.maximumf %396, %397 : vector<1x32xf32>
    %c73_322 = arith.constant 73 : index
    %c0_323 = arith.constant 0 : index
    %399 = vector.load %arg14[%c73_322, %c0_323] : memref<145x32xf32, #tpu.memory_space<vmem>>, vector<1x32xf32>
    tpu.vector_store %arg14[%c73_322, %c0_323], %398 {strides = array<i32>} : memref<145x32xf32, #tpu.memory_space<vmem>>, vector<1x32xf32>,
    %c156 = arith.constant 156 : index
    %c0_324 = arith.constant 0 : index
    %400 = vector.load %arg13[%c156, %c0_324] : memref<324x32xf32, #tpu.memory_space<vmem>>, vector<1x32xf32>
    %c157 = arith.constant 157 : index
    %c0_325 = arith.constant 0 : index
    %401 = vector.load %arg13[%c157, %c0_325] : memref<324x32xf32, #tpu.memory_space<vmem>>, vector<1x32xf32>
    %c174 = arith.constant 174 : index
    %c0_326 = arith.constant 0 : index
    %402 = vector.load %arg13[%c174, %c0_326] : memref<324x32xf32, #tpu.memory_space<vmem>>, vector<1x32xf32>
    %c175 = arith.constant 175 : index
    %c0_327 = arith.constant 0 : index
    %403 = vector.load %arg13[%c175, %c0_327] : memref<324x32xf32, #tpu.memory_space<vmem>>, vector<1x32xf32>
    %404 = arith.maximumf %400, %401 : vector<1x32xf32>
    %405 = arith.maximumf %402, %403 : vector<1x32xf32>
    %406 = arith.maximumf %404, %405 : vector<1x32xf32>
    %c74_328 = arith.constant 74 : index
    %c0_329 = arith.constant 0 : index
    %407 = vector.load %arg14[%c74_328, %c0_329] : memref<145x32xf32, #tpu.memory_space<vmem>>, vector<1x32xf32>
    tpu.vector_store %arg14[%c74_328, %c0_329], %406 {strides = array<i32>} : memref<145x32xf32, #tpu.memory_space<vmem>>, vector<1x32xf32>,
    %c158 = arith.constant 158 : index
    %c0_330 = arith.constant 0 : index
    %408 = vector.load %arg13[%c158, %c0_330] : memref<324x32xf32, #tpu.memory_space<vmem>>, vector<1x32xf32>
    %c159 = arith.constant 159 : index
    %c0_331 = arith.constant 0 : index
    %409 = vector.load %arg13[%c159, %c0_331] : memref<324x32xf32, #tpu.memory_space<vmem>>, vector<1x32xf32>
    %c176 = arith.constant 176 : index
    %c0_332 = arith.constant 0 : index
    %410 = vector.load %arg13[%c176, %c0_332] : memref<324x32xf32, #tpu.memory_space<vmem>>, vector<1x32xf32>
    %c177 = arith.constant 177 : index
    %c0_333 = arith.constant 0 : index
    %411 = vector.load %arg13[%c177, %c0_333] : memref<324x32xf32, #tpu.memory_space<vmem>>, vector<1x32xf32>
    %412 = arith.maximumf %408, %409 : vector<1x32xf32>
    %413 = arith.maximumf %410, %411 : vector<1x32xf32>
    %414 = arith.maximumf %412, %413 : vector<1x32xf32>
    %c75_334 = arith.constant 75 : index
    %c0_335 = arith.constant 0 : index
    %415 = vector.load %arg14[%c75_334, %c0_335] : memref<145x32xf32, #tpu.memory_space<vmem>>, vector<1x32xf32>
    tpu.vector_store %arg14[%c75_334, %c0_335], %414 {strides = array<i32>} : memref<145x32xf32, #tpu.memory_space<vmem>>, vector<1x32xf32>,
    %c160 = arith.constant 160 : index
    %c0_336 = arith.constant 0 : index
    %416 = vector.load %arg13[%c160, %c0_336] : memref<324x32xf32, #tpu.memory_space<vmem>>, vector<1x32xf32>
    %c161 = arith.constant 161 : index
    %c0_337 = arith.constant 0 : index
    %417 = vector.load %arg13[%c161, %c0_337] : memref<324x32xf32, #tpu.memory_space<vmem>>, vector<1x32xf32>
    %c178 = arith.constant 178 : index
    %c0_338 = arith.constant 0 : index
    %418 = vector.load %arg13[%c178, %c0_338] : memref<324x32xf32, #tpu.memory_space<vmem>>, vector<1x32xf32>
    %c179 = arith.constant 179 : index
    %c0_339 = arith.constant 0 : index
    %419 = vector.load %arg13[%c179, %c0_339] : memref<324x32xf32, #tpu.memory_space<vmem>>, vector<1x32xf32>
    %420 = arith.maximumf %416, %417 : vector<1x32xf32>
    %421 = arith.maximumf %418, %419 : vector<1x32xf32>
    %422 = arith.maximumf %420, %421 : vector<1x32xf32>
    %c76_340 = arith.constant 76 : index
    %c0_341 = arith.constant 0 : index
    %423 = vector.load %arg14[%c76_340, %c0_341] : memref<145x32xf32, #tpu.memory_space<vmem>>, vector<1x32xf32>
    tpu.vector_store %arg14[%c76_340, %c0_341], %422 {strides = array<i32>} : memref<145x32xf32, #tpu.memory_space<vmem>>, vector<1x32xf32>,
    %c180 = arith.constant 180 : index
    %c0_342 = arith.constant 0 : index
    %424 = vector.load %arg13[%c180, %c0_342] : memref<324x32xf32, #tpu.memory_space<vmem>>, vector<1x32xf32>
    %c181 = arith.constant 181 : index
    %c0_343 = arith.constant 0 : index
    %425 = vector.load %arg13[%c181, %c0_343] : memref<324x32xf32, #tpu.memory_space<vmem>>, vector<1x32xf32>
    %c198 = arith.constant 198 : index
    %c0_344 = arith.constant 0 : index
    %426 = vector.load %arg13[%c198, %c0_344] : memref<324x32xf32, #tpu.memory_space<vmem>>, vector<1x32xf32>
    %c199 = arith.constant 199 : index
    %c0_345 = arith.constant 0 : index
    %427 = vector.load %arg13[%c199, %c0_345] : memref<324x32xf32, #tpu.memory_space<vmem>>, vector<1x32xf32>
    %428 = arith.maximumf %424, %425 : vector<1x32xf32>
    %429 = arith.maximumf %426, %427 : vector<1x32xf32>
    %430 = arith.maximumf %428, %429 : vector<1x32xf32>
    %c79_346 = arith.constant 79 : index
    %c0_347 = arith.constant 0 : index
    %431 = vector.load %arg14[%c79_346, %c0_347] : memref<145x32xf32, #tpu.memory_space<vmem>>, vector<1x32xf32>
    tpu.vector_store %arg14[%c79_346, %c0_347], %430 {strides = array<i32>} : memref<145x32xf32, #tpu.memory_space<vmem>>, vector<1x32xf32>,
    %c182 = arith.constant 182 : index
    %c0_348 = arith.constant 0 : index
    %432 = vector.load %arg13[%c182, %c0_348] : memref<324x32xf32, #tpu.memory_space<vmem>>, vector<1x32xf32>
    %c183 = arith.constant 183 : index
    %c0_349 = arith.constant 0 : index
    %433 = vector.load %arg13[%c183, %c0_349] : memref<324x32xf32, #tpu.memory_space<vmem>>, vector<1x32xf32>
    %c200 = arith.constant 200 : index
    %c0_350 = arith.constant 0 : index
    %434 = vector.load %arg13[%c200, %c0_350] : memref<324x32xf32, #tpu.memory_space<vmem>>, vector<1x32xf32>
    %c201 = arith.constant 201 : index
    %c0_351 = arith.constant 0 : index
    %435 = vector.load %arg13[%c201, %c0_351] : memref<324x32xf32, #tpu.memory_space<vmem>>, vector<1x32xf32>
    %436 = arith.maximumf %432, %433 : vector<1x32xf32>
    %437 = arith.maximumf %434, %435 : vector<1x32xf32>
    %438 = arith.maximumf %436, %437 : vector<1x32xf32>
    %c80_352 = arith.constant 80 : index
    %c0_353 = arith.constant 0 : index
    %439 = vector.load %arg14[%c80_352, %c0_353] : memref<145x32xf32, #tpu.memory_space<vmem>>, vector<1x32xf32>
    tpu.vector_store %arg14[%c80_352, %c0_353], %438 {strides = array<i32>} : memref<145x32xf32, #tpu.memory_space<vmem>>, vector<1x32xf32>,
    %c184 = arith.constant 184 : index
    %c0_354 = arith.constant 0 : index
    %440 = vector.load %arg13[%c184, %c0_354] : memref<324x32xf32, #tpu.memory_space<vmem>>, vector<1x32xf32>
    %c185 = arith.constant 185 : index
    %c0_355 = arith.constant 0 : index
    %441 = vector.load %arg13[%c185, %c0_355] : memref<324x32xf32, #tpu.memory_space<vmem>>, vector<1x32xf32>
    %c202 = arith.constant 202 : index
    %c0_356 = arith.constant 0 : index
    %442 = vector.load %arg13[%c202, %c0_356] : memref<324x32xf32, #tpu.memory_space<vmem>>, vector<1x32xf32>
    %c203 = arith.constant 203 : index
    %c0_357 = arith.constant 0 : index
    %443 = vector.load %arg13[%c203, %c0_357] : memref<324x32xf32, #tpu.memory_space<vmem>>, vector<1x32xf32>
    %444 = arith.maximumf %440, %441 : vector<1x32xf32>
    %445 = arith.maximumf %442, %443 : vector<1x32xf32>
    %446 = arith.maximumf %444, %445 : vector<1x32xf32>
    %c81_358 = arith.constant 81 : index
    %c0_359 = arith.constant 0 : index
    %447 = vector.load %arg14[%c81_358, %c0_359] : memref<145x32xf32, #tpu.memory_space<vmem>>, vector<1x32xf32>
    tpu.vector_store %arg14[%c81_358, %c0_359], %446 {strides = array<i32>} : memref<145x32xf32, #tpu.memory_space<vmem>>, vector<1x32xf32>,
    %c186 = arith.constant 186 : index
    %c0_360 = arith.constant 0 : index
    %448 = vector.load %arg13[%c186, %c0_360] : memref<324x32xf32, #tpu.memory_space<vmem>>, vector<1x32xf32>
    %c187 = arith.constant 187 : index
    %c0_361 = arith.constant 0 : index
    %449 = vector.load %arg13[%c187, %c0_361] : memref<324x32xf32, #tpu.memory_space<vmem>>, vector<1x32xf32>
    %c204 = arith.constant 204 : index
    %c0_362 = arith.constant 0 : index
    %450 = vector.load %arg13[%c204, %c0_362] : memref<324x32xf32, #tpu.memory_space<vmem>>, vector<1x32xf32>
    %c205 = arith.constant 205 : index
    %c0_363 = arith.constant 0 : index
    %451 = vector.load %arg13[%c205, %c0_363] : memref<324x32xf32, #tpu.memory_space<vmem>>, vector<1x32xf32>
    %452 = arith.maximumf %448, %449 : vector<1x32xf32>
    %453 = arith.maximumf %450, %451 : vector<1x32xf32>
    %454 = arith.maximumf %452, %453 : vector<1x32xf32>
    %c82_364 = arith.constant 82 : index
    %c0_365 = arith.constant 0 : index
    %455 = vector.load %arg14[%c82_364, %c0_365] : memref<145x32xf32, #tpu.memory_space<vmem>>, vector<1x32xf32>
    tpu.vector_store %arg14[%c82_364, %c0_365], %454 {strides = array<i32>} : memref<145x32xf32, #tpu.memory_space<vmem>>, vector<1x32xf32>,
    %c188 = arith.constant 188 : index
    %c0_366 = arith.constant 0 : index
    %456 = vector.load %arg13[%c188, %c0_366] : memref<324x32xf32, #tpu.memory_space<vmem>>, vector<1x32xf32>
    %c189 = arith.constant 189 : index
    %c0_367 = arith.constant 0 : index
    %457 = vector.load %arg13[%c189, %c0_367] : memref<324x32xf32, #tpu.memory_space<vmem>>, vector<1x32xf32>
    %c206 = arith.constant 206 : index
    %c0_368 = arith.constant 0 : index
    %458 = vector.load %arg13[%c206, %c0_368] : memref<324x32xf32, #tpu.memory_space<vmem>>, vector<1x32xf32>
    %c207 = arith.constant 207 : index
    %c0_369 = arith.constant 0 : index
    %459 = vector.load %arg13[%c207, %c0_369] : memref<324x32xf32, #tpu.memory_space<vmem>>, vector<1x32xf32>
    %460 = arith.maximumf %456, %457 : vector<1x32xf32>
    %461 = arith.maximumf %458, %459 : vector<1x32xf32>
    %462 = arith.maximumf %460, %461 : vector<1x32xf32>
    %c83_370 = arith.constant 83 : index
    %c0_371 = arith.constant 0 : index
    %463 = vector.load %arg14[%c83_370, %c0_371] : memref<145x32xf32, #tpu.memory_space<vmem>>, vector<1x32xf32>
    tpu.vector_store %arg14[%c83_370, %c0_371], %462 {strides = array<i32>} : memref<145x32xf32, #tpu.memory_space<vmem>>, vector<1x32xf32>,
    %c190 = arith.constant 190 : index
    %c0_372 = arith.constant 0 : index
    %464 = vector.load %arg13[%c190, %c0_372] : memref<324x32xf32, #tpu.memory_space<vmem>>, vector<1x32xf32>
    %c191 = arith.constant 191 : index
    %c0_373 = arith.constant 0 : index
    %465 = vector.load %arg13[%c191, %c0_373] : memref<324x32xf32, #tpu.memory_space<vmem>>, vector<1x32xf32>
    %c208 = arith.constant 208 : index
    %c0_374 = arith.constant 0 : index
    %466 = vector.load %arg13[%c208, %c0_374] : memref<324x32xf32, #tpu.memory_space<vmem>>, vector<1x32xf32>
    %c209 = arith.constant 209 : index
    %c0_375 = arith.constant 0 : index
    %467 = vector.load %arg13[%c209, %c0_375] : memref<324x32xf32, #tpu.memory_space<vmem>>, vector<1x32xf32>
    %468 = arith.maximumf %464, %465 : vector<1x32xf32>
    %469 = arith.maximumf %466, %467 : vector<1x32xf32>
    %470 = arith.maximumf %468, %469 : vector<1x32xf32>
    %c84_376 = arith.constant 84 : index
    %c0_377 = arith.constant 0 : index
    %471 = vector.load %arg14[%c84_376, %c0_377] : memref<145x32xf32, #tpu.memory_space<vmem>>, vector<1x32xf32>
    tpu.vector_store %arg14[%c84_376, %c0_377], %470 {strides = array<i32>} : memref<145x32xf32, #tpu.memory_space<vmem>>, vector<1x32xf32>,
    %c192 = arith.constant 192 : index
    %c0_378 = arith.constant 0 : index
    %472 = vector.load %arg13[%c192, %c0_378] : memref<324x32xf32, #tpu.memory_space<vmem>>, vector<1x32xf32>
    %c193 = arith.constant 193 : index
    %c0_379 = arith.constant 0 : index
    %473 = vector.load %arg13[%c193, %c0_379] : memref<324x32xf32, #tpu.memory_space<vmem>>, vector<1x32xf32>
    %c210 = arith.constant 210 : index
    %c0_380 = arith.constant 0 : index
    %474 = vector.load %arg13[%c210, %c0_380] : memref<324x32xf32, #tpu.memory_space<vmem>>, vector<1x32xf32>
    %c211 = arith.constant 211 : index
    %c0_381 = arith.constant 0 : index
    %475 = vector.load %arg13[%c211, %c0_381] : memref<324x32xf32, #tpu.memory_space<vmem>>, vector<1x32xf32>
    %476 = arith.maximumf %472, %473 : vector<1x32xf32>
    %477 = arith.maximumf %474, %475 : vector<1x32xf32>
    %478 = arith.maximumf %476, %477 : vector<1x32xf32>
    %c85_382 = arith.constant 85 : index
    %c0_383 = arith.constant 0 : index
    %479 = vector.load %arg14[%c85_382, %c0_383] : memref<145x32xf32, #tpu.memory_space<vmem>>, vector<1x32xf32>
    tpu.vector_store %arg14[%c85_382, %c0_383], %478 {strides = array<i32>} : memref<145x32xf32, #tpu.memory_space<vmem>>, vector<1x32xf32>,
    %c194 = arith.constant 194 : index
    %c0_384 = arith.constant 0 : index
    %480 = vector.load %arg13[%c194, %c0_384] : memref<324x32xf32, #tpu.memory_space<vmem>>, vector<1x32xf32>
    %c195 = arith.constant 195 : index
    %c0_385 = arith.constant 0 : index
    %481 = vector.load %arg13[%c195, %c0_385] : memref<324x32xf32, #tpu.memory_space<vmem>>, vector<1x32xf32>
    %c212 = arith.constant 212 : index
    %c0_386 = arith.constant 0 : index
    %482 = vector.load %arg13[%c212, %c0_386] : memref<324x32xf32, #tpu.memory_space<vmem>>, vector<1x32xf32>
    %c213 = arith.constant 213 : index
    %c0_387 = arith.constant 0 : index
    %483 = vector.load %arg13[%c213, %c0_387] : memref<324x32xf32, #tpu.memory_space<vmem>>, vector<1x32xf32>
    %484 = arith.maximumf %480, %481 : vector<1x32xf32>
    %485 = arith.maximumf %482, %483 : vector<1x32xf32>
    %486 = arith.maximumf %484, %485 : vector<1x32xf32>
    %c86_388 = arith.constant 86 : index
    %c0_389 = arith.constant 0 : index
    %487 = vector.load %arg14[%c86_388, %c0_389] : memref<145x32xf32, #tpu.memory_space<vmem>>, vector<1x32xf32>
    tpu.vector_store %arg14[%c86_388, %c0_389], %486 {strides = array<i32>} : memref<145x32xf32, #tpu.memory_space<vmem>>, vector<1x32xf32>,
    %c196 = arith.constant 196 : index
    %c0_390 = arith.constant 0 : index
    %488 = vector.load %arg13[%c196, %c0_390] : memref<324x32xf32, #tpu.memory_space<vmem>>, vector<1x32xf32>
    %c197 = arith.constant 197 : index
    %c0_391 = arith.constant 0 : index
    %489 = vector.load %arg13[%c197, %c0_391] : memref<324x32xf32, #tpu.memory_space<vmem>>, vector<1x32xf32>
    %c214 = arith.constant 214 : index
    %c0_392 = arith.constant 0 : index
    %490 = vector.load %arg13[%c214, %c0_392] : memref<324x32xf32, #tpu.memory_space<vmem>>, vector<1x32xf32>
    %c215 = arith.constant 215 : index
    %c0_393 = arith.constant 0 : index
    %491 = vector.load %arg13[%c215, %c0_393] : memref<324x32xf32, #tpu.memory_space<vmem>>, vector<1x32xf32>
    %492 = arith.maximumf %488, %489 : vector<1x32xf32>
    %493 = arith.maximumf %490, %491 : vector<1x32xf32>
    %494 = arith.maximumf %492, %493 : vector<1x32xf32>
    %c87_394 = arith.constant 87 : index
    %c0_395 = arith.constant 0 : index
    %495 = vector.load %arg14[%c87_394, %c0_395] : memref<145x32xf32, #tpu.memory_space<vmem>>, vector<1x32xf32>
    tpu.vector_store %arg14[%c87_394, %c0_395], %494 {strides = array<i32>} : memref<145x32xf32, #tpu.memory_space<vmem>>, vector<1x32xf32>,
    %c216 = arith.constant 216 : index
    %c0_396 = arith.constant 0 : index
    %496 = vector.load %arg13[%c216, %c0_396] : memref<324x32xf32, #tpu.memory_space<vmem>>, vector<1x32xf32>
    %c217 = arith.constant 217 : index
    %c0_397 = arith.constant 0 : index
    %497 = vector.load %arg13[%c217, %c0_397] : memref<324x32xf32, #tpu.memory_space<vmem>>, vector<1x32xf32>
    %c234 = arith.constant 234 : index
    %c0_398 = arith.constant 0 : index
    %498 = vector.load %arg13[%c234, %c0_398] : memref<324x32xf32, #tpu.memory_space<vmem>>, vector<1x32xf32>
    %c235 = arith.constant 235 : index
    %c0_399 = arith.constant 0 : index
    %499 = vector.load %arg13[%c235, %c0_399] : memref<324x32xf32, #tpu.memory_space<vmem>>, vector<1x32xf32>
    %500 = arith.maximumf %496, %497 : vector<1x32xf32>
    %501 = arith.maximumf %498, %499 : vector<1x32xf32>
    %502 = arith.maximumf %500, %501 : vector<1x32xf32>
    %c90_400 = arith.constant 90 : index
    %c0_401 = arith.constant 0 : index
    %503 = vector.load %arg14[%c90_400, %c0_401] : memref<145x32xf32, #tpu.memory_space<vmem>>, vector<1x32xf32>
    tpu.vector_store %arg14[%c90_400, %c0_401], %502 {strides = array<i32>} : memref<145x32xf32, #tpu.memory_space<vmem>>, vector<1x32xf32>,
    %c218 = arith.constant 218 : index
    %c0_402 = arith.constant 0 : index
    %504 = vector.load %arg13[%c218, %c0_402] : memref<324x32xf32, #tpu.memory_space<vmem>>, vector<1x32xf32>
    %c219 = arith.constant 219 : index
    %c0_403 = arith.constant 0 : index
    %505 = vector.load %arg13[%c219, %c0_403] : memref<324x32xf32, #tpu.memory_space<vmem>>, vector<1x32xf32>
    %c236 = arith.constant 236 : index
    %c0_404 = arith.constant 0 : index
    %506 = vector.load %arg13[%c236, %c0_404] : memref<324x32xf32, #tpu.memory_space<vmem>>, vector<1x32xf32>
    %c237 = arith.constant 237 : index
    %c0_405 = arith.constant 0 : index
    %507 = vector.load %arg13[%c237, %c0_405] : memref<324x32xf32, #tpu.memory_space<vmem>>, vector<1x32xf32>
    %508 = arith.maximumf %504, %505 : vector<1x32xf32>
    %509 = arith.maximumf %506, %507 : vector<1x32xf32>
    %510 = arith.maximumf %508, %509 : vector<1x32xf32>
    %c91_406 = arith.constant 91 : index
    %c0_407 = arith.constant 0 : index
    %511 = vector.load %arg14[%c91_406, %c0_407] : memref<145x32xf32, #tpu.memory_space<vmem>>, vector<1x32xf32>
    tpu.vector_store %arg14[%c91_406, %c0_407], %510 {strides = array<i32>} : memref<145x32xf32, #tpu.memory_space<vmem>>, vector<1x32xf32>,
    %c220 = arith.constant 220 : index
    %c0_408 = arith.constant 0 : index
    %512 = vector.load %arg13[%c220, %c0_408] : memref<324x32xf32, #tpu.memory_space<vmem>>, vector<1x32xf32>
    %c221 = arith.constant 221 : index
    %c0_409 = arith.constant 0 : index
    %513 = vector.load %arg13[%c221, %c0_409] : memref<324x32xf32, #tpu.memory_space<vmem>>, vector<1x32xf32>
    %c238 = arith.constant 238 : index
    %c0_410 = arith.constant 0 : index
    %514 = vector.load %arg13[%c238, %c0_410] : memref<324x32xf32, #tpu.memory_space<vmem>>, vector<1x32xf32>
    %c239 = arith.constant 239 : index
    %c0_411 = arith.constant 0 : index
    %515 = vector.load %arg13[%c239, %c0_411] : memref<324x32xf32, #tpu.memory_space<vmem>>, vector<1x32xf32>
    %516 = arith.maximumf %512, %513 : vector<1x32xf32>
    %517 = arith.maximumf %514, %515 : vector<1x32xf32>
    %518 = arith.maximumf %516, %517 : vector<1x32xf32>
    %c92_412 = arith.constant 92 : index
    %c0_413 = arith.constant 0 : index
    %519 = vector.load %arg14[%c92_412, %c0_413] : memref<145x32xf32, #tpu.memory_space<vmem>>, vector<1x32xf32>
    tpu.vector_store %arg14[%c92_412, %c0_413], %518 {strides = array<i32>} : memref<145x32xf32, #tpu.memory_space<vmem>>, vector<1x32xf32>,
    %c222 = arith.constant 222 : index
    %c0_414 = arith.constant 0 : index
    %520 = vector.load %arg13[%c222, %c0_414] : memref<324x32xf32, #tpu.memory_space<vmem>>, vector<1x32xf32>
    %c223 = arith.constant 223 : index
    %c0_415 = arith.constant 0 : index
    %521 = vector.load %arg13[%c223, %c0_415] : memref<324x32xf32, #tpu.memory_space<vmem>>, vector<1x32xf32>
    %c240 = arith.constant 240 : index
    %c0_416 = arith.constant 0 : index
    %522 = vector.load %arg13[%c240, %c0_416] : memref<324x32xf32, #tpu.memory_space<vmem>>, vector<1x32xf32>
    %c241 = arith.constant 241 : index
    %c0_417 = arith.constant 0 : index
    %523 = vector.load %arg13[%c241, %c0_417] : memref<324x32xf32, #tpu.memory_space<vmem>>, vector<1x32xf32>
    %524 = arith.maximumf %520, %521 : vector<1x32xf32>
    %525 = arith.maximumf %522, %523 : vector<1x32xf32>
    %526 = arith.maximumf %524, %525 : vector<1x32xf32>
    %c93_418 = arith.constant 93 : index
    %c0_419 = arith.constant 0 : index
    %527 = vector.load %arg14[%c93_418, %c0_419] : memref<145x32xf32, #tpu.memory_space<vmem>>, vector<1x32xf32>
    tpu.vector_store %arg14[%c93_418, %c0_419], %526 {strides = array<i32>} : memref<145x32xf32, #tpu.memory_space<vmem>>, vector<1x32xf32>,
    %c224 = arith.constant 224 : index
    %c0_420 = arith.constant 0 : index
    %528 = vector.load %arg13[%c224, %c0_420] : memref<324x32xf32, #tpu.memory_space<vmem>>, vector<1x32xf32>
    %c225 = arith.constant 225 : index
    %c0_421 = arith.constant 0 : index
    %529 = vector.load %arg13[%c225, %c0_421] : memref<324x32xf32, #tpu.memory_space<vmem>>, vector<1x32xf32>
    %c242 = arith.constant 242 : index
    %c0_422 = arith.constant 0 : index
    %530 = vector.load %arg13[%c242, %c0_422] : memref<324x32xf32, #tpu.memory_space<vmem>>, vector<1x32xf32>
    %c243 = arith.constant 243 : index
    %c0_423 = arith.constant 0 : index
    %531 = vector.load %arg13[%c243, %c0_423] : memref<324x32xf32, #tpu.memory_space<vmem>>, vector<1x32xf32>
    %532 = arith.maximumf %528, %529 : vector<1x32xf32>
    %533 = arith.maximumf %530, %531 : vector<1x32xf32>
    %534 = arith.maximumf %532, %533 : vector<1x32xf32>
    %c94_424 = arith.constant 94 : index
    %c0_425 = arith.constant 0 : index
    %535 = vector.load %arg14[%c94_424, %c0_425] : memref<145x32xf32, #tpu.memory_space<vmem>>, vector<1x32xf32>
    tpu.vector_store %arg14[%c94_424, %c0_425], %534 {strides = array<i32>} : memref<145x32xf32, #tpu.memory_space<vmem>>, vector<1x32xf32>,
    %c226 = arith.constant 226 : index
    %c0_426 = arith.constant 0 : index
    %536 = vector.load %arg13[%c226, %c0_426] : memref<324x32xf32, #tpu.memory_space<vmem>>, vector<1x32xf32>
    %c227 = arith.constant 227 : index
    %c0_427 = arith.constant 0 : index
    %537 = vector.load %arg13[%c227, %c0_427] : memref<324x32xf32, #tpu.memory_space<vmem>>, vector<1x32xf32>
    %c244 = arith.constant 244 : index
    %c0_428 = arith.constant 0 : index
    %538 = vector.load %arg13[%c244, %c0_428] : memref<324x32xf32, #tpu.memory_space<vmem>>, vector<1x32xf32>
    %c245 = arith.constant 245 : index
    %c0_429 = arith.constant 0 : index
    %539 = vector.load %arg13[%c245, %c0_429] : memref<324x32xf32, #tpu.memory_space<vmem>>, vector<1x32xf32>
    %540 = arith.maximumf %536, %537 : vector<1x32xf32>
    %541 = arith.maximumf %538, %539 : vector<1x32xf32>
    %542 = arith.maximumf %540, %541 : vector<1x32xf32>
    %c95_430 = arith.constant 95 : index
    %c0_431 = arith.constant 0 : index
    %543 = vector.load %arg14[%c95_430, %c0_431] : memref<145x32xf32, #tpu.memory_space<vmem>>, vector<1x32xf32>
    tpu.vector_store %arg14[%c95_430, %c0_431], %542 {strides = array<i32>} : memref<145x32xf32, #tpu.memory_space<vmem>>, vector<1x32xf32>,
    %c228 = arith.constant 228 : index
    %c0_432 = arith.constant 0 : index
    %544 = vector.load %arg13[%c228, %c0_432] : memref<324x32xf32, #tpu.memory_space<vmem>>, vector<1x32xf32>
    %c229 = arith.constant 229 : index
    %c0_433 = arith.constant 0 : index
    %545 = vector.load %arg13[%c229, %c0_433] : memref<324x32xf32, #tpu.memory_space<vmem>>, vector<1x32xf32>
    %c246 = arith.constant 246 : index
    %c0_434 = arith.constant 0 : index
    %546 = vector.load %arg13[%c246, %c0_434] : memref<324x32xf32, #tpu.memory_space<vmem>>, vector<1x32xf32>
    %c247 = arith.constant 247 : index
    %c0_435 = arith.constant 0 : index
    %547 = vector.load %arg13[%c247, %c0_435] : memref<324x32xf32, #tpu.memory_space<vmem>>, vector<1x32xf32>
    %548 = arith.maximumf %544, %545 : vector<1x32xf32>
    %549 = arith.maximumf %546, %547 : vector<1x32xf32>
    %550 = arith.maximumf %548, %549 : vector<1x32xf32>
    %c96_436 = arith.constant 96 : index
    %c0_437 = arith.constant 0 : index
    %551 = vector.load %arg14[%c96_436, %c0_437] : memref<145x32xf32, #tpu.memory_space<vmem>>, vector<1x32xf32>
    tpu.vector_store %arg14[%c96_436, %c0_437], %550 {strides = array<i32>} : memref<145x32xf32, #tpu.memory_space<vmem>>, vector<1x32xf32>,
    %c230 = arith.constant 230 : index
    %c0_438 = arith.constant 0 : index
    %552 = vector.load %arg13[%c230, %c0_438] : memref<324x32xf32, #tpu.memory_space<vmem>>, vector<1x32xf32>
    %c231 = arith.constant 231 : index
    %c0_439 = arith.constant 0 : index
    %553 = vector.load %arg13[%c231, %c0_439] : memref<324x32xf32, #tpu.memory_space<vmem>>, vector<1x32xf32>
    %c248 = arith.constant 248 : index
    %c0_440 = arith.constant 0 : index
    %554 = vector.load %arg13[%c248, %c0_440] : memref<324x32xf32, #tpu.memory_space<vmem>>, vector<1x32xf32>
    %c249 = arith.constant 249 : index
    %c0_441 = arith.constant 0 : index
    %555 = vector.load %arg13[%c249, %c0_441] : memref<324x32xf32, #tpu.memory_space<vmem>>, vector<1x32xf32>
    %556 = arith.maximumf %552, %553 : vector<1x32xf32>
    %557 = arith.maximumf %554, %555 : vector<1x32xf32>
    %558 = arith.maximumf %556, %557 : vector<1x32xf32>
    %c97_442 = arith.constant 97 : index
    %c0_443 = arith.constant 0 : index
    %559 = vector.load %arg14[%c97_442, %c0_443] : memref<145x32xf32, #tpu.memory_space<vmem>>, vector<1x32xf32>
    tpu.vector_store %arg14[%c97_442, %c0_443], %558 {strides = array<i32>} : memref<145x32xf32, #tpu.memory_space<vmem>>, vector<1x32xf32>,
    %c232 = arith.constant 232 : index
    %c0_444 = arith.constant 0 : index
    %560 = vector.load %arg13[%c232, %c0_444] : memref<324x32xf32, #tpu.memory_space<vmem>>, vector<1x32xf32>
    %c233 = arith.constant 233 : index
    %c0_445 = arith.constant 0 : index
    %561 = vector.load %arg13[%c233, %c0_445] : memref<324x32xf32, #tpu.memory_space<vmem>>, vector<1x32xf32>
    %c250 = arith.constant 250 : index
    %c0_446 = arith.constant 0 : index
    %562 = vector.load %arg13[%c250, %c0_446] : memref<324x32xf32, #tpu.memory_space<vmem>>, vector<1x32xf32>
    %c251 = arith.constant 251 : index
    %c0_447 = arith.constant 0 : index
    %563 = vector.load %arg13[%c251, %c0_447] : memref<324x32xf32, #tpu.memory_space<vmem>>, vector<1x32xf32>
    %564 = arith.maximumf %560, %561 : vector<1x32xf32>
    %565 = arith.maximumf %562, %563 : vector<1x32xf32>
    %566 = arith.maximumf %564, %565 : vector<1x32xf32>
    %c98_448 = arith.constant 98 : index
    %c0_449 = arith.constant 0 : index
    %567 = vector.load %arg14[%c98_448, %c0_449] : memref<145x32xf32, #tpu.memory_space<vmem>>, vector<1x32xf32>
    tpu.vector_store %arg14[%c98_448, %c0_449], %566 {strides = array<i32>} : memref<145x32xf32, #tpu.memory_space<vmem>>, vector<1x32xf32>,
    %c252 = arith.constant 252 : index
    %c0_450 = arith.constant 0 : index
    %568 = vector.load %arg13[%c252, %c0_450] : memref<324x32xf32, #tpu.memory_space<vmem>>, vector<1x32xf32>
    %c253 = arith.constant 253 : index
    %c0_451 = arith.constant 0 : index
    %569 = vector.load %arg13[%c253, %c0_451] : memref<324x32xf32, #tpu.memory_space<vmem>>, vector<1x32xf32>
    %c270 = arith.constant 270 : index
    %c0_452 = arith.constant 0 : index
    %570 = vector.load %arg13[%c270, %c0_452] : memref<324x32xf32, #tpu.memory_space<vmem>>, vector<1x32xf32>
    %c271 = arith.constant 271 : index
    %c0_453 = arith.constant 0 : index
    %571 = vector.load %arg13[%c271, %c0_453] : memref<324x32xf32, #tpu.memory_space<vmem>>, vector<1x32xf32>
    %572 = arith.maximumf %568, %569 : vector<1x32xf32>
    %573 = arith.maximumf %570, %571 : vector<1x32xf32>
    %574 = arith.maximumf %572, %573 : vector<1x32xf32>
    %c101_454 = arith.constant 101 : index
    %c0_455 = arith.constant 0 : index
    %575 = vector.load %arg14[%c101_454, %c0_455] : memref<145x32xf32, #tpu.memory_space<vmem>>, vector<1x32xf32>
    tpu.vector_store %arg14[%c101_454, %c0_455], %574 {strides = array<i32>} : memref<145x32xf32, #tpu.memory_space<vmem>>, vector<1x32xf32>,
    %c254 = arith.constant 254 : index
    %c0_456 = arith.constant 0 : index
    %576 = vector.load %arg13[%c254, %c0_456] : memref<324x32xf32, #tpu.memory_space<vmem>>, vector<1x32xf32>
    %c255 = arith.constant 255 : index
    %c0_457 = arith.constant 0 : index
    %577 = vector.load %arg13[%c255, %c0_457] : memref<324x32xf32, #tpu.memory_space<vmem>>, vector<1x32xf32>
    %c272 = arith.constant 272 : index
    %c0_458 = arith.constant 0 : index
    %578 = vector.load %arg13[%c272, %c0_458] : memref<324x32xf32, #tpu.memory_space<vmem>>, vector<1x32xf32>
    %c273 = arith.constant 273 : index
    %c0_459 = arith.constant 0 : index
    %579 = vector.load %arg13[%c273, %c0_459] : memref<324x32xf32, #tpu.memory_space<vmem>>, vector<1x32xf32>
    %580 = arith.maximumf %576, %577 : vector<1x32xf32>
    %581 = arith.maximumf %578, %579 : vector<1x32xf32>
    %582 = arith.maximumf %580, %581 : vector<1x32xf32>
    %c102_460 = arith.constant 102 : index
    %c0_461 = arith.constant 0 : index
    %583 = vector.load %arg14[%c102_460, %c0_461] : memref<145x32xf32, #tpu.memory_space<vmem>>, vector<1x32xf32>
    tpu.vector_store %arg14[%c102_460, %c0_461], %582 {strides = array<i32>} : memref<145x32xf32, #tpu.memory_space<vmem>>, vector<1x32xf32>,
    %c256 = arith.constant 256 : index
    %c0_462 = arith.constant 0 : index
    %584 = vector.load %arg13[%c256, %c0_462] : memref<324x32xf32, #tpu.memory_space<vmem>>, vector<1x32xf32>
    %c257 = arith.constant 257 : index
    %c0_463 = arith.constant 0 : index
    %585 = vector.load %arg13[%c257, %c0_463] : memref<324x32xf32, #tpu.memory_space<vmem>>, vector<1x32xf32>
    %c274 = arith.constant 274 : index
    %c0_464 = arith.constant 0 : index
    %586 = vector.load %arg13[%c274, %c0_464] : memref<324x32xf32, #tpu.memory_space<vmem>>, vector<1x32xf32>
    %c275 = arith.constant 275 : index
    %c0_465 = arith.constant 0 : index
    %587 = vector.load %arg13[%c275, %c0_465] : memref<324x32xf32, #tpu.memory_space<vmem>>, vector<1x32xf32>
    %588 = arith.maximumf %584, %585 : vector<1x32xf32>
    %589 = arith.maximumf %586, %587 : vector<1x32xf32>
    %590 = arith.maximumf %588, %589 : vector<1x32xf32>
    %c103_466 = arith.constant 103 : index
    %c0_467 = arith.constant 0 : index
    %591 = vector.load %arg14[%c103_466, %c0_467] : memref<145x32xf32, #tpu.memory_space<vmem>>, vector<1x32xf32>
    tpu.vector_store %arg14[%c103_466, %c0_467], %590 {strides = array<i32>} : memref<145x32xf32, #tpu.memory_space<vmem>>, vector<1x32xf32>,
    %c258 = arith.constant 258 : index
    %c0_468 = arith.constant 0 : index
    %592 = vector.load %arg13[%c258, %c0_468] : memref<324x32xf32, #tpu.memory_space<vmem>>, vector<1x32xf32>
    %c259 = arith.constant 259 : index
    %c0_469 = arith.constant 0 : index
    %593 = vector.load %arg13[%c259, %c0_469] : memref<324x32xf32, #tpu.memory_space<vmem>>, vector<1x32xf32>
    %c276 = arith.constant 276 : index
    %c0_470 = arith.constant 0 : index
    %594 = vector.load %arg13[%c276, %c0_470] : memref<324x32xf32, #tpu.memory_space<vmem>>, vector<1x32xf32>
    %c277 = arith.constant 277 : index
    %c0_471 = arith.constant 0 : index
    %595 = vector.load %arg13[%c277, %c0_471] : memref<324x32xf32, #tpu.memory_space<vmem>>, vector<1x32xf32>
    %596 = arith.maximumf %592, %593 : vector<1x32xf32>
    %597 = arith.maximumf %594, %595 : vector<1x32xf32>
    %598 = arith.maximumf %596, %597 : vector<1x32xf32>
    %c104_472 = arith.constant 104 : index
    %c0_473 = arith.constant 0 : index
    %599 = vector.load %arg14[%c104_472, %c0_473] : memref<145x32xf32, #tpu.memory_space<vmem>>, vector<1x32xf32>
    tpu.vector_store %arg14[%c104_472, %c0_473], %598 {strides = array<i32>} : memref<145x32xf32, #tpu.memory_space<vmem>>, vector<1x32xf32>,
    %c260 = arith.constant 260 : index
    %c0_474 = arith.constant 0 : index
    %600 = vector.load %arg13[%c260, %c0_474] : memref<324x32xf32, #tpu.memory_space<vmem>>, vector<1x32xf32>
    %c261 = arith.constant 261 : index
    %c0_475 = arith.constant 0 : index
    %601 = vector.load %arg13[%c261, %c0_475] : memref<324x32xf32, #tpu.memory_space<vmem>>, vector<1x32xf32>
    %c278 = arith.constant 278 : index
    %c0_476 = arith.constant 0 : index
    %602 = vector.load %arg13[%c278, %c0_476] : memref<324x32xf32, #tpu.memory_space<vmem>>, vector<1x32xf32>
    %c279 = arith.constant 279 : index
    %c0_477 = arith.constant 0 : index
    %603 = vector.load %arg13[%c279, %c0_477] : memref<324x32xf32, #tpu.memory_space<vmem>>, vector<1x32xf32>
    %604 = arith.maximumf %600, %601 : vector<1x32xf32>
    %605 = arith.maximumf %602, %603 : vector<1x32xf32>
    %606 = arith.maximumf %604, %605 : vector<1x32xf32>
    %c105_478 = arith.constant 105 : index
    %c0_479 = arith.constant 0 : index
    %607 = vector.load %arg14[%c105_478, %c0_479] : memref<145x32xf32, #tpu.memory_space<vmem>>, vector<1x32xf32>
    tpu.vector_store %arg14[%c105_478, %c0_479], %606 {strides = array<i32>} : memref<145x32xf32, #tpu.memory_space<vmem>>, vector<1x32xf32>,
    %c262 = arith.constant 262 : index
    %c0_480 = arith.constant 0 : index
    %608 = vector.load %arg13[%c262, %c0_480] : memref<324x32xf32, #tpu.memory_space<vmem>>, vector<1x32xf32>
    %c263 = arith.constant 263 : index
    %c0_481 = arith.constant 0 : index
    %609 = vector.load %arg13[%c263, %c0_481] : memref<324x32xf32, #tpu.memory_space<vmem>>, vector<1x32xf32>
    %c280 = arith.constant 280 : index
    %c0_482 = arith.constant 0 : index
    %610 = vector.load %arg13[%c280, %c0_482] : memref<324x32xf32, #tpu.memory_space<vmem>>, vector<1x32xf32>
    %c281 = arith.constant 281 : index
    %c0_483 = arith.constant 0 : index
    %611 = vector.load %arg13[%c281, %c0_483] : memref<324x32xf32, #tpu.memory_space<vmem>>, vector<1x32xf32>
    %612 = arith.maximumf %608, %609 : vector<1x32xf32>
    %613 = arith.maximumf %610, %611 : vector<1x32xf32>
    %614 = arith.maximumf %612, %613 : vector<1x32xf32>
    %c106_484 = arith.constant 106 : index
    %c0_485 = arith.constant 0 : index
    %615 = vector.load %arg14[%c106_484, %c0_485] : memref<145x32xf32, #tpu.memory_space<vmem>>, vector<1x32xf32>
    tpu.vector_store %arg14[%c106_484, %c0_485], %614 {strides = array<i32>} : memref<145x32xf32, #tpu.memory_space<vmem>>, vector<1x32xf32>,
    %c264 = arith.constant 264 : index
    %c0_486 = arith.constant 0 : index
    %616 = vector.load %arg13[%c264, %c0_486] : memref<324x32xf32, #tpu.memory_space<vmem>>, vector<1x32xf32>
    %c265 = arith.constant 265 : index
    %c0_487 = arith.constant 0 : index
    %617 = vector.load %arg13[%c265, %c0_487] : memref<324x32xf32, #tpu.memory_space<vmem>>, vector<1x32xf32>
    %c282 = arith.constant 282 : index
    %c0_488 = arith.constant 0 : index
    %618 = vector.load %arg13[%c282, %c0_488] : memref<324x32xf32, #tpu.memory_space<vmem>>, vector<1x32xf32>
    %c283 = arith.constant 283 : index
    %c0_489 = arith.constant 0 : index
    %619 = vector.load %arg13[%c283, %c0_489] : memref<324x32xf32, #tpu.memory_space<vmem>>, vector<1x32xf32>
    %620 = arith.maximumf %616, %617 : vector<1x32xf32>
    %621 = arith.maximumf %618, %619 : vector<1x32xf32>
    %622 = arith.maximumf %620, %621 : vector<1x32xf32>
    %c107_490 = arith.constant 107 : index
    %c0_491 = arith.constant 0 : index
    %623 = vector.load %arg14[%c107_490, %c0_491] : memref<145x32xf32, #tpu.memory_space<vmem>>, vector<1x32xf32>
    tpu.vector_store %arg14[%c107_490, %c0_491], %622 {strides = array<i32>} : memref<145x32xf32, #tpu.memory_space<vmem>>, vector<1x32xf32>,
    %c266 = arith.constant 266 : index
    %c0_492 = arith.constant 0 : index
    %624 = vector.load %arg13[%c266, %c0_492] : memref<324x32xf32, #tpu.memory_space<vmem>>, vector<1x32xf32>
    %c267 = arith.constant 267 : index
    %c0_493 = arith.constant 0 : index
    %625 = vector.load %arg13[%c267, %c0_493] : memref<324x32xf32, #tpu.memory_space<vmem>>, vector<1x32xf32>
    %c284 = arith.constant 284 : index
    %c0_494 = arith.constant 0 : index
    %626 = vector.load %arg13[%c284, %c0_494] : memref<324x32xf32, #tpu.memory_space<vmem>>, vector<1x32xf32>
    %c285 = arith.constant 285 : index
    %c0_495 = arith.constant 0 : index
    %627 = vector.load %arg13[%c285, %c0_495] : memref<324x32xf32, #tpu.memory_space<vmem>>, vector<1x32xf32>
    %628 = arith.maximumf %624, %625 : vector<1x32xf32>
    %629 = arith.maximumf %626, %627 : vector<1x32xf32>
    %630 = arith.maximumf %628, %629 : vector<1x32xf32>
    %c108_496 = arith.constant 108 : index
    %c0_497 = arith.constant 0 : index
    %631 = vector.load %arg14[%c108_496, %c0_497] : memref<145x32xf32, #tpu.memory_space<vmem>>, vector<1x32xf32>
    tpu.vector_store %arg14[%c108_496, %c0_497], %630 {strides = array<i32>} : memref<145x32xf32, #tpu.memory_space<vmem>>, vector<1x32xf32>,
    %c268 = arith.constant 268 : index
    %c0_498 = arith.constant 0 : index
    %632 = vector.load %arg13[%c268, %c0_498] : memref<324x32xf32, #tpu.memory_space<vmem>>, vector<1x32xf32>
    %c269 = arith.constant 269 : index
    %c0_499 = arith.constant 0 : index
    %633 = vector.load %arg13[%c269, %c0_499] : memref<324x32xf32, #tpu.memory_space<vmem>>, vector<1x32xf32>
    %c286 = arith.constant 286 : index
    %c0_500 = arith.constant 0 : index
    %634 = vector.load %arg13[%c286, %c0_500] : memref<324x32xf32, #tpu.memory_space<vmem>>, vector<1x32xf32>
    %c287 = arith.constant 287 : index
    %c0_501 = arith.constant 0 : index
    %635 = vector.load %arg13[%c287, %c0_501] : memref<324x32xf32, #tpu.memory_space<vmem>>, vector<1x32xf32>
    %636 = arith.maximumf %632, %633 : vector<1x32xf32>
    %637 = arith.maximumf %634, %635 : vector<1x32xf32>
    %638 = arith.maximumf %636, %637 : vector<1x32xf32>
    %c109_502 = arith.constant 109 : index
    %c0_503 = arith.constant 0 : index
    %639 = vector.load %arg14[%c109_502, %c0_503] : memref<145x32xf32, #tpu.memory_space<vmem>>, vector<1x32xf32>
    tpu.vector_store %arg14[%c109_502, %c0_503], %638 {strides = array<i32>} : memref<145x32xf32, #tpu.memory_space<vmem>>, vector<1x32xf32>,
    %c288 = arith.constant 288 : index
    %c0_504 = arith.constant 0 : index
    %640 = vector.load %arg13[%c288, %c0_504] : memref<324x32xf32, #tpu.memory_space<vmem>>, vector<1x32xf32>
    %c289 = arith.constant 289 : index
    %c0_505 = arith.constant 0 : index
    %641 = vector.load %arg13[%c289, %c0_505] : memref<324x32xf32, #tpu.memory_space<vmem>>, vector<1x32xf32>
    %c306 = arith.constant 306 : index
    %c0_506 = arith.constant 0 : index
    %642 = vector.load %arg13[%c306, %c0_506] : memref<324x32xf32, #tpu.memory_space<vmem>>, vector<1x32xf32>
    %c307 = arith.constant 307 : index
    %c0_507 = arith.constant 0 : index
    %643 = vector.load %arg13[%c307, %c0_507] : memref<324x32xf32, #tpu.memory_space<vmem>>, vector<1x32xf32>
    %644 = arith.maximumf %640, %641 : vector<1x32xf32>
    %645 = arith.maximumf %642, %643 : vector<1x32xf32>
    %646 = arith.maximumf %644, %645 : vector<1x32xf32>
    %c112_508 = arith.constant 112 : index
    %c0_509 = arith.constant 0 : index
    %647 = vector.load %arg14[%c112_508, %c0_509] : memref<145x32xf32, #tpu.memory_space<vmem>>, vector<1x32xf32>
    tpu.vector_store %arg14[%c112_508, %c0_509], %646 {strides = array<i32>} : memref<145x32xf32, #tpu.memory_space<vmem>>, vector<1x32xf32>,
    %c290 = arith.constant 290 : index
    %c0_510 = arith.constant 0 : index
    %648 = vector.load %arg13[%c290, %c0_510] : memref<324x32xf32, #tpu.memory_space<vmem>>, vector<1x32xf32>
    %c291 = arith.constant 291 : index
    %c0_511 = arith.constant 0 : index
    %649 = vector.load %arg13[%c291, %c0_511] : memref<324x32xf32, #tpu.memory_space<vmem>>, vector<1x32xf32>
    %c308 = arith.constant 308 : index
    %c0_512 = arith.constant 0 : index
    %650 = vector.load %arg13[%c308, %c0_512] : memref<324x32xf32, #tpu.memory_space<vmem>>, vector<1x32xf32>
    %c309 = arith.constant 309 : index
    %c0_513 = arith.constant 0 : index
    %651 = vector.load %arg13[%c309, %c0_513] : memref<324x32xf32, #tpu.memory_space<vmem>>, vector<1x32xf32>
    %652 = arith.maximumf %648, %649 : vector<1x32xf32>
    %653 = arith.maximumf %650, %651 : vector<1x32xf32>
    %654 = arith.maximumf %652, %653 : vector<1x32xf32>
    %c113_514 = arith.constant 113 : index
    %c0_515 = arith.constant 0 : index
    %655 = vector.load %arg14[%c113_514, %c0_515] : memref<145x32xf32, #tpu.memory_space<vmem>>, vector<1x32xf32>
    tpu.vector_store %arg14[%c113_514, %c0_515], %654 {strides = array<i32>} : memref<145x32xf32, #tpu.memory_space<vmem>>, vector<1x32xf32>,
    %c292 = arith.constant 292 : index
    %c0_516 = arith.constant 0 : index
    %656 = vector.load %arg13[%c292, %c0_516] : memref<324x32xf32, #tpu.memory_space<vmem>>, vector<1x32xf32>
    %c293 = arith.constant 293 : index
    %c0_517 = arith.constant 0 : index
    %657 = vector.load %arg13[%c293, %c0_517] : memref<324x32xf32, #tpu.memory_space<vmem>>, vector<1x32xf32>
    %c310 = arith.constant 310 : index
    %c0_518 = arith.constant 0 : index
    %658 = vector.load %arg13[%c310, %c0_518] : memref<324x32xf32, #tpu.memory_space<vmem>>, vector<1x32xf32>
    %c311 = arith.constant 311 : index
    %c0_519 = arith.constant 0 : index
    %659 = vector.load %arg13[%c311, %c0_519] : memref<324x32xf32, #tpu.memory_space<vmem>>, vector<1x32xf32>
    %660 = arith.maximumf %656, %657 : vector<1x32xf32>
    %661 = arith.maximumf %658, %659 : vector<1x32xf32>
    %662 = arith.maximumf %660, %661 : vector<1x32xf32>
    %c114_520 = arith.constant 114 : index
    %c0_521 = arith.constant 0 : index
    %663 = vector.load %arg14[%c114_520, %c0_521] : memref<145x32xf32, #tpu.memory_space<vmem>>, vector<1x32xf32>
    tpu.vector_store %arg14[%c114_520, %c0_521], %662 {strides = array<i32>} : memref<145x32xf32, #tpu.memory_space<vmem>>, vector<1x32xf32>,
    %c294 = arith.constant 294 : index
    %c0_522 = arith.constant 0 : index
    %664 = vector.load %arg13[%c294, %c0_522] : memref<324x32xf32, #tpu.memory_space<vmem>>, vector<1x32xf32>
    %c295 = arith.constant 295 : index
    %c0_523 = arith.constant 0 : index
    %665 = vector.load %arg13[%c295, %c0_523] : memref<324x32xf32, #tpu.memory_space<vmem>>, vector<1x32xf32>
    %c312 = arith.constant 312 : index
    %c0_524 = arith.constant 0 : index
    %666 = vector.load %arg13[%c312, %c0_524] : memref<324x32xf32, #tpu.memory_space<vmem>>, vector<1x32xf32>
    %c313 = arith.constant 313 : index
    %c0_525 = arith.constant 0 : index
    %667 = vector.load %arg13[%c313, %c0_525] : memref<324x32xf32, #tpu.memory_space<vmem>>, vector<1x32xf32>
    %668 = arith.maximumf %664, %665 : vector<1x32xf32>
    %669 = arith.maximumf %666, %667 : vector<1x32xf32>
    %670 = arith.maximumf %668, %669 : vector<1x32xf32>
    %c115_526 = arith.constant 115 : index
    %c0_527 = arith.constant 0 : index
    %671 = vector.load %arg14[%c115_526, %c0_527] : memref<145x32xf32, #tpu.memory_space<vmem>>, vector<1x32xf32>
    tpu.vector_store %arg14[%c115_526, %c0_527], %670 {strides = array<i32>} : memref<145x32xf32, #tpu.memory_space<vmem>>, vector<1x32xf32>,
    %c296 = arith.constant 296 : index
    %c0_528 = arith.constant 0 : index
    %672 = vector.load %arg13[%c296, %c0_528] : memref<324x32xf32, #tpu.memory_space<vmem>>, vector<1x32xf32>
    %c297 = arith.constant 297 : index
    %c0_529 = arith.constant 0 : index
    %673 = vector.load %arg13[%c297, %c0_529] : memref<324x32xf32, #tpu.memory_space<vmem>>, vector<1x32xf32>
    %c314 = arith.constant 314 : index
    %c0_530 = arith.constant 0 : index
    %674 = vector.load %arg13[%c314, %c0_530] : memref<324x32xf32, #tpu.memory_space<vmem>>, vector<1x32xf32>
    %c315 = arith.constant 315 : index
    %c0_531 = arith.constant 0 : index
    %675 = vector.load %arg13[%c315, %c0_531] : memref<324x32xf32, #tpu.memory_space<vmem>>, vector<1x32xf32>
    %676 = arith.maximumf %672, %673 : vector<1x32xf32>
    %677 = arith.maximumf %674, %675 : vector<1x32xf32>
    %678 = arith.maximumf %676, %677 : vector<1x32xf32>
    %c116_532 = arith.constant 116 : index
    %c0_533 = arith.constant 0 : index
    %679 = vector.load %arg14[%c116_532, %c0_533] : memref<145x32xf32, #tpu.memory_space<vmem>>, vector<1x32xf32>
    tpu.vector_store %arg14[%c116_532, %c0_533], %678 {strides = array<i32>} : memref<145x32xf32, #tpu.memory_space<vmem>>, vector<1x32xf32>,
    %c298 = arith.constant 298 : index
    %c0_534 = arith.constant 0 : index
    %680 = vector.load %arg13[%c298, %c0_534] : memref<324x32xf32, #tpu.memory_space<vmem>>, vector<1x32xf32>
    %c299 = arith.constant 299 : index
    %c0_535 = arith.constant 0 : index
    %681 = vector.load %arg13[%c299, %c0_535] : memref<324x32xf32, #tpu.memory_space<vmem>>, vector<1x32xf32>
    %c316 = arith.constant 316 : index
    %c0_536 = arith.constant 0 : index
    %682 = vector.load %arg13[%c316, %c0_536] : memref<324x32xf32, #tpu.memory_space<vmem>>, vector<1x32xf32>
    %c317 = arith.constant 317 : index
    %c0_537 = arith.constant 0 : index
    %683 = vector.load %arg13[%c317, %c0_537] : memref<324x32xf32, #tpu.memory_space<vmem>>, vector<1x32xf32>
    %684 = arith.maximumf %680, %681 : vector<1x32xf32>
    %685 = arith.maximumf %682, %683 : vector<1x32xf32>
    %686 = arith.maximumf %684, %685 : vector<1x32xf32>
    %c117_538 = arith.constant 117 : index
    %c0_539 = arith.constant 0 : index
    %687 = vector.load %arg14[%c117_538, %c0_539] : memref<145x32xf32, #tpu.memory_space<vmem>>, vector<1x32xf32>
    tpu.vector_store %arg14[%c117_538, %c0_539], %686 {strides = array<i32>} : memref<145x32xf32, #tpu.memory_space<vmem>>, vector<1x32xf32>,
    %c300 = arith.constant 300 : index
    %c0_540 = arith.constant 0 : index
    %688 = vector.load %arg13[%c300, %c0_540] : memref<324x32xf32, #tpu.memory_space<vmem>>, vector<1x32xf32>
    %c301 = arith.constant 301 : index
    %c0_541 = arith.constant 0 : index
    %689 = vector.load %arg13[%c301, %c0_541] : memref<324x32xf32, #tpu.memory_space<vmem>>, vector<1x32xf32>
    %c318 = arith.constant 318 : index
    %c0_542 = arith.constant 0 : index
    %690 = vector.load %arg13[%c318, %c0_542] : memref<324x32xf32, #tpu.memory_space<vmem>>, vector<1x32xf32>
    %c319 = arith.constant 319 : index
    %c0_543 = arith.constant 0 : index
    %691 = vector.load %arg13[%c319, %c0_543] : memref<324x32xf32, #tpu.memory_space<vmem>>, vector<1x32xf32>
    %692 = arith.maximumf %688, %689 : vector<1x32xf32>
    %693 = arith.maximumf %690, %691 : vector<1x32xf32>
    %694 = arith.maximumf %692, %693 : vector<1x32xf32>
    %c118_544 = arith.constant 118 : index
    %c0_545 = arith.constant 0 : index
    %695 = vector.load %arg14[%c118_544, %c0_545] : memref<145x32xf32, #tpu.memory_space<vmem>>, vector<1x32xf32>
    tpu.vector_store %arg14[%c118_544, %c0_545], %694 {strides = array<i32>} : memref<145x32xf32, #tpu.memory_space<vmem>>, vector<1x32xf32>,
    %c302 = arith.constant 302 : index
    %c0_546 = arith.constant 0 : index
    %696 = vector.load %arg13[%c302, %c0_546] : memref<324x32xf32, #tpu.memory_space<vmem>>, vector<1x32xf32>
    %c303 = arith.constant 303 : index
    %c0_547 = arith.constant 0 : index
    %697 = vector.load %arg13[%c303, %c0_547] : memref<324x32xf32, #tpu.memory_space<vmem>>, vector<1x32xf32>
    %c320 = arith.constant 320 : index
    %c0_548 = arith.constant 0 : index
    %698 = vector.load %arg13[%c320, %c0_548] : memref<324x32xf32, #tpu.memory_space<vmem>>, vector<1x32xf32>
    %c321 = arith.constant 321 : index
    %c0_549 = arith.constant 0 : index
    %699 = vector.load %arg13[%c321, %c0_549] : memref<324x32xf32, #tpu.memory_space<vmem>>, vector<1x32xf32>
    %700 = arith.maximumf %696, %697 : vector<1x32xf32>
    %701 = arith.maximumf %698, %699 : vector<1x32xf32>
    %702 = arith.maximumf %700, %701 : vector<1x32xf32>
    %c119_550 = arith.constant 119 : index
    %c0_551 = arith.constant 0 : index
    %703 = vector.load %arg14[%c119_550, %c0_551] : memref<145x32xf32, #tpu.memory_space<vmem>>, vector<1x32xf32>
    tpu.vector_store %arg14[%c119_550, %c0_551], %702 {strides = array<i32>} : memref<145x32xf32, #tpu.memory_space<vmem>>, vector<1x32xf32>,
    %c304 = arith.constant 304 : index
    %c0_552 = arith.constant 0 : index
    %704 = vector.load %arg13[%c304, %c0_552] : memref<324x32xf32, #tpu.memory_space<vmem>>, vector<1x32xf32>
    %c305 = arith.constant 305 : index
    %c0_553 = arith.constant 0 : index
    %705 = vector.load %arg13[%c305, %c0_553] : memref<324x32xf32, #tpu.memory_space<vmem>>, vector<1x32xf32>
    %c322 = arith.constant 322 : index
    %c0_554 = arith.constant 0 : index
    %706 = vector.load %arg13[%c322, %c0_554] : memref<324x32xf32, #tpu.memory_space<vmem>>, vector<1x32xf32>
    %c323 = arith.constant 323 : index
    %c0_555 = arith.constant 0 : index
    %707 = vector.load %arg13[%c323, %c0_555] : memref<324x32xf32, #tpu.memory_space<vmem>>, vector<1x32xf32>
    %708 = arith.maximumf %704, %705 : vector<1x32xf32>
    %709 = arith.maximumf %706, %707 : vector<1x32xf32>
    %710 = arith.maximumf %708, %709 : vector<1x32xf32>
    %c120_556 = arith.constant 120 : index
    %c0_557 = arith.constant 0 : index
    %711 = vector.load %arg14[%c120_556, %c0_557] : memref<145x32xf32, #tpu.memory_space<vmem>>, vector<1x32xf32>
    tpu.vector_store %arg14[%c120_556, %c0_557], %710 {strides = array<i32>} : memref<145x32xf32, #tpu.memory_space<vmem>>, vector<1x32xf32>,
    %c0_558 = arith.constant 0 : index
    %c0_559 = arith.constant 0 : index
    %712 = vector.load %arg14[%c0_558, %c0_559] : memref<145x32xf32, #tpu.memory_space<vmem>>, vector<121x32xf32>
    %713 = arith.truncf %712 : vector<121x32xf32> to vector<121x32xbf16>
    %c0_560 = arith.constant 0 : index
    %c0_561 = arith.constant 0 : index
    %c0_562 = arith.constant 0 : index
    %714 = vector.load %arg5[%c0_560, %c0_561, %c0_562] : memref<9x32x64xbf16, #tpu.memory_space<vmem>>, vector<1x32x64xbf16>
    %715 = vector.shape_cast %714 : vector<1x32x64xbf16> to vector<32x64xbf16>
    %cst_563 = arith.constant dense<0.000000e+00> : vector<121x64xf32>
    %716 = tpu.matmul %713, %715, %cst_563 {dimension_numbers = #tpu.dot_dimension_numbers<[1], [0], [0], [1], [0, 0, 1, 1], [], []>} : vector<121x32xbf16>, vector<32x64xbf16>, vector<121x64xf32> -> vector<121x64xf32>
    %c1_564 = arith.constant 1 : index
    %c0_565 = arith.constant 0 : index
    %717 = vector.load %arg14[%c1_564, %c0_565] : memref<145x32xf32, #tpu.memory_space<vmem>>, vector<121x32xf32>
    %718 = arith.truncf %717 : vector<121x32xf32> to vector<121x32xbf16>
    %c1_566 = arith.constant 1 : index
    %c0_567 = arith.constant 0 : index
    %c0_568 = arith.constant 0 : index
    %719 = vector.load %arg5[%c1_566, %c0_567, %c0_568] : memref<9x32x64xbf16, #tpu.memory_space<vmem>>, vector<1x32x64xbf16>
    %720 = vector.shape_cast %719 : vector<1x32x64xbf16> to vector<32x64xbf16>
    %cst_569 = arith.constant dense<0.000000e+00> : vector<121x64xf32>
    %721 = tpu.matmul %718, %720, %cst_569 {dimension_numbers = #tpu.dot_dimension_numbers<[1], [0], [0], [1], [0, 0, 1, 1], [], []>} : vector<121x32xbf16>, vector<32x64xbf16>, vector<121x64xf32> -> vector<121x64xf32>
    %c2_570 = arith.constant 2 : index
    %c0_571 = arith.constant 0 : index
    %722 = vector.load %arg14[%c2_570, %c0_571] : memref<145x32xf32, #tpu.memory_space<vmem>>, vector<121x32xf32>
    %723 = arith.truncf %722 : vector<121x32xf32> to vector<121x32xbf16>
    %c2_572 = arith.constant 2 : index
    %c0_573 = arith.constant 0 : index
    %c0_574 = arith.constant 0 : index
    %724 = vector.load %arg5[%c2_572, %c0_573, %c0_574] : memref<9x32x64xbf16, #tpu.memory_space<vmem>>, vector<1x32x64xbf16>
    %725 = vector.shape_cast %724 : vector<1x32x64xbf16> to vector<32x64xbf16>
    %cst_575 = arith.constant dense<0.000000e+00> : vector<121x64xf32>
    %726 = tpu.matmul %723, %725, %cst_575 {dimension_numbers = #tpu.dot_dimension_numbers<[1], [0], [0], [1], [0, 0, 1, 1], [], []>} : vector<121x32xbf16>, vector<32x64xbf16>, vector<121x64xf32> -> vector<121x64xf32>
    %c11_576 = arith.constant 11 : index
    %c0_577 = arith.constant 0 : index
    %727 = vector.load %arg14[%c11_576, %c0_577] : memref<145x32xf32, #tpu.memory_space<vmem>>, vector<121x32xf32>
    %728 = arith.truncf %727 : vector<121x32xf32> to vector<121x32xbf16>
    %c3_578 = arith.constant 3 : index
    %c0_579 = arith.constant 0 : index
    %c0_580 = arith.constant 0 : index
    %729 = vector.load %arg5[%c3_578, %c0_579, %c0_580] : memref<9x32x64xbf16, #tpu.memory_space<vmem>>, vector<1x32x64xbf16>
    %730 = vector.shape_cast %729 : vector<1x32x64xbf16> to vector<32x64xbf16>
    %cst_581 = arith.constant dense<0.000000e+00> : vector<121x64xf32>
    %731 = tpu.matmul %728, %730, %cst_581 {dimension_numbers = #tpu.dot_dimension_numbers<[1], [0], [0], [1], [0, 0, 1, 1], [], []>} : vector<121x32xbf16>, vector<32x64xbf16>, vector<121x64xf32> -> vector<121x64xf32>
    %732 = arith.addf %716, %731 : vector<121x64xf32>
    %c12_582 = arith.constant 12 : index
    %c0_583 = arith.constant 0 : index
    %733 = vector.load %arg14[%c12_582, %c0_583] : memref<145x32xf32, #tpu.memory_space<vmem>>, vector<121x32xf32>
    %734 = arith.truncf %733 : vector<121x32xf32> to vector<121x32xbf16>
    %c4_584 = arith.constant 4 : index
    %c0_585 = arith.constant 0 : index
    %c0_586 = arith.constant 0 : index
    %735 = vector.load %arg5[%c4_584, %c0_585, %c0_586] : memref<9x32x64xbf16, #tpu.memory_space<vmem>>, vector<1x32x64xbf16>
    %736 = vector.shape_cast %735 : vector<1x32x64xbf16> to vector<32x64xbf16>
    %cst_587 = arith.constant dense<0.000000e+00> : vector<121x64xf32>
    %737 = tpu.matmul %734, %736, %cst_587 {dimension_numbers = #tpu.dot_dimension_numbers<[1], [0], [0], [1], [0, 0, 1, 1], [], []>} : vector<121x32xbf16>, vector<32x64xbf16>, vector<121x64xf32> -> vector<121x64xf32>
    %738 = arith.addf %721, %737 : vector<121x64xf32>
    %c13_588 = arith.constant 13 : index
    %c0_589 = arith.constant 0 : index
    %739 = vector.load %arg14[%c13_588, %c0_589] : memref<145x32xf32, #tpu.memory_space<vmem>>, vector<121x32xf32>
    %740 = arith.truncf %739 : vector<121x32xf32> to vector<121x32xbf16>
    %c5_590 = arith.constant 5 : index
    %c0_591 = arith.constant 0 : index
    %c0_592 = arith.constant 0 : index
    %741 = vector.load %arg5[%c5_590, %c0_591, %c0_592] : memref<9x32x64xbf16, #tpu.memory_space<vmem>>, vector<1x32x64xbf16>
    %742 = vector.shape_cast %741 : vector<1x32x64xbf16> to vector<32x64xbf16>
    %cst_593 = arith.constant dense<0.000000e+00> : vector<121x64xf32>
    %743 = tpu.matmul %740, %742, %cst_593 {dimension_numbers = #tpu.dot_dimension_numbers<[1], [0], [0], [1], [0, 0, 1, 1], [], []>} : vector<121x32xbf16>, vector<32x64xbf16>, vector<121x64xf32> -> vector<121x64xf32>
    %744 = arith.addf %726, %743 : vector<121x64xf32>
    %c22_594 = arith.constant 22 : index
    %c0_595 = arith.constant 0 : index
    %745 = vector.load %arg14[%c22_594, %c0_595] : memref<145x32xf32, #tpu.memory_space<vmem>>, vector<121x32xf32>
    %746 = arith.truncf %745 : vector<121x32xf32> to vector<121x32xbf16>
    %c6_596 = arith.constant 6 : index
    %c0_597 = arith.constant 0 : index
    %c0_598 = arith.constant 0 : index
    %747 = vector.load %arg5[%c6_596, %c0_597, %c0_598] : memref<9x32x64xbf16, #tpu.memory_space<vmem>>, vector<1x32x64xbf16>
    %748 = vector.shape_cast %747 : vector<1x32x64xbf16> to vector<32x64xbf16>
    %cst_599 = arith.constant dense<0.000000e+00> : vector<121x64xf32>
    %749 = tpu.matmul %746, %748, %cst_599 {dimension_numbers = #tpu.dot_dimension_numbers<[1], [0], [0], [1], [0, 0, 1, 1], [], []>} : vector<121x32xbf16>, vector<32x64xbf16>, vector<121x64xf32> -> vector<121x64xf32>
    %750 = arith.addf %732, %749 : vector<121x64xf32>
    %c23_600 = arith.constant 23 : index
    %c0_601 = arith.constant 0 : index
    %751 = vector.load %arg14[%c23_600, %c0_601] : memref<145x32xf32, #tpu.memory_space<vmem>>, vector<121x32xf32>
    %752 = arith.truncf %751 : vector<121x32xf32> to vector<121x32xbf16>
    %c7_602 = arith.constant 7 : index
    %c0_603 = arith.constant 0 : index
    %c0_604 = arith.constant 0 : index
    %753 = vector.load %arg5[%c7_602, %c0_603, %c0_604] : memref<9x32x64xbf16, #tpu.memory_space<vmem>>, vector<1x32x64xbf16>
    %754 = vector.shape_cast %753 : vector<1x32x64xbf16> to vector<32x64xbf16>
    %cst_605 = arith.constant dense<0.000000e+00> : vector<121x64xf32>
    %755 = tpu.matmul %752, %754, %cst_605 {dimension_numbers = #tpu.dot_dimension_numbers<[1], [0], [0], [1], [0, 0, 1, 1], [], []>} : vector<121x32xbf16>, vector<32x64xbf16>, vector<121x64xf32> -> vector<121x64xf32>
    %756 = arith.addf %738, %755 : vector<121x64xf32>
    %c24_606 = arith.constant 24 : index
    %c0_607 = arith.constant 0 : index
    %757 = vector.load %arg14[%c24_606, %c0_607] : memref<145x32xf32, #tpu.memory_space<vmem>>, vector<121x32xf32>
    %758 = arith.truncf %757 : vector<121x32xf32> to vector<121x32xbf16>
    %c8_608 = arith.constant 8 : index
    %c0_609 = arith.constant 0 : index
    %c0_610 = arith.constant 0 : index
    %759 = vector.load %arg5[%c8_608, %c0_609, %c0_610] : memref<9x32x64xbf16, #tpu.memory_space<vmem>>, vector<1x32x64xbf16>
    %760 = vector.shape_cast %759 : vector<1x32x64xbf16> to vector<32x64xbf16>
    %cst_611 = arith.constant dense<0.000000e+00> : vector<121x64xf32>
    %761 = tpu.matmul %758, %760, %cst_611 {dimension_numbers = #tpu.dot_dimension_numbers<[1], [0], [0], [1], [0, 0, 1, 1], [], []>} : vector<121x32xbf16>, vector<32x64xbf16>, vector<121x64xf32> -> vector<121x64xf32>
    %762 = arith.addf %744, %761 : vector<121x64xf32>
    %763 = arith.addf %750, %756 : vector<121x64xf32>
    %764 = arith.addf %763, %762 : vector<121x64xf32>
    %c0_612 = arith.constant 0 : index
    %c0_613 = arith.constant 0 : index
    %765 = vector.load %arg6[%c0_612, %c0_613] : memref<1x64xf32, #tpu.memory_space<vmem>>, vector<1x64xf32>
    %766 = vector.broadcast %765 : vector<1x64xf32> to vector<121x64xf32>
    %767 = arith.addf %764, %766 : vector<121x64xf32>
    %cst_614 = arith.constant 0.000000e+00 : f32
    %768 = vector.broadcast %cst_614 : f32 to vector<121x64xf32>
    %769 = arith.maximumf %767, %768 : vector<121x64xf32>
    %c0_615 = arith.constant 0 : index
    %c0_616 = arith.constant 0 : index
    %770 = vector.load %arg7[%c0_615, %c0_616] : memref<121x1xf32, #tpu.memory_space<vmem>>, vector<121x1xf32>
    %771 = vector.broadcast %770 : vector<121x1xf32> to vector<121x64xf32>
    %772 = arith.mulf %769, %771 : vector<121x64xf32>
    %c0_617 = arith.constant 0 : index
    %c0_618 = arith.constant 0 : index
    %773 = vector.load %arg15[%c0_617, %c0_618] : memref<121x64xf32, #tpu.memory_space<vmem>>, vector<121x64xf32>
    tpu.vector_store %arg15[%c0_617, %c0_618], %772 {strides = array<i32>} : memref<121x64xf32, #tpu.memory_space<vmem>>, vector<121x64xf32>,
    %c0_619 = arith.constant 0 : index
    %c0_620 = arith.constant 0 : index
    %774 = vector.load %arg15[%c0_619, %c0_620] : memref<121x64xf32, #tpu.memory_space<vmem>>, vector<1x64xf32>
    %c1_621 = arith.constant 1 : index
    %c0_622 = arith.constant 0 : index
    %775 = vector.load %arg15[%c1_621, %c0_622] : memref<121x64xf32, #tpu.memory_space<vmem>>, vector<1x64xf32>
    %c11_623 = arith.constant 11 : index
    %c0_624 = arith.constant 0 : index
    %776 = vector.load %arg15[%c11_623, %c0_624] : memref<121x64xf32, #tpu.memory_space<vmem>>, vector<1x64xf32>
    %c12_625 = arith.constant 12 : index
    %c0_626 = arith.constant 0 : index
    %777 = vector.load %arg15[%c12_625, %c0_626] : memref<121x64xf32, #tpu.memory_space<vmem>>, vector<1x64xf32>
    %778 = arith.maximumf %774, %775 : vector<1x64xf32>
    %779 = arith.maximumf %776, %777 : vector<1x64xf32>
    %780 = arith.maximumf %778, %779 : vector<1x64xf32>
    %c0_627 = arith.constant 0 : index
    %c0_628 = arith.constant 0 : index
    %781 = vector.load %arg16[%c0_627, %c0_628] : memref<1x1600xf32, #tpu.memory_space<vmem>>, vector<1x64xf32>
    tpu.vector_store %arg16[%c0_627, %c0_628], %780 {strides = array<i32>} : memref<1x1600xf32, #tpu.memory_space<vmem>>, vector<1x64xf32>,
    %c2_629 = arith.constant 2 : index
    %c0_630 = arith.constant 0 : index
    %782 = vector.load %arg15[%c2_629, %c0_630] : memref<121x64xf32, #tpu.memory_space<vmem>>, vector<1x64xf32>
    %c3_631 = arith.constant 3 : index
    %c0_632 = arith.constant 0 : index
    %783 = vector.load %arg15[%c3_631, %c0_632] : memref<121x64xf32, #tpu.memory_space<vmem>>, vector<1x64xf32>
    %c13_633 = arith.constant 13 : index
    %c0_634 = arith.constant 0 : index
    %784 = vector.load %arg15[%c13_633, %c0_634] : memref<121x64xf32, #tpu.memory_space<vmem>>, vector<1x64xf32>
    %c14_635 = arith.constant 14 : index
    %c0_636 = arith.constant 0 : index
    %785 = vector.load %arg15[%c14_635, %c0_636] : memref<121x64xf32, #tpu.memory_space<vmem>>, vector<1x64xf32>
    %786 = arith.maximumf %782, %783 : vector<1x64xf32>
    %787 = arith.maximumf %784, %785 : vector<1x64xf32>
    %788 = arith.maximumf %786, %787 : vector<1x64xf32>
    %c0_637 = arith.constant 0 : index
    %c64_638 = arith.constant 64 : index
    %789 = vector.load %arg16[%c0_637, %c64_638] : memref<1x1600xf32, #tpu.memory_space<vmem>>, vector<1x64xf32>
    tpu.vector_store %arg16[%c0_637, %c64_638], %788 {strides = array<i32>} : memref<1x1600xf32, #tpu.memory_space<vmem>>, vector<1x64xf32>,
    %c4_639 = arith.constant 4 : index
    %c0_640 = arith.constant 0 : index
    %790 = vector.load %arg15[%c4_639, %c0_640] : memref<121x64xf32, #tpu.memory_space<vmem>>, vector<1x64xf32>
    %c5_641 = arith.constant 5 : index
    %c0_642 = arith.constant 0 : index
    %791 = vector.load %arg15[%c5_641, %c0_642] : memref<121x64xf32, #tpu.memory_space<vmem>>, vector<1x64xf32>
    %c15_643 = arith.constant 15 : index
    %c0_644 = arith.constant 0 : index
    %792 = vector.load %arg15[%c15_643, %c0_644] : memref<121x64xf32, #tpu.memory_space<vmem>>, vector<1x64xf32>
    %c16_645 = arith.constant 16 : index
    %c0_646 = arith.constant 0 : index
    %793 = vector.load %arg15[%c16_645, %c0_646] : memref<121x64xf32, #tpu.memory_space<vmem>>, vector<1x64xf32>
    %794 = arith.maximumf %790, %791 : vector<1x64xf32>
    %795 = arith.maximumf %792, %793 : vector<1x64xf32>
    %796 = arith.maximumf %794, %795 : vector<1x64xf32>
    %c0_647 = arith.constant 0 : index
    %c128_648 = arith.constant 128 : index
    %797 = vector.load %arg16[%c0_647, %c128_648] : memref<1x1600xf32, #tpu.memory_space<vmem>>, vector<1x64xf32>
    tpu.vector_store %arg16[%c0_647, %c128_648], %796 {strides = array<i32>} : memref<1x1600xf32, #tpu.memory_space<vmem>>, vector<1x64xf32>,
    %c6_649 = arith.constant 6 : index
    %c0_650 = arith.constant 0 : index
    %798 = vector.load %arg15[%c6_649, %c0_650] : memref<121x64xf32, #tpu.memory_space<vmem>>, vector<1x64xf32>
    %c7_651 = arith.constant 7 : index
    %c0_652 = arith.constant 0 : index
    %799 = vector.load %arg15[%c7_651, %c0_652] : memref<121x64xf32, #tpu.memory_space<vmem>>, vector<1x64xf32>
    %c17_653 = arith.constant 17 : index
    %c0_654 = arith.constant 0 : index
    %800 = vector.load %arg15[%c17_653, %c0_654] : memref<121x64xf32, #tpu.memory_space<vmem>>, vector<1x64xf32>
    %c18_655 = arith.constant 18 : index
    %c0_656 = arith.constant 0 : index
    %801 = vector.load %arg15[%c18_655, %c0_656] : memref<121x64xf32, #tpu.memory_space<vmem>>, vector<1x64xf32>
    %802 = arith.maximumf %798, %799 : vector<1x64xf32>
    %803 = arith.maximumf %800, %801 : vector<1x64xf32>
    %804 = arith.maximumf %802, %803 : vector<1x64xf32>
    %c0_657 = arith.constant 0 : index
    %c192_658 = arith.constant 192 : index
    %805 = vector.load %arg16[%c0_657, %c192_658] : memref<1x1600xf32, #tpu.memory_space<vmem>>, vector<1x64xf32>
    tpu.vector_store %arg16[%c0_657, %c192_658], %804 {strides = array<i32>} : memref<1x1600xf32, #tpu.memory_space<vmem>>, vector<1x64xf32>,
    %c8_659 = arith.constant 8 : index
    %c0_660 = arith.constant 0 : index
    %806 = vector.load %arg15[%c8_659, %c0_660] : memref<121x64xf32, #tpu.memory_space<vmem>>, vector<1x64xf32>
    %c9_661 = arith.constant 9 : index
    %c0_662 = arith.constant 0 : index
    %807 = vector.load %arg15[%c9_661, %c0_662] : memref<121x64xf32, #tpu.memory_space<vmem>>, vector<1x64xf32>
    %c19_663 = arith.constant 19 : index
    %c0_664 = arith.constant 0 : index
    %808 = vector.load %arg15[%c19_663, %c0_664] : memref<121x64xf32, #tpu.memory_space<vmem>>, vector<1x64xf32>
    %c20_665 = arith.constant 20 : index
    %c0_666 = arith.constant 0 : index
    %809 = vector.load %arg15[%c20_665, %c0_666] : memref<121x64xf32, #tpu.memory_space<vmem>>, vector<1x64xf32>
    %810 = arith.maximumf %806, %807 : vector<1x64xf32>
    %811 = arith.maximumf %808, %809 : vector<1x64xf32>
    %812 = arith.maximumf %810, %811 : vector<1x64xf32>
    %c0_667 = arith.constant 0 : index
    %c256_668 = arith.constant 256 : index
    %813 = vector.load %arg16[%c0_667, %c256_668] : memref<1x1600xf32, #tpu.memory_space<vmem>>, vector<1x64xf32>
    tpu.vector_store %arg16[%c0_667, %c256_668], %812 {strides = array<i32>} : memref<1x1600xf32, #tpu.memory_space<vmem>>, vector<1x64xf32>,
    %c22_669 = arith.constant 22 : index
    %c0_670 = arith.constant 0 : index
    %814 = vector.load %arg15[%c22_669, %c0_670] : memref<121x64xf32, #tpu.memory_space<vmem>>, vector<1x64xf32>
    %c23_671 = arith.constant 23 : index
    %c0_672 = arith.constant 0 : index
    %815 = vector.load %arg15[%c23_671, %c0_672] : memref<121x64xf32, #tpu.memory_space<vmem>>, vector<1x64xf32>
    %c33_673 = arith.constant 33 : index
    %c0_674 = arith.constant 0 : index
    %816 = vector.load %arg15[%c33_673, %c0_674] : memref<121x64xf32, #tpu.memory_space<vmem>>, vector<1x64xf32>
    %c34_675 = arith.constant 34 : index
    %c0_676 = arith.constant 0 : index
    %817 = vector.load %arg15[%c34_675, %c0_676] : memref<121x64xf32, #tpu.memory_space<vmem>>, vector<1x64xf32>
    %818 = arith.maximumf %814, %815 : vector<1x64xf32>
    %819 = arith.maximumf %816, %817 : vector<1x64xf32>
    %820 = arith.maximumf %818, %819 : vector<1x64xf32>
    %c0_677 = arith.constant 0 : index
    %c320_678 = arith.constant 320 : index
    %821 = vector.load %arg16[%c0_677, %c320_678] : memref<1x1600xf32, #tpu.memory_space<vmem>>, vector<1x64xf32>
    tpu.vector_store %arg16[%c0_677, %c320_678], %820 {strides = array<i32>} : memref<1x1600xf32, #tpu.memory_space<vmem>>, vector<1x64xf32>,
    %c24_679 = arith.constant 24 : index
    %c0_680 = arith.constant 0 : index
    %822 = vector.load %arg15[%c24_679, %c0_680] : memref<121x64xf32, #tpu.memory_space<vmem>>, vector<1x64xf32>
    %c25_681 = arith.constant 25 : index
    %c0_682 = arith.constant 0 : index
    %823 = vector.load %arg15[%c25_681, %c0_682] : memref<121x64xf32, #tpu.memory_space<vmem>>, vector<1x64xf32>
    %c35_683 = arith.constant 35 : index
    %c0_684 = arith.constant 0 : index
    %824 = vector.load %arg15[%c35_683, %c0_684] : memref<121x64xf32, #tpu.memory_space<vmem>>, vector<1x64xf32>
    %c36_685 = arith.constant 36 : index
    %c0_686 = arith.constant 0 : index
    %825 = vector.load %arg15[%c36_685, %c0_686] : memref<121x64xf32, #tpu.memory_space<vmem>>, vector<1x64xf32>
    %826 = arith.maximumf %822, %823 : vector<1x64xf32>
    %827 = arith.maximumf %824, %825 : vector<1x64xf32>
    %828 = arith.maximumf %826, %827 : vector<1x64xf32>
    %c0_687 = arith.constant 0 : index
    %c384 = arith.constant 384 : index
    %829 = vector.load %arg16[%c0_687, %c384] : memref<1x1600xf32, #tpu.memory_space<vmem>>, vector<1x64xf32>
    tpu.vector_store %arg16[%c0_687, %c384], %828 {strides = array<i32>} : memref<1x1600xf32, #tpu.memory_space<vmem>>, vector<1x64xf32>,
    %c26_688 = arith.constant 26 : index
    %c0_689 = arith.constant 0 : index
    %830 = vector.load %arg15[%c26_688, %c0_689] : memref<121x64xf32, #tpu.memory_space<vmem>>, vector<1x64xf32>
    %c27_690 = arith.constant 27 : index
    %c0_691 = arith.constant 0 : index
    %831 = vector.load %arg15[%c27_690, %c0_691] : memref<121x64xf32, #tpu.memory_space<vmem>>, vector<1x64xf32>
    %c37_692 = arith.constant 37 : index
    %c0_693 = arith.constant 0 : index
    %832 = vector.load %arg15[%c37_692, %c0_693] : memref<121x64xf32, #tpu.memory_space<vmem>>, vector<1x64xf32>
    %c38_694 = arith.constant 38 : index
    %c0_695 = arith.constant 0 : index
    %833 = vector.load %arg15[%c38_694, %c0_695] : memref<121x64xf32, #tpu.memory_space<vmem>>, vector<1x64xf32>
    %834 = arith.maximumf %830, %831 : vector<1x64xf32>
    %835 = arith.maximumf %832, %833 : vector<1x64xf32>
    %836 = arith.maximumf %834, %835 : vector<1x64xf32>
    %c0_696 = arith.constant 0 : index
    %c448 = arith.constant 448 : index
    %837 = vector.load %arg16[%c0_696, %c448] : memref<1x1600xf32, #tpu.memory_space<vmem>>, vector<1x64xf32>
    tpu.vector_store %arg16[%c0_696, %c448], %836 {strides = array<i32>} : memref<1x1600xf32, #tpu.memory_space<vmem>>, vector<1x64xf32>,
    %c28_697 = arith.constant 28 : index
    %c0_698 = arith.constant 0 : index
    %838 = vector.load %arg15[%c28_697, %c0_698] : memref<121x64xf32, #tpu.memory_space<vmem>>, vector<1x64xf32>
    %c29_699 = arith.constant 29 : index
    %c0_700 = arith.constant 0 : index
    %839 = vector.load %arg15[%c29_699, %c0_700] : memref<121x64xf32, #tpu.memory_space<vmem>>, vector<1x64xf32>
    %c39_701 = arith.constant 39 : index
    %c0_702 = arith.constant 0 : index
    %840 = vector.load %arg15[%c39_701, %c0_702] : memref<121x64xf32, #tpu.memory_space<vmem>>, vector<1x64xf32>
    %c40_703 = arith.constant 40 : index
    %c0_704 = arith.constant 0 : index
    %841 = vector.load %arg15[%c40_703, %c0_704] : memref<121x64xf32, #tpu.memory_space<vmem>>, vector<1x64xf32>
    %842 = arith.maximumf %838, %839 : vector<1x64xf32>
    %843 = arith.maximumf %840, %841 : vector<1x64xf32>
    %844 = arith.maximumf %842, %843 : vector<1x64xf32>
    %c0_705 = arith.constant 0 : index
    %c512 = arith.constant 512 : index
    %845 = vector.load %arg16[%c0_705, %c512] : memref<1x1600xf32, #tpu.memory_space<vmem>>, vector<1x64xf32>
    tpu.vector_store %arg16[%c0_705, %c512], %844 {strides = array<i32>} : memref<1x1600xf32, #tpu.memory_space<vmem>>, vector<1x64xf32>,
    %c30_706 = arith.constant 30 : index
    %c0_707 = arith.constant 0 : index
    %846 = vector.load %arg15[%c30_706, %c0_707] : memref<121x64xf32, #tpu.memory_space<vmem>>, vector<1x64xf32>
    %c31_708 = arith.constant 31 : index
    %c0_709 = arith.constant 0 : index
    %847 = vector.load %arg15[%c31_708, %c0_709] : memref<121x64xf32, #tpu.memory_space<vmem>>, vector<1x64xf32>
    %c41_710 = arith.constant 41 : index
    %c0_711 = arith.constant 0 : index
    %848 = vector.load %arg15[%c41_710, %c0_711] : memref<121x64xf32, #tpu.memory_space<vmem>>, vector<1x64xf32>
    %c42_712 = arith.constant 42 : index
    %c0_713 = arith.constant 0 : index
    %849 = vector.load %arg15[%c42_712, %c0_713] : memref<121x64xf32, #tpu.memory_space<vmem>>, vector<1x64xf32>
    %850 = arith.maximumf %846, %847 : vector<1x64xf32>
    %851 = arith.maximumf %848, %849 : vector<1x64xf32>
    %852 = arith.maximumf %850, %851 : vector<1x64xf32>
    %c0_714 = arith.constant 0 : index
    %c576 = arith.constant 576 : index
    %853 = vector.load %arg16[%c0_714, %c576] : memref<1x1600xf32, #tpu.memory_space<vmem>>, vector<1x64xf32>
    tpu.vector_store %arg16[%c0_714, %c576], %852 {strides = array<i32>} : memref<1x1600xf32, #tpu.memory_space<vmem>>, vector<1x64xf32>,
    %c44_715 = arith.constant 44 : index
    %c0_716 = arith.constant 0 : index
    %854 = vector.load %arg15[%c44_715, %c0_716] : memref<121x64xf32, #tpu.memory_space<vmem>>, vector<1x64xf32>
    %c45_717 = arith.constant 45 : index
    %c0_718 = arith.constant 0 : index
    %855 = vector.load %arg15[%c45_717, %c0_718] : memref<121x64xf32, #tpu.memory_space<vmem>>, vector<1x64xf32>
    %c55_719 = arith.constant 55 : index
    %c0_720 = arith.constant 0 : index
    %856 = vector.load %arg15[%c55_719, %c0_720] : memref<121x64xf32, #tpu.memory_space<vmem>>, vector<1x64xf32>
    %c56_721 = arith.constant 56 : index
    %c0_722 = arith.constant 0 : index
    %857 = vector.load %arg15[%c56_721, %c0_722] : memref<121x64xf32, #tpu.memory_space<vmem>>, vector<1x64xf32>
    %858 = arith.maximumf %854, %855 : vector<1x64xf32>
    %859 = arith.maximumf %856, %857 : vector<1x64xf32>
    %860 = arith.maximumf %858, %859 : vector<1x64xf32>
    %c0_723 = arith.constant 0 : index
    %c640 = arith.constant 640 : index
    %861 = vector.load %arg16[%c0_723, %c640] : memref<1x1600xf32, #tpu.memory_space<vmem>>, vector<1x64xf32>
    tpu.vector_store %arg16[%c0_723, %c640], %860 {strides = array<i32>} : memref<1x1600xf32, #tpu.memory_space<vmem>>, vector<1x64xf32>,
    %c46_724 = arith.constant 46 : index
    %c0_725 = arith.constant 0 : index
    %862 = vector.load %arg15[%c46_724, %c0_725] : memref<121x64xf32, #tpu.memory_space<vmem>>, vector<1x64xf32>
    %c47_726 = arith.constant 47 : index
    %c0_727 = arith.constant 0 : index
    %863 = vector.load %arg15[%c47_726, %c0_727] : memref<121x64xf32, #tpu.memory_space<vmem>>, vector<1x64xf32>
    %c57_728 = arith.constant 57 : index
    %c0_729 = arith.constant 0 : index
    %864 = vector.load %arg15[%c57_728, %c0_729] : memref<121x64xf32, #tpu.memory_space<vmem>>, vector<1x64xf32>
    %c58_730 = arith.constant 58 : index
    %c0_731 = arith.constant 0 : index
    %865 = vector.load %arg15[%c58_730, %c0_731] : memref<121x64xf32, #tpu.memory_space<vmem>>, vector<1x64xf32>
    %866 = arith.maximumf %862, %863 : vector<1x64xf32>
    %867 = arith.maximumf %864, %865 : vector<1x64xf32>
    %868 = arith.maximumf %866, %867 : vector<1x64xf32>
    %c0_732 = arith.constant 0 : index
    %c704 = arith.constant 704 : index
    %869 = vector.load %arg16[%c0_732, %c704] : memref<1x1600xf32, #tpu.memory_space<vmem>>, vector<1x64xf32>
    tpu.vector_store %arg16[%c0_732, %c704], %868 {strides = array<i32>} : memref<1x1600xf32, #tpu.memory_space<vmem>>, vector<1x64xf32>,
    %c48_733 = arith.constant 48 : index
    %c0_734 = arith.constant 0 : index
    %870 = vector.load %arg15[%c48_733, %c0_734] : memref<121x64xf32, #tpu.memory_space<vmem>>, vector<1x64xf32>
    %c49_735 = arith.constant 49 : index
    %c0_736 = arith.constant 0 : index
    %871 = vector.load %arg15[%c49_735, %c0_736] : memref<121x64xf32, #tpu.memory_space<vmem>>, vector<1x64xf32>
    %c59_737 = arith.constant 59 : index
    %c0_738 = arith.constant 0 : index
    %872 = vector.load %arg15[%c59_737, %c0_738] : memref<121x64xf32, #tpu.memory_space<vmem>>, vector<1x64xf32>
    %c60_739 = arith.constant 60 : index
    %c0_740 = arith.constant 0 : index
    %873 = vector.load %arg15[%c60_739, %c0_740] : memref<121x64xf32, #tpu.memory_space<vmem>>, vector<1x64xf32>
    %874 = arith.maximumf %870, %871 : vector<1x64xf32>
    %875 = arith.maximumf %872, %873 : vector<1x64xf32>
    %876 = arith.maximumf %874, %875 : vector<1x64xf32>
    %c0_741 = arith.constant 0 : index
    %c768 = arith.constant 768 : index
    %877 = vector.load %arg16[%c0_741, %c768] : memref<1x1600xf32, #tpu.memory_space<vmem>>, vector<1x64xf32>
    tpu.vector_store %arg16[%c0_741, %c768], %876 {strides = array<i32>} : memref<1x1600xf32, #tpu.memory_space<vmem>>, vector<1x64xf32>,
    %c50_742 = arith.constant 50 : index
    %c0_743 = arith.constant 0 : index
    %878 = vector.load %arg15[%c50_742, %c0_743] : memref<121x64xf32, #tpu.memory_space<vmem>>, vector<1x64xf32>
    %c51_744 = arith.constant 51 : index
    %c0_745 = arith.constant 0 : index
    %879 = vector.load %arg15[%c51_744, %c0_745] : memref<121x64xf32, #tpu.memory_space<vmem>>, vector<1x64xf32>
    %c61_746 = arith.constant 61 : index
    %c0_747 = arith.constant 0 : index
    %880 = vector.load %arg15[%c61_746, %c0_747] : memref<121x64xf32, #tpu.memory_space<vmem>>, vector<1x64xf32>
    %c62_748 = arith.constant 62 : index
    %c0_749 = arith.constant 0 : index
    %881 = vector.load %arg15[%c62_748, %c0_749] : memref<121x64xf32, #tpu.memory_space<vmem>>, vector<1x64xf32>
    %882 = arith.maximumf %878, %879 : vector<1x64xf32>
    %883 = arith.maximumf %880, %881 : vector<1x64xf32>
    %884 = arith.maximumf %882, %883 : vector<1x64xf32>
    %c0_750 = arith.constant 0 : index
    %c832 = arith.constant 832 : index
    %885 = vector.load %arg16[%c0_750, %c832] : memref<1x1600xf32, #tpu.memory_space<vmem>>, vector<1x64xf32>
    tpu.vector_store %arg16[%c0_750, %c832], %884 {strides = array<i32>} : memref<1x1600xf32, #tpu.memory_space<vmem>>, vector<1x64xf32>,
    %c52_751 = arith.constant 52 : index
    %c0_752 = arith.constant 0 : index
    %886 = vector.load %arg15[%c52_751, %c0_752] : memref<121x64xf32, #tpu.memory_space<vmem>>, vector<1x64xf32>
    %c53_753 = arith.constant 53 : index
    %c0_754 = arith.constant 0 : index
    %887 = vector.load %arg15[%c53_753, %c0_754] : memref<121x64xf32, #tpu.memory_space<vmem>>, vector<1x64xf32>
    %c63_755 = arith.constant 63 : index
    %c0_756 = arith.constant 0 : index
    %888 = vector.load %arg15[%c63_755, %c0_756] : memref<121x64xf32, #tpu.memory_space<vmem>>, vector<1x64xf32>
    %c64_757 = arith.constant 64 : index
    %c0_758 = arith.constant 0 : index
    %889 = vector.load %arg15[%c64_757, %c0_758] : memref<121x64xf32, #tpu.memory_space<vmem>>, vector<1x64xf32>
    %890 = arith.maximumf %886, %887 : vector<1x64xf32>
    %891 = arith.maximumf %888, %889 : vector<1x64xf32>
    %892 = arith.maximumf %890, %891 : vector<1x64xf32>
    %c0_759 = arith.constant 0 : index
    %c896 = arith.constant 896 : index
    %893 = vector.load %arg16[%c0_759, %c896] : memref<1x1600xf32, #tpu.memory_space<vmem>>, vector<1x64xf32>
    tpu.vector_store %arg16[%c0_759, %c896], %892 {strides = array<i32>} : memref<1x1600xf32, #tpu.memory_space<vmem>>, vector<1x64xf32>,
    %c66_760 = arith.constant 66 : index
    %c0_761 = arith.constant 0 : index
    %894 = vector.load %arg15[%c66_760, %c0_761] : memref<121x64xf32, #tpu.memory_space<vmem>>, vector<1x64xf32>
    %c67_762 = arith.constant 67 : index
    %c0_763 = arith.constant 0 : index
    %895 = vector.load %arg15[%c67_762, %c0_763] : memref<121x64xf32, #tpu.memory_space<vmem>>, vector<1x64xf32>
    %c77_764 = arith.constant 77 : index
    %c0_765 = arith.constant 0 : index
    %896 = vector.load %arg15[%c77_764, %c0_765] : memref<121x64xf32, #tpu.memory_space<vmem>>, vector<1x64xf32>
    %c78_766 = arith.constant 78 : index
    %c0_767 = arith.constant 0 : index
    %897 = vector.load %arg15[%c78_766, %c0_767] : memref<121x64xf32, #tpu.memory_space<vmem>>, vector<1x64xf32>
    %898 = arith.maximumf %894, %895 : vector<1x64xf32>
    %899 = arith.maximumf %896, %897 : vector<1x64xf32>
    %900 = arith.maximumf %898, %899 : vector<1x64xf32>
    %c0_768 = arith.constant 0 : index
    %c960 = arith.constant 960 : index
    %901 = vector.load %arg16[%c0_768, %c960] : memref<1x1600xf32, #tpu.memory_space<vmem>>, vector<1x64xf32>
    tpu.vector_store %arg16[%c0_768, %c960], %900 {strides = array<i32>} : memref<1x1600xf32, #tpu.memory_space<vmem>>, vector<1x64xf32>,
    %c68_769 = arith.constant 68 : index
    %c0_770 = arith.constant 0 : index
    %902 = vector.load %arg15[%c68_769, %c0_770] : memref<121x64xf32, #tpu.memory_space<vmem>>, vector<1x64xf32>
    %c69_771 = arith.constant 69 : index
    %c0_772 = arith.constant 0 : index
    %903 = vector.load %arg15[%c69_771, %c0_772] : memref<121x64xf32, #tpu.memory_space<vmem>>, vector<1x64xf32>
    %c79_773 = arith.constant 79 : index
    %c0_774 = arith.constant 0 : index
    %904 = vector.load %arg15[%c79_773, %c0_774] : memref<121x64xf32, #tpu.memory_space<vmem>>, vector<1x64xf32>
    %c80_775 = arith.constant 80 : index
    %c0_776 = arith.constant 0 : index
    %905 = vector.load %arg15[%c80_775, %c0_776] : memref<121x64xf32, #tpu.memory_space<vmem>>, vector<1x64xf32>
    %906 = arith.maximumf %902, %903 : vector<1x64xf32>
    %907 = arith.maximumf %904, %905 : vector<1x64xf32>
    %908 = arith.maximumf %906, %907 : vector<1x64xf32>
    %c0_777 = arith.constant 0 : index
    %c1024 = arith.constant 1024 : index
    %909 = vector.load %arg16[%c0_777, %c1024] : memref<1x1600xf32, #tpu.memory_space<vmem>>, vector<1x64xf32>
    tpu.vector_store %arg16[%c0_777, %c1024], %908 {strides = array<i32>} : memref<1x1600xf32, #tpu.memory_space<vmem>>, vector<1x64xf32>,
    %c70_778 = arith.constant 70 : index
    %c0_779 = arith.constant 0 : index
    %910 = vector.load %arg15[%c70_778, %c0_779] : memref<121x64xf32, #tpu.memory_space<vmem>>, vector<1x64xf32>
    %c71_780 = arith.constant 71 : index
    %c0_781 = arith.constant 0 : index
    %911 = vector.load %arg15[%c71_780, %c0_781] : memref<121x64xf32, #tpu.memory_space<vmem>>, vector<1x64xf32>
    %c81_782 = arith.constant 81 : index
    %c0_783 = arith.constant 0 : index
    %912 = vector.load %arg15[%c81_782, %c0_783] : memref<121x64xf32, #tpu.memory_space<vmem>>, vector<1x64xf32>
    %c82_784 = arith.constant 82 : index
    %c0_785 = arith.constant 0 : index
    %913 = vector.load %arg15[%c82_784, %c0_785] : memref<121x64xf32, #tpu.memory_space<vmem>>, vector<1x64xf32>
    %914 = arith.maximumf %910, %911 : vector<1x64xf32>
    %915 = arith.maximumf %912, %913 : vector<1x64xf32>
    %916 = arith.maximumf %914, %915 : vector<1x64xf32>
    %c0_786 = arith.constant 0 : index
    %c1088 = arith.constant 1088 : index
    %917 = vector.load %arg16[%c0_786, %c1088] : memref<1x1600xf32, #tpu.memory_space<vmem>>, vector<1x64xf32>
    tpu.vector_store %arg16[%c0_786, %c1088], %916 {strides = array<i32>} : memref<1x1600xf32, #tpu.memory_space<vmem>>, vector<1x64xf32>,
    %c72_787 = arith.constant 72 : index
    %c0_788 = arith.constant 0 : index
    %918 = vector.load %arg15[%c72_787, %c0_788] : memref<121x64xf32, #tpu.memory_space<vmem>>, vector<1x64xf32>
    %c73_789 = arith.constant 73 : index
    %c0_790 = arith.constant 0 : index
    %919 = vector.load %arg15[%c73_789, %c0_790] : memref<121x64xf32, #tpu.memory_space<vmem>>, vector<1x64xf32>
    %c83_791 = arith.constant 83 : index
    %c0_792 = arith.constant 0 : index
    %920 = vector.load %arg15[%c83_791, %c0_792] : memref<121x64xf32, #tpu.memory_space<vmem>>, vector<1x64xf32>
    %c84_793 = arith.constant 84 : index
    %c0_794 = arith.constant 0 : index
    %921 = vector.load %arg15[%c84_793, %c0_794] : memref<121x64xf32, #tpu.memory_space<vmem>>, vector<1x64xf32>
    %922 = arith.maximumf %918, %919 : vector<1x64xf32>
    %923 = arith.maximumf %920, %921 : vector<1x64xf32>
    %924 = arith.maximumf %922, %923 : vector<1x64xf32>
    %c0_795 = arith.constant 0 : index
    %c1152 = arith.constant 1152 : index
    %925 = vector.load %arg16[%c0_795, %c1152] : memref<1x1600xf32, #tpu.memory_space<vmem>>, vector<1x64xf32>
    tpu.vector_store %arg16[%c0_795, %c1152], %924 {strides = array<i32>} : memref<1x1600xf32, #tpu.memory_space<vmem>>, vector<1x64xf32>,
    %c74_796 = arith.constant 74 : index
    %c0_797 = arith.constant 0 : index
    %926 = vector.load %arg15[%c74_796, %c0_797] : memref<121x64xf32, #tpu.memory_space<vmem>>, vector<1x64xf32>
    %c75_798 = arith.constant 75 : index
    %c0_799 = arith.constant 0 : index
    %927 = vector.load %arg15[%c75_798, %c0_799] : memref<121x64xf32, #tpu.memory_space<vmem>>, vector<1x64xf32>
    %c85_800 = arith.constant 85 : index
    %c0_801 = arith.constant 0 : index
    %928 = vector.load %arg15[%c85_800, %c0_801] : memref<121x64xf32, #tpu.memory_space<vmem>>, vector<1x64xf32>
    %c86_802 = arith.constant 86 : index
    %c0_803 = arith.constant 0 : index
    %929 = vector.load %arg15[%c86_802, %c0_803] : memref<121x64xf32, #tpu.memory_space<vmem>>, vector<1x64xf32>
    %930 = arith.maximumf %926, %927 : vector<1x64xf32>
    %931 = arith.maximumf %928, %929 : vector<1x64xf32>
    %932 = arith.maximumf %930, %931 : vector<1x64xf32>
    %c0_804 = arith.constant 0 : index
    %c1216 = arith.constant 1216 : index
    %933 = vector.load %arg16[%c0_804, %c1216] : memref<1x1600xf32, #tpu.memory_space<vmem>>, vector<1x64xf32>
    tpu.vector_store %arg16[%c0_804, %c1216], %932 {strides = array<i32>} : memref<1x1600xf32, #tpu.memory_space<vmem>>, vector<1x64xf32>,
    %c88_805 = arith.constant 88 : index
    %c0_806 = arith.constant 0 : index
    %934 = vector.load %arg15[%c88_805, %c0_806] : memref<121x64xf32, #tpu.memory_space<vmem>>, vector<1x64xf32>
    %c89_807 = arith.constant 89 : index
    %c0_808 = arith.constant 0 : index
    %935 = vector.load %arg15[%c89_807, %c0_808] : memref<121x64xf32, #tpu.memory_space<vmem>>, vector<1x64xf32>
    %c99_809 = arith.constant 99 : index
    %c0_810 = arith.constant 0 : index
    %936 = vector.load %arg15[%c99_809, %c0_810] : memref<121x64xf32, #tpu.memory_space<vmem>>, vector<1x64xf32>
    %c100_811 = arith.constant 100 : index
    %c0_812 = arith.constant 0 : index
    %937 = vector.load %arg15[%c100_811, %c0_812] : memref<121x64xf32, #tpu.memory_space<vmem>>, vector<1x64xf32>
    %938 = arith.maximumf %934, %935 : vector<1x64xf32>
    %939 = arith.maximumf %936, %937 : vector<1x64xf32>
    %940 = arith.maximumf %938, %939 : vector<1x64xf32>
    %c0_813 = arith.constant 0 : index
    %c1280 = arith.constant 1280 : index
    %941 = vector.load %arg16[%c0_813, %c1280] : memref<1x1600xf32, #tpu.memory_space<vmem>>, vector<1x64xf32>
    tpu.vector_store %arg16[%c0_813, %c1280], %940 {strides = array<i32>} : memref<1x1600xf32, #tpu.memory_space<vmem>>, vector<1x64xf32>,
    %c90_814 = arith.constant 90 : index
    %c0_815 = arith.constant 0 : index
    %942 = vector.load %arg15[%c90_814, %c0_815] : memref<121x64xf32, #tpu.memory_space<vmem>>, vector<1x64xf32>
    %c91_816 = arith.constant 91 : index
    %c0_817 = arith.constant 0 : index
    %943 = vector.load %arg15[%c91_816, %c0_817] : memref<121x64xf32, #tpu.memory_space<vmem>>, vector<1x64xf32>
    %c101_818 = arith.constant 101 : index
    %c0_819 = arith.constant 0 : index
    %944 = vector.load %arg15[%c101_818, %c0_819] : memref<121x64xf32, #tpu.memory_space<vmem>>, vector<1x64xf32>
    %c102_820 = arith.constant 102 : index
    %c0_821 = arith.constant 0 : index
    %945 = vector.load %arg15[%c102_820, %c0_821] : memref<121x64xf32, #tpu.memory_space<vmem>>, vector<1x64xf32>
    %946 = arith.maximumf %942, %943 : vector<1x64xf32>
    %947 = arith.maximumf %944, %945 : vector<1x64xf32>
    %948 = arith.maximumf %946, %947 : vector<1x64xf32>
    %c0_822 = arith.constant 0 : index
    %c1344 = arith.constant 1344 : index
    %949 = vector.load %arg16[%c0_822, %c1344] : memref<1x1600xf32, #tpu.memory_space<vmem>>, vector<1x64xf32>
    tpu.vector_store %arg16[%c0_822, %c1344], %948 {strides = array<i32>} : memref<1x1600xf32, #tpu.memory_space<vmem>>, vector<1x64xf32>,
    %c92_823 = arith.constant 92 : index
    %c0_824 = arith.constant 0 : index
    %950 = vector.load %arg15[%c92_823, %c0_824] : memref<121x64xf32, #tpu.memory_space<vmem>>, vector<1x64xf32>
    %c93_825 = arith.constant 93 : index
    %c0_826 = arith.constant 0 : index
    %951 = vector.load %arg15[%c93_825, %c0_826] : memref<121x64xf32, #tpu.memory_space<vmem>>, vector<1x64xf32>
    %c103_827 = arith.constant 103 : index
    %c0_828 = arith.constant 0 : index
    %952 = vector.load %arg15[%c103_827, %c0_828] : memref<121x64xf32, #tpu.memory_space<vmem>>, vector<1x64xf32>
    %c104_829 = arith.constant 104 : index
    %c0_830 = arith.constant 0 : index
    %953 = vector.load %arg15[%c104_829, %c0_830] : memref<121x64xf32, #tpu.memory_space<vmem>>, vector<1x64xf32>
    %954 = arith.maximumf %950, %951 : vector<1x64xf32>
    %955 = arith.maximumf %952, %953 : vector<1x64xf32>
    %956 = arith.maximumf %954, %955 : vector<1x64xf32>
    %c0_831 = arith.constant 0 : index
    %c1408 = arith.constant 1408 : index
    %957 = vector.load %arg16[%c0_831, %c1408] : memref<1x1600xf32, #tpu.memory_space<vmem>>, vector<1x64xf32>
    tpu.vector_store %arg16[%c0_831, %c1408], %956 {strides = array<i32>} : memref<1x1600xf32, #tpu.memory_space<vmem>>, vector<1x64xf32>,
    %c94_832 = arith.constant 94 : index
    %c0_833 = arith.constant 0 : index
    %958 = vector.load %arg15[%c94_832, %c0_833] : memref<121x64xf32, #tpu.memory_space<vmem>>, vector<1x64xf32>
    %c95_834 = arith.constant 95 : index
    %c0_835 = arith.constant 0 : index
    %959 = vector.load %arg15[%c95_834, %c0_835] : memref<121x64xf32, #tpu.memory_space<vmem>>, vector<1x64xf32>
    %c105_836 = arith.constant 105 : index
    %c0_837 = arith.constant 0 : index
    %960 = vector.load %arg15[%c105_836, %c0_837] : memref<121x64xf32, #tpu.memory_space<vmem>>, vector<1x64xf32>
    %c106_838 = arith.constant 106 : index
    %c0_839 = arith.constant 0 : index
    %961 = vector.load %arg15[%c106_838, %c0_839] : memref<121x64xf32, #tpu.memory_space<vmem>>, vector<1x64xf32>
    %962 = arith.maximumf %958, %959 : vector<1x64xf32>
    %963 = arith.maximumf %960, %961 : vector<1x64xf32>
    %964 = arith.maximumf %962, %963 : vector<1x64xf32>
    %c0_840 = arith.constant 0 : index
    %c1472 = arith.constant 1472 : index
    %965 = vector.load %arg16[%c0_840, %c1472] : memref<1x1600xf32, #tpu.memory_space<vmem>>, vector<1x64xf32>
    tpu.vector_store %arg16[%c0_840, %c1472], %964 {strides = array<i32>} : memref<1x1600xf32, #tpu.memory_space<vmem>>, vector<1x64xf32>,
    %c96_841 = arith.constant 96 : index
    %c0_842 = arith.constant 0 : index
    %966 = vector.load %arg15[%c96_841, %c0_842] : memref<121x64xf32, #tpu.memory_space<vmem>>, vector<1x64xf32>
    %c97_843 = arith.constant 97 : index
    %c0_844 = arith.constant 0 : index
    %967 = vector.load %arg15[%c97_843, %c0_844] : memref<121x64xf32, #tpu.memory_space<vmem>>, vector<1x64xf32>
    %c107_845 = arith.constant 107 : index
    %c0_846 = arith.constant 0 : index
    %968 = vector.load %arg15[%c107_845, %c0_846] : memref<121x64xf32, #tpu.memory_space<vmem>>, vector<1x64xf32>
    %c108_847 = arith.constant 108 : index
    %c0_848 = arith.constant 0 : index
    %969 = vector.load %arg15[%c108_847, %c0_848] : memref<121x64xf32, #tpu.memory_space<vmem>>, vector<1x64xf32>
    %970 = arith.maximumf %966, %967 : vector<1x64xf32>
    %971 = arith.maximumf %968, %969 : vector<1x64xf32>
    %972 = arith.maximumf %970, %971 : vector<1x64xf32>
    %c0_849 = arith.constant 0 : index
    %c1536 = arith.constant 1536 : index
    %973 = vector.load %arg16[%c0_849, %c1536] : memref<1x1600xf32, #tpu.memory_space<vmem>>, vector<1x64xf32>
    tpu.vector_store %arg16[%c0_849, %c1536], %972 {strides = array<i32>} : memref<1x1600xf32, #tpu.memory_space<vmem>>, vector<1x64xf32>,
    %c0_850 = arith.constant 0 : index
    %c0_851 = arith.constant 0 : index
    %974 = vector.load %arg16[%c0_850, %c0_851] : memref<1x1600xf32, #tpu.memory_space<vmem>>, vector<1x1600xf32>
    %975 = arith.truncf %974 : vector<1x1600xf32> to vector<1x1600xbf16>
    %c0_852 = arith.constant 0 : index
    %c0_853 = arith.constant 0 : index
    %976 = vector.load %arg8[%c0_852, %c0_853] : memref<1600x128xbf16, #tpu.memory_space<vmem>>, vector<1600x128xbf16>
    %cst_854 = arith.constant dense<0.000000e+00> : vector<1x128xf32>
    %977 = tpu.matmul %975, %976, %cst_854 {dimension_numbers = #tpu.dot_dimension_numbers<[1], [0], [0], [1], [0, 0, 1, 1], [], []>} : vector<1x1600xbf16>, vector<1600x128xbf16>, vector<1x128xf32> -> vector<1x128xf32>
    %c0_855 = arith.constant 0 : index
    %c0_856 = arith.constant 0 : index
    %978 = vector.load %arg9[%c0_855, %c0_856] : memref<1x128xf32, #tpu.memory_space<vmem>>, vector<1x128xf32>
    %979 = arith.addf %977, %978 : vector<1x128xf32>
    %980 = arith.truncf %979 : vector<1x128xf32> to vector<1x128xbf16>
    %c0_857 = arith.constant 0 : index
    %c0_858 = arith.constant 0 : index
    %981 = vector.load %arg10[%c0_857, %c0_858] : memref<128x128xbf16, #tpu.memory_space<vmem>>, vector<128x128xbf16>
    %cst_859 = arith.constant dense<0.000000e+00> : vector<1x128xf32>
    %982 = tpu.matmul %980, %981, %cst_859 {dimension_numbers = #tpu.dot_dimension_numbers<[1], [0], [0], [1], [0, 0, 1, 1], [], []>} : vector<1x128xbf16>, vector<128x128xbf16>, vector<1x128xf32> -> vector<1x128xf32>
    %c0_860 = arith.constant 0 : index
    %c0_861 = arith.constant 0 : index
    %983 = vector.load %arg11[%c0_860, %c0_861] : memref<1x128xf32, #tpu.memory_space<vmem>>, vector<1x128xf32>
    %984 = arith.addf %982, %983 : vector<1x128xf32>
    %c0_862 = arith.constant 0 : index
    %c0_863 = arith.constant 0 : index
    %c0_864 = arith.constant 0 : index
    %985 = vector.load %arg12[%c0_862, %c0_863, %c0_864] : memref<1x1x128xf32, #tpu.memory_space<vmem>>, vector<1x1x128xf32>
    %986 = vector.shape_cast %985 : vector<1x1x128xf32> to vector<1x128xf32>
    %987 = vector.shape_cast %984 : vector<1x128xf32> to vector<1x1x128xf32>
    tpu.vector_store %arg12[%c0_862, %c0_863, %c0_864], %987 {strides = array<i32>} : memref<1x1x128xf32, #tpu.memory_space<vmem>>, vector<1x1x128xf32>,
    return
  }
  func.func @transform_0(%arg0: i32) -> (i32, i32, i32) {
    %c0_i32 = arith.constant 0 : i32
    %c0_i32_0 = arith.constant 0 : i32
    %c0_i32_1 = arith.constant 0 : i32
    return %arg0, %c0_i32, %c0_i32_0 : i32, i32, i32
  }
  func.func @transform_1(%arg0: i32) -> (i32, i32, i32) {
    %c0_i32 = arith.constant 0 : i32
    %c0_i32_0 = arith.constant 0 : i32
    %c0_i32_1 = arith.constant 0 : i32
    %c0_i32_2 = arith.constant 0 : i32
    return %c0_i32, %c0_i32_0, %c0_i32_1 : i32, i32, i32
  }
  func.func @transform_2(%arg0: i32) -> (i32, i32) {
    %c0_i32 = arith.constant 0 : i32
    %c0_i32_0 = arith.constant 0 : i32
    %c0_i32_1 = arith.constant 0 : i32
    return %c0_i32, %c0_i32_0 : i32, i32
  }
  func.func @transform_3(%arg0: i32) -> (i32, i32) {
    %c0_i32 = arith.constant 0 : i32
    %c0_i32_0 = arith.constant 0 : i32
    %c0_i32_1 = arith.constant 0 : i32
    return %c0_i32, %c0_i32_0 : i32, i32
  }
  func.func @transform_4(%arg0: i32) -> (i32, i32, i32) {
    %c0_i32 = arith.constant 0 : i32
    %c0_i32_0 = arith.constant 0 : i32
    %c0_i32_1 = arith.constant 0 : i32
    %c0_i32_2 = arith.constant 0 : i32
    return %c0_i32, %c0_i32_0, %c0_i32_1 : i32, i32, i32
  }
  func.func @transform_5(%arg0: i32) -> (i32, i32) {
    %c0_i32 = arith.constant 0 : i32
    %c0_i32_0 = arith.constant 0 : i32
    %c0_i32_1 = arith.constant 0 : i32
    return %c0_i32, %c0_i32_0 : i32, i32
  }
  func.func @transform_6(%arg0: i32) -> (i32, i32) {
    %c0_i32 = arith.constant 0 : i32
    %c0_i32_0 = arith.constant 0 : i32
    %c0_i32_1 = arith.constant 0 : i32
    return %c0_i32, %c0_i32_0 : i32, i32
  }
  func.func @transform_7(%arg0: i32) -> (i32, i32) {
    %c0_i32 = arith.constant 0 : i32
    %c0_i32_0 = arith.constant 0 : i32
    %c0_i32_1 = arith.constant 0 : i32
    return %c0_i32, %c0_i32_0 : i32, i32
  }
  func.func @transform_8(%arg0: i32) -> (i32, i32) {
    %c0_i32 = arith.constant 0 : i32
    %c0_i32_0 = arith.constant 0 : i32
    %c0_i32_1 = arith.constant 0 : i32
    return %c0_i32, %c0_i32_0 : i32, i32
  }
  func.func @transform_9(%arg0: i32) -> (i32, i32) {
    %c0_i32 = arith.constant 0 : i32
    %c0_i32_0 = arith.constant 0 : i32
    %c0_i32_1 = arith.constant 0 : i32
    return %c0_i32, %c0_i32_0 : i32, i32
  }
  func.func @transform_10(%arg0: i32) -> (i32, i32) {
    %c0_i32 = arith.constant 0 : i32
    %c0_i32_0 = arith.constant 0 : i32
    %c0_i32_1 = arith.constant 0 : i32
    return %c0_i32, %c0_i32_0 : i32, i32
  }
  func.func @transform_11(%arg0: i32) -> (i32, i32, i32) {
    %c0_i32 = arith.constant 0 : i32
    %c0_i32_0 = arith.constant 0 : i32
    %c0_i32_1 = arith.constant 0 : i32
    return %arg0, %c0_i32, %c0_i32_0 : i32, i32, i32
  }
}

</mosaic_0001>

<bundles_post_ra>
// kernel: speech_to_text_forward.1
= control target key start
LH: loop header
LB: loop body
LE: loop exit
PB: predicated region body
PF: predicated region fallthrough
CT: control target
= control target key end

     0   :  { %16 = vsyncpa [#allocation7], 0  ;;  %s14175_s0 = inlined_call_operand.vmem [shape: bf16[2,362,2], index: 0, kind: input, shape index: {}]   ;;  %s14176_s1 = inlined_call_operand.vmem [shape: bf16[9,2,32], index: 1, kind: input, shape index: {}]   ;;  %s14177_s2 = inlined_call_operand.vmem [shape: f32[1,32], index: 2, kind: input, shape index: {}]   ;;  %s14178_s3 = inlined_call_operand.vmem [shape: f32[324,1], index: 3, kind: input, shape index: {}]   ;;  %s14179_s4 = inlined_call_operand.vmem [shape: bf16[9,32,64], index: 4, kind: input, shape index: {}]   ;;  %s14180_s5 = inlined_call_operand.vmem [shape: f32[1,64], index: 5, kind: input, shape index: {}]   ;;  %s14181_s6 = inlined_call_operand.hbm [shape: f32[121,1], index: 6, kind: input, shape index: {}]   ;;  %s14182_s7 = inlined_call_operand.vmem [shape: bf16[1600,128], index: 7, kind: input, shape index: {}]   ;;  %s14183_s8 = inlined_call_operand.vmem [shape: f32[1,128], index: 8, kind: input, shape index: {}]   ;;  %s14184_s9 = inlined_call_operand.hbm [shape: bf16[128,128], index: 9, kind: input, shape index: {}]   ;;  %s14185_s10 = inlined_call_operand.vmem [shape: f32[1,128], index: 10, kind: input, shape index: {}]   ;;  %s14186_s11 = inlined_call_operand.hbm [shape: f32[2,1,128], index: 11, kind: output, shape index: {}]  }
   0x1   :  { %17 = vsyncpa [#allocation10], 0 }
   0x2   :  { %18 = vsyncpa [#allocation8], 0 }
   0x3   :  { %20 = vsyncpa [#allocation8 + $0x1], 0  ;;  %s11213_s17 = smov 0   ;;  %s11215_s18 = smov 0  }
   0x4   :  { %s11217_s19 = smov 0   ;;  %s11219_s20 = smov 0  }
   0x5 LB: > { %14217 = sst [smem:[#allocation15_spill]] %s11127_s17  ;;  %s11234_s21 = sadd.s32 4294967295, %s11139_s20   ;;  %s11139_s20 = sphi %s11219_s20, %s14453_s20   ;;  %s11135_s19 = sphi %s11217_s19, %s14455_s19   ;;  %s11131_s18 = sphi %s11215_s18, %s14457_s18   ;;  %s11127_s17 = sphi %s11213_s17, %s14456_s17  }
   0x6   : > { %14218 = sst [smem:[#allocation16_spill]] %s11135_s19  ;;  %s8640_s22 = sadd.s32 4294967294, %s11139_s20  }
   0x7   : > { %s11238_s23 = sadd.s32 1, %s11139_s20   ;;  %s269_s24 = sadd.s32 1, %s11135_s19 }
   0x8   : > { %14219 = sst [smem:[#allocation17_spill]] %s11238_s23  ;;  %s266_s25 = ssub.s32 %s11139_s20, %s11238_s23 }
   0x9   : > { %p279_p0 = scmp.ne.s32.totalorder %s11135_s19, %s11131_s18  ;;  %p267_p1 = scmp.eq.s32.totalorder %s266_s25, 0 }
   0xa   : > { %p280_p2 = scmp.eq.s32.totalorder %s11234_s21, 1  ;;  %p285_p3 = scmp.ne.s32.totalorder %s11131_s18, %s11127_s17 }
   0xb   : > { %p286_p4 = scmp.eq.s32.totalorder %s8640_s22, 1  ;;  %p8641_p7 = scmp.ge.s32.totalorder %s11139_s20, 1 }
   0xc   : > { %s11249_s26 = scalar_select %p267_p1, %s11135_s19, %s269_s24  }
   0xd   : > { %p11251_p5 = por %p280_p2, %p279_p0  ;;  %p11255_p6 = por %p286_p4, %p285_p3 }
   0xe   : > { %14220 = sst [smem:[#allocation18_spill]] %s11249_s26  ;;  %p293_p8 = scmp.lt.s32.totalorder %s11139_s20, 3 }
   0xf   : > { %s14221_s27 = scalar_select %p11251_p5, 1, 0 }
  0x10   : > { %s14222_s28 = scalar_select %p11255_p6, 1, 0 }
  0x11   : > { %p14188_p9 = scmp.eq.s32.totalorder %s11234_s21, 0  ;;  %p11262_p10 = pnand %p8641_p7, %p293_p8 }
  0x12   : > { %14223 = sst [smem:[#allocation19_spill]] %s14222_s28  ;;  %s11141_s30 = smov [#allocation6]  }
  0x13   : > { %s14224_s29 = scalar_select %p11262_p10, 1, 0 }
  0x14   : > { %s320_s12 = sshll.u32 %s11141_s30, 4  ;;  %p10714_p11 = pneg %p11262_p10  ;;  %s321_s12 = int_to_ptr.vmem [resolvable:$true] %s320_s12 }
  0x15   : > { %s11142_s14 = smov [#allocation9]   ;;  %s11013_s24 = scalar_lea.hbm %s14181_s6, 2048 }
  0x16   : > { %p11270_p12 = pnand %p14188_p9, %p10714_p11  ;;  %s339_s15 = sshll.u32 %s11142_s14, 4  ;;  %s11274_s15 = int_to_ptr.vmem [resolvable:$true] %s339_s15 }
  0x17   : > { %p11014_p13 = scmp.ne.s32.totalorder %s14181_s6, %s11013_s24  ;;  %p11020_p3 = scmp.lt.u32.totalorder %s11013_s24, %s14181_s6 }
  0x18   : > { %p11015_p0 = pneg %p11270_p12 }
  0x1a   : > { %p11016_p1 = pnand %p11015_p0, %p11014_p13 }
  0x1c   : > { %p11017_p2 = pneg %p11016_p1 }
  0x1e   : > { %p11022_p4 = pnand %p11020_p3, %p11017_p2 }
  0x20   : > { %11025 = shalt.err (!%p11022_p4)
}
  0x21   : > { %s11026_s14 = scalar_lea.vmem %s321_s12, 2048  ;;  %p11034_p9 = scmp.lt.s32.totalorder %s321_s12, %s321_s12 }
  0x22   : > { %p11027_p7 = scmp.ne.s32.totalorder %s321_s12, %s11026_s14  ;;  %p11035_p6 = scmp.lt.s32.totalorder %s11026_s14, %s11026_s14 }
  0x24   : > { %p11029_p8 = pnand %p11027_p7, %p11015_p0  ;;  %p11036_p5 = por %p11035_p6, %p11034_p9 }
  0x26   : > { %p11030_p11 = pneg %p11029_p8 }
  0x28   : > { %p11037_p10 = pnand %p11036_p5, %p11030_p11 }
  0x2a   : > { %11040 = shalt.err (!%p11037_p10)
}
  0x2b   : > { %s11143_s16 = smov 128   ;;  %s11144_s22 = smov 8  }
  0x2c   : > { %10717 = dma.hbm_to_vmem [thread:$0]  (!%p11270_p12), %s14181_s6, 2048, %s321_s12, [#allocation7], %s11143_s16, %s11143_s16, %s11144_s22  }
  0x2d   : > { %s11041_s30 = scalar_lea.hbm %s14184_s9, 1024 }
  0x2e   : > { %p11042_p13 = scmp.ne.s32.totalorder %s14184_s9, %s11041_s30  ;;  %p11048_p9 = scmp.lt.u32.totalorder %s11041_s30, %s14184_s9 }
  0x30   : > { %p11044_p5 = pnand %p11042_p13, %p11015_p0 }
  0x32   : > { %p11045_p6 = pneg %p11044_p5 }
  0x34   : > { %p11050_p10 = pnand %p11048_p9, %p11045_p6 }
  0x36   : > { %11053 = shalt.err (!%p11050_p10)
}
  0x37   : > { %s11054_s12 = scalar_lea.vmem %s11274_s15, 1024  ;;  %p11062_p4 = scmp.lt.s32.totalorder %s11274_s15, %s11274_s15 }
  0x38   : > { %p11055_p1 = scmp.ne.s32.totalorder %s11274_s15, %s11054_s12  ;;  %p11063_p7 = scmp.lt.s32.totalorder %s11054_s12, %s11054_s12 }
  0x3a   : > { %p11057_p2 = pnand %p11055_p1, %p11015_p0  ;;  %p11064_p8 = por %p11063_p7, %p11062_p4 }
  0x3c   : > { %p11058_p3 = pneg %p11057_p2 }
  0x3e   : > { %p11065_p11 = pnand %p11064_p8, %p11058_p3 }
  0x40   : > { %11068 = shalt.err (!%p11065_p11)
}
  0x41   : > { %s11145_s17 = smov 64   ;;  %s11146_s23 = smov 4  }
  0x42   : > { %10720 = dma.hbm_to_vmem [thread:$0]  (!%p11270_p12), %s14184_s9, 1024, %s11274_s15, [#allocation10], %s11145_s17, %s11145_s17, %s11146_s23  }
  0x43   : > { %p14226_p13 = scmp.ne.s32.totalorder %s14224_s29, 0 }
  0x45   : > { %366 = sbr.rel (%p14226_p13) target bundleno = 2424 (0x978), region = 64 }
  0x4c   : > { %p14227_p0 = scmp.eq.s32.totalorder %s11234_s21, 0 }
  0x4e   : > { %11114 = dma.done.wait (%p14227_p0), [#allocation7], 2048   ;;  %p14228_p5 = pmov %p14227_p0 }
  0x4f   : > { %p14229_p6 = pmov %p14227_p0 }
  0x50   : > { %11116 = vsyncadd (%p14228_p5), [#allocation7], 4294965248 }
  0x51   : > { %11118 = dma.done.wait (%p14229_p6), [#allocation10], 1024   ;;  %p14230_p9 = pmov %p14227_p0 }
  0x52   : > { %p409_p10 = scmp.lt.s32.totalorder %s11234_s21, 1  ;;  %v14213_v0 = vmov 0.0   ;;  %vm11148_vm0 = vmmov 0   ;;  %vm678_vm1 = vcmask 1040384   ;;  %v8651_v1 = vld [vmem:[%s14176_s1 + $0x3] sm:$0x1] }
  0x53   : > { %11120 = vsyncadd (%p14230_p9), [#allocation10], 4294966272  ;;  %9587 = vmatprep.subr.bf16.mxu0 %v14213_v0  ;;  %10573 = vmatprep.subr.bf16.mxu1 %v14213_v0  ;;  %v680_v3 = vsel %vm678_vm1, %v8651_v1, 0  ;;  %vm614_vm2 = vcmask 15360   ;;  %v8718_v9 = vld [vmem:[%s14176_s1 + $0x4] sm:$0x1] }
  0x54   : > { %9669 = vmatprep.mubr.msk.bf16.mxu1 %vm11148_vm0, %v14213_v0  ;;  %9589 = vmatprep.mubr.msk.bf16.mxu0 %vm11148_vm0, %v14213_v0  ;;  %s410_s29 = scalar_select %p409_p10, %s11234_s21, 1  ;;  %v456_v10 = vld [vmem:[%s14176_s1] sm:$0x1]  ;;  %vm572_vm3 = vcmask 1046528   ;;  %v1400_v15 = vsel %vm678_vm1, %v8718_v9, 0  ;;  %vm1953_vm6 = vcmask 1045504  }
  0x55   : > { %9588 = vmatpush3.bf16.msra.mxu0 %v680_v3  ;;  %10574 = vmatpush3.bf16.msra.mxu1 %v680_v3  ;;  %v957_v12 = vsel %vm678_vm1, %v456_v10, 0  ;;  %v8649_v31 = vld [vmem:[%s14176_s1 + $0x1] sm:$0x1]  ;;  %vm1165_vm4 = vsmask.f32 6400  ;;  %vm3630_vm8 = vcmask 1044480  }
  0x56   : > { %s10703_s13 = smul.u32 184, %s410_s29  ;;  %9759 = vmatprep.subr.bf16.mxu0 %v14213_v0  ;;  %9673 = vmatprep.subr.bf16.mxu1 %v14213_v0  ;;  %v1745_v33 = vsel %vm678_vm1, %v8649_v31, 0  ;;  %vm1605_vm5 = vsmask.f32 7424  ;;  %vm3128_vm7 = vsmask.f32 5376 }
  0x57   : > { %vm4437_vm9 = vcmask 261120   ;;  %vm4498_vm10 = vcmask 253952   ;;  %vm4478_vm11 = vcmask 257024   ;;  %vm6836_vm12 = vcmask 523264   ;;  %s11151_s16 = smov 64   ;;  %s407_s22 = sand.u32 1, %s11131_s18  }
  0x58   : > { %s11344_s19 = scalar_lea.vmem %s14175_s0, %s10703_s13  ;;  %s9150_s25 = sshll.u32 %s11234_s21, 4 }
  0x59   : > { %v418_v2 = vld [vmem:[%s11344_s19 + $0xc] sm:$0xf]  ;;  %v11352_v4 = vld [vmem:[%s11344_s19 + $0xa8] ss:$0 sps:$4 sm:$0x77]   ;;  %v10777_v6 = vld [vmem:[%s11344_s19 + $0x10] sm:$0xff]   ;;  %s14133_s12 = scalar_lea.hbm %s14186_s11, %s9150_s25 }
  0x5a   : > { %v463_v5 = vld [vmem:[%s11344_s19 + $0x8] sm:$0xe]  ;;  %v612_v7 = vrot.slane %v11352_v4, 1  ;;  %v11367_v11 = vrot.slane %v10777_v6, 1  ;;  %v10779_v13 = vld [vmem:[%s11344_s19 + $0x18] sm:$0xff]   ;;  %v10781_v22 = vld [vmem:[%s11344_s19 + $0x20] sm:$0xff]  }
  0x5b   : > { %v11358_v8 = vcombine.low %v463_v5, %v418_v2  ;;  %v415_v16 = vld [vmem:[%s11344_s19] sm:$0xf]  ;;  %v416_v17 = vld [vmem:[%s11344_s19 + $0x4] sm:$0xf]  ;;  %v576_v20 = vrot.slane %v10779_v13, 1  ;;  %v578_v25 = vrot.slane %v10781_v22, 1 }
  0x5c   : > { %9670 = vmatmul.mubr.msk.bf16.vlgmr.msra.gmra.mrb[0].mxu1 %vm614_vm2, %v612_v7  ;;  %v11386_v19 = vcombine.low %v415_v16, %v416_v17  ;;  %v417_v23 = vld [vmem:[%s11344_s19 + $0x8] sm:$0xf]  ;;  %v11421_v29 = vld [vmem:[%s11344_s19 + $0x30] sm:$0xff]   ;;  %v11444_v35 = vld [vmem:[%s11344_s19 + $0x38] sm:$0xff]   ;;  %s8551_s17 = scalar_lea.sflag [#allocation8], %s407_s22  ;;  %p14449_p1 = scmp.ne.s32.totalorder %s14221_s27, 0 }
  0x5d   : > { %v573_v14 = vrot.slane %v11358_v8, 1  ;;  %9674 = vmatpush3.bf16.msra.mxu1 %v957_v12  ;;  %9675 = vmatprep.mubr.msk.bf16.mxu1 %vm11148_vm0, %v14213_v0  ;;  %v11393_v21 = vsel %vm572_vm3, %v11367_v11, %v576_v20  ;;  %v11403_v24 = vcombine.low %v417_v23, %v418_v2  ;;  %v11408_v26 = vsel %vm572_vm3, %v576_v20, %v578_v25  ;;  %v11411_v27 = vld [vmem:[%s11344_s19 + $0x28] sm:$0xff]   ;;  %v11454_v37 = vld [vmem:[%s11344_s19 + $0x40] sm:$0xff]   ;;  %v11483_v43 = vld [vmem:[%s11344_s19 + $0x50] sm:$0xff]   ;;  %s11152_s23 = smov [#allocation11]  }
  0x5e   : > { %9845 = vmatprep.subr.bf16.mxu1 %v14213_v0  ;;  %v580_v28 = vrot.slane %v11411_v27, 1  ;;  %v582_v32 = vrot.slane %v11421_v29, 1  ;;  %v584_v36 = vrot.slane %v11444_v35, 1  ;;  %v586_v39 = vrot.slane %v11454_v37, 1  ;;  %v11468_v40 = vld [vmem:[%s11344_s19 + $0x48] sm:$0xff]   ;;  %v11498_v46 = vld [vmem:[%s11344_s19 + $0x58] sm:$0xff]  }
  0x5f   : > { %v575_v18 = vsel %vm572_vm3, %v573_v14, %v11367_v11  ;;  %v588_v42 = vrot.slane %v11468_v40, 1  ;;  %v590_v45 = vrot.slane %v11483_v43, 1  ;;  %v592_v48 = vrot.slane %v11498_v46, 1  ;;  %v11513_v49 = vld [vmem:[%s11344_s19 + $0x60] sm:$0xff]   ;;  %v11528_v52 = vld [vmem:[%s11344_s19 + $0x68] sm:$0xff]   ;;  %v11543_v55 = vld [vmem:[%s11344_s19 + $0x70] sm:$0xff]  }
  0x60   : > { %9590 = vmatmul.mubr.msk.bf16.vlgmr.msra.gmra.mrb[0].mxu0 %vm614_vm2, %v575_v18  ;;  %v11425_v30 = vsel %vm572_vm3, %v578_v25, %v580_v28  ;;  %v11441_v34 = vsel %vm572_vm3, %v580_v28, %v582_v32  ;;  %v11458_v38 = vsel %vm572_vm3, %v582_v32, %v584_v36  ;;  %v11473_v41 = vsel %vm572_vm3, %v584_v36, %v586_v39  ;;  %v11558_v58 = vld [vmem:[%s11344_s19 + $0x78] sm:$0xff]   ;;  %v11573_v61 = vld [vmem:[%s11344_s19 + $0x80] sm:$0xff]   ;;  %v11588_v1 = vld [vmem:[%s11344_s19 + $0x88] sm:$0xff]   ;;  %s11073_s28 = sshll.u32 %s11152_s23, 4  ;;  %s11074_s28 = int_to_ptr.vmem [resolvable:$false] %s11073_s28 }
  0x61   : > { %9760 = vmatpush3.bf16.msra.mxu0 %v1400_v15  ;;  %9593 = vmatprep.mubr.msk.bf16.mxu0 %vm11148_vm0, %v14213_v0  ;;  %v11488_v44 = vsel %vm572_vm3, %v586_v39, %v588_v42  ;;  %v11503_v47 = vsel %vm572_vm3, %v588_v42, %v590_v45  ;;  %v11518_v50 = vsel %vm572_vm3, %v590_v45, %v592_v48  ;;  %v594_v51 = vrot.slane %v11513_v49, 1  ;;  %v11603_v5 = vld [vmem:[%s11344_s19 + $0x90] sm:$0xff]   ;;  %v11618_v10 = vld [vmem:[%s11344_s19 + $0x98] sm:$0xff]   ;;  %v11635_v14 = vld [vmem:[%s11344_s19 + $0xa0] sm:$0xff]   ;;  %s11075_s29 = scalar_lea.vmem %s11074_s28, 32 }
  0x62   : > { %9931 = vmatprep.subr.bf16.mxu0 %v14213_v0  ;;  %v596_v54 = vrot.slane %v11528_v52, 1  ;;  %v598_v57 = vrot.slane %v11543_v55, 1  ;;  %v600_v60 = vrot.slane %v11558_v58, 1  ;;  %v602_v63 = vrot.slane %v11573_v61, 1  ;;  %v11679_v36 = vld [vmem:[%s11344_s19 + $0x18] sm:$0xff]  }
  0x63   : > { %v11533_v53 = vsel %vm572_vm3, %v592_v48, %v594_v51  ;;  %v604_v3 = vrot.slane %v11588_v1, 1  ;;  %v606_v9 = vrot.slane %v11603_v5, 1  ;;  %v610_v16 = vrot.slane %v11635_v14, 1  ;;  %v8763_v45 = vld [vmem:[%s14176_s1 + $0x5] sm:$0x1] }
  0x64   : > { %9676 = vmatmul.mubr.msk.bf16.vlgmr.msra.gmra.mrb[4].mxu1 %vm614_vm2, %v11386_v19  ;;  %v11548_v56 = vsel %vm572_vm3, %v594_v51, %v596_v54  ;;  %v11563_v59 = vsel %vm572_vm3, %v596_v54, %v598_v57  ;;  %v11578_v62 = vsel %vm572_vm3, %v598_v57, %v600_v60  ;;  %v11593_v2 = vsel %vm572_vm3, %v600_v60, %v602_v63 }
  0x65   : > { %9679 = vmatprep.mubr.msk.bf16.mxu1 %vm11148_vm0, %v14213_v0  ;;  %9846 = vmatpush3.bf16.msra.mxu1 %v1745_v33  ;;  %v11623_v12 = vsel %vm572_vm3, %v604_v3, %v606_v9  ;;  %v1167_v17 = vshrl.u32 %v11358_v8, 16  ;;  %v1170_v18 = vshll.u32 %v11358_v8, 16  ;;  %v613_v25 = vsel %vm572_vm3, %v610_v16, %v612_v7 }
  0x66   : > { %10017 = vmatprep.subr.bf16.mxu1 %v14213_v0  ;;  %v1182_v39 = vshrl.u32 %v11679_v36, 16  ;;  %v1185_v42 = vshll.u32 %v11679_v36, 16  ;;  %v2059_v57 = vsel %vm678_vm1, %v8763_v45, 0  ;;  %v1608_v60 = vshll.u32 %v11386_v19, 16 }
  0x67   : > { %v1169_v28 = vrot.slane %v1167_v17, 1  ;;  %v1172_v31 = vrot.slane %v1170_v18, 2  ;;  %v1606_v18 = vshrl.u32 %v11386_v19, 16  ;;  %v1198_v45 = vshrl.u32 %v11411_v27, 16 }
  0x68   : > { %9594 = vmatmul.mubr.msk.bf16.gmra.mrb[4].mxu0 %vm614_vm2, %v11393_v21  ;;  %v1184_v51 = vrot.slane %v1182_v39, 1  ;;  %v1187_v54 = vrot.slane %v1185_v42, 2 }
  0x69   : > { %9597 = vmatprep.mubr.msk.bf16.mxu0 %vm11148_vm0, %v14213_v0  ;;  %v1173_v4 = vor.u32 %v1172_v31, %v1169_v28 }
  0x6c   : > { %9680 = vmatmul.mubr.msk.bf16.gmra.mrb[8].mxu1 %vm614_vm2, %v11403_v24 }
  0x6d   : > { %9683 = vmatprep.mubr.msk.bf16.mxu1 %vm11148_vm0, %v14213_v0 }
  0x70   : > { %9598 = vmatmul.mubr.msk.bf16.gmra.mrb[8].mxu0 %vm614_vm2, %v11408_v26 }
  0x71   : > { %9601 = vmatprep.mubr.msk.bf16.mxu0 %vm11148_vm0, %v14213_v0 }
  0x74   : > { %9684 = vmatmul.mubr.msk.bf16.gmra.mrb[12].mxu1 %vm614_vm2, %v10777_v6  ;;  %v11608_v6 = vsel %vm572_vm3, %v602_v63, %v604_v3  ;;  %v10798_v63 = vld [vmem:[%s11344_s19 + $0xa0] ss:$0 sps:$4 sm:$0x33]   ;;  %v1188_v3 = vor.u32 %v1187_v54, %v1184_v51  ;;  %v1616_v51 = vshrl.u32 %v11403_v24, 16 }
  0x75   : > { %9687 = vmatprep.mubr.msk.bf16.mxu1 %vm11148_vm0, %v14213_v0 }
  0x78   : > { %9602 = vmatmul.mubr.msk.bf16.gmra.mrb[12].mxu0 %vm614_vm2, %v11425_v30 }
  0x79   : > { %9605 = vmatprep.mubr.msk.bf16.mxu0 %vm11148_vm0, %v14213_v0 }
  0x7c   : > { %9688 = vmatmul.mubr.msk.bf16.gmra.mrb[16].mxu1 %vm614_vm2, %v10779_v13  ;;  %v11632_v13 = vrot.slane %v11618_v10, 1 }
  0x7d   : > { %9691 = vmatprep.mubr.msk.bf16.mxu1 %vm11148_vm0, %v14213_v0 }
  0x7e   : > { %v11641_v15 = vsel %vm572_vm3, %v606_v9, %v11632_v13  ;;  %v611_v20 = vsel %vm572_vm3, %v11632_v13, %v610_v16  ;;  %v11700_v9 = vld [vmem:[%s11344_s19 + $0x20] sm:$0xff]  }
  0x7f   : > { %v1190_v16 = vshrl.u32 %v11700_v9, 16  ;;  %v1193_v17 = vshll.u32 %v11700_v9, 16 }
  0x80   : > { %9606 = vmatmul.mubr.msk.bf16.gmra.mrb[16].mxu0 %vm614_vm2, %v11441_v34 }
  0x81   : > { %9609 = vmatprep.mubr.msk.bf16.mxu0 %vm11148_vm0, %v14213_v0  ;;  %v1192_v31 = vrot.slane %v1190_v16, 1 }
  0x84   : > { %9692 = vmatmul.mubr.msk.bf16.gmra.mrb[20].mxu1 %vm614_vm2, %v10781_v22  ;;  %v11662_v22 = vld [vmem:[%s11344_s19 + $0x10] sm:$0xff]  }
  0x85   : > { %9695 = vmatprep.mubr.msk.bf16.mxu1 %vm11148_vm0, %v14213_v0  ;;  %v1174_v23 = vshrl.u32 %v11662_v22, 16  ;;  %v1177_v8 = vshll.u32 %v11662_v22, 16 }
  0x87   : > { %v1176_v32 = vrot.slane %v1174_v23, 1  ;;  %v1179_v33 = vrot.slane %v1177_v8, 2 }
  0x88   : > { %9610 = vmatmul.mubr.msk.bf16.gmra.mrb[20].mxu0 %vm614_vm2, %v11458_v38 }
  0x89   : > { %9613 = vmatprep.mubr.msk.bf16.mxu0 %vm11148_vm0, %v14213_v0  ;;  %v1180_v7 = vor.u32 %v1179_v33, %v1176_v32  ;;  %v1195_v32 = vrot.slane %v1193_v17, 2 }
  0x8b   : > { %v1181_v48 = vsel %vm1165_vm4, %v1173_v4, %v1180_v7  ;;  %v1189_v28 = vsel %vm1165_vm4, %v1180_v7, %v1188_v3  ;;  %v1196_v19 = vor.u32 %v1195_v32, %v1192_v31  ;;  %v1201_v7 = vshll.u32 %v11411_v27, 16 }
  0x8c   : > { %9696 = vmatmul.mubr.msk.bf16.gmra.mrb[24].mxu1 %vm614_vm2, %v11411_v27 }
  0x8d   : > { %9699 = vmatprep.mubr.msk.bf16.mxu1 %vm11148_vm0, %v14213_v0  ;;  %v1197_v54 = vsel %vm1165_vm4, %v1188_v3, %v1196_v19 }
  0x90   : > { %9614 = vmatmul.mubr.msk.bf16.gmra.mrb[24].mxu0 %vm614_vm2, %v11473_v41 }
  0x91   : > { %9617 = vmatprep.mubr.msk.bf16.mxu0 %vm11148_vm0, %v14213_v0 }
  0x94   : > { %9700 = vmatmul.mubr.msk.bf16.gmra.mrb[28].mxu1 %vm614_vm2, %v11421_v29 }
  0x95   : > { %9703 = vmatprep.mubr.msk.bf16.mxu1 %vm11148_vm0, %v14213_v0 }
  0x98   : > { %9618 = vmatmul.mubr.msk.bf16.gmra.mrb[28].mxu0 %vm614_vm2, %v11488_v44 }
  0x99   : > { %9621 = vmatprep.mubr.msk.bf16.mxu0 %vm11148_vm0, %v14213_v0 }
  0x9c   : > { %9704 = vmatmul.mubr.msk.bf16.gmra.mrb[32].mxu1 %vm614_vm2, %v11444_v35 }
  0x9d   : > { %9707 = vmatprep.mubr.msk.bf16.mxu1 %vm11148_vm0, %v14213_v0 }
  0xa0   : > { %9622 = vmatmul.mubr.msk.bf16.gmra.mrb[32].mxu0 %vm614_vm2, %v11503_v47 }
  0xa1   : > { %9625 = vmatprep.mubr.msk.bf16.mxu0 %vm11148_vm0, %v14213_v0 }
  0xa4   : > { %9708 = vmatmul.mubr.msk.bf16.gmra.mrb[36].mxu1 %vm614_vm2, %v11454_v37 }
  0xa5   : > { %9711 = vmatprep.mubr.msk.bf16.mxu1 %vm11148_vm0, %v14213_v0 }
  0xa8   : > { %9626 = vmatmul.mubr.msk.bf16.gmra.mrb[36].mxu0 %vm614_vm2, %v11518_v50 }
  0xa9   : > { %9629 = vmatprep.mubr.msk.bf16.mxu0 %vm11148_vm0, %v14213_v0 }
  0xac   : > { %9712 = vmatmul.mubr.msk.bf16.gmra.mrb[40].mxu1 %vm614_vm2, %v11468_v40 }
  0xad   : > { %9715 = vmatprep.mubr.msk.bf16.mxu1 %vm11148_vm0, %v14213_v0 }
  0xb0   : > { %9630 = vmatmul.mubr.msk.bf16.gmra.mrb[40].mxu0 %vm614_vm2, %v11533_v53 }
  0xb1   : > { %9633 = vmatprep.mubr.msk.bf16.mxu0 %vm11148_vm0, %v14213_v0 }
  0xb4   : > { %9716 = vmatmul.mubr.msk.bf16.gmra.mrb[44].mxu1 %vm614_vm2, %v11483_v43 }
  0xb5   : > { %9719 = vmatprep.mubr.msk.bf16.mxu1 %vm11148_vm0, %v14213_v0 }
  0xb8   : > { %9634 = vmatmul.mubr.msk.bf16.gmra.mrb[44].mxu0 %vm614_vm2, %v11548_v56 }
  0xb9   : > { %9637 = vmatprep.mubr.msk.bf16.mxu0 %vm11148_vm0, %v14213_v0 }
  0xbc   : > { %9720 = vmatmul.mubr.msk.bf16.gmra.mrb[48].mxu1 %vm614_vm2, %v11498_v46 }
  0xbd   : > { %9723 = vmatprep.mubr.msk.bf16.mxu1 %vm11148_vm0, %v14213_v0 }
  0xc0   : > { %9638 = vmatmul.mubr.msk.bf16.gmra.mrb[48].mxu0 %vm614_vm2, %v11563_v59 }
  0xc1   : > { %9641 = vmatprep.mubr.msk.bf16.mxu0 %vm11148_vm0, %v14213_v0 }
  0xc4   : > { %9724 = vmatmul.mubr.msk.bf16.gmra.mrb[52].mxu1 %vm614_vm2, %v11513_v49 }
  0xc5   : > { %9727 = vmatprep.mubr.msk.bf16.mxu1 %vm11148_vm0, %v14213_v0 }
  0xc8   : > { %9642 = vmatmul.mubr.msk.bf16.gmra.mrb[52].mxu0 %vm614_vm2, %v11578_v62 }
  0xc9   : > { %9645 = vmatprep.mubr.msk.bf16.mxu0 %vm11148_vm0, %v14213_v0 }
  0xcc   : > { %9728 = vmatmul.mubr.msk.bf16.gmra.mrb[56].mxu1 %vm614_vm2, %v11528_v52 }
  0xcd   : > { %9731 = vmatprep.mubr.msk.bf16.mxu1 %vm11148_vm0, %v14213_v0 }
  0xd0   : > { %9646 = vmatmul.mubr.msk.bf16.gmra.mrb[56].mxu0 %vm614_vm2, %v11593_v2 }
  0xd1   : > { %9649 = vmatprep.mubr.msk.bf16.mxu0 %vm11148_vm0, %v14213_v0 }
  0xd4   : > { %9732 = vmatmul.mubr.msk.bf16.gmra.mrb[60].mxu1 %vm614_vm2, %v11543_v55 }
  0xd5   : > { %9735 = vmatprep.mubr.msk.bf16.mxu1 %vm11148_vm0, %v14213_v0 }
  0xd8   : > { %9650 = vmatmul.mubr.msk.bf16.gmra.mrb[60].mxu0 %vm614_vm2, %v11608_v6 }
  0xd9   : > { %9653 = vmatprep.mubr.msk.bf16.mxu0 %vm11148_vm0, %v14213_v0 }
  0xdc   : > { %9736 = vmatmul.mubr.msk.bf16.gmra.mrb[64].mxu1 %vm614_vm2, %v11558_v58 }
  0xdd   : > { %9739 = vmatprep.mubr.msk.bf16.mxu1 %vm11148_vm0, %v14213_v0 }
  0xe0   : > { %9654 = vmatmul.mubr.msk.bf16.gmra.mrb[64].mxu0 %vm614_vm2, %v11623_v12 }
  0xe1   : > { %9657 = vmatprep.mubr.msk.bf16.mxu0 %vm11148_vm0, %v14213_v0 }
  0xe4   : > { %9740 = vmatmul.mubr.msk.bf16.gmra.mrb[68].mxu1 %vm614_vm2, %v11573_v61 }
  0xe5   : > { %9743 = vmatprep.mubr.msk.bf16.mxu1 %vm11148_vm0, %v14213_v0 }
  0xe8   : > { %9658 = vmatmul.mubr.msk.bf16.gmra.mrb[68].mxu0 %vm614_vm2, %v11641_v15 }
  0xe9   : > { %9661 = vmatprep.mubr.msk.bf16.mxu0 %vm11148_vm0, %v14213_v0 }
  0xec   : > { %9744 = vmatmul.mubr.msk.bf16.gmra.mrb[72].mxu1 %vm614_vm2, %v11588_v1 }
  0xed   : > { %9747 = vmatprep.mubr.msk.bf16.mxu1 %vm11148_vm0, %v14213_v0 }
  0xf0   : > { %9662 = vmatmul.mubr.msk.bf16.gmra.mrb[72].mxu0 %vm614_vm2, %v611_v20  ;;  %v1610_v20 = vrot.slane %v1608_v60, 1  ;;  %v1203_v60 = vrot.slane %v1201_v7, 2 }
  0xf1   : > { %9665 = vmatprep.mubr.msk.bf16.mxu0 %vm11148_vm0, %v14213_v0 }
  0xf2   : > { %v1611_v33 = vor.u32 %v1610_v20, %v1606_v18  ;;  %v1619_v18 = vrot.slane %v1177_v8, 1 }
  0xf4   : > { %9748 = vmatmul.mubr.msk.bf16.gmra.mrb[76].mxu1 %vm614_vm2, %v11603_v5 }
  0xf5   : > { %9751 = vmatprep.mubr.msk.bf16.mxu1 %vm11148_vm0, %v14213_v0 }
  0xf8   : > { %9666 = vmatmul.mubr.msk.bf16.gmra.mrb[76].mxu0 %vm614_vm2, %v613_v25  ;;  %v1612_v25 = vshll.u32 %v11403_v24, 16 }
  0xf9   : > { %9761 = vmatprep.mubr.msk.bf16.mxu0 %vm11148_vm0, %v14213_v0 }
  0xfa   : > { %v1614_v4 = vrot.slane %v1612_v25, 1  ;;  %v1206_v25 = vshrl.u32 %v11421_v29, 16 }
  0xfc   : > { %9752 = vmatmul.mubr.msk.bf16.gmra.mrb[80].mxu1 %vm614_vm2, %v11618_v10  ;;  %v1208_v32 = vrot.slane %v1206_v25, 1 }
  0xfd   : > { %9755 = vmatprep.mubr.msk.bf16.mxu1 %vm11148_vm0, %v14213_v0 }
 0x100   : > { %9762 = vmatmul.mubr.msk.bf16.vlgmr.msra.gmra.mrb[80].mxu0 %vm614_vm2, %v1181_v48  ;;  %v1615_v48 = vsel %vm1605_vm5, %v1611_v33, %v1614_v4  ;;  %v1621_v33 = vor.u32 %v1619_v18, %v1174_v23 }
 0x101   : > { %9932 = vmatpush3.bf16.msra.mxu0 %v2059_v57  ;;  %9765 = vmatprep.mubr.msk.bf16.mxu0 %vm11148_vm0, %v14213_v0  ;;  %v1200_v57 = vrot.slane %v1198_v45, 1 }
 0x102   : > { %10103 = vmatprep.subr.bf16.mxu0 %v14213_v0 }
 0x103   : > { %v1204_v20 = vor.u32 %v1203_v60, %v1200_v57 }
 0x104   : > { %9756 = vmatmul.mubr.msk.bf16.gmra.mrb[84].mxu1 %vm614_vm2, %v10798_v63  ;;  %v1618_v63 = vor.u32 %v1616_v51, %v1614_v4  ;;  %v1622_v4 = vrot.slane %v1185_v42, 1  ;;  %v1214_v51 = vshrl.u32 %v11444_v35, 16 }
 0x105   : > { %9847 = vmatprep.mubr.msk.bf16.mxu1 %vm11148_vm0, %v14213_v0  ;;  %v1205_v31 = vsel %vm1165_vm4, %v1196_v19, %v1204_v20  ;;  %v1217_v19 = vshll.u32 %v11444_v35, 16 }
 0x106   : > { %v1620_v3 = vsel %vm1605_vm5, %v1618_v63, %v1619_v18  ;;  %v1216_v23 = vrot.slane %v1214_v51, 1  ;;  %v1624_v60 = vor.u32 %v1622_v4, %v1182_v39  ;;  %v1625_v63 = vrot.slane %v1193_v17, 1 }
 0x107   : > { %v1219_v42 = vrot.slane %v1217_v19, 2 }
 0x108   : > { %9766 = vmatmul.mubr.msk.bf16.gmra.mrb[84].mxu0 %vm614_vm2, %v1189_v28  ;;  %v1209_v28 = vshll.u32 %v11421_v29, 16 }
 0x109   : > { %9769 = vmatprep.mubr.msk.bf16.mxu0 %vm11148_vm0, %v14213_v0  ;;  %v1220_v18 = vor.u32 %v1219_v42, %v1216_v23  ;;  %v1233_v23 = vshll.u32 %v11468_v40, 16 }
 0x10a   : > { %v1211_v8 = vrot.slane %v1209_v28, 2 }
 0x10c   : > { %9848 = vmatmul.mubr.msk.bf16.vlgmr.msra.gmra.mrb[88].mxu1 %vm614_vm2, %v1615_v48  ;;  %v1212_v48 = vor.u32 %v1211_v8, %v1208_v32  ;;  %v1627_v8 = vor.u32 %v1625_v63, %v1190_v16 }
 0x10d   : > { %9851 = vmatprep.mubr.msk.bf16.mxu1 %vm11148_vm0, %v14213_v0 }
 0x10e   : > { %v1213_v57 = vsel %vm1165_vm4, %v1204_v20, %v1212_v48  ;;  %v1225_v20 = vshll.u32 %v11454_v37, 16  ;;  %v1221_v32 = vsel %vm1165_vm4, %v1212_v48, %v1220_v18 }
 0x110   : > { %9770 = vmatmul.mubr.msk.bf16.gmra.mrb[88].mxu0 %vm614_vm2, %v1197_v54  ;;  %v1623_v54 = vsel %vm1605_vm5, %v1621_v33, %v1622_v4  ;;  %v1227_v17 = vrot.slane %v1225_v20, 2  ;;  %v1628_v33 = vrot.slane %v1201_v7, 1  ;;  %v8650_v4 = vld [vmem:[%s14176_s1 + $0x2] sm:$0x1] }
 0x111   : > { %9773 = vmatprep.mubr.msk.bf16.mxu0 %vm11148_vm0, %v14213_v0 }
 0x112   : > { %v1629_v16 = vsel %vm1605_vm5, %v1627_v8, %v1628_v33  ;;  %v14196_v8 = vshll.u32 %v11483_v43, 16 }
 0x114   : > { %9852 = vmatmul.mubr.msk.bf16.gmra.mrb[92].mxu1 %vm614_vm2, %v1620_v3  ;;  %v1222_v3 = vshrl.u32 %v11454_v37, 16 }
 0x115   : > { %9855 = vmatprep.mubr.msk.bf16.mxu1 %vm11148_vm0, %v14213_v0 }
 0x116   : > { %v1224_v39 = vrot.slane %v1222_v3, 1 }
 0x118   : > { %9774 = vmatmul.mubr.msk.bf16.gmra.mrb[92].mxu0 %vm614_vm2, %v1205_v31  ;;  %v1626_v31 = vsel %vm1605_vm5, %v1624_v60, %v1625_v63  ;;  %v1228_v48 = vor.u32 %v1227_v17, %v1224_v39  ;;  %v1235_v60 = vrot.slane %v1233_v23, 2  ;;  %v1630_v63 = vor.u32 %v1628_v33, %v1198_v45 }
 0x119   : > { %9777 = vmatprep.mubr.msk.bf16.mxu0 %vm11148_vm0, %v14213_v0  ;;  %v14195_v17 = vshrl.u32 %v11483_v43, 16 }
 0x11a   : > { %v1229_v7 = vsel %vm1165_vm4, %v1220_v18, %v1228_v48 }
 0x11c   : > { %9856 = vmatmul.mubr.msk.bf16.gmra.mrb[96].mxu1 %vm614_vm2, %v1623_v54  ;;  %v2283_v54 = vsel %vm678_vm1, %v8650_v4, 0 }
 0x11d   : > { %9859 = vmatprep.mubr.msk.bf16.mxu1 %vm11148_vm0, %v14213_v0  ;;  %10018 = vmatpush3.bf16.msra.mxu1 %v2283_v54 }
 0x11e   : > { %10189 = vmatprep.subr.bf16.mxu1 %v14213_v0 }
 0x120   : > { %9778 = vmatmul.mubr.msk.bf16.gmra.mrb[96].mxu0 %vm614_vm2, %v1213_v57  ;;  %v1230_v57 = vshrl.u32 %v11468_v40, 16 }
 0x121   : > { %9781 = vmatprep.mubr.msk.bf16.mxu0 %vm11148_vm0, %v14213_v0 }
 0x122   : > { %v1232_v42 = vrot.slane %v1230_v57, 1 }
 0x124   : > { %9860 = vmatmul.mubr.msk.bf16.gmra.mrb[100].mxu1 %vm614_vm2, %v1626_v31  ;;  %v1631_v31 = vrot.slane %v1209_v28, 1  ;;  %v1236_v18 = vor.u32 %v1235_v60, %v1232_v42  ;;  %v1243_v42 = vrot.slane %v14196_v8, 2 }
 0x125   : > { %9863 = vmatprep.mubr.msk.bf16.mxu1 %vm11148_vm0, %v14213_v0 }
 0x126   : > { %v1632_v4 = vsel %vm1605_vm5, %v1630_v63, %v1631_v31  ;;  %v1237_v33 = vsel %vm1165_vm4, %v1228_v48, %v1236_v18  ;;  %v1633_v63 = vor.u32 %v1631_v31, %v1206_v25 }
 0x128   : > { %9782 = vmatmul.mubr.msk.bf16.gmra.mrb[100].mxu0 %vm614_vm2, %v1221_v32 }
 0x129   : > { %9785 = vmatprep.mubr.msk.bf16.mxu0 %vm11148_vm0, %v14213_v0 }
 0x12c   : > { %9864 = vmatmul.mubr.msk.bf16.gmra.mrb[104].mxu1 %vm614_vm2, %v1629_v16 }
 0x12d   : > { %9867 = vmatprep.mubr.msk.bf16.mxu1 %vm11148_vm0, %v14213_v0 }
 0x12f   : > { %v11792_v32 = vpop.f32.mrb[0].mxu1 }
 0x130   : > { %9786 = vmatmul.mubr.msk.bf16.gmra.mrb[104].mxu0 %vm614_vm2, %v1229_v7  ;;  %v9671_v39 = vpop.f32.mrb[1].mxu1  ;;  %v1240_v7 = vrot.slane %v14195_v17, 1 }
 0x131   : > { %9789 = vmatprep.mubr.msk.bf16.mxu0 %vm11148_vm0, %v14213_v0  ;;  %v879_v54 = vpop.f32.mrb[2].mxu1  ;;  %v1634_v39 = vrot.slane %v1217_v19, 1 }
 0x132   : > { %v9672_v27 = vpop.f32.mrb[3].mxu1  ;;  %v1244_v48 = vor.u32 %v1243_v42, %v1240_v7 }
 0x133   : > { %v716_v16 = vpop.f32.mrb[0].mxu0  ;;  %v14197_v27 = vshrl.u32 %v11498_v46, 16  ;;  %v1635_v8 = vsel %vm1605_vm5, %v1633_v63, %v1634_v39 }
 0x134   : > { %v9591_v45 = vpop.f32.mrb[1].mxu0  ;;  %9868 = vmatmul.mubr.msk.bf16.gmra.mrb[108].mxu1 %vm614_vm2, %v1632_v4 }
 0x135   : > { %v719_v28 = vpop.f32.mrb[2].mxu0  ;;  %9871 = vmatprep.mubr.msk.bf16.mxu1 %vm11148_vm0, %v14213_v0  ;;  %v1249_v45 = vshll.u32 %v11498_v46, 16  ;;  %v1248_v7 = vrot.slane %v14197_v27, 1 }
 0x136   : > { %v9592_v60 = vpop.f32.mrb[3].mxu0 }
 0x137   : > { %v993_v54 = vpop.f32.mrb[4].mxu1 }
 0x138   : > { %9790 = vmatmul.mubr.msk.bf16.gmra.mrb[108].mxu0 %vm614_vm2, %v1237_v33  ;;  %v9677_v4 = vpop.f32.mrb[5].mxu1  ;;  %v11814_v60 = vadd.f32 %v993_v54, %v716_v16  ;;  %v1251_v16 = vrot.slane %v1249_v45, 2  ;;  %v14198_v54 = vshrl.u32 %v11513_v49, 16 }
 0x139   : > { %9793 = vmatprep.mubr.msk.bf16.mxu0 %vm11148_vm0, %v14213_v0  ;;  %v996_v17 = vpop.f32.mrb[6].mxu1  ;;  %v1245_v4 = vsel %vm1165_vm4, %v1236_v18, %v1244_v48 }
 0x13a   : > { %v9678_v25 = vpop.f32.mrb[7].mxu1  ;;  %v11817_v19 = vadd.f32 %v996_v17, %v719_v28  ;;  %v1636_v17 = vor.u32 %v1634_v39, %v1214_v51  ;;  %v1637_v28 = vrot.slane %v1225_v20, 1  ;;  %v1252_v63 = vor.u32 %v1251_v16, %v1248_v7 }
 0x13b   : > { %v724_v29 = vpop.f32.mrb[4].mxu0  ;;  %v1257_v25 = vshll.u32 %v11513_v49, 16  ;;  %v1256_v7 = vrot.slane %v14198_v54, 1 }
 0x13c   : > { %v9595_v31 = vpop.f32.mrb[5].mxu0  ;;  %9872 = vmatmul.mubr.msk.bf16.gmra.mrb[112].mxu1 %vm614_vm2, %v1635_v8  ;;  %v1638_v35 = vsel %vm1605_vm5, %v1636_v17, %v1637_v28  ;;  %v1640_v17 = vrot.slane %v1233_v23, 1 }
 0x13d   : > { %v727_v33 = vpop.f32.mrb[6].mxu0  ;;  %9875 = vmatprep.mubr.msk.bf16.mxu1 %vm11148_vm0, %v14213_v0 }
 0x13e   : > { %v9596_v42 = vpop.f32.mrb[7].mxu0 }
 0x13f   : > { %v1001_v8 = vpop.f32.mrb[8].mxu1 }
 0x140   : > { %9794 = vmatmul.mubr.msk.bf16.gmra.mrb[112].mxu0 %vm614_vm2, %v1245_v4  ;;  %v9681_v18 = vpop.f32.mrb[9].mxu1  ;;  %v11836_v31 = vadd.f32 %v1001_v8, %v724_v29  ;;  %v1259_v29 = vrot.slane %v1257_v25, 2 }
 0x141   : > { %9797 = vmatprep.mubr.msk.bf16.mxu0 %vm11148_vm0, %v14213_v0  ;;  %v1004_v42 = vpop.f32.mrb[10].mxu1  ;;  %v1253_v18 = vsel %vm1165_vm4, %v1244_v48, %v1252_v63 }
 0x142   : > { %v9682_v39 = vpop.f32.mrb[11].mxu1  ;;  %v11839_v20 = vadd.f32 %v1004_v42, %v727_v33  ;;  %v1639_v33 = vor.u32 %v1637_v28, %v1222_v3  ;;  %v1260_v42 = vor.u32 %v1259_v29, %v1256_v7 }
 0x143   : > { %v732_v51 = vpop.f32.mrb[8].mxu0  ;;  %v14200_v39 = vshll.u32 %v11528_v52, 16 }
 0x144   : > { %v9599_v4 = vpop.f32.mrb[9].mxu0  ;;  %9876 = vmatmul.mubr.msk.bf16.gmra.mrb[116].mxu1 %vm614_vm2, %v1638_v35  ;;  %v14199_v35 = vshrl.u32 %v11528_v52, 16  ;;  %v1641_v37 = vsel %vm1605_vm5, %v1639_v33, %v1640_v17  ;;  %v14231_v33 = vshll.u32 %v11483_v43, 16 }
 0x145   : > { %v735_v27 = vpop.f32.mrb[10].mxu0  ;;  %9879 = vmatprep.mubr.msk.bf16.mxu1 %vm11148_vm0, %v14213_v0 }
 0x146   : > { %v9600_v16 = vpop.f32.mrb[11].mxu0  ;;  %v1264_v7 = vrot.slane %v14199_v35, 1 }
 0x147   : > { %v1009_v8 = vpop.f32.mrb[12].mxu1 }
 0x148   : > { %9798 = vmatmul.mubr.msk.bf16.gmra.mrb[116].mxu0 %vm614_vm2, %v1253_v18  ;;  %v9685_v48 = vpop.f32.mrb[13].mxu1  ;;  %v11858_v4 = vadd.f32 %v1009_v8, %v732_v51  ;;  %v1267_v51 = vrot.slane %v14200_v39, 2  ;;  %v1643_v8 = vrot.slane %v14231_v33, 1 }
 0x149   : > { %9801 = vmatprep.mubr.msk.bf16.mxu0 %vm11148_vm0, %v14213_v0  ;;  %v1012_v16 = vpop.f32.mrb[14].mxu1  ;;  %v1261_v48 = vsel %vm1165_vm4, %v1252_v63, %v1260_v42 }
 0x14a   : > { %v9686_v28 = vpop.f32.mrb[15].mxu1  ;;  %v11861_v23 = vadd.f32 %v1012_v16, %v735_v27  ;;  %v1642_v27 = vor.u32 %v1640_v17, %v1230_v57 }
 0x14b   : > { %v740_v3 = vpop.f32.mrb[12].mxu0  ;;  %v14201_v28 = vshrl.u32 %v11543_v55, 16 }
 0x14c   : > { %v9603_v18 = vpop.f32.mrb[13].mxu0  ;;  %9880 = vmatmul.mubr.msk.bf16.gmra.mrb[120].mxu1 %vm614_vm2, %v1641_v37  ;;  %v1268_v37 = vor.u32 %v1267_v51, %v1264_v7  ;;  %v1644_v40 = vsel %vm1605_vm5, %v1642_v27, %v1643_v8  ;;  %v14232_v27 = vshrl.u32 %v11483_v43, 16 }
 0x14d   : > { %v743_v54 = vpop.f32.mrb[14].mxu0  ;;  %9883 = vmatprep.mubr.msk.bf16.mxu1 %vm11148_vm0, %v14213_v0  ;;  %v14202_v18 = vshll.u32 %v11543_v55, 16  ;;  %v1272_v7 = vrot.slane %v14201_v28, 1 }
 0x14e   : > { %v9604_v29 = vpop.f32.mrb[15].mxu0 }
 0x14f   : > { %v1017_v16 = vpop.f32.mrb[16].mxu1 }
 0x150   : > { %9802 = vmatmul.mubr.msk.bf16.gmra.mrb[120].mxu0 %vm614_vm2, %v1261_v48  ;;  %v9689_v63 = vpop.f32.mrb[17].mxu1  ;;  %v11880_v29 = vadd.f32 %v1017_v16, %v740_v3  ;;  %v1275_v3 = vrot.slane %v14202_v18, 2 }
 0x151   : > { %9805 = vmatprep.mubr.msk.bf16.mxu0 %vm11148_vm0, %v14213_v0  ;;  %v1020_v35 = vpop.f32.mrb[18].mxu1  ;;  %v1269_v63 = vsel %vm1165_vm4, %v1260_v42, %v1268_v37 }
 0x152   : > { %v9690_v17 = vpop.f32.mrb[19].mxu1  ;;  %v11883_v33 = vadd.f32 %v1020_v35, %v743_v54  ;;  %v1645_v54 = vor.u32 %v1643_v8, %v14232_v27  ;;  %v1646_v35 = vrot.slane %v1249_v45, 1 }
 0x153   : > { %v748_v57 = vpop.f32.mrb[16].mxu0  ;;  %v14203_v17 = vshrl.u32 %v11558_v58, 16 }
 0x154   : > { %v9607_v48 = vpop.f32.mrb[17].mxu0  ;;  %9884 = vmatmul.mubr.msk.bf16.gmra.mrb[124].mxu1 %vm614_vm2, %v1644_v40  ;;  %v1276_v40 = vor.u32 %v1275_v3, %v1272_v7  ;;  %v1647_v43 = vsel %vm1605_vm5, %v1645_v54, %v1646_v35  ;;  %v14233_v54 = vshrl.u32 %v11498_v46, 16 }
 0x155   : > { %v751_v39 = vpop.f32.mrb[18].mxu0  ;;  %9887 = vmatprep.mubr.msk.bf16.mxu1 %vm11148_vm0, %v14213_v0  ;;  %v14204_v48 = vshll.u32 %v11558_v58, 16  ;;  %v1280_v7 = vrot.slane %v14203_v17, 1 }
 0x156   : > { %v9608_v51 = vpop.f32.mrb[19].mxu0 }
 0x157   : > { %v1025_v16 = vpop.f32.mrb[20].mxu1 }
 0x158   : > { %9806 = vmatmul.mubr.msk.bf16.gmra.mrb[124].mxu0 %vm614_vm2, %v1269_v63  ;;  %v9693_v42 = vpop.f32.mrb[21].mxu1  ;;  %v11902_v51 = vadd.f32 %v1025_v16, %v748_v57  ;;  %v1283_v57 = vrot.slane %v14204_v48, 2 }
 0x159   : > { %9809 = vmatprep.mubr.msk.bf16.mxu0 %vm11148_vm0, %v14213_v0  ;;  %v1028_v28 = vpop.f32.mrb[22].mxu1  ;;  %v1277_v42 = vsel %vm1165_vm4, %v1268_v37, %v1276_v40 }
 0x15a   : > { %v9694_v27 = vpop.f32.mrb[23].mxu1  ;;  %v11905_v45 = vadd.f32 %v1028_v28, %v751_v39  ;;  %v1648_v39 = vor.u32 %v1646_v35, %v14233_v54  ;;  %v1649_v28 = vrot.slane %v1257_v25, 1 }
 0x15b   : > { %v756_v8 = vpop.f32.mrb[20].mxu0  ;;  %v14205_v27 = vshrl.u32 %v11573_v61, 16 }
 0x15c   : > { %v9611_v63 = vpop.f32.mrb[21].mxu0  ;;  %9888 = vmatmul.mubr.msk.bf16.gmra.mrb[128].mxu1 %vm614_vm2, %v1647_v43  ;;  %v1284_v43 = vor.u32 %v1283_v57, %v1280_v7  ;;  %v1650_v46 = vsel %vm1605_vm5, %v1648_v39, %v1649_v28  ;;  %v14235_v39 = vshrl.u32 %v11513_v49, 16 }
 0x15d   : > { %v759_v18 = vpop.f32.mrb[22].mxu0  ;;  %9891 = vmatprep.mubr.msk.bf16.mxu1 %vm11148_vm0, %v14213_v0  ;;  %v14206_v63 = vshll.u32 %v11573_v61, 16  ;;  %v1288_v7 = vrot.slane %v14205_v27, 1 }
 0x15e   : > { %v9612_v3 = vpop.f32.mrb[23].mxu0 }
 0x15f   : > { %v1033_v16 = vpop.f32.mrb[24].mxu1 }
 0x160   : > { %9810 = vmatmul.mubr.msk.bf16.gmra.mrb[128].mxu0 %vm614_vm2, %v1277_v42  ;;  %v9697_v37 = vpop.f32.mrb[25].mxu1  ;;  %v11924_v3 = vadd.f32 %v1033_v16, %v756_v8  ;;  %v1291_v8 = vrot.slane %v14206_v63, 2 }
 0x161   : > { %9813 = vmatprep.mubr.msk.bf16.mxu0 %vm11148_vm0, %v14213_v0  ;;  %v1036_v17 = vpop.f32.mrb[26].mxu1  ;;  %v1285_v37 = vsel %vm1165_vm4, %v1276_v40, %v1284_v43 }
 0x162   : > { %v9698_v54 = vpop.f32.mrb[27].mxu1  ;;  %v11927_v25 = vadd.f32 %v1036_v17, %v759_v18  ;;  %v1651_v18 = vor.u32 %v1649_v28, %v14235_v39  ;;  %v14236_v17 = vshll.u32 %v11528_v52, 16 }
 0x163   : > { %v764_v35 = vpop.f32.mrb[24].mxu0  ;;  %v1292_v54 = vor.u32 %v1291_v8, %v1288_v7 }
 0x164   : > { %14234 = vst [vmem:[#allocation20_spill] sm:$0xff] %v11927_v25  ;;  %v9615_v42 = vpop.f32.mrb[25].mxu0  ;;  %9892 = vmatmul.mubr.msk.bf16.gmra.mrb[132].mxu1 %vm614_vm2, %v1650_v46  ;;  %v1652_v16 = vrot.slane %v14236_v17, 1 }
 0x165   : > { %v767_v48 = vpop.f32.mrb[26].mxu0  ;;  %9895 = vmatprep.mubr.msk.bf16.mxu1 %vm11148_vm0, %v14213_v0  ;;  %v14207_v42 = vshrl.u32 %v11588_v1, 16 }
 0x166   : > { %v9616_v57 = vpop.f32.mrb[27].mxu0  ;;  %v1653_v49 = vsel %vm1605_vm5, %v1651_v18, %v1652_v16  ;;  %v14238_v18 = vshrl.u32 %v11528_v52, 16 }
 0x167   : > { %v1041_v46 = vpop.f32.mrb[28].mxu1  ;;  %v14208_v57 = vshll.u32 %v11588_v1, 16  ;;  %v1296_v7 = vrot.slane %v14207_v42, 1 }
 0x168   : > { %9814 = vmatmul.mubr.msk.bf16.gmra.mrb[132].mxu0 %vm614_vm2, %v1285_v37  ;;  %v9701_v40 = vpop.f32.mrb[29].mxu1  ;;  %v11946_v27 = vadd.f32 %v1041_v46, %v764_v35 }
 0x169   : > { %9817 = vmatprep.mubr.msk.bf16.mxu0 %vm11148_vm0, %v14213_v0  ;;  %v1044_v63 = vpop.f32.mrb[30].mxu1  ;;  %v1293_v40 = vsel %vm1165_vm4, %v1284_v43, %v1292_v54  ;;  %v1299_v35 = vrot.slane %v14208_v57, 2 }
 0x16a   : > { %v9702_v39 = vpop.f32.mrb[31].mxu1  ;;  %v11949_v17 = vadd.f32 %v1044_v63, %v767_v48  ;;  %v1654_v48 = vor.u32 %v1652_v16, %v14238_v18  ;;  %v14239_v63 = vshll.u32 %v11543_v55, 16 }
 0x16b   : > { %v772_v28 = vpop.f32.mrb[28].mxu0  ;;  %v1300_v39 = vor.u32 %v1299_v35, %v1296_v7 }
 0x16c   : > { %14237 = vst [vmem:[#allocation21_spill] sm:$0xff] %v11949_v17  ;;  %v9619_v37 = vpop.f32.mrb[29].mxu0  ;;  %9896 = vmatmul.mubr.msk.bf16.gmra.mrb[136].mxu1 %vm614_vm2, %v1653_v49  ;;  %v1655_v46 = vrot.slane %v14239_v63, 1 }
 0x16d   : > { %v775_v25 = vpop.f32.mrb[30].mxu0  ;;  %9899 = vmatprep.mubr.msk.bf16.mxu1 %vm11148_vm0, %v14213_v0  ;;  %v14209_v37 = vshrl.u32 %v11603_v5, 16 }
 0x16e   : > { %v9620_v8 = vpop.f32.mrb[31].mxu0  ;;  %v1656_v52 = vsel %vm1605_vm5, %v1654_v48, %v1655_v46  ;;  %v14241_v48 = vshrl.u32 %v11543_v55, 16 }
 0x16f   : > { %v1049_v49 = vpop.f32.mrb[32].mxu1  ;;  %v14210_v8 = vshll.u32 %v11603_v5, 16  ;;  %v1304_v7 = vrot.slane %v14209_v37, 1 }
 0x170   : > { %9818 = vmatmul.mubr.msk.bf16.gmra.mrb[136].mxu0 %vm614_vm2, %v1293_v40  ;;  %v9705_v43 = vpop.f32.mrb[33].mxu1  ;;  %v11968_v42 = vadd.f32 %v1049_v49, %v772_v28 }
 0x171   : > { %9821 = vmatprep.mubr.msk.bf16.mxu0 %vm11148_vm0, %v14213_v0  ;;  %v1052_v57 = vpop.f32.mrb[34].mxu1  ;;  %v1301_v43 = vsel %vm1165_vm4, %v1292_v54, %v1300_v39  ;;  %v1307_v28 = vrot.slane %v14210_v8, 2 }
 0x172   : > { %v9706_v18 = vpop.f32.mrb[35].mxu1  ;;  %v11971_v63 = vadd.f32 %v1052_v57, %v775_v25  ;;  %v1657_v25 = vor.u32 %v1655_v46, %v14241_v48  ;;  %v14242_v57 = vshll.u32 %v11558_v58, 16 }
 0x173   : > { %v780_v16 = vpop.f32.mrb[32].mxu0  ;;  %v1308_v18 = vor.u32 %v1307_v28, %v1304_v7 }
 0x174   : > { %14240 = vst [vmem:[#allocation22_spill] sm:$0xff] %v11971_v63  ;;  %v9623_v40 = vpop.f32.mrb[33].mxu0  ;;  %9900 = vmatmul.mubr.msk.bf16.gmra.mrb[140].mxu1 %vm614_vm2, %v1656_v52  ;;  %v1658_v49 = vrot.slane %v14242_v57, 1 }
 0x175   : > { %v783_v17 = vpop.f32.mrb[34].mxu0  ;;  %9903 = vmatprep.mubr.msk.bf16.mxu1 %vm11148_vm0, %v14213_v0  ;;  %v14211_v40 = vshrl.u32 %v11618_v10, 16 }
 0x176   : > { %v9624_v35 = vpop.f32.mrb[35].mxu0  ;;  %v1659_v55 = vsel %vm1605_vm5, %v1657_v25, %v1658_v49  ;;  %v14244_v25 = vshrl.u32 %v11558_v58, 16 }
 0x177   : > { %v1057_v52 = vpop.f32.mrb[36].mxu1  ;;  %v14212_v35 = vshll.u32 %v11618_v10, 16  ;;  %v1312_v7 = vrot.slane %v14211_v40, 1 }
 0x178   : > { %9822 = vmatmul.mubr.msk.bf16.gmra.mrb[140].mxu0 %vm614_vm2, %v1301_v43  ;;  %v9709_v54 = vpop.f32.mrb[37].mxu1  ;;  %v11990_v37 = vadd.f32 %v1057_v52, %v780_v16 }
 0x179   : > { %9825 = vmatprep.mubr.msk.bf16.mxu0 %vm11148_vm0, %v14213_v0  ;;  %v1060_v8 = vpop.f32.mrb[38].mxu1  ;;  %v1309_v54 = vsel %vm1165_vm4, %v1300_v39, %v1308_v18  ;;  %v1315_v16 = vrot.slane %v14212_v35, 2 }
 0x17a   : > { %v9710_v48 = vpop.f32.mrb[39].mxu1  ;;  %v11993_v57 = vadd.f32 %v1060_v8, %v783_v17  ;;  %v1660_v17 = vor.u32 %v1658_v49, %v14244_v25  ;;  %v14245_v8 = vshll.u32 %v11573_v61, 16 }
 0x17b   : > { %v788_v46 = vpop.f32.mrb[36].mxu0  ;;  %v1316_v48 = vor.u32 %v1315_v16, %v1312_v7 }
 0x17c   : > { %14243 = vst [vmem:[#allocation23_spill] sm:$0xff] %v11993_v57  ;;  %v9627_v43 = vpop.f32.mrb[37].mxu0  ;;  %9904 = vmatmul.mubr.msk.bf16.gmra.mrb[144].mxu1 %vm614_vm2, %v1659_v55  ;;  %v1661_v52 = vrot.slane %v14245_v8, 1  ;;  %v12020_v57 = vld [vmem:[%s11344_s19 + $0xa8] ss:$0 sps:$4 sm:$0xff]  }
 0x17d   : > { %v791_v63 = vpop.f32.mrb[38].mxu0  ;;  %9907 = vmatprep.mubr.msk.bf16.mxu1 %vm11148_vm0, %v14213_v0  ;;  %v1319_v43 = vshrl.u32 %v11635_v14, 16 }
 0x17e   : > { %v9628_v28 = vpop.f32.mrb[39].mxu0  ;;  %v1662_v49 = vsel %vm1605_vm5, %v1660_v17, %v1661_v52  ;;  %v14249_v17 = vshrl.u32 %v11573_v61, 16 }
 0x17f   : > { %v1065_v55 = vpop.f32.mrb[40].mxu1  ;;  %v1322_v28 = vshll.u32 %v11635_v14, 16  ;;  %v1321_v7 = vrot.slane %v1319_v43, 1  ;;  %v1328_v43 = vshrl.u32 %v12020_v57, 16 }
 0x180   : > { %9826 = vmatmul.mubr.msk.bf16.gmra.mrb[144].mxu0 %vm614_vm2, %v1309_v54  ;;  %v9713_v39 = vpop.f32.mrb[41].mxu1  ;;  %v12012_v40 = vadd.f32 %v1065_v55, %v788_v46  ;;  %v14248_v46 = vmov 0.0   ;;  %v1663_v55 = vor.u32 %v1661_v52, %v14249_v17 }
 0x181   : > { %9829 = vmatprep.mubr.msk.bf16.mxu0 %vm11148_vm0, %v14213_v0  ;;  %v1068_v58 = vpop.f32.mrb[42].mxu1  ;;  %v1317_v0 = vsel %vm1165_vm4, %v1308_v18, %v1316_v48  ;;  %v1324_v16 = vrot.slane %v1322_v28, 2  ;;  %v1331_v28 = vshll.u32 %v12020_v57, 16  ;;  %4480 = vst.msk [vmem:[#allocation3] sm:$0xff] %vm4437_vm9, %v14248_v46  ;;  %4481 = vst.msk [vmem:[#allocation3 + $0x8] sm:$0xff] %vm4437_vm9, %v14248_v46 }
 0x182   : > { %14246 = vst [vmem:[#allocation24_spill] sm:$0xff] %v12012_v40  ;;  %v9714_v8 = vpop.f32.mrb[43].mxu1  ;;  %v12015_v35 = vadd.f32 %v1068_v58, %v791_v63  ;;  %v14250_v63 = vshll.u32 %v11588_v1, 16  ;;  %4482 = vst.msk [vmem:[#allocation3 + $0x10] sm:$0xff] %vm4437_vm9, %v14248_v46 }
 0x183   : > { %v796_v25 = vpop.f32.mrb[40].mxu0  ;;  %v1325_v18 = vor.u32 %v1324_v16, %v1321_v7  ;;  %v1330_v7 = vrot.slane %v1328_v43, 1  ;;  %v1333_v16 = vrot.slane %v1331_v28, 2  ;;  %4483 = vst.msk [vmem:[#allocation3 + $0x18] sm:$0xff] %vm4437_vm9, %v14248_v46  ;;  %4484 = vst.msk [vmem:[#allocation3 + $0x20] sm:$0xff] %vm4437_vm9, %v14248_v46 }
 0x184   : > { %14247 = vst [vmem:[#allocation25_spill] sm:$0xff] %v12015_v35  ;;  %v9631_v54 = vpop.f32.mrb[41].mxu0  ;;  %9908 = vmatmul.mubr.msk.bf16.gmra.mrb[148].mxu1 %vm614_vm2, %v1662_v49  ;;  %v1664_v58 = vrot.slane %v14250_v63, 1  ;;  %4485 = vst.msk [vmem:[#allocation3 + $0x28] sm:$0xff] %vm4437_vm9, %v14248_v46 }
 0x185   : > { %v799_v39 = vpop.f32.mrb[42].mxu0  ;;  %9911 = vmatprep.mubr.msk.bf16.mxu1 %vm11148_vm0, %v14248_v46  ;;  %4486 = vst.msk [vmem:[#allocation3 + $0x30] sm:$0xff] %vm4437_vm9, %v14248_v46  ;;  %4487 = vst.msk [vmem:[#allocation3 + $0x38] sm:$0xff] %vm4437_vm9, %v14248_v46 }
 0x186   : > { %v9632_v14 = vpop.f32.mrb[43].mxu0  ;;  %v1665_v61 = vsel %vm1605_vm5, %v1663_v55, %v1664_v58  ;;  %v14252_v55 = vshll.u32 %v11603_v5, 16  ;;  %4488 = vst.msk [vmem:[#allocation3 + $0x40] sm:$0xff] %vm4437_vm9, %v14248_v46  ;;  %4489 = vst.msk [vmem:[#allocation3 + $0x48] sm:$0xff] %vm4437_vm9, %v14248_v46 }
 0x187   : > { %v1073_v8 = vpop.f32.mrb[44].mxu1  ;;  %4490 = vst.msk [vmem:[#allocation3 + $0x50] sm:$0xff] %vm4437_vm9, %v14248_v46  ;;  %4491 = vst.msk [vmem:[#allocation3 + $0x58] sm:$0xff] %vm4437_vm9, %v14248_v46 }
 0x188   : > { %9830 = vmatmul.mubr.msk.bf16.gmra.mrb[148].mxu0 %vm614_vm2, %v1317_v0  ;;  %v9717_v49 = vpop.f32.mrb[45].mxu1  ;;  %v12033_v54 = vadd.f32 %v1073_v8, %v796_v25  ;;  %v14251_v25 = vshrl.u32 %v11588_v1, 16  ;;  %4492 = vst.msk [vmem:[#allocation3 + $0x60] sm:$0xff] %vm4437_vm9, %v14248_v46  ;;  %4493 = vst.msk [vmem:[#allocation3 + $0x68] sm:$0xff] %vm4437_vm9, %v14248_v46 }
 0x189   : > { %9833 = vmatprep.mubr.msk.bf16.mxu0 %vm11148_vm0, %v14248_v46  ;;  %v1076_v14 = vpop.f32.mrb[46].mxu1  ;;  %v1326_v49 = vsel %vm1165_vm4, %v1316_v48, %v1325_v18  ;;  %v1334_v48 = vor.u32 %v1333_v16, %v1330_v7  ;;  %v14256_v16 = vshll.u32 %v11618_v10, 16  ;;  %4494 = vst.msk [vmem:[#allocation3 + $0x70] sm:$0xff] %vm4437_vm9, %v14248_v46  ;;  %4495 = vst.msk [vmem:[#allocation3 + $0x78] sm:$0xff] %vm4437_vm9, %v14248_v46 }
 0x18a   : > { %v9718_v17 = vpop.f32.mrb[47].mxu1  ;;  %v12036_v63 = vadd.f32 %v1076_v14, %v799_v39  ;;  %v1666_v8 = vor.u32 %v1664_v58, %v14251_v25  ;;  %4496 = vst.msk [vmem:[#allocation3 + $0x80] sm:$0xff] %vm4437_vm9, %v14248_v46  ;;  %4497 = vst.msk [vmem:[#allocation3 + $0x88] sm:$0xff] %vm4437_vm9, %v14248_v46 }
 0x18b   : > { %v804_v52 = vpop.f32.mrb[44].mxu0  ;;  %v1667_v17 = vrot.slane %v14252_v55, 1  ;;  %4499 = vst.msk [vmem:[#allocation3 + $0x90] sm:$0x1] %vm4498_vm10, %v14248_v46 }
 0x18c   : > { %v9635_v0 = vpop.f32.mrb[45].mxu0  ;;  %9912 = vmatmul.mubr.msk.bf16.gmra.mrb[152].mxu1 %vm614_vm2, %v1665_v61 }
 0x18d   : > { %v807_v35 = vpop.f32.mrb[46].mxu0  ;;  %9915 = vmatprep.mubr.msk.bf16.mxu1 %vm11148_vm0, %v14248_v46  ;;  %v1668_v28 = vsel %vm1605_vm5, %v1666_v8, %v1667_v17  ;;  %v1670_v8 = vrot.slane %v14256_v16, 1 }
 0x18e   : > { %v9636_v40 = vpop.f32.mrb[47].mxu0 }
 0x18f   : > { %v1081_v39 = vpop.f32.mrb[48].mxu1 }
 0x190   : > { %9834 = vmatmul.mubr.msk.bf16.gmra.mrb[152].mxu0 %vm614_vm2, %v1326_v49  ;;  %v9721_v14 = vpop.f32.mrb[49].mxu1  ;;  %v12049_v43 = vadd.f32 %v1081_v39, %v804_v52  ;;  %v1335_v49 = vsel %vm1165_vm4, %v1325_v18, %v1334_v48  ;;  %v14255_v52 = vshrl.u32 %v11603_v5, 16  ;;  %v12063_v39 = vld [vmem:[%s11344_s19 + $0xa0] ss:$0 sps:$4 sm:$0x77]  }
 0x191   : > { %9837 = vmatprep.mubr.msk.bf16.mxu0 %vm11148_vm0, %v14248_v46  ;;  %v1084_v40 = vpop.f32.mrb[50].mxu1  ;;  %v1674_v5 = vshll.u32 %v12063_v39, 16 }
 0x192   : > { %14253 = vst [vmem:[#allocation26_spill] sm:$0xff] %v12049_v43  ;;  %v9722_v1 = vpop.f32.mrb[51].mxu1  ;;  %v12052_v58 = vadd.f32 %v1084_v40, %v807_v35  ;;  %v1669_v7 = vor.u32 %v1667_v17, %v14255_v52  ;;  %v1947_v17 = vld [vmem:[%s11344_s19 + $0x8] sm:$0xc] }
 0x193   : > { %v812_v61 = vpop.f32.mrb[48].mxu0 }
 0x194   : > { %14254 = vst [vmem:[#allocation27_spill] sm:$0xff] %v12052_v58  ;;  %v9639_v0 = vpop.f32.mrb[49].mxu0  ;;  %9916 = vmatmul.mubr.msk.bf16.gmra.mrb[156].mxu1 %vm614_vm2, %v1668_v28  ;;  %v1671_v28 = vsel %vm1605_vm5, %v1669_v7, %v1670_v8 }
 0x195   : > { %v815_v25 = vpop.f32.mrb[50].mxu0  ;;  %9919 = vmatprep.mubr.msk.bf16.mxu1 %vm11148_vm0, %v14248_v46 }
 0x196   : > { %v9640_v55 = vpop.f32.mrb[51].mxu0 }
 0x197   : > { %v1089_v35 = vpop.f32.mrb[52].mxu1 }
 0x198   : > { %9838 = vmatmul.mubr.msk.bf16.gmra.mrb[156].mxu0 %vm614_vm2, %v1335_v49  ;;  %v9725_v14 = vpop.f32.mrb[53].mxu1  ;;  %v12068_v18 = vadd.f32 %v1089_v35, %v812_v61  ;;  %v10975_v49 = vld [vmem:[%s11344_s19 + $0xc] sm:$0xf]  ;;  %v14259_v61 = vshrl.u32 %v11618_v10, 16  ;;  %v1676_v35 = vrot.slane %v1674_v5, 1 }
 0x199   : > { %9841 = vmatprep.mubr.msk.bf16.mxu0 %vm11148_vm0, %v14248_v46  ;;  %v1092_v40 = vpop.f32.mrb[54].mxu1  ;;  %v8764_v14 = vcombine.low %v1947_v17, %v10975_v49 }
 0x19a   : > { %14257 = vst [vmem:[#allocation28_spill] sm:$0xff] %v12068_v18  ;;  %v9726_v0 = vpop.f32.mrb[55].mxu1  ;;  %v12073_v55 = vadd.f32 %v1092_v40, %v815_v25  ;;  %v1672_v7 = vor.u32 %v1670_v8, %v14259_v61  ;;  %v1955_v40 = vrot.slane %v11662_v22, 2  ;;  %v460_v61 = vld [vmem:[%s11344_s19] sm:$0xe] }
 0x19b   : > { %v820_v1 = vpop.f32.mrb[52].mxu0  ;;  %v1954_v25 = vrot.slane %v8764_v14, 2 }
 0x19c   : > { %14258 = vst [vmem:[#allocation29_spill] sm:$0xff] %v12073_v55  ;;  %v9643_v52 = vpop.f32.mrb[53].mxu0  ;;  %9920 = vmatmul.mubr.msk.bf16.gmra.mrb[160].mxu1 %vm614_vm2, %v1671_v28  ;;  %v1677_v17 = vsel %vm1605_vm5, %v1672_v7, %v1676_v35 }
 0x19d   : > { %v823_v16 = vpop.f32.mrb[54].mxu0  ;;  %9923 = vmatprep.mubr.msk.bf16.mxu1 %vm11148_vm0, %v14248_v46  ;;  %v1956_v22 = vsel %vm1953_vm6, %v1954_v25, %v1955_v40  ;;  %v1957_v25 = vrot.slane %v11679_v36, 2 }
 0x19e   : > { %v9644_v58 = vpop.f32.mrb[55].mxu0 }
 0x19f   : > { %v1097_v18 = vpop.f32.mrb[56].mxu1 }
 0x1a0   : > { %9842 = vmatmul.mubr.msk.bf16.gmra.mrb[160].mxu0 %vm614_vm2, %v1334_v48  ;;  %v9729_v0 = vpop.f32.mrb[57].mxu1  ;;  %v12085_v28 = vadd.f32 %v1097_v18, %v820_v1  ;;  %v8808_v48 = vld [vmem:[%s14176_s1 + $0x6] sm:$0x1]  ;;  %v1678_v18 = vshrl.u32 %v12063_v39, 16 }
 0x1a1   : > { %9933 = vmatprep.mubr.msk.bf16.mxu0 %vm11148_vm0, %v14248_v46  ;;  %v1100_v58 = vpop.f32.mrb[58].mxu1  ;;  %v2736_v14 = vsel %vm678_vm1, %v8808_v48, 0 }
 0x1a2   : > { %14260 = vst [vmem:[#allocation30_spill] sm:$0xff] %v12085_v28  ;;  %v9730_v8 = vpop.f32.mrb[59].mxu1  ;;  %v12091_v5 = vadd.f32 %v1100_v58, %v823_v16  ;;  %v1680_v0 = vor.u32 %v1678_v18, %v1676_v35  ;;  %v1958_v35 = vsel %vm1953_vm6, %v1955_v40, %v1957_v25 }
 0x1a3   : > { %v828_v10 = vpop.f32.mrb[56].mxu0  ;;  %v10976_v8 = vld [vmem:[%s11344_s19 + $0x4] sm:$0xf] }
 0x1a4   : > { %14261 = vst [vmem:[#allocation31_spill] sm:$0xff] %v12091_v5  ;;  %v9647_v52 = vpop.f32.mrb[57].mxu0  ;;  %9924 = vmatmul.mubr.msk.bf16.gmra.mrb[164].mxu1 %vm614_vm2, %v1677_v17  ;;  %v8786_v48 = vcombine.low %v460_v61, %v10976_v8 }
 0x1a5   : > { %v831_v49 = vpop.f32.mrb[58].mxu0  ;;  %9927 = vmatprep.mubr.msk.bf16.mxu1 %vm11148_vm0, %v14248_v46 }
 0x1a6   : > { %v9648_v1 = vpop.f32.mrb[59].mxu0  ;;  %v2264_v36 = vrot.slane %v8786_v48, 1 }
 0x1a7   : > { %v1105_v16 = vpop.f32.mrb[60].mxu1 }
 0x1a8   : > { %9934 = vmatmul.mubr.msk.bf16.vlgmr.msra.gmra.mrb[164].mxu0 %vm614_vm2, %v1956_v22  ;;  %v9733_v7 = vpop.f32.mrb[61].mxu1  ;;  %v12104_v58 = vadd.f32 %v1105_v16, %v828_v10  ;;  %v2265_v10 = vrot.slane %v11403_v24, 1 }
 0x1a9   : > { %10104 = vmatpush3.bf16.msra.mxu0 %v2736_v14  ;;  %9937 = vmatprep.mubr.msk.bf16.mxu0 %vm11148_vm0, %v14248_v46  ;;  %v1108_v17 = vpop.f32.mrb[62].mxu1 }
 0x1aa   : > { %14262 = vst [vmem:[#allocation32_spill] sm:$0xff] %v12104_v58  ;;  %10275 = vmatprep.subr.bf16.mxu0 %v14248_v46  ;;  %v9734_v1 = vpop.f32.mrb[63].mxu1  ;;  %v12108_v5 = vadd.f32 %v1108_v17, %v831_v49  ;;  %v1959_v49 = vrot.slane %v11700_v9, 2 }
 0x1ab   : > { %v836_v52 = vpop.f32.mrb[60].mxu0 }
 0x1ac   : > { %14263 = vst [vmem:[#allocation33_spill] sm:$0xff] %v12108_v5  ;;  %v9651_v22 = vpop.f32.mrb[61].mxu0  ;;  %9928 = vmatmul.mubr.msk.bf16.gmra.mrb[168].mxu1 %vm614_vm2, %v1680_v0  ;;  %v2266_v0 = vsel %vm572_vm3, %v2264_v36, %v2265_v10 }
 0x1ad   : > { %v839_v14 = vpop.f32.mrb[62].mxu0  ;;  %10019 = vmatprep.mubr.msk.bf16.mxu1 %vm11148_vm0, %v14248_v46  ;;  %v1960_v22 = vsel %vm1953_vm6, %v1957_v25, %v1959_v49  ;;  %v2267_v25 = vsel %vm572_vm3, %v2265_v10, %v11367_v11  ;;  %v10978_v11 = vld [vmem:[%s11344_s19 + $0x30] sm:$0xff]  }
 0x1ae   : > { %v9652_v18 = vpop.f32.mrb[63].mxu0  ;;  %v1963_v10 = vrot.slane %v10978_v11, 2 }
 0x1af   : > { %v1113_v61 = vpop.f32.mrb[64].mxu1  ;;  %v10977_v18 = vld [vmem:[%s11344_s19 + $0x28] sm:$0xff]  }
 0x1b0   : > { %9938 = vmatmul.mubr.msk.bf16.gmra.mrb[168].mxu0 %vm614_vm2, %v1958_v35  ;;  %v9737_v16 = vpop.f32.mrb[65].mxu1  ;;  %v12119_v7 = vadd.f32 %v1113_v61, %v836_v52 }
 0x1b1   : > { %9941 = vmatprep.mubr.msk.bf16.mxu0 %vm11148_vm0, %v14248_v46  ;;  %v1116_v40 = vpop.f32.mrb[66].mxu1 }
 0x1b2   : > { %14264 = vst [vmem:[#allocation34_spill] sm:$0xff] %v12119_v7  ;;  %v9738_v8 = vpop.f32.mrb[67].mxu1  ;;  %v12122_v48 = vadd.f32 %v1116_v40, %v839_v14  ;;  %v1961_v14 = vrot.slane %v10977_v18, 2 }
 0x1b3   : > { %v844_v17 = vpop.f32.mrb[64].mxu0 }
 0x1b4   : > { %14265 = vst [vmem:[#allocation35_spill] sm:$0xff] %v12122_v48  ;;  %v9655_v24 = vpop.f32.mrb[65].mxu0  ;;  %10020 = vmatmul.mubr.msk.bf16.vlgmr.msra.gmra.mrb[172].mxu1 %vm614_vm2, %v2266_v0 }
 0x1b5   : > { %v847_v1 = vpop.f32.mrb[66].mxu0  ;;  %10023 = vmatprep.mubr.msk.bf16.mxu1 %vm11148_vm0, %v14248_v46 }
 0x1b6   : > { %v9656_v35 = vpop.f32.mrb[67].mxu0 }
 0x1b7   : > { %v1121_v9 = vpop.f32.mrb[68].mxu1 }
 0x1b8   : > { %9942 = vmatmul.mubr.msk.bf16.gmra.mrb[172].mxu0 %vm614_vm2, %v1960_v22  ;;  %v9741_v52 = vpop.f32.mrb[69].mxu1  ;;  %v12132_v36 = vadd.f32 %v1121_v9, %v844_v17  ;;  %v1962_v22 = vsel %vm1953_vm6, %v1959_v49, %v1961_v14 }
 0x1b9   : > { %9945 = vmatprep.mubr.msk.bf16.mxu0 %vm11148_vm0, %v14248_v46  ;;  %v1124_v61 = vpop.f32.mrb[70].mxu1 }
 0x1ba   : > { %14266 = vst [vmem:[#allocation36_spill] sm:$0xff] %v12132_v36  ;;  %v9742_v40 = vpop.f32.mrb[71].mxu1  ;;  %v12136_v0 = vadd.f32 %v1124_v61, %v847_v1 }
 0x1bb   : > { %v852_v16 = vpop.f32.mrb[68].mxu0 }
 0x1bc   : > { %14267 = vst [vmem:[#allocation37_spill] sm:$0xff] %v12136_v0  ;;  %v9659_v8 = vpop.f32.mrb[69].mxu0  ;;  %10024 = vmatmul.mubr.msk.bf16.gmra.mrb[176].mxu1 %vm614_vm2, %v2267_v25 }
 0x1bd   : > { %v855_v24 = vpop.f32.mrb[70].mxu0  ;;  %10027 = vmatprep.mubr.msk.bf16.mxu1 %vm11148_vm0, %v14248_v46  ;;  %v1964_v8 = vsel %vm1953_vm6, %v1961_v14, %v1963_v10 }
 0x1be   : > { %v9660_v35 = vpop.f32.mrb[71].mxu0 }
 0x1bf   : > { %v1129_v17 = vpop.f32.mrb[72].mxu1 }
 0x1c0   : > { %9946 = vmatmul.mubr.msk.bf16.gmra.mrb[176].mxu0 %vm614_vm2, %v1962_v22  ;;  %v9745_v9 = vpop.f32.mrb[73].mxu1  ;;  %v12146_v1 = vadd.f32 %v1129_v17, %v852_v16 }
 0x1c1   : > { %9949 = vmatprep.mubr.msk.bf16.mxu0 %vm11148_vm0, %v14248_v46  ;;  %v1132_v52 = vpop.f32.mrb[74].mxu1 }
 0x1c2   : > { %14268 = vst [vmem:[#allocation38_spill] sm:$0xff] %v12146_v1  ;;  %v9746_v61 = vpop.f32.mrb[75].mxu1  ;;  %v12148_v49 = vadd.f32 %v1132_v52, %v855_v24  ;;  %v10979_v24 = vld [vmem:[%s11344_s19 + $0x38] sm:$0xff]  }
 0x1c3   : > { %v860_v18 = vpop.f32.mrb[72].mxu0  ;;  %v1965_v17 = vrot.slane %v10979_v24, 2 }
 0x1c4   : > { %14269 = vst [vmem:[#allocation39_spill] sm:$0xff] %v12148_v49  ;;  %v9663_v25 = vpop.f32.mrb[73].mxu0  ;;  %10028 = vmatmul.mubr.msk.bf16.gmra.mrb[180].mxu1 %vm614_vm2, %v11393_v21 }
 0x1c5   : > { %v863_v40 = vpop.f32.mrb[74].mxu0  ;;  %10031 = vmatprep.mubr.msk.bf16.mxu1 %vm11148_vm0, %v14248_v46 }
 0x1c6   : > { %v9664_v22 = vpop.f32.mrb[75].mxu0 }
 0x1c7   : > { %v1137_v16 = vpop.f32.mrb[76].mxu1 }
 0x1c8   : > { %9950 = vmatmul.mubr.msk.bf16.gmra.mrb[180].mxu0 %vm614_vm2, %v1964_v8  ;;  %v9749_v35 = vpop.f32.mrb[77].mxu1  ;;  %v12159_v9 = vadd.f32 %v1137_v16, %v860_v18  ;;  %v1966_v8 = vsel %vm1953_vm6, %v1963_v10, %v1965_v17  ;;  %v8851_v18 = vld [vmem:[%s14176_s1 + $0x7] sm:$0x1] }
 0x1c9   : > { %9953 = vmatprep.mubr.msk.bf16.mxu0 %vm11148_vm0, %v14248_v46  ;;  %v1140_v11 = vpop.f32.mrb[78].mxu1  ;;  %v3381_v16 = vsel %vm678_vm1, %v8851_v18, 0 }
 0x1ca   : > { %14270 = vst [vmem:[#allocation40_spill] sm:$0xff] %v12159_v9  ;;  %v9750_v21 = vpop.f32.mrb[79].mxu1  ;;  %v12161_v14 = vadd.f32 %v1140_v11, %v863_v40  ;;  %10190 = vmatpush3.bf16.msra.mxu1 %v3381_v16 }
 0x1cb   : > { %v868_v52 = vpop.f32.mrb[76].mxu0 }
 0x1cc   : > { %14271 = vst [vmem:[#allocation41_spill] sm:$0xff] %v12161_v14  ;;  %v9667_v61 = vpop.f32.mrb[77].mxu0  ;;  %10032 = vmatmul.mubr.msk.bf16.gmra.mrb[184].mxu1 %vm614_vm2, %v11408_v26  ;;  %v10980_v26 = vld [vmem:[%s11344_s19 + $0x40] sm:$0xff]  }
 0x1cd   : > { %v871_v25 = vpop.f32.mrb[78].mxu0  ;;  %10035 = vmatprep.mubr.msk.bf16.mxu1 %vm11148_vm0, %v14248_v46  ;;  %v1967_v10 = vrot.slane %v10980_v26, 2 }
 0x1ce   : > { %v9668_v22 = vpop.f32.mrb[79].mxu0 }
 0x1cf   : > { %v1145_v40 = vpop.f32.mrb[80].mxu1 }
 0x1d0   : > { %9954 = vmatmul.mubr.msk.bf16.gmra.mrb[184].mxu0 %vm614_vm2, %v1966_v8  ;;  %v9753_v35 = vpop.f32.mrb[81].mxu1  ;;  %v12176_v24 = vadd.f32 %v1145_v40, %v868_v52  ;;  %v1968_v8 = vsel %vm1953_vm6, %v1965_v17, %v1967_v10 }
 0x1d1   : > { %9957 = vmatprep.mubr.msk.bf16.mxu0 %vm11148_vm0, %v14248_v46  ;;  %v1148_v11 = vpop.f32.mrb[82].mxu1 }
 0x1d2   : > { %14272 = vst [vmem:[#allocation42_spill] sm:$0xff] %v12176_v24  ;;  %v9754_v61 = vpop.f32.mrb[83].mxu1  ;;  %v12178_v22 = vadd.f32 %v1148_v11, %v871_v25  ;;  %v10981_v25 = vld [vmem:[%s11344_s19 + $0x48] sm:$0xff]  }
 0x1d3   : > { %v1436_v21 = vpop.f32.mrb[80].mxu0 }
 0x1d4   : > { %14273 = vst [vmem:[#allocation43_spill] sm:$0xff] %v12178_v22  ;;  %v9763_v14 = vpop.f32.mrb[81].mxu0  ;;  %10036 = vmatmul.mubr.msk.bf16.gmra.mrb[188].mxu1 %vm614_vm2, %v11425_v30 }
 0x1d5   : > { %v1439_v18 = vpop.f32.mrb[82].mxu0  ;;  %10039 = vmatprep.mubr.msk.bf16.mxu1 %vm11148_vm0, %v14248_v46  ;;  %v1969_v14 = vrot.slane %v10981_v25, 2 }
 0x1d6   : > { %v9764_v16 = vpop.f32.mrb[83].mxu0 }
 0x1d7   : > { %v1153_v52 = vpop.f32.mrb[84].mxu1 }
 0x1d8   : > { %9958 = vmatmul.mubr.msk.bf16.gmra.mrb[188].mxu0 %vm614_vm2, %v1968_v8  ;;  %v9757_v40 = vpop.f32.mrb[85].mxu1  ;;  %v12190_v35 = vadd.f32 %v1153_v52, %v11792_v32  ;;  %v1970_v8 = vsel %vm1953_vm6, %v1967_v10, %v1969_v14  ;;  %v10982_v32 = vld [vmem:[%s11344_s19 + $0x50] sm:$0xff]  }
 0x1d9   : > { %9961 = vmatprep.mubr.msk.bf16.mxu0 %vm11148_vm0, %v14248_v46  ;;  %v1156_v30 = vpop.f32.mrb[86].mxu1  ;;  %v1971_v52 = vrot.slane %v10982_v32, 2 }
 0x1da   : > { %14274 = vst [vmem:[#allocation44_spill] sm:$0xff] %v12190_v35  ;;  %v9758_v17 = vpop.f32.mrb[87].mxu1 }
 0x1db   : > { %v1444_v26 = vpop.f32.mrb[84].mxu0 }
 0x1dc   : > { %v9767_v11 = vpop.f32.mrb[85].mxu0  ;;  %10040 = vmatmul.mubr.msk.bf16.gmra.mrb[192].mxu1 %vm614_vm2, %v11441_v34 }
 0x1dd   : > { %v1447_v61 = vpop.f32.mrb[86].mxu0  ;;  %10043 = vmatprep.mubr.msk.bf16.mxu1 %vm11148_vm0, %v14248_v46 }
 0x1de   : > { %v9768_v16 = vpop.f32.mrb[87].mxu0 }
 0x1df   : > { %v1781_v40 = vpop.f32.mrb[88].mxu1 }
 0x1e0   : > { %9962 = vmatmul.mubr.msk.bf16.gmra.mrb[192].mxu0 %vm614_vm2, %v1970_v8  ;;  %v9849_v25 = vpop.f32.mrb[89].mxu1  ;;  %v12201_v30 = vadd.f32 %v1781_v40, %v1436_v21  ;;  %v1972_v8 = vsel %vm1953_vm6, %v1969_v14, %v1971_v52 }
 0x1e1   : > { %9965 = vmatprep.mubr.msk.bf16.mxu0 %vm11148_vm0, %v14248_v46  ;;  %v1784_v17 = vpop.f32.mrb[90].mxu1 }
 0x1e2   : > { %v9850_v11 = vpop.f32.mrb[91].mxu1  ;;  %v12203_v10 = vadd.f32 %v1784_v17, %v1439_v18  ;;  %v10983_v18 = vld [vmem:[%s11344_s19 + $0x58] sm:$0xff]  }
 0x1e3   : > { %v1452_v34 = vpop.f32.mrb[88].mxu0  ;;  %v1973_v32 = vrot.slane %v10983_v18, 2 }
 0x1e4   : > { %v9771_v16 = vpop.f32.mrb[89].mxu0  ;;  %10044 = vmatmul.mubr.msk.bf16.gmra.mrb[196].mxu1 %vm614_vm2, %v11458_v38 }
 0x1e5   : > { %v1455_v35 = vpop.f32.mrb[90].mxu0  ;;  %10047 = vmatprep.mubr.msk.bf16.mxu1 %vm11148_vm0, %v14248_v46 }
 0x1e6   : > { %v9772_v25 = vpop.f32.mrb[91].mxu0 }
 0x1e7   : > { %v1789_v21 = vpop.f32.mrb[92].mxu1 }
 0x1e8   : > { %9966 = vmatmul.mubr.msk.bf16.gmra.mrb[196].mxu0 %vm614_vm2, %v1972_v8  ;;  %v9853_v40 = vpop.f32.mrb[93].mxu1  ;;  %v12214_v17 = vadd.f32 %v1789_v21, %v1444_v26  ;;  %v1974_v8 = vsel %vm1953_vm6, %v1971_v52, %v1973_v32 }
 0x1e9   : > { %9969 = vmatprep.mubr.msk.bf16.mxu0 %vm11148_vm0, %v14248_v46  ;;  %v1792_v11 = vpop.f32.mrb[94].mxu1 }
 0x1ea   : > { %v9854_v16 = vpop.f32.mrb[95].mxu1  ;;  %v12216_v14 = vadd.f32 %v1792_v11, %v1447_v61  ;;  %v10984_v61 = vld [vmem:[%s11344_s19 + $0x60] sm:$0xff]  }
 0x1eb   : > { %v1460_v38 = vpop.f32.mrb[92].mxu0  ;;  %v1975_v18 = vrot.slane %v10984_v61, 2 }
 0x1ec   : > { %v9775_v25 = vpop.f32.mrb[93].mxu0  ;;  %10048 = vmatmul.mubr.msk.bf16.gmra.mrb[200].mxu1 %vm614_vm2, %v11473_v41 }
 0x1ed   : > { %v1463_v22 = vpop.f32.mrb[94].mxu0  ;;  %10051 = vmatprep.mubr.msk.bf16.mxu1 %vm11148_vm0, %v14248_v46 }
 0x1ee   : > { %v9776_v40 = vpop.f32.mrb[95].mxu0 }
 0x1ef   : > { %v1797_v26 = vpop.f32.mrb[96].mxu1 }
 0x1f0   : > { %9970 = vmatmul.mubr.msk.bf16.gmra.mrb[200].mxu0 %vm614_vm2, %v1974_v8  ;;  %v9857_v21 = vpop.f32.mrb[97].mxu1  ;;  %v12227_v11 = vadd.f32 %v1797_v26, %v1452_v34  ;;  %v1976_v8 = vsel %vm1953_vm6, %v1973_v32, %v1975_v18 }
 0x1f1   : > { %9973 = vmatprep.mubr.msk.bf16.mxu0 %vm11148_vm0, %v14248_v46  ;;  %v1800_v16 = vpop.f32.mrb[98].mxu1 }
 0x1f2   : > { %v9858_v25 = vpop.f32.mrb[99].mxu1  ;;  %v12229_v52 = vadd.f32 %v1800_v16, %v1455_v35  ;;  %v10985_v35 = vld [vmem:[%s11344_s19 + $0x68] sm:$0xff]  }
 0x1f3   : > { %v1468_v41 = vpop.f32.mrb[96].mxu0  ;;  %v1977_v61 = vrot.slane %v10985_v35, 2 }
 0x1f4   : > { %v9779_v40 = vpop.f32.mrb[97].mxu0  ;;  %10052 = vmatmul.mubr.msk.bf16.gmra.mrb[204].mxu1 %vm614_vm2, %v11488_v44 }
 0x1f5   : > { %v1471_v24 = vpop.f32.mrb[98].mxu0  ;;  %10055 = vmatprep.mubr.msk.bf16.mxu1 %vm11148_vm0, %v14248_v46 }
 0x1f6   : > { %v9780_v21 = vpop.f32.mrb[99].mxu0 }
 0x1f7   : > { %v1805_v34 = vpop.f32.mrb[100].mxu1 }
 0x1f8   : > { %9974 = vmatmul.mubr.msk.bf16.gmra.mrb[204].mxu0 %vm614_vm2, %v1976_v8  ;;  %v9861_v26 = vpop.f32.mrb[101].mxu1  ;;  %v12240_v16 = vadd.f32 %v1805_v34, %v1460_v38  ;;  %v1978_v8 = vsel %vm1953_vm6, %v1975_v18, %v1977_v61 }
 0x1f9   : > { %9977 = vmatprep.mubr.msk.bf16.mxu0 %vm11148_vm0, %v14248_v46  ;;  %v1808_v25 = vpop.f32.mrb[102].mxu1 }
 0x1fa   : > { %v9862_v40 = vpop.f32.mrb[103].mxu1  ;;  %v12242_v32 = vadd.f32 %v1808_v25, %v1463_v22  ;;  %v10986_v22 = vld [vmem:[%s11344_s19 + $0x70] sm:$0xff]  }
 0x1fb   : > { %v1476_v44 = vpop.f32.mrb[100].mxu0  ;;  %v1979_v35 = vrot.slane %v10986_v22, 2 }
 0x1fc   : > { %v9783_v21 = vpop.f32.mrb[101].mxu0  ;;  %10056 = vmatmul.mubr.msk.bf16.gmra.mrb[208].mxu1 %vm614_vm2, %v11503_v47 }
 0x1fd   : > { %v1479_v9 = vpop.f32.mrb[102].mxu0  ;;  %10059 = vmatprep.mubr.msk.bf16.mxu1 %vm11148_vm0, %v14248_v46 }
 0x1fe   : > { %v9784_v26 = vpop.f32.mrb[103].mxu0 }
 0x1ff   : > { %v1813_v38 = vpop.f32.mrb[104].mxu1 }
 0x200   : > { %9978 = vmatmul.mubr.msk.bf16.gmra.mrb[208].mxu0 %vm614_vm2, %v1978_v8  ;;  %v9865_v34 = vpop.f32.mrb[105].mxu1  ;;  %v12253_v25 = vadd.f32 %v1813_v38, %v1468_v41  ;;  %v1980_v8 = vsel %vm1953_vm6, %v1977_v61, %v1979_v35 }
 0x201   : > { %9981 = vmatprep.mubr.msk.bf16.mxu0 %vm11148_vm0, %v14248_v46  ;;  %v1816_v40 = vpop.f32.mrb[106].mxu1 }
 0x202   : > { %v9866_v21 = vpop.f32.mrb[107].mxu1  ;;  %v12255_v18 = vadd.f32 %v1816_v40, %v1471_v24  ;;  %v10987_v24 = vld [vmem:[%s11344_s19 + $0x78] sm:$0xff]  }
 0x203   : > { %v1484_v47 = vpop.f32.mrb[104].mxu0  ;;  %v1981_v40 = vrot.slane %v10987_v24, 2 }
 0x204   : > { %v9787_v26 = vpop.f32.mrb[105].mxu0  ;;  %10060 = vmatmul.mubr.msk.bf16.gmra.mrb[212].mxu1 %vm614_vm2, %v11518_v50 }
 0x205   : > { %v1487_v49 = vpop.f32.mrb[106].mxu0  ;;  %10063 = vmatprep.mubr.msk.bf16.mxu1 %vm11148_vm0, %v14248_v46 }
 0x206   : > { %v9788_v34 = vpop.f32.mrb[107].mxu0 }
 0x207   : > { %v1821_v41 = vpop.f32.mrb[108].mxu1 }
 0x208   : > { %9982 = vmatmul.mubr.msk.bf16.gmra.mrb[212].mxu0 %vm614_vm2, %v1980_v8  ;;  %v12263_v38 = vadd.f32 %v1821_v41, %v1476_v44  ;;  %v9869_v22 = vpop.f32.mrb[109].mxu1  ;;  %v1982_v44 = vsel %vm1953_vm6, %v1979_v35, %v1981_v40 }
 0x209   : > { %9985 = vmatprep.mubr.msk.bf16.mxu0 %vm11148_vm0, %v14248_v46  ;;  %v1824_v21 = vpop.f32.mrb[110].mxu1 }
 0x20a   : > { %v12268_v26 = vadd.f32 %v1824_v21, %v1479_v9  ;;  %v9870_v61 = vpop.f32.mrb[111].mxu1  ;;  %v10988_v9 = vld [vmem:[%s11344_s19 + $0x80] sm:$0xff]  }
 0x20b   : > { %v1492_v50 = vpop.f32.mrb[108].mxu0  ;;  %v1983_v21 = vrot.slane %v10988_v9, 2 }
 0x20c   : > { %v9791_v34 = vpop.f32.mrb[109].mxu0  ;;  %10064 = vmatmul.mubr.msk.bf16.gmra.mrb[216].mxu1 %vm614_vm2, %v11533_v53 }
 0x20d   : > { %v1495_v1 = vpop.f32.mrb[110].mxu0  ;;  %10067 = vmatprep.mubr.msk.bf16.mxu1 %vm11148_vm0, %v14248_v46 }
 0x20e   : > { %v9792_v8 = vpop.f32.mrb[111].mxu0 }
 0x20f   : > { %v1829_v41 = vpop.f32.mrb[112].mxu1 }
 0x210   : > { %9986 = vmatmul.mubr.msk.bf16.gmra.mrb[216].mxu0 %vm614_vm2, %v1982_v44  ;;  %v12276_v22 = vadd.f32 %v1829_v41, %v1484_v47  ;;  %v9873_v24 = vpop.f32.mrb[113].mxu1  ;;  %v1984_v47 = vsel %vm1953_vm6, %v1981_v40, %v1983_v21 }
 0x211   : > { %9989 = vmatprep.mubr.msk.bf16.mxu0 %vm11148_vm0, %v14248_v46  ;;  %v1832_v61 = vpop.f32.mrb[114].mxu1 }
 0x212   : > { %v12281_v34 = vadd.f32 %v1832_v61, %v1487_v49  ;;  %v9874_v35 = vpop.f32.mrb[115].mxu1  ;;  %v10989_v49 = vld [vmem:[%s11344_s19 + $0x88] sm:$0xff]  }
 0x213   : > { %v1500_v53 = vpop.f32.mrb[112].mxu0  ;;  %v1985_v61 = vrot.slane %v10989_v49, 2 }
 0x214   : > { %v9795_v8 = vpop.f32.mrb[113].mxu0  ;;  %10068 = vmatmul.mubr.msk.bf16.gmra.mrb[220].mxu1 %vm614_vm2, %v11548_v56 }
 0x215   : > { %v1503_v0 = vpop.f32.mrb[114].mxu0  ;;  %10071 = vmatprep.mubr.msk.bf16.mxu1 %vm11148_vm0, %v14248_v46 }
 0x216   : > { %v9796_v44 = vpop.f32.mrb[115].mxu0 }
 0x217   : > { %v1837_v41 = vpop.f32.mrb[116].mxu1 }
 0x218   : > { %9990 = vmatmul.mubr.msk.bf16.gmra.mrb[220].mxu0 %vm614_vm2, %v1984_v47  ;;  %v12289_v24 = vadd.f32 %v1837_v41, %v1492_v50  ;;  %v9877_v9 = vpop.f32.mrb[117].mxu1  ;;  %v1986_v50 = vsel %vm1953_vm6, %v1983_v21, %v1985_v61 }
 0x219   : > { %9993 = vmatprep.mubr.msk.bf16.mxu0 %vm11148_vm0, %v14248_v46  ;;  %v1840_v35 = vpop.f32.mrb[118].mxu1 }
 0x21a   : > { %v12294_v8 = vadd.f32 %v1840_v35, %v1495_v1  ;;  %v9878_v40 = vpop.f32.mrb[119].mxu1  ;;  %v10990_v1 = vld [vmem:[%s11344_s19 + $0x90] sm:$0xff]  }
 0x21b   : > { %v1508_v56 = vpop.f32.mrb[116].mxu0  ;;  %v1987_v35 = vrot.slane %v10990_v1, 2 }
 0x21c   : > { %v9799_v44 = vpop.f32.mrb[117].mxu0  ;;  %10072 = vmatmul.mubr.msk.bf16.gmra.mrb[224].mxu1 %vm614_vm2, %v11563_v59 }
 0x21d   : > { %v1511_v36 = vpop.f32.mrb[118].mxu0  ;;  %10075 = vmatprep.mubr.msk.bf16.mxu1 %vm11148_vm0, %v14248_v46 }
 0x21e   : > { %v9800_v47 = vpop.f32.mrb[119].mxu0 }
 0x21f   : > { %v1845_v41 = vpop.f32.mrb[120].mxu1 }
 0x220   : > { %9994 = vmatmul.mubr.msk.bf16.gmra.mrb[224].mxu0 %vm614_vm2, %v1986_v50  ;;  %v12302_v9 = vadd.f32 %v1845_v41, %v1500_v53  ;;  %v9881_v49 = vpop.f32.mrb[121].mxu1  ;;  %v1988_v53 = vsel %vm1953_vm6, %v1985_v61, %v1987_v35 }
 0x221   : > { %9997 = vmatprep.mubr.msk.bf16.mxu0 %vm11148_vm0, %v14248_v46  ;;  %v1848_v40 = vpop.f32.mrb[122].mxu1 }
 0x222   : > { %v12307_v44 = vadd.f32 %v1848_v40, %v1503_v0  ;;  %v9882_v21 = vpop.f32.mrb[123].mxu1  ;;  %v10991_v0 = vld [vmem:[%s11344_s19 + $0x98] sm:$0xff]  }
 0x223   : > { %v1516_v59 = vpop.f32.mrb[120].mxu0  ;;  %v1989_v40 = vrot.slane %v10991_v0, 2 }
 0x224   : > { %v9803_v47 = vpop.f32.mrb[121].mxu0  ;;  %10076 = vmatmul.mubr.msk.bf16.gmra.mrb[228].mxu1 %vm614_vm2, %v11578_v62 }
 0x225   : > { %v1519_v48 = vpop.f32.mrb[122].mxu0  ;;  %10079 = vmatprep.mubr.msk.bf16.mxu1 %vm11148_vm0, %v14248_v46 }
 0x226   : > { %v9804_v50 = vpop.f32.mrb[123].mxu0 }
 0x227   : > { %v1853_v41 = vpop.f32.mrb[124].mxu1 }
 0x228   : > { %9998 = vmatmul.mubr.msk.bf16.gmra.mrb[228].mxu0 %vm614_vm2, %v1988_v53  ;;  %v12315_v49 = vadd.f32 %v1853_v41, %v1508_v56  ;;  %v9885_v1 = vpop.f32.mrb[125].mxu1  ;;  %v1990_v56 = vsel %vm1953_vm6, %v1987_v35, %v1989_v40 }
 0x229   : > { %10001 = vmatprep.mubr.msk.bf16.mxu0 %vm11148_vm0, %v14248_v46  ;;  %v1856_v21 = vpop.f32.mrb[126].mxu1 }
 0x22a   : > { %v12320_v47 = vadd.f32 %v1856_v21, %v1511_v36  ;;  %v9886_v61 = vpop.f32.mrb[127].mxu1  ;;  %v10992_v36 = vld [vmem:[%s11344_s19 + $0xa0] sm:$0xff]  }
 0x22b   : > { %v1524_v62 = vpop.f32.mrb[124].mxu0  ;;  %v1991_v21 = vrot.slane %v10992_v36, 2 }
 0x22c   : > { %14275 = vst [vmem:[#allocation45_spill] sm:$0xff] %v12320_v47  ;;  %v9807_v50 = vpop.f32.mrb[125].mxu0  ;;  %10080 = vmatmul.mubr.msk.bf16.gmra.mrb[232].mxu1 %vm614_vm2, %v11593_v2 }
 0x22d   : > { %v1527_v7 = vpop.f32.mrb[126].mxu0  ;;  %10083 = vmatprep.mubr.msk.bf16.mxu1 %vm11148_vm0, %v14248_v46 }
 0x22e   : > { %v9808_v53 = vpop.f32.mrb[127].mxu0 }
 0x22f   : > { %v1861_v41 = vpop.f32.mrb[128].mxu1 }
 0x230   : > { %10002 = vmatmul.mubr.msk.bf16.gmra.mrb[232].mxu0 %vm614_vm2, %v1990_v56  ;;  %v12328_v1 = vadd.f32 %v1861_v41, %v1516_v59  ;;  %v9889_v0 = vpop.f32.mrb[129].mxu1  ;;  %v1992_v56 = vsel %vm1953_vm6, %v1989_v40, %v1991_v21 }
 0x231   : > { %10005 = vmatprep.mubr.msk.bf16.mxu0 %vm11148_vm0, %v14248_v46  ;;  %v1864_v61 = vpop.f32.mrb[130].mxu1 }
 0x232   : > { %14276 = vst [vmem:[#allocation46_spill] sm:$0xff] %v12328_v1  ;;  %v12333_v2 = vadd.f32 %v1864_v61, %v1519_v48  ;;  %v9890_v35 = vpop.f32.mrb[131].mxu1  ;;  %v1993_v48 = vrot.slane %v12020_v57, 2 }
 0x233   : > { %v1532_v50 = vpop.f32.mrb[128].mxu0 }
 0x234   : > { %14277 = vst [vmem:[#allocation47_spill] sm:$0xff] %v12333_v2  ;;  %v9811_v53 = vpop.f32.mrb[129].mxu0  ;;  %10084 = vmatmul.mubr.msk.bf16.gmra.mrb[236].mxu1 %vm614_vm2, %v11608_v6 }
 0x235   : > { %v1535_v5 = vpop.f32.mrb[130].mxu0  ;;  %10087 = vmatprep.mubr.msk.bf16.mxu1 %vm11148_vm0, %v14248_v46 }
 0x236   : > { %v9812_v59 = vpop.f32.mrb[131].mxu0 }
 0x237   : > { %v1869_v41 = vpop.f32.mrb[132].mxu1 }
 0x238   : > { %10006 = vmatmul.mubr.msk.bf16.gmra.mrb[236].mxu0 %vm614_vm2, %v1992_v56  ;;  %v12341_v0 = vadd.f32 %v1869_v41, %v1524_v62  ;;  %v9893_v36 = vpop.f32.mrb[133].mxu1  ;;  %v1994_v62 = vsel %vm1953_vm6, %v1991_v21, %v1993_v48 }
 0x239   : > { %10009 = vmatprep.mubr.msk.bf16.mxu0 %vm11148_vm0, %v14248_v46  ;;  %v1872_v61 = vpop.f32.mrb[134].mxu1 }
 0x23a   : > { %14278 = vst [vmem:[#allocation48_spill] sm:$0xff] %v12341_v0  ;;  %v12346_v6 = vadd.f32 %v1872_v61, %v1527_v7  ;;  %v9894_v40 = vpop.f32.mrb[135].mxu1 }
 0x23b   : > { %v1540_v35 = vpop.f32.mrb[132].mxu0 }
 0x23c   : > { %14279 = vst [vmem:[#allocation49_spill] sm:$0xff] %v12346_v6  ;;  %v9815_v53 = vpop.f32.mrb[133].mxu0  ;;  %10088 = vmatmul.mubr.msk.bf16.gmra.mrb[240].mxu1 %vm614_vm2, %v11623_v12  ;;  %v10805_v6 = vld [vmem:[%s11344_s19 + $0x20] sm:$0xff]  }
 0x23d   : > { %v1543_v59 = vpop.f32.mrb[134].mxu0  ;;  %10091 = vmatprep.mubr.msk.bf16.mxu1 %vm11148_vm0, %v14248_v46 }
 0x23e   : > { %v9816_v56 = vpop.f32.mrb[135].mxu0 }
 0x23f   : > { %v1877_v57 = vpop.f32.mrb[136].mxu1  ;;  %v10804_v56 = vld [vmem:[%s11344_s19 + $0x18] sm:$0xff]  }
 0x240   : > { %10010 = vmatmul.mubr.msk.bf16.gmra.mrb[240].mxu0 %vm614_vm2, %v1994_v62  ;;  %v12354_v7 = vadd.f32 %v1877_v57, %v1532_v50  ;;  %v9897_v41 = vpop.f32.mrb[137].mxu1  ;;  %v10803_v62 = vld [vmem:[%s11344_s19 + $0x10] sm:$0xfc]   ;;  %v2268_v50 = vrot.slane %v12063_v39, 1  ;;  %v8894_v39 = vld [vmem:[%s14176_s1 + $0x8] sm:$0x1] }
 0x241   : > { %10013 = vmatprep.mubr.msk.bf16.mxu0 %vm11148_vm0, %v14248_v46  ;;  %v1880_v12 = vpop.f32.mrb[138].mxu1  ;;  %v2979_v57 = vld [vmem:[%s11344_s19 + $0x10] sm:$0xc]  ;;  %v2980_v41 = vld [vmem:[%s11344_s19 + $0x14] sm:$0xf] }
 0x242   : > { %14280 = vst [vmem:[#allocation50_spill] sm:$0xff] %v12354_v7  ;;  %v12358_v61 = vadd.f32 %v1880_v12, %v1535_v5  ;;  %v9898_v21 = vpop.f32.mrb[139].mxu1  ;;  %v8852_v7 = vcombine.low %v2979_v57, %v2980_v41 }
 0x243   : > { %v1548_v36 = vpop.f32.mrb[136].mxu0 }
 0x244   : > { %14281 = vst [vmem:[#allocation51_spill] sm:$0xff] %v12358_v61  ;;  %v9819_v40 = vpop.f32.mrb[137].mxu0  ;;  %10092 = vmatmul.mubr.msk.bf16.gmra.mrb[244].mxu1 %vm614_vm2, %v11641_v15  ;;  %v2631_v15 = vrot.slane %v10803_v62, 2  ;;  %v2269_v61 = vsel %vm572_vm3, %v11632_v13, %v2268_v50  ;;  %v3130_v0 = vshrl.u32 %v8852_v7, 16  ;;  %v3133_v57 = vshll.u32 %v8852_v7, 16  ;;  %v10809_v7 = vld [vmem:[%s11344_s19 + $0x20] sm:$0xff]  }
 0x245   : > { %v1551_v53 = vpop.f32.mrb[138].mxu0  ;;  %10095 = vmatprep.mubr.msk.bf16.mxu1 %vm11148_vm0, %v14248_v46 }
 0x246   : > { %v9820_v58 = vpop.f32.mrb[139].mxu0 }
 0x247   : > { %v1885_v5 = vpop.f32.mrb[140].mxu1  ;;  %v2632_v58 = vrot.slane %v10804_v56, 2  ;;  %v3736_v56 = vsel %vm678_vm1, %v8894_v39, 0 }
 0x248   : > { %10014 = vmatmul.mubr.msk.bf16.gmra.mrb[244].mxu0 %vm614_vm2, %v1993_v48  ;;  %v12370_v12 = vadd.f32 %v1885_v5, %v1540_v35  ;;  %v9901_v21 = vpop.f32.mrb[141].mxu1  ;;  %v10808_v48 = vld [vmem:[%s11344_s19 + $0x18] sm:$0xff]  }
 0x249   : > { %10105 = vmatprep.mubr.msk.bf16.mxu0 %vm11148_vm0, %v14248_v46  ;;  %v1888_v40 = vpop.f32.mrb[142].mxu1  ;;  %v2633_v62 = vsel %vm1953_vm6, %v2631_v15, %v2632_v58  ;;  %v3138_v41 = vshrl.u32 %v10808_v48, 16  ;;  %v2634_v15 = vrot.slane %v10805_v6, 2 }
 0x24a   : > { %14282 = vst [vmem:[#allocation52_spill] sm:$0xff] %v12370_v12  ;;  %v12380_v35 = vadd.f32 %v1888_v40, %v1543_v59  ;;  %v9902_v5 = vpop.f32.mrb[143].mxu1  ;;  %v3141_v59 = vshll.u32 %v10808_v48, 16 }
 0x24b   : > { %v1556_v28 = vpop.f32.mrb[140].mxu0 }
 0x24c   : > { %14283 = vst [vmem:[#allocation53_spill] sm:$0xff] %v12380_v35  ;;  %v9823_v21 = vpop.f32.mrb[141].mxu0  ;;  %10096 = vmatmul.mubr.msk.bf16.gmra.mrb[248].mxu1 %vm614_vm2, %v2269_v61  ;;  %v3140_v35 = vrot.slane %v3138_v41, 2  ;;  %v3143_v55 = vrot.slane %v3141_v59, 3  ;;  %v3150_v41 = vshll.u32 %v10809_v7, 16 }
 0x24d   : > { %v1559_v12 = vpop.f32.mrb[142].mxu0  ;;  %10099 = vmatprep.mubr.msk.bf16.mxu1 %vm11148_vm0, %v14248_v46  ;;  %v3132_v21 = vrot.slane %v3130_v0, 2 }
 0x24e   : > { %v9824_v13 = vpop.f32.mrb[143].mxu0  ;;  %v3144_v6 = vor.u32 %v3143_v55, %v3140_v35  ;;  %v10811_v55 = vld [vmem:[%s11344_s19 + $0x28] sm:$0xff]  }
 0x24f   : > { %v1893_v40 = vpop.f32.mrb[144].mxu1  ;;  %v3135_v13 = vrot.slane %v3133_v57, 3  ;;  %v3147_v57 = vshrl.u32 %v10809_v7, 16 }
 0x250   : > { %10106 = vmatmul.mubr.msk.bf16.vlgmr.msra.gmra.mrb[248].mxu0 %vm614_vm2, %v2633_v62  ;;  %v12389_v5 = vadd.f32 %v1893_v40, %v1548_v36  ;;  %v9905_v61 = vpop.f32.mrb[145].mxu1  ;;  %v10806_v36 = vld [vmem:[%s11344_s19 + $0x28] sm:$0xff]   ;;  %v2635_v40 = vsel %vm1953_vm6, %v2632_v58, %v2634_v15 }
 0x251   : > { %10276 = vmatpush3.bf16.msra.mxu0 %v3736_v56  ;;  %10109 = vmatprep.mubr.msk.bf16.mxu0 %vm11148_vm0, %v14248_v46  ;;  %v1896_v39 = vpop.f32.mrb[146].mxu1  ;;  %v3136_v0 = vor.u32 %v3135_v13, %v3132_v21  ;;  %v3152_v21 = vrot.slane %v3150_v41, 3  ;;  %v3159_v41 = vshll.u32 %v10811_v55, 16 }
 0x252   : > { %14284 = vst [vmem:[#allocation54_spill] sm:$0xff] %v12389_v5  ;;  %v12394_v48 = vadd.f32 %v1896_v39, %v1551_v53  ;;  %v9906_v62 = vpop.f32.mrb[147].mxu1 }
 0x253   : > { %v1564_v2 = vpop.f32.mrb[144].mxu0  ;;  %v3145_v39 = vsel %vm3128_vm7, %v3136_v0, %v3144_v6  ;;  %v3149_v62 = vrot.slane %v3147_v57, 2  ;;  %v3156_v57 = vshrl.u32 %v10811_v55, 16 }
 0x254   : > { %14285 = vst [vmem:[#allocation55_spill] sm:$0xff] %v12394_v48  ;;  %v9827_v1 = vpop.f32.mrb[145].mxu0  ;;  %10100 = vmatmul.mubr.msk.bf16.gmra.mrb[252].mxu1 %vm614_vm2, %v2268_v50 }
 0x255   : > { %v1567_v56 = vpop.f32.mrb[146].mxu0  ;;  %10191 = vmatprep.mubr.msk.bf16.mxu1 %vm11148_vm0, %v14248_v46  ;;  %v2636_v1 = vrot.slane %v10806_v36, 2  ;;  %v3153_v0 = vor.u32 %v3152_v21, %v3149_v62 }
 0x256   : > { %v9828_v61 = vpop.f32.mrb[147].mxu0 }
 0x257   : > { %v1901_v53 = vpop.f32.mrb[148].mxu1  ;;  %v2637_v36 = vsel %vm1953_vm6, %v2634_v15, %v2636_v1 }
 0x258   : > { %10110 = vmatmul.mubr.msk.bf16.gmra.mrb[252].mxu0 %vm614_vm2, %v2635_v40  ;;  %v12402_v59 = vadd.f32 %v1901_v53, %v1556_v28  ;;  %v9909_v50 = vpop.f32.mrb[149].mxu1  ;;  %v10810_v28 = vld [vmem:[%s11344_s19 + $0x30] sm:$0xff]  }
 0x259   : > { %10113 = vmatprep.mubr.msk.bf16.mxu0 %vm11148_vm0, %v14248_v46  ;;  %v1904_v58 = vpop.f32.mrb[150].mxu1  ;;  %v2638_v15 = vrot.slane %v10810_v28, 2 }
 0x25a   : > { %14286 = vst [vmem:[#allocation56_spill] sm:$0xff] %v12402_v59  ;;  %v12408_v13 = vadd.f32 %v1904_v58, %v1559_v12  ;;  %v9910_v7 = vpop.f32.mrb[151].mxu1 }
 0x25b   : > { %v1572_v35 = vpop.f32.mrb[148].mxu0  ;;  %v3154_v7 = vsel %vm3128_vm7, %v3144_v6, %v3153_v0 }
 0x25c   : > { %14287 = vst [vmem:[#allocation57_spill] sm:$0xff] %v12408_v13  ;;  %v9831_v40 = vpop.f32.mrb[149].mxu0  ;;  %10192 = vmatmul.mubr.msk.bf16.vlgmr.msra.gmra.mrb[0].mxu1 %vm614_vm2, %v3145_v39  ;;  %v10813_v13 = vld [vmem:[%s11344_s19 + $0x30] sm:$0xff]  }
 0x25d   : > { %v1575_v61 = vpop.f32.mrb[150].mxu0  ;;  %10195 = vmatprep.mubr.msk.bf16.mxu1 %vm11148_vm0, %v14248_v46  ;;  %v3158_v40 = vrot.slane %v3156_v57, 2  ;;  %v3165_v28 = vshrl.u32 %v10813_v13, 16  ;;  %v3168_v57 = vshll.u32 %v10813_v13, 16 }
 0x25e   : > { %v9832_v53 = vpop.f32.mrb[151].mxu0 }
 0x25f   : > { %v1909_v12 = vpop.f32.mrb[152].mxu1  ;;  %v3161_v53 = vrot.slane %v3159_v41, 3 }
 0x260   : > { %10114 = vmatmul.mubr.msk.bf16.gmra.mrb[0].mxu0 %vm614_vm2, %v2637_v36  ;;  %v12416_v50 = vadd.f32 %v1909_v12, %v1564_v2  ;;  %v9913_v58 = vpop.f32.mrb[153].mxu1  ;;  %v2639_v2 = vsel %vm1953_vm6, %v2636_v1, %v2638_v15  ;;  %v10812_v12 = vld [vmem:[%s11344_s19 + $0x38] sm:$0xff]  }
 0x261   : > { %10117 = vmatprep.mubr.msk.bf16.mxu0 %vm11148_vm0, %v14248_v46  ;;  %v1912_v39 = vpop.f32.mrb[154].mxu1  ;;  %v3162_v6 = vor.u32 %v3161_v53, %v3158_v40  ;;  %v2640_v1 = vrot.slane %v10812_v12, 2 }
 0x262   : > { %14288 = vst [vmem:[#allocation58_spill] sm:$0xff] %v12416_v50  ;;  %v12422_v21 = vadd.f32 %v1912_v39, %v1567_v56  ;;  %v9914_v55 = vpop.f32.mrb[155].mxu1 }
 0x263   : > { %v1580_v62 = vpop.f32.mrb[152].mxu0  ;;  %v3163_v55 = vsel %vm3128_vm7, %v3153_v0, %v3162_v6 }
 0x264   : > { %14289 = vst [vmem:[#allocation59_spill] sm:$0xff] %v12422_v21  ;;  %v9835_v36 = vpop.f32.mrb[153].mxu0  ;;  %10196 = vmatmul.mubr.msk.bf16.gmra.mrb[4].mxu1 %vm614_vm2, %v3154_v7  ;;  %v10815_v21 = vld [vmem:[%s11344_s19 + $0x38] sm:$0xff]  }
 0x265   : > { %v1583_v59 = vpop.f32.mrb[154].mxu0  ;;  %10199 = vmatprep.mubr.msk.bf16.mxu1 %vm11148_vm0, %v14248_v46  ;;  %v3167_v36 = vrot.slane %v3165_v28, 2  ;;  %v3174_v12 = vshrl.u32 %v10815_v21, 16  ;;  %v3177_v28 = vshll.u32 %v10815_v21, 16 }
 0x266   : > { %v9836_v58 = vpop.f32.mrb[155].mxu0 }
 0x267   : > { %v1917_v56 = vpop.f32.mrb[156].mxu1  ;;  %v3170_v58 = vrot.slane %v3168_v57, 3 }
 0x268   : > { %10118 = vmatmul.mubr.msk.bf16.gmra.mrb[4].mxu0 %vm614_vm2, %v2639_v2  ;;  %v12430_v41 = vadd.f32 %v1917_v56, %v1572_v35  ;;  %v9917_v39 = vpop.f32.mrb[157].mxu1  ;;  %v2641_v35 = vsel %vm1953_vm6, %v2638_v15, %v2640_v1  ;;  %v10814_v56 = vld [vmem:[%s11344_s19 + $0x40] sm:$0xff]  }
 0x269   : > { %10121 = vmatprep.mubr.msk.bf16.mxu0 %vm11148_vm0, %v14248_v46  ;;  %v1920_v7 = vpop.f32.mrb[158].mxu1  ;;  %v3171_v0 = vor.u32 %v3170_v58, %v3167_v36  ;;  %v2642_v15 = vrot.slane %v10814_v56, 2 }
 0x26a   : > { %14290 = vst [vmem:[#allocation60_spill] sm:$0xff] %v12430_v41  ;;  %v12436_v53 = vadd.f32 %v1920_v7, %v1575_v61  ;;  %v9918_v13 = vpop.f32.mrb[159].mxu1 }
 0x26b   : > { %v1588_v40 = vpop.f32.mrb[156].mxu0  ;;  %v3172_v13 = vsel %vm3128_vm7, %v3162_v6, %v3171_v0 }
 0x26c   : > { %14291 = vst [vmem:[#allocation61_spill] sm:$0xff] %v12436_v53  ;;  %v9839_v2 = vpop.f32.mrb[157].mxu0  ;;  %10200 = vmatmul.mubr.msk.bf16.gmra.mrb[8].mxu1 %vm614_vm2, %v3163_v55  ;;  %v10817_v53 = vld [vmem:[%s11344_s19 + $0x40] sm:$0xff]  }
 0x26d   : > { %v1591_v50 = vpop.f32.mrb[158].mxu0  ;;  %10203 = vmatprep.mubr.msk.bf16.mxu1 %vm11148_vm0, %v14248_v46  ;;  %v3176_v2 = vrot.slane %v3174_v12, 2  ;;  %v3183_v56 = vshrl.u32 %v10817_v53, 16  ;;  %v3186_v12 = vshll.u32 %v10817_v53, 16 }
 0x26e   : > { %v9840_v39 = vpop.f32.mrb[159].mxu0 }
 0x26f   : > { %v1925_v61 = vpop.f32.mrb[160].mxu1  ;;  %v3179_v39 = vrot.slane %v3177_v28, 3 }
 0x270   : > { %10122 = vmatmul.mubr.msk.bf16.gmra.mrb[8].mxu0 %vm614_vm2, %v2641_v35  ;;  %v12444_v57 = vadd.f32 %v1925_v61, %v1580_v62  ;;  %v9921_v7 = vpop.f32.mrb[161].mxu1  ;;  %v2643_v62 = vsel %vm1953_vm6, %v2640_v1, %v2642_v15  ;;  %v10816_v61 = vld [vmem:[%s11344_s19 + $0x48] sm:$0xff]  }
 0x271   : > { %10125 = vmatprep.mubr.msk.bf16.mxu0 %vm11148_vm0, %v14248_v46  ;;  %v1928_v55 = vpop.f32.mrb[162].mxu1  ;;  %v3180_v6 = vor.u32 %v3179_v39, %v3176_v2  ;;  %v2644_v1 = vrot.slane %v10816_v61, 2 }
 0x272   : > { %14292 = vst [vmem:[#allocation62_spill] sm:$0xff] %v12444_v57  ;;  %v12450_v58 = vadd.f32 %v1928_v55, %v1583_v59  ;;  %v9922_v21 = vpop.f32.mrb[163].mxu1 }
 0x273   : > { %v1596_v36 = vpop.f32.mrb[160].mxu0  ;;  %v3185_v21 = vrot.slane %v3183_v56, 2 }
 0x274   : > { %14293 = vst [vmem:[#allocation63_spill] sm:$0xff] %v12450_v58  ;;  %v9843_v35 = vpop.f32.mrb[161].mxu0  ;;  %10204 = vmatmul.mubr.msk.bf16.gmra.mrb[12].mxu1 %vm614_vm2, %v3172_v13  ;;  %v3181_v13 = vsel %vm3128_vm7, %v3171_v0, %v3180_v6 }
 0x275   : > { %v1599_v41 = vpop.f32.mrb[162].mxu0  ;;  %10207 = vmatprep.mubr.msk.bf16.mxu1 %vm11148_vm0, %v14248_v46  ;;  %v3188_v35 = vrot.slane %v3186_v12, 3 }
 0x276   : > { %v9844_v7 = vpop.f32.mrb[163].mxu0 }
 0x277   : > { %v1933_v59 = vpop.f32.mrb[164].mxu1  ;;  %v10819_v7 = vld [vmem:[%s11344_s19 + $0x48] sm:$0xff]   ;;  %v3189_v0 = vor.u32 %v3188_v35, %v3185_v21 }
 0x278   : > { %10126 = vmatmul.mubr.msk.bf16.gmra.mrb[12].mxu0 %vm614_vm2, %v2643_v62  ;;  %v12458_v28 = vadd.f32 %v1933_v59, %v1588_v40  ;;  %v9925_v41 = vpop.f32.mrb[165].mxu1  ;;  %v2645_v40 = vsel %vm1953_vm6, %v2642_v15, %v2644_v1  ;;  %v10818_v59 = vld [vmem:[%s11344_s19 + $0x50] sm:$0xff]   ;;  %v3192_v61 = vshrl.u32 %v10819_v7, 16  ;;  %v3195_v56 = vshll.u32 %v10819_v7, 16 }
 0x279   : > { %10129 = vmatprep.mubr.msk.bf16.mxu0 %vm11148_vm0, %v14248_v46  ;;  %v1936_v55 = vpop.f32.mrb[166].mxu1  ;;  %v2646_v15 = vrot.slane %v10818_v59, 2 }
 0x27a   : > { %14294 = vst [vmem:[#allocation64_spill] sm:$0xff] %v12458_v28  ;;  %v12464_v39 = vadd.f32 %v1936_v55, %v1591_v50  ;;  %v9926_v53 = vpop.f32.mrb[167].mxu1 }
 0x27b   : > { %v2095_v2 = vpop.f32.mrb[164].mxu0 }
 0x27c   : > { %14295 = vst [vmem:[#allocation65_spill] sm:$0xff] %v12464_v39  ;;  %v9935_v62 = vpop.f32.mrb[165].mxu0  ;;  %10208 = vmatmul.mubr.msk.bf16.gmra.mrb[16].mxu1 %vm614_vm2, %v3181_v13  ;;  %v3190_v13 = vsel %vm3128_vm7, %v3180_v6, %v3189_v0  ;;  %v10821_v39 = vld [vmem:[%s11344_s19 + $0x50] sm:$0xff]  }
 0x27d   : > { %v2098_v58 = vpop.f32.mrb[166].mxu0  ;;  %10211 = vmatprep.mubr.msk.bf16.mxu1 %vm11148_vm0, %v14248_v46  ;;  %v3194_v62 = vrot.slane %v3192_v61, 2  ;;  %v3201_v6 = vshrl.u32 %v10821_v39, 16 }
 0x27e   : > { %v9936_v41 = vpop.f32.mrb[167].mxu0 }
 0x27f   : > { %v1941_v50 = vpop.f32.mrb[168].mxu1  ;;  %v3197_v41 = vrot.slane %v3195_v56, 3 }
 0x280   : > { %10130 = vmatmul.mubr.msk.bf16.gmra.mrb[16].mxu0 %vm614_vm2, %v2645_v40  ;;  %v12472_v12 = vadd.f32 %v1941_v50, %v1596_v36  ;;  %v9929_v55 = vpop.f32.mrb[169].mxu1  ;;  %v2647_v36 = vsel %vm1953_vm6, %v2644_v1, %v2646_v15  ;;  %v10820_v40 = vld [vmem:[%s11344_s19 + $0x58] sm:$0xff]  }
 0x281   : > { %10133 = vmatprep.mubr.msk.bf16.mxu0 %vm11148_vm0, %v14248_v46  ;;  %v1944_v53 = vpop.f32.mrb[170].mxu1  ;;  %v3198_v59 = vor.u32 %v3197_v41, %v3194_v62  ;;  %v3204_v55 = vshll.u32 %v10821_v39, 16  ;;  %v2648_v1 = vrot.slane %v10820_v40, 2 }
 0x282   : > { %14296 = vst [vmem:[#allocation66_spill] sm:$0xff] %v12472_v12  ;;  %v9930_v35 = vpop.f32.mrb[171].mxu1  ;;  %v10823_v12 = vld [vmem:[%s11344_s19 + $0x58] sm:$0xff]  }
 0x283   : > { %v2103_v21 = vpop.f32.mrb[168].mxu0  ;;  %v3199_v35 = vsel %vm3128_vm7, %v3189_v0, %v3198_v59  ;;  %v3210_v40 = vshrl.u32 %v10823_v12, 16 }
 0x284   : > { %v9939_v7 = vpop.f32.mrb[169].mxu0  ;;  %10212 = vmatmul.mubr.msk.bf16.gmra.mrb[20].mxu1 %vm614_vm2, %v3190_v13 }
 0x285   : > { %v2106_v28 = vpop.f32.mrb[170].mxu0  ;;  %10215 = vmatprep.mubr.msk.bf16.mxu1 %vm11148_vm0, %v14248_v46  ;;  %v3203_v7 = vrot.slane %v3201_v6, 2  ;;  %v3213_v6 = vshll.u32 %v10823_v12, 16 }
 0x286   : > { %v9940_v50 = vpop.f32.mrb[171].mxu0 }
 0x287   : > { %v2319_v61 = vpop.f32.mrb[172].mxu1  ;;  %v3206_v50 = vrot.slane %v3204_v55, 3 }
 0x288   : > { %10134 = vmatmul.mubr.msk.bf16.gmra.mrb[20].mxu0 %vm614_vm2, %v2647_v36  ;;  %v12484_v56 = vadd.f32 %v2319_v61, %v2095_v2  ;;  %v10021_v53 = vpop.f32.mrb[173].mxu1  ;;  %v2649_v2 = vsel %vm1953_vm6, %v2646_v15, %v2648_v1  ;;  %v10822_v61 = vld [vmem:[%s11344_s19 + $0x60] sm:$0xff]  }
 0x289   : > { %10137 = vmatprep.mubr.msk.bf16.mxu0 %vm11148_vm0, %v14248_v46  ;;  %v2322_v13 = vpop.f32.mrb[174].mxu1  ;;  %v3207_v0 = vor.u32 %v3206_v50, %v3203_v7  ;;  %v2650_v15 = vrot.slane %v10822_v61, 2 }
 0x28a   : > { %14297 = vst [vmem:[#allocation67_spill] sm:$0xff] %v12484_v56  ;;  %v12490_v41 = vadd.f32 %v2322_v13, %v2098_v58  ;;  %v10022_v39 = vpop.f32.mrb[175].mxu1 }
 0x28b   : > { %v2111_v62 = vpop.f32.mrb[172].mxu0  ;;  %v3208_v39 = vsel %vm3128_vm7, %v3198_v59, %v3207_v0 }
 0x28c   : > { %14298 = vst [vmem:[#allocation68_spill] sm:$0xff] %v12490_v41  ;;  %v9943_v36 = vpop.f32.mrb[173].mxu0  ;;  %10216 = vmatmul.mubr.msk.bf16.gmra.mrb[24].mxu1 %vm614_vm2, %v3199_v35  ;;  %v10825_v41 = vld [vmem:[%s11344_s19 + $0x60] sm:$0xff]  }
 0x28d   : > { %v2114_v57 = vpop.f32.mrb[174].mxu0  ;;  %10219 = vmatprep.mubr.msk.bf16.mxu1 %vm11148_vm0, %v14248_v46  ;;  %v3212_v36 = vrot.slane %v3210_v40, 2  ;;  %v3219_v61 = vshrl.u32 %v10825_v41, 16  ;;  %v3222_v40 = vshll.u32 %v10825_v41, 16 }
 0x28e   : > { %v9944_v53 = vpop.f32.mrb[175].mxu0 }
 0x28f   : > { %v2327_v58 = vpop.f32.mrb[176].mxu1  ;;  %v3215_v53 = vrot.slane %v3213_v6, 3 }
 0x290   : > { %10138 = vmatmul.mubr.msk.bf16.gmra.mrb[24].mxu0 %vm614_vm2, %v2649_v2  ;;  %v12498_v55 = vadd.f32 %v2327_v58, %v2103_v21  ;;  %v10025_v13 = vpop.f32.mrb[177].mxu1  ;;  %v2651_v21 = vsel %vm1953_vm6, %v2648_v1, %v2650_v15  ;;  %v10824_v58 = vld [vmem:[%s11344_s19 + $0x68] sm:$0xff]  }
 0x291   : > { %10141 = vmatprep.mubr.msk.bf16.mxu0 %vm11148_vm0, %v14248_v46  ;;  %v2330_v35 = vpop.f32.mrb[178].mxu1  ;;  %v3216_v59 = vor.u32 %v3215_v53, %v3212_v36  ;;  %v2652_v1 = vrot.slane %v10824_v58, 2 }
 0x292   : > { %14299 = vst [vmem:[#allocation69_spill] sm:$0xff] %v12498_v55  ;;  %v12504_v50 = vadd.f32 %v2330_v35, %v2106_v28  ;;  %v10026_v12 = vpop.f32.mrb[179].mxu1 }
 0x293   : > { %v2119_v7 = vpop.f32.mrb[176].mxu0  ;;  %v3217_v12 = vsel %vm3128_vm7, %v3207_v0, %v3216_v59 }
 0x294   : > { %14300 = vst [vmem:[#allocation70_spill] sm:$0xff] %v12504_v50  ;;  %v9947_v2 = vpop.f32.mrb[177].mxu0  ;;  %10220 = vmatmul.mubr.msk.bf16.gmra.mrb[28].mxu1 %vm614_vm2, %v3208_v39  ;;  %v10827_v50 = vld [vmem:[%s11344_s19 + $0x68] sm:$0xff]  }
 0x295   : > { %v2122_v56 = vpop.f32.mrb[178].mxu0  ;;  %10223 = vmatprep.mubr.msk.bf16.mxu1 %vm11148_vm0, %v14248_v46  ;;  %v3221_v2 = vrot.slane %v3219_v61, 2  ;;  %v3228_v58 = vshrl.u32 %v10827_v50, 16  ;;  %v3231_v61 = vshll.u32 %v10827_v50, 16 }
 0x296   : > { %v9948_v13 = vpop.f32.mrb[179].mxu0 }
 0x297   : > { %v2335_v28 = vpop.f32.mrb[180].mxu1  ;;  %v3224_v13 = vrot.slane %v3222_v40, 3 }
 0x298   : > { %10142 = vmatmul.mubr.msk.bf16.gmra.mrb[28].mxu0 %vm614_vm2, %v2651_v21  ;;  %v12512_v6 = vadd.f32 %v2335_v28, %v2111_v62  ;;  %v10029_v35 = vpop.f32.mrb[181].mxu1  ;;  %v2653_v62 = vsel %vm1953_vm6, %v2650_v15, %v2652_v1  ;;  %v10826_v28 = vld [vmem:[%s11344_s19 + $0x70] sm:$0xff]  }
 0x299   : > { %10145 = vmatprep.mubr.msk.bf16.mxu0 %vm11148_vm0, %v14248_v46  ;;  %v2338_v39 = vpop.f32.mrb[182].mxu1  ;;  %v3225_v0 = vor.u32 %v3224_v13, %v3221_v2  ;;  %v2654_v15 = vrot.slane %v10826_v28, 2 }
 0x29a   : > { %14301 = vst [vmem:[#allocation71_spill] sm:$0xff] %v12512_v6  ;;  %v12518_v53 = vadd.f32 %v2338_v39, %v2114_v57  ;;  %v10030_v41 = vpop.f32.mrb[183].mxu1 }
 0x29b   : > { %v2127_v36 = vpop.f32.mrb[180].mxu0  ;;  %v3226_v41 = vsel %vm3128_vm7, %v3216_v59, %v3225_v0 }
 0x29c   : > { %14302 = vst [vmem:[#allocation72_spill] sm:$0xff] %v12518_v53  ;;  %v9951_v21 = vpop.f32.mrb[181].mxu0  ;;  %10224 = vmatmul.mubr.msk.bf16.gmra.mrb[32].mxu1 %vm614_vm2, %v3217_v12  ;;  %v12532_v53 = vld [vmem:[%s11344_s19 + $0x70] sm:$0xff]  }
 0x29d   : > { %v2130_v55 = vpop.f32.mrb[182].mxu0  ;;  %10227 = vmatprep.mubr.msk.bf16.mxu1 %vm11148_vm0, %v14248_v46  ;;  %v3230_v21 = vrot.slane %v3228_v58, 2  ;;  %v3237_v58 = vshrl.u32 %v12532_v53, 16 }
 0x29e   : > { %v9952_v35 = vpop.f32.mrb[183].mxu0 }
 0x29f   : > { %v2343_v57 = vpop.f32.mrb[184].mxu1  ;;  %v3233_v35 = vrot.slane %v3231_v61, 3  ;;  %v3240_v61 = vshll.u32 %v12532_v53, 16 }
 0x2a0   : > { %10146 = vmatmul.mubr.msk.bf16.gmra.mrb[32].mxu0 %vm614_vm2, %v2653_v62  ;;  %v12526_v40 = vadd.f32 %v2343_v57, %v2119_v7  ;;  %v10033_v39 = vpop.f32.mrb[185].mxu1  ;;  %v2655_v57 = vsel %vm1953_vm6, %v2652_v1, %v2654_v15 }
 0x2a1   : > { %10149 = vmatprep.mubr.msk.bf16.mxu0 %vm11148_vm0, %v14248_v46  ;;  %v2346_v12 = vpop.f32.mrb[186].mxu1  ;;  %v10828_v39 = vld [vmem:[%s11344_s19 + $0x78] sm:$0xff]   ;;  %v3234_v59 = vor.u32 %v3233_v35, %v3230_v21  ;;  %v3242_v21 = vrot.slane %v3240_v61, 3 }
 0x2a2   : > { %14303 = vst [vmem:[#allocation73_spill] sm:$0xff] %v12526_v40  ;;  %v12534_v50 = vadd.f32 %v2346_v12, %v2122_v56  ;;  %v10034_v13 = vpop.f32.mrb[187].mxu1  ;;  %v2656_v1 = vrot.slane %v10828_v39, 2  ;;  %v12550_v35 = vld [vmem:[%s11344_s19 + $0x78] sm:$0xff]  }
 0x2a3   : > { %v2135_v2 = vpop.f32.mrb[184].mxu0  ;;  %v3249_v61 = vshll.u32 %v12550_v35, 16 }
 0x2a4   : > { %14304 = vst [vmem:[#allocation74_spill] sm:$0xff] %v12534_v50  ;;  %v9955_v62 = vpop.f32.mrb[185].mxu0  ;;  %10228 = vmatmul.mubr.msk.bf16.gmra.mrb[36].mxu1 %vm614_vm2, %v3226_v41 }
 0x2a5   : > { %v2138_v7 = vpop.f32.mrb[186].mxu0  ;;  %10231 = vmatprep.mubr.msk.bf16.mxu1 %vm11148_vm0, %v14248_v46  ;;  %v3235_v62 = vsel %vm3128_vm7, %v3225_v0, %v3234_v59 }
 0x2a6   : > { %v9956_v28 = vpop.f32.mrb[187].mxu0 }
 0x2a7   : > { %v2351_v56 = vpop.f32.mrb[188].mxu1  ;;  %v3239_v28 = vrot.slane %v3237_v58, 2  ;;  %v3246_v58 = vshrl.u32 %v12550_v35, 16 }
 0x2a8   : > { %10150 = vmatmul.mubr.msk.bf16.gmra.mrb[36].mxu0 %vm614_vm2, %v2655_v57  ;;  %v12544_v12 = vadd.f32 %v2351_v56, %v2127_v36  ;;  %v10037_v41 = vpop.f32.mrb[189].mxu1  ;;  %v2657_v56 = vsel %vm1953_vm6, %v2654_v15, %v2656_v1 }
 0x2a9   : > { %10153 = vmatprep.mubr.msk.bf16.mxu0 %vm11148_vm0, %v14248_v46  ;;  %v2354_v13 = vpop.f32.mrb[190].mxu1  ;;  %v10830_v41 = vld [vmem:[%s11344_s19 + $0x80] sm:$0xff]   ;;  %v3243_v0 = vor.u32 %v3242_v21, %v3239_v28  ;;  %v3251_v28 = vrot.slane %v3249_v61, 3 }
 0x2aa   : > { %14305 = vst [vmem:[#allocation75_spill] sm:$0xff] %v12544_v12  ;;  %v12552_v40 = vadd.f32 %v2354_v13, %v2130_v55  ;;  %v10038_v57 = vpop.f32.mrb[191].mxu1  ;;  %v2658_v15 = vrot.slane %v10830_v41, 2  ;;  %v10833_v21 = vld [vmem:[%s11344_s19 + $0x80] sm:$0xff]  }
 0x2ab   : > { %v2143_v50 = vpop.f32.mrb[188].mxu0  ;;  %v3244_v57 = vsel %vm3128_vm7, %v3234_v59, %v3243_v0  ;;  %v3255_v41 = vshrl.u32 %v10833_v21, 16 }
 0x2ac   : > { %14306 = vst [vmem:[#allocation76_spill] sm:$0xff] %v12552_v40  ;;  %v9959_v6 = vpop.f32.mrb[189].mxu0  ;;  %10232 = vmatmul.mubr.msk.bf16.gmra.mrb[40].mxu1 %vm614_vm2, %v3235_v62 }
 0x2ad   : > { %v2146_v36 = vpop.f32.mrb[190].mxu0  ;;  %10235 = vmatprep.mubr.msk.bf16.mxu1 %vm11148_vm0, %v14248_v46 }
 0x2ae   : > { %v9960_v39 = vpop.f32.mrb[191].mxu0 }
 0x2af   : > { %v2359_v55 = vpop.f32.mrb[192].mxu1  ;;  %v3248_v39 = vrot.slane %v3246_v58, 2  ;;  %v3258_v58 = vshll.u32 %v10833_v21, 16 }
 0x2b0   : > { %10154 = vmatmul.mubr.msk.bf16.gmra.mrb[40].mxu0 %vm614_vm2, %v2657_v56  ;;  %v12562_v6 = vadd.f32 %v2359_v55, %v2135_v2  ;;  %v10041_v13 = vpop.f32.mrb[193].mxu1  ;;  %v2659_v2 = vsel %vm1953_vm6, %v2656_v1, %v2658_v15  ;;  %v10832_v55 = vld [vmem:[%s11344_s19 + $0x88] sm:$0xff]  }
 0x2b1   : > { %10157 = vmatprep.mubr.msk.bf16.mxu0 %vm11148_vm0, %v14248_v46  ;;  %v2362_v62 = vpop.f32.mrb[194].mxu1  ;;  %v3252_v59 = vor.u32 %v3251_v28, %v3248_v39  ;;  %v2660_v1 = vrot.slane %v10832_v55, 2 }
 0x2b2   : > { %14307 = vst [vmem:[#allocation77_spill] sm:$0xff] %v12562_v6  ;;  %v12568_v12 = vadd.f32 %v2362_v62, %v2138_v7  ;;  %v10042_v48 = vpop.f32.mrb[195].mxu1 }
 0x2b3   : > { %v2151_v40 = vpop.f32.mrb[192].mxu0 }
 0x2b4   : > { %14308 = vst [vmem:[#allocation78_spill] sm:$0xff] %v12568_v12  ;;  %v9963_v56 = vpop.f32.mrb[193].mxu0  ;;  %10236 = vmatmul.mubr.msk.bf16.gmra.mrb[44].mxu1 %vm614_vm2, %v3244_v57  ;;  %v3253_v57 = vsel %vm3128_vm7, %v3243_v0, %v3252_v59  ;;  %v10835_v12 = vld [vmem:[%s11344_s19 + $0x88] sm:$0xff]  }
 0x2b5   : > { %v2154_v5 = vpop.f32.mrb[194].mxu0  ;;  %10239 = vmatprep.mubr.msk.bf16.mxu1 %vm11148_vm0, %v14248_v46  ;;  %v3257_v56 = vrot.slane %v3255_v41, 2  ;;  %v3264_v55 = vshrl.u32 %v10835_v12, 16  ;;  %v3267_v41 = vshll.u32 %v10835_v12, 16 }
 0x2b6   : > { %v9964_v13 = vpop.f32.mrb[195].mxu0 }
 0x2b7   : > { %v2367_v7 = vpop.f32.mrb[196].mxu1  ;;  %v3260_v13 = vrot.slane %v3258_v58, 3  ;;  %v11149_v58 = vmov 0  }
 0x2b8   : > { %10158 = vmatmul.mubr.msk.bf16.gmra.mrb[44].mxu0 %vm614_vm2, %v2659_v2  ;;  %v12576_v61 = vadd.f32 %v2367_v7, %v2143_v50  ;;  %v10045_v48 = vpop.f32.mrb[197].mxu1  ;;  %v2661_v50 = vsel %vm1953_vm6, %v2658_v15, %v2660_v1  ;;  %v12587_v7 = vld [vmem:[%s11344_s19 + $0x90] sm:$0xff]   ;;  %10773 = vset.pattern.permute.xlu0 %v11149_v58 }
 0x2b9   : > { %10161 = vmatprep.mubr.msk.bf16.mxu0 %vm11148_vm0, %v14248_v46  ;;  %v2370_v62 = vpop.f32.mrb[198].mxu1  ;;  %v3261_v0 = vor.u32 %v3260_v13, %v3257_v56  ;;  %10774 = vset.pattern.permute.xlu1 %v11149_v58  ;;  %v2662_v12 = vrot.slane %v12587_v7, 2 }
 0x2ba   : > { %14309 = vst [vmem:[#allocation79_spill] sm:$0xff] %v12576_v61  ;;  %v12582_v28 = vadd.f32 %v2370_v62, %v2146_v36  ;;  %v10046_v21 = vpop.f32.mrb[199].mxu1  ;;  %v4150_v36 = vld [vmem:[%s14178_s3] sm:$0xff] }
 0x2bb   : > { %v2159_v39 = vpop.f32.mrb[196].mxu0  ;;  %4193 = vperm.xlu0 %10773, %v4150_v36   ;;  %v3262_v13 = vsel %vm3128_vm7, %v3252_v59, %v3261_v0  ;;  %v3266_v21 = vrot.slane %v3264_v55, 2  ;;  %v2663_v7 = vsel %vm1953_vm6, %v2660_v1, %v2662_v12  ;;  %v12612_v59 = vld [vmem:[%s11344_s19 + $0x98] sm:$0xff]   ;;  %v4154_v1 = vld [vmem:[%s14178_s3 + $0x20] sm:$0xff] }
 0x2bc   : > { %14310 = vst [vmem:[#allocation80_spill] sm:$0xff] %v12582_v28  ;;  %v9967_v2 = vpop.f32.mrb[197].mxu0  ;;  %10240 = vmatmul.mubr.msk.bf16.gmra.mrb[48].mxu1 %vm614_vm2, %v3253_v57  ;;  %v12632_v28 = vld [vmem:[%s11344_s19 + $0x98] sm:$0xff]   ;;  %v12665_v61 = vld [vmem:[%s11344_s19 + $0xa0] sm:$0xff]  }
 0x2bd   : > { %v2162_v6 = vpop.f32.mrb[198].mxu0  ;;  %10243 = vmatprep.mubr.msk.bf16.mxu1 %vm11148_vm0, %v14248_v46  ;;  %v3269_v2 = vrot.slane %v3267_v41, 3 }
 0x2be   : > { %v9968_v48 = vpop.f32.mrb[199].mxu0 }
 0x2bf   : > { %v2375_v15 = vpop.f32.mrb[200].mxu1  ;;  %v12602_v48 = vld [vmem:[%s11344_s19 + $0x90] sm:$0xff]  }
 0x2c0   : > { %10162 = vmatmul.mubr.msk.bf16.gmra.mrb[48].mxu0 %vm614_vm2, %v2661_v50  ;;  %v12595_v62 = vadd.f32 %v2375_v15, %v2151_v40  ;;  %v10049_v57 = vpop.f32.mrb[201].mxu1  ;;  %v4152_v40 = vld [vmem:[%s14178_s3 + $0x10] sm:$0xff]  ;;  %v3273_v41 = vshrl.u32 %v12602_v48, 16 }
 0x2c1   : > { %10165 = vmatprep.mubr.msk.bf16.mxu0 %vm11148_vm0, %v14248_v46  ;;  %v2378_v56 = vpop.f32.mrb[202].mxu1  ;;  %4203 = vperm.xlu0 %10773, %v4152_v40  }
 0x2c2   : > { %14311 = vst [vmem:[#allocation81_spill] sm:$0xff] %v12595_v62  ;;  %v12604_v50 = vadd.f32 %v2378_v56, %v2154_v5  ;;  %v10050_v36 = vpop.f32.mrb[203].mxu1  ;;  %v3270_v5 = vor.u32 %v3269_v2, %v3266_v21  ;;  %v3276_v56 = vshll.u32 %v12602_v48, 16  ;;  %v2664_v2 = vrot.slane %v12612_v59, 2  ;;  %v4156_v59 = vld [vmem:[%s14178_s3 + $0x30] sm:$0xff] }
 0x2c3   : > { %v2167_v58 = vpop.f32.mrb[200].mxu0  ;;  %v4151_v36 = vld [vmem:[%s14178_s3 + $0x8] sm:$0xff] }
 0x2c4   : > { %14312 = vst [vmem:[#allocation82_spill] sm:$0xff] %v12604_v50  ;;  %v9971_v15 = vpop.f32.mrb[201].mxu0  ;;  %10244 = vmatmul.mubr.msk.bf16.gmra.mrb[52].mxu1 %vm614_vm2, %v3262_v13  ;;  %4198 = vperm.xlu1 %10774, %v4151_v36   ;;  %v3275_v50 = vrot.slane %v3273_v41, 2  ;;  %v3278_v62 = vrot.slane %v3276_v56, 3  ;;  %v2665_v41 = vsel %vm1953_vm6, %v2662_v12, %v2664_v2  ;;  %v12645_v56 = vld [vmem:[%s11344_s19 + $0xa0] sm:$0xff]  }
 0x2c5   : > { %v2170_v57 = vpop.f32.mrb[202].mxu0  ;;  %10247 = vmatprep.mubr.msk.bf16.mxu1 %vm11148_vm0, %v14248_v46  ;;  %4213 = vperm.xlu0 %10773, %v4154_v1   ;;  %v4158_v12 = vld [vmem:[%s14178_s3 + $0x40] sm:$0xff] }
 0x2c6   : > { %v9972_v55 = vpop.f32.mrb[203].mxu0 }
 0x2c7   : > { %v2383_v13 = vpop.f32.mrb[204].mxu1  ;;  %v3271_v55 = vsel %vm3128_vm7, %v3261_v0, %v3270_v5 }
 0x2c8   : > { %10166 = vmatmul.mubr.msk.bf16.gmra.mrb[52].mxu0 %vm614_vm2, %v2663_v7  ;;  %v12625_v40 = vadd.f32 %v2383_v13, %v2159_v39  ;;  %v10053_v21 = vpop.f32.mrb[205].mxu1  ;;  %v4153_v39 = vld [vmem:[%s14178_s3 + $0x18] sm:$0xff] }
 0x2c9   : > { %10169 = vmatprep.mubr.msk.bf16.mxu0 %vm11148_vm0, %v14248_v46  ;;  %v2386_v15 = vpop.f32.mrb[206].mxu1  ;;  %4208 = vperm.xlu1 %10774, %v4153_v39   ;;  %v3279_v21 = vor.u32 %v3278_v62, %v3275_v50  ;;  %v4155_v39 = vld [vmem:[%s14178_s3 + $0x28] sm:$0xff]  ;;  %v2666_v50 = vrot.slane %v12645_v56, 2  ;;  %v4160_v56 = vld [vmem:[%s14178_s3 + $0x50] sm:$0xff] }
 0x2ca   : > { %14313 = vst [vmem:[#allocation83_spill] sm:$0xff] %v12625_v40  ;;  %v12634_v7 = vadd.f32 %v2386_v15, %v2162_v6  ;;  %v10054_v1 = vpop.f32.mrb[207].mxu1  ;;  %4223 = vperm.xlu0 %10773, %v4156_v59   ;;  %v3282_v15 = vshrl.u32 %v12632_v28, 16 }
 0x2cb   : > { %v2175_v36 = vpop.f32.mrb[204].mxu0  ;;  %v3285_v1 = vshll.u32 %v12632_v28, 16 }
 0x2cc   : > { %14314 = vst [vmem:[#allocation84_spill] sm:$0xff] %v12634_v7  ;;  %v9975_v13 = vpop.f32.mrb[205].mxu0  ;;  %10248 = vmatmul.mubr.msk.bf16.gmra.mrb[56].mxu1 %vm614_vm2, %v3271_v55  ;;  %v3284_v7 = vrot.slane %v3282_v15, 2  ;;  %v12678_v15 = vld [vmem:[%s11344_s19 + $0xa8] sm:$0xff]  }
 0x2cd   : > { %v2178_v0 = vpop.f32.mrb[206].mxu0  ;;  %10251 = vmatprep.mubr.msk.bf16.mxu1 %vm11148_vm0, %v14248_v46  ;;  %4218 = vperm.xlu1 %10774, %v4155_v39   ;;  %v3287_v40 = vrot.slane %v3285_v1, 3  ;;  %v4157_v39 = vld [vmem:[%s14178_s3 + $0x38] sm:$0xff] }
 0x2ce   : > { %v9976_v6 = vpop.f32.mrb[207].mxu0  ;;  %4233 = vperm.xlu0 %10773, %v4158_v12  }
 0x2cf   : > { %v2391_v55 = vpop.f32.mrb[208].mxu1  ;;  %v3280_v6 = vsel %vm3128_vm7, %v3270_v5, %v3279_v21  ;;  %v2667_v5 = vsel %vm1953_vm6, %v2664_v2, %v2666_v50  ;;  %v3288_v1 = vor.u32 %v3287_v40, %v3284_v7  ;;  %v4162_v2 = vld [vmem:[%s14178_s3 + $0x60] sm:$0xff]  ;;  %v2668_v7 = vrot.slane %v12678_v15, 2  ;;  %v4165_v15 = vld [vmem:[%s14178_s3 + $0x78] sm:$0xff] }
 0x2d0   : > { %10170 = vmatmul.mubr.msk.bf16.gmra.mrb[56].mxu0 %vm614_vm2, %v2665_v41  ;;  %v12658_v59 = vadd.f32 %v2391_v55, %v2167_v58  ;;  %v10057_v62 = vpop.f32.mrb[209].mxu1 }
 0x2d1   : > { %10173 = vmatprep.mubr.msk.bf16.mxu0 %vm11148_vm0, %v14248_v46  ;;  %v2394_v13 = vpop.f32.mrb[210].mxu1  ;;  %4228 = vperm.xlu1 %10774, %v4157_v39   ;;  %v3291_v62 = vshrl.u32 %v12665_v61, 16 }
 0x2d2   : > { %14315 = vst [vmem:[#allocation85_spill] sm:$0xff] %v12658_v59  ;;  %v12667_v43 = vadd.f32 %v2394_v13, %v2170_v57  ;;  %v10058_v58 = vpop.f32.mrb[211].mxu1  ;;  %4243 = vperm.xlu0 %10773, %v4160_v56   ;;  %v3294_v13 = vshll.u32 %v12665_v61, 16  ;;  %v12698_v59 = vld [vmem:[%s11344_s19 + $0xa8] sm:$0xff]  }
 0x2d3   : > { %v2183_v41 = vpop.f32.mrb[208].mxu0  ;;  %v4159_v58 = vld [vmem:[%s14178_s3 + $0x48] sm:$0xff]  ;;  %14318 = vst [vmem:[#allocation88_spill] sm:$0xff] %v12698_v59 }
 0x2d4   : > { %14316 = vst [vmem:[#allocation86_spill] sm:$0xff] %v12667_v43  ;;  %v9979_v12 = vpop.f32.mrb[209].mxu0  ;;  %10252 = vmatmul.mubr.msk.bf16.gmra.mrb[60].mxu1 %vm614_vm2, %v3280_v6  ;;  %v3296_v43 = vrot.slane %v3294_v13, 3 }
 0x2d5   : > { %v2186_v55 = vpop.f32.mrb[210].mxu0  ;;  %10255 = vmatprep.mubr.msk.bf16.mxu1 %vm11148_vm0, %v14248_v46  ;;  %4238 = vperm.xlu1 %10774, %v4159_v58   ;;  %v3289_v12 = vsel %vm3128_vm7, %v3279_v21, %v3288_v1  ;;  %v4161_v58 = vld [vmem:[%s14178_s3 + $0x58] sm:$0xff]  ;;  %v2669_v21 = vsel %vm1953_vm6, %v2666_v50, %v2668_v7  ;;  %v4164_v50 = vld [vmem:[%s14178_s3 + $0x70] sm:$0xff] }
 0x2d6   : > { %v9980_v57 = vpop.f32.mrb[211].mxu0  ;;  %4253 = vperm.xlu0 %10773, %v4162_v2  }
 0x2d7   : > { %v2399_v6 = vpop.f32.mrb[212].mxu1  ;;  %v3293_v57 = vrot.slane %v3291_v62, 2  ;;  %v12711_v62 = vld [vmem:[%s11344_s19 + $0xb0] ss:$0 sps:$4 sm:$0xff]  }
 0x2d8   : > { %10174 = vmatmul.mubr.msk.bf16.gmra.mrb[60].mxu0 %vm614_vm2, %v2667_v5  ;;  %v12691_v39 = vadd.f32 %v2399_v6, %v2175_v36  ;;  %v10061_v40 = vpop.f32.mrb[213].mxu1 }
 0x2d9   : > { %10177 = vmatprep.mubr.msk.bf16.mxu0 %vm11148_vm0, %v14248_v46  ;;  %v2402_v56 = vpop.f32.mrb[214].mxu1  ;;  %4248 = vperm.xlu1 %10774, %v4161_v58   ;;  %v3297_v13 = vor.u32 %v3296_v43, %v3293_v57  ;;  %v3300_v40 = vshrl.u32 %v12698_v59, 16  ;;  %v2670_v57 = vrot.slane %v12711_v62, 2  ;;  %v4168_v62 = vld [vmem:[%s14178_s3 + $0x90] sm:$0xff] }
 0x2da   : > { %14317 = vst [vmem:[#allocation87_spill] sm:$0xff] %v12691_v39  ;;  %v12700_v47 = vadd.f32 %v2402_v56, %v2178_v0  ;;  %v10062_v36 = vpop.f32.mrb[215].mxu1  ;;  %4268 = vperm.xlu0 %10773, %v4165_v15   ;;  %v3303_v56 = vshll.u32 %v12698_v59, 16  ;;  %v12731_v39 = vld [vmem:[%s11344_s19 + $0xb0] sm:$0x1f]  }
 0x2db   : > { %v2191_v5 = vpop.f32.mrb[212].mxu0  ;;  %v4163_v36 = vld [vmem:[%s14178_s3 + $0x68] sm:$0xff] }
 0x2dc   : > { %14319 = vst [vmem:[#allocation89_spill] sm:$0xff] %v12700_v47  ;;  %v9983_v2 = vpop.f32.mrb[213].mxu0  ;;  %10256 = vmatmul.mubr.msk.bf16.gmra.mrb[64].mxu1 %vm614_vm2, %v3289_v12  ;;  %v3305_v47 = vrot.slane %v3303_v56, 3  ;;  %v3309_v56 = vshrl.u32 %v12731_v39, 16 }
 0x2dd   : > { %v2194_v6 = vpop.f32.mrb[214].mxu0  ;;  %10259 = vmatprep.mubr.msk.bf16.mxu1 %vm11148_vm0, %v14248_v46  ;;  %4258 = vperm.xlu1 %10774, %v4163_v36   ;;  %v3298_v2 = vsel %vm3128_vm7, %v3288_v1, %v3297_v13  ;;  %v2671_v1 = vsel %vm1953_vm6, %v2668_v7, %v2670_v57 }
 0x2de   : > { %v9984_v0 = vpop.f32.mrb[215].mxu0  ;;  %4263 = vperm.xlu0 %10773, %v4164_v50  }
 0x2df   : > { %v2407_v12 = vpop.f32.mrb[216].mxu1  ;;  %v3302_v0 = vrot.slane %v3300_v40, 2 }
 0x2e0   : > { %10178 = vmatmul.mubr.msk.bf16.gmra.mrb[64].mxu0 %vm614_vm2, %v2669_v21  ;;  %v12724_v58 = vadd.f32 %v2407_v12, %v2183_v41  ;;  %v10065_v43 = vpop.f32.mrb[217].mxu1  ;;  %v4166_v41 = vld [vmem:[%s14178_s3 + $0x80] sm:$0xff] }
 0x2e1   : > { %10181 = vmatprep.mubr.msk.bf16.mxu0 %vm11148_vm0, %v14248_v46  ;;  %v2410_v15 = vpop.f32.mrb[218].mxu1  ;;  %4273 = vperm.xlu1 %10774, %v4166_v41   ;;  %v3312_v43 = vshll.u32 %v12731_v39, 16 }
 0x2e2   : > { %14320 = vst [vmem:[#allocation90_spill] sm:$0xff] %v12724_v58  ;;  %v12733_v21 = vadd.f32 %v2410_v15, %v2186_v55  ;;  %v10066_v36 = vpop.f32.mrb[219].mxu1  ;;  %4283 = vperm.xlu0 %10773, %v4168_v62   ;;  %v3306_v55 = vor.u32 %v3305_v47, %v3302_v0  ;;  %v4167_v15 = vld [vmem:[%s14178_s3 + $0x88] sm:$0xff]  ;;  %v3311_v62 = vrot.slane %v3309_v56, 2 }
 0x2e3   : > { %v2199_v59 = vpop.f32.mrb[216].mxu0 }
 0x2e4   : > { %14321 = vst [vmem:[#allocation91_spill] sm:$0xff] %v12733_v21  ;;  %v9987_v50 = vpop.f32.mrb[217].mxu0  ;;  %10260 = vmatmul.mubr.msk.bf16.gmra.mrb[68].mxu1 %vm614_vm2, %v3298_v2  ;;  %v4170_v2 = vld [vmem:[%s14178_s3 + $0xa0] sm:$0xff]  ;;  %v3307_v41 = vsel %vm3128_vm7, %v3297_v13, %v3306_v55  ;;  %v10993_v13 = vld [vmem:[%s11344_s19 + $0x14] sm:$0xf] }
 0x2e5   : > { %v2202_v12 = vpop.f32.mrb[218].mxu0  ;;  %10263 = vmatprep.mubr.msk.bf16.mxu1 %vm11148_vm0, %v14248_v46  ;;  %4278 = vperm.xlu1 %10774, %v4167_v15   ;;  %v3314_v50 = vrot.slane %v3312_v43, 3  ;;  %v4172_v15 = vld [vmem:[%s14178_s3 + $0xb0] sm:$0xff] }
 0x2e6   : > { %v9988_v40 = vpop.f32.mrb[219].mxu0  ;;  %4293 = vperm.xlu0 %10773, %v4170_v2  }
 0x2e7   : > { %v2415_v7 = vpop.f32.mrb[220].mxu1  ;;  %v3624_v40 = vld [vmem:[%s11344_s19 + $0x10] sm:$0x8]  ;;  %v3315_v43 = vor.u32 %v3314_v50, %v3311_v62  ;;  %v10994_v62 = vld [vmem:[%s11344_s19 + $0x18] sm:$0xff]  }
 0x2e8   : > { %10182 = vmatmul.mubr.msk.bf16.gmra.mrb[68].mxu0 %vm614_vm2, %v2671_v1  ;;  %v12754_v36 = vadd.f32 %v2415_v7, %v2191_v5  ;;  %v10069_v47 = vpop.f32.mrb[221].mxu1  ;;  %v4169_v5 = vld [vmem:[%s14178_s3 + $0x98] sm:$0xff]  ;;  %v8895_v56 = vcombine.low %v3624_v40, %v10993_v13  ;;  %v3632_v50 = vrot.slane %v10994_v62, 3 }
 0x2e9   : > { %10185 = vmatprep.mubr.msk.bf16.mxu0 %vm11148_vm0, %v14248_v46  ;;  %v2418_v0 = vpop.f32.mrb[222].mxu1  ;;  %4288 = vperm.xlu1 %10774, %v4169_v5   ;;  %v4171_v47 = vld [vmem:[%s14178_s3 + $0xa8] sm:$0xff] }
 0x2ea   : > { %v12760_v58 = vadd.f32 %v2418_v0, %v2194_v6  ;;  %v10070_v1 = vpop.f32.mrb[223].mxu1  ;;  %4303 = vperm.xlu0 %10773, %v4172_v15   ;;  %v4174_v0 = vld [vmem:[%s14178_s3 + $0xc0] sm:$0xff]  ;;  %v3631_v5 = vrot.slane %v8895_v56, 3 }
 0x2eb   : > { %v2207_v21 = vpop.f32.mrb[220].mxu0 }
 0x2ec   : > { %v9991_v7 = vpop.f32.mrb[221].mxu0  ;;  %10264 = vmatmul.mubr.msk.bf16.gmra.mrb[72].mxu1 %vm614_vm2, %v3307_v41 }
 0x2ed   : > { %v2210_v2 = vpop.f32.mrb[222].mxu0  ;;  %10267 = vmatprep.mubr.msk.bf16.mxu1 %vm11148_vm0, %v14248_v46  ;;  %4298 = vperm.xlu1 %10774, %v4171_v47   ;;  %v3316_v7 = vsel %vm3128_vm7, %v3306_v55, %v3315_v43  ;;  %v4176_v47 = vld [vmem:[%s14178_s3 + $0xd0] sm:$0xff]  ;;  %v3633_v55 = vsel %vm3630_vm8, %v3631_v5, %v3632_v50 }
 0x2ee   : > { %v9992_v6 = vpop.f32.mrb[223].mxu0  ;;  %4313 = vperm.xlu0 %10773, %v4174_v0  }
 0x2ef   : > { %v2423_v41 = vpop.f32.mrb[224].mxu1 }
 0x2f0   : > { %10186 = vmatmul.mubr.msk.bf16.gmra.mrb[72].mxu0 %vm614_vm2, %v2670_v57  ;;  %v12779_v1 = vadd.f32 %v2423_v41, %v2199_v59  ;;  %v10073_v40 = vpop.f32.mrb[225].mxu1  ;;  %v4173_v59 = vld [vmem:[%s14178_s3 + $0xb8] sm:$0xff]  ;;  %v4175_v41 = vld [vmem:[%s14178_s3 + $0xc8] sm:$0xff] }
 0x2f1   : > { %10277 = vmatprep.mubr.msk.bf16.mxu0 %vm11148_vm0, %v14248_v46  ;;  %v2426_v15 = vpop.f32.mrb[226].mxu1  ;;  %4308 = vperm.xlu1 %10774, %v4173_v59   ;;  %v4179_v40 = vld [vmem:[%s14178_s3 + $0xe8] sm:$0xff] }
 0x2f2   : > { %v12785_v6 = vadd.f32 %v2426_v15, %v2202_v12  ;;  %v10074_v57 = vpop.f32.mrb[227].mxu1  ;;  %4323 = vperm.xlu0 %10773, %v4176_v47  }
 0x2f3   : > { %v2215_v13 = vpop.f32.mrb[224].mxu0 }
 0x2f4   : > { %14322 = vst [vmem:[#allocation92_spill] sm:$0xff] %v12785_v6  ;;  %v9995_v56 = vpop.f32.mrb[225].mxu0  ;;  %10268 = vmatmul.mubr.msk.bf16.gmra.mrb[76].mxu1 %vm614_vm2, %v3316_v7  ;;  %v10995_v7 = vld [vmem:[%s11344_s19 + $0x20] sm:$0xff]   ;;  %v6729_v6 = vld [vmem:[#allocation6 + $0x28] sm:$0xff] }
 0x2f5   : > { %v2218_v0 = vpop.f32.mrb[226].mxu0  ;;  %10271 = vmatprep.mubr.msk.bf16.mxu1 %vm11148_vm0, %v14248_v46  ;;  %4318 = vperm.xlu1 %10774, %v4175_v41   ;;  %v3634_v57 = vrot.slane %v10995_v7, 3  ;;  %v4182_v7 = vld [vmem:[%s14178_s3 + $0x100] sm:$0xff] }
 0x2f6   : > { %v9996_v12 = vpop.f32.mrb[227].mxu0  ;;  %4338 = vperm.xlu0 %10773, %v4179_v40  }
 0x2f7   : > { %v2431_v62 = vpop.f32.mrb[228].mxu1  ;;  %v3635_v40 = vsel %vm3630_vm8, %v3632_v50, %v3634_v57 }
 0x2f8   : > { %10278 = vmatmul.mubr.msk.bf16.vlgmr.msra.gmra.mrb[76].mxu0 %vm614_vm2, %v3633_v55  ;;  %v12804_v15 = vadd.f32 %v2431_v62, %v2207_v21  ;;  %v10077_v5 = vpop.f32.mrb[229].mxu1  ;;  %v4177_v55 = vld [vmem:[%s14178_s3 + $0xd8] sm:$0xff]  ;;  %v4180_v21 = vld [vmem:[%s14178_s3 + $0xf0] sm:$0xff] }
 0x2f9   : > { %10281 = vmatprep.mubr.msk.bf16.mxu0 %vm11148_vm0, %v14248_v46  ;;  %v2434_v59 = vpop.f32.mrb[230].mxu1  ;;  %4328 = vperm.xlu1 %10774, %v4177_v55   ;;  %v4178_v5 = vld [vmem:[%s14178_s3 + $0xe0] sm:$0xff] }
 0x2fa   : > { %14323 = vst [vmem:[#allocation93_spill] sm:$0xff] %v12804_v15  ;;  %v12809_v56 = vadd.f32 %v2434_v59, %v2210_v2  ;;  %v10078_v12 = vpop.f32.mrb[231].mxu1  ;;  %4343 = vperm.xlu0 %10773, %v4180_v21  }
 0x2fb   : > { %v2223_v47 = vpop.f32.mrb[228].mxu0 }
 0x2fc   : > { %14324 = vst [vmem:[#allocation94_spill] sm:$0xff] %v12809_v56  ;;  %v9999_v41 = vpop.f32.mrb[229].mxu0  ;;  %10272 = vmatmul.mubr.msk.bf16.gmra.mrb[80].mxu1 %vm614_vm2, %v3315_v43  ;;  %v10996_v43 = vld [vmem:[%s11344_s19 + $0x28] sm:$0xff]  }
 0x2fd   : > { %v2226_v62 = vpop.f32.mrb[230].mxu0  ;;  %4333 = vperm.xlu1 %10774, %v4178_v5   ;;  %v3636_v50 = vrot.slane %v10996_v43, 3 }
 0x2fe   : > { %v10000_v2 = vpop.f32.mrb[231].mxu0  ;;  %4353 = vperm.xlu0 %10773, %v4182_v7  }
 0x2ff   : > { %v2439_v59 = vpop.f32.mrb[232].mxu1 }
 0x300   : > { %10282 = vmatmul.mubr.msk.bf16.gmra.mrb[80].mxu0 %vm614_vm2, %v3635_v40  ;;  %v12826_v12 = vadd.f32 %v2439_v59, %v2215_v13  ;;  %v10081_v55 = vpop.f32.mrb[233].mxu1  ;;  %v4181_v40 = vld [vmem:[%s14178_s3 + $0xf8] sm:$0xff]  ;;  %v4184_v13 = vld [vmem:[%s14178_s3 + $0x110] sm:$0xff] }
 0x301   : > { %10285 = vmatprep.mubr.msk.bf16.mxu0 %vm11148_vm0, %v14248_v46  ;;  %v2442_v21 = vpop.f32.mrb[234].mxu1  ;;  %4348 = vperm.xlu1 %10774, %v4181_v40   ;;  %v3637_v55 = vsel %vm3630_vm8, %v3634_v57, %v3636_v50  ;;  %v10997_v57 = vld [vmem:[%s11344_s19 + $0x30] sm:$0xff]  }
 0x302   : > { %14325 = vst [vmem:[#allocation95_spill] sm:$0xff] %v12826_v12  ;;  %v12831_v2 = vadd.f32 %v2442_v21, %v2218_v0  ;;  %v10082_v56 = vpop.f32.mrb[235].mxu1  ;;  %4363 = vperm.xlu0 %10773, %v4184_v13   ;;  %v4183_v0 = vld [vmem:[%s14178_s3 + $0x108] sm:$0xff]  ;;  %v3638_v13 = vrot.slane %v10997_v57, 3 }
 0x303   : > { %v2231_v41 = vpop.f32.mrb[232].mxu0  ;;  %v4186_v56 = vld [vmem:[%s14178_s3 + $0x120] sm:$0xff] }
 0x304   : > { %14326 = vst [vmem:[#allocation96_spill] sm:$0xff] %v12831_v2  ;;  %v10003_v5 = vpop.f32.mrb[233].mxu0 }
 0x305   : > { %v2234_v59 = vpop.f32.mrb[234].mxu0  ;;  %4358 = vperm.xlu1 %10774, %v4183_v0  }
 0x306   : > { %v10004_v7 = vpop.f32.mrb[235].mxu0  ;;  %4373 = vperm.xlu0 %10773, %v4186_v56  }
 0x307   : > { %v2447_v43 = vpop.f32.mrb[236].mxu1 }
 0x308   : > { %10286 = vmatmul.mubr.msk.bf16.gmra.mrb[84].mxu0 %vm614_vm2, %v3637_v55  ;;  %v12847_v21 = vadd.f32 %v2447_v43, %v2223_v47  ;;  %v10085_v40 = vpop.f32.mrb[237].mxu1  ;;  %v4185_v55 = vld [vmem:[%s14178_s3 + $0x118] sm:$0xff]  ;;  %v4188_v47 = vld [vmem:[%s14178_s3 + $0x130] sm:$0xff] }
 0x309   : > { %10289 = vmatprep.mubr.msk.bf16.mxu0 %vm11148_vm0, %v14248_v46  ;;  %v2450_v5 = vpop.f32.mrb[238].mxu1  ;;  %4368 = vperm.xlu1 %10774, %v4185_v55   ;;  %v3639_v40 = vsel %vm3630_vm8, %v3636_v50, %v3638_v13  ;;  %v10998_v50 = vld [vmem:[%s11344_s19 + $0x38] sm:$0xff]  }
 0x30a   : > { %14327 = vst [vmem:[#allocation97_spill] sm:$0xff] %v12847_v21  ;;  %v12852_v2 = vadd.f32 %v2450_v5, %v2226_v62  ;;  %v10086_v12 = vpop.f32.mrb[239].mxu1  ;;  %4383 = vperm.xlu0 %10773, %v4188_v47   ;;  %v4187_v62 = vld [vmem:[%s14178_s3 + $0x128] sm:$0xff]  ;;  %v3640_v47 = vrot.slane %v10998_v50, 3 }
 0x30b   : > { %v2239_v7 = vpop.f32.mrb[236].mxu0  ;;  %v4190_v12 = vld [vmem:[%s14178_s3 + $0x140] sm:$0xf]  ;;  %v6724_v50 = vld [vmem:[#allocation6] sm:$0xff] }
 0x30c   : > { %14328 = vst [vmem:[#allocation98_spill] sm:$0xff] %v12852_v2  ;;  %v10007_v0 = vpop.f32.mrb[237].mxu0 }
 0x30d   : > { %v2242_v43 = vpop.f32.mrb[238].mxu0  ;;  %4378 = vperm.xlu1 %10774, %v4187_v62   ;;  %v6725_v62 = vld [vmem:[#allocation6 + $0x8] sm:$0xff] }
 0x30e   : > { %v10008_v56 = vpop.f32.mrb[239].mxu0  ;;  %4393 = vperm.xlu0 %10773, %v4190_v12   ;;  %v6727_v12 = vld [vmem:[#allocation6 + $0x18] sm:$0xff] }
 0x30f   : > { %v2455_v57 = vpop.f32.mrb[240].mxu1 }
 0x310   : > { %10290 = vmatmul.mubr.msk.bf16.gmra.mrb[88].mxu0 %vm614_vm2, %v3639_v40  ;;  %v12868_v5 = vadd.f32 %v2455_v57, %v2231_v41  ;;  %v10089_v55 = vpop.f32.mrb[241].mxu1  ;;  %v4189_v40 = vld [vmem:[%s14178_s3 + $0x138] sm:$0xff] }
 0x311   : > { %10293 = vmatprep.mubr.msk.bf16.mxu0 %vm11148_vm0, %v14248_v46  ;;  %v2458_v0 = vpop.f32.mrb[242].mxu1  ;;  %4388 = vperm.xlu1 %10774, %v4189_v40   ;;  %v3641_v55 = vsel %vm3630_vm8, %v3638_v13, %v3640_v47 }
 0x312   : > { %14329 = vst [vmem:[#allocation99_spill] sm:$0xff] %v12868_v5  ;;  %v12873_v2 = vadd.f32 %v2458_v0, %v2234_v59  ;;  %v10090_v21 = vpop.f32.mrb[243].mxu1  ;;  %6747 = vperm.xlu0 %10773, %v6725_v62   ;;  %v6726_v62 = vld [vmem:[#allocation6 + $0x10] sm:$0xff] }
 0x313   : > { %v2247_v56 = vpop.f32.mrb[240].mxu0 }
 0x314   : > { %14330 = vst [vmem:[#allocation100_spill] sm:$0xff] %v12873_v2  ;;  %v10011_v41 = vpop.f32.mrb[241].mxu0  ;;  %v10999_v2 = vld [vmem:[%s11344_s19 + $0x40] sm:$0xff]  }
 0x315   : > { %v2250_v57 = vpop.f32.mrb[242].mxu0  ;;  %6742 = vperm.xlu1 %10774, %v6724_v50   ;;  %v3642_v41 = vrot.slane %v10999_v2, 3 }
 0x316   : > { %v10012_v5 = vpop.f32.mrb[243].mxu0  ;;  %6757 = vperm.xlu0 %10773, %v6727_v12  }
 0x317   : > { %v2463_v59 = vpop.f32.mrb[244].mxu1 }
 0x318   : > { %10294 = vmatmul.mubr.msk.bf16.gmra.mrb[92].mxu0 %vm614_vm2, %v3641_v55  ;;  %v12880_v21 = vadd.f32 %v2463_v59, %v2239_v7  ;;  %v10093_v0 = vpop.f32.mrb[245].mxu1  ;;  %v3643_v7 = vsel %vm3630_vm8, %v3640_v47, %v3642_v41 }
 0x319   : > { %10297 = vmatprep.mubr.msk.bf16.mxu0 %vm11148_vm0, %v14248_v46  ;;  %v2466_v40 = vpop.f32.mrb[246].mxu1  ;;  %6752 = vperm.xlu1 %10774, %v6726_v62   ;;  %v6728_v0 = vld [vmem:[#allocation6 + $0x20] sm:$0xff] }
 0x31a   : > { %14331 = vst [vmem:[#allocation101_spill] sm:$0xff] %v12880_v21  ;;  %v12885_v13 = vadd.f32 %v2466_v40, %v2242_v43  ;;  %v10094_v5 = vpop.f32.mrb[247].mxu1  ;;  %6767 = vperm.xlu0 %10773, %v6729_v6   ;;  %v6731_v21 = vld [vmem:[#allocation6 + $0x38] sm:$0xff] }
 0x31b   : > { %v2255_v15 = vpop.f32.mrb[244].mxu0  ;;  %v11000_v40 = vld [vmem:[%s11344_s19 + $0x48] sm:$0xff]  }
 0x31c   : > { %14332 = vst [vmem:[#allocation102_spill] sm:$0xff] %v12885_v13  ;;  %v10015_v55 = vpop.f32.mrb[245].mxu0  ;;  %v3644_v5 = vrot.slane %v11000_v40, 3 }
 0x31d   : > { %v2258_v50 = vpop.f32.mrb[246].mxu0  ;;  %6762 = vperm.xlu1 %10774, %v6728_v0  }
 0x31e   : > { %v10016_v59 = vpop.f32.mrb[247].mxu0  ;;  %6777 = vperm.xlu0 %10773, %v6731_v21   ;;  %v6730_v50 = vld [vmem:[#allocation6 + $0x30] sm:$0xff]  ;;  %v6732_v21 = vld [vmem:[#allocation6 + $0x40] sm:$0xff] }
 0x31f   : > { %v2471_v2 = vpop.f32.mrb[248].mxu1  ;;  %v6733_v59 = vld [vmem:[#allocation6 + $0x48] sm:$0xff] }
 0x320   : > { %10298 = vmatmul.mubr.msk.bf16.gmra.mrb[96].mxu0 %vm614_vm2, %v3643_v7  ;;  %v12889_v12 = vadd.f32 %v2471_v2, %v2247_v56  ;;  %v10097_v43 = vpop.f32.mrb[249].mxu1  ;;  %v3645_v2 = vsel %vm3630_vm8, %v3642_v41, %v3644_v5 }
 0x321   : > { %10301 = vmatprep.mubr.msk.bf16.mxu0 %vm11148_vm0, %v14248_v46  ;;  %v2474_v62 = vpop.f32.mrb[250].mxu1  ;;  %6772 = vperm.xlu1 %10774, %v6730_v50  }
 0x322   : > { %14333 = vst [vmem:[#allocation103_spill] sm:$0xff] %v12889_v12  ;;  %v12894_v47 = vadd.f32 %v2474_v62, %v2250_v57  ;;  %v10098_v6 = vpop.f32.mrb[251].mxu1  ;;  %6787 = vperm.xlu0 %10773, %v6733_v59  }
 0x323   : > { %v2772_v55 = vpop.f32.mrb[248].mxu0 }
 0x324   : > { %14334 = vst [vmem:[#allocation104_spill] sm:$0xff] %v12894_v47  ;;  %v2938_v7 = vadd.f32 %v2772_v55, %v11814_v60  ;;  %v10107_v0 = vpop.f32.mrb[249].mxu0  ;;  %v11001_v60 = vld [vmem:[%s11344_s19 + $0x50] sm:$0xff]   ;;  %v14386_v47 = vld [vmem:[#allocation63_spill] sm:$0xff] }
 0x325   : > { %v2775_v56 = vpop.f32.mrb[250].mxu0  ;;  %6782 = vperm.xlu1 %10774, %v6732_v21   ;;  %v3646_v55 = vrot.slane %v11001_v60, 3  ;;  %v11002_v60 = vld [vmem:[%s11344_s19 + $0x58] sm:$0xff]  }
 0x326   : > { %v2939_v43 = vadd.f32 %v2775_v56, %v11817_v19  ;;  %v10108_v40 = vpop.f32.mrb[251].mxu0 }
 0x327   : > { %v2479_v57 = vpop.f32.mrb[252].mxu1 }
 0x328   : > { %10302 = vmatmul.mubr.msk.bf16.gmra.mrb[100].mxu0 %vm614_vm2, %v3645_v2  ;;  %v12900_v62 = vadd.f32 %v2479_v57, %v2255_v15  ;;  %v10101_v6 = vpop.f32.mrb[253].mxu1  ;;  %v3647_v2 = vsel %vm3630_vm8, %v3644_v5, %v3646_v55 }
 0x329   : > { %10305 = vmatprep.mubr.msk.bf16.mxu0 %vm11148_vm0, %v14248_v46  ;;  %v2482_v50 = vpop.f32.mrb[254].mxu1 }
 0x32a   : > { %14335 = vst [vmem:[#allocation105_spill] sm:$0xff] %v12900_v62  ;;  %v10102_v59 = vpop.f32.mrb[255].mxu1  ;;  %v3648_v50 = vrot.slane %v11002_v60, 3  ;;  %v14384_v62 = vld [vmem:[#allocation62_spill] sm:$0xff] }
 0x32b   : > { %v2780_v41 = vpop.f32.mrb[252].mxu0 }
 0x32c   : > { %v2940_v19 = vadd.f32 %v2780_v41, %v11836_v31  ;;  %v10111_v0 = vpop.f32.mrb[253].mxu0 }
 0x32d   : > { %v2783_v56 = vpop.f32.mrb[254].mxu0 }
 0x32e   : > { %v2941_v40 = vadd.f32 %v2783_v56, %v11839_v20  ;;  %v10112_v15 = vpop.f32.mrb[255].mxu0 }
 0x32f   : > { %v3417_v21 = vpop.f32.mrb[0].mxu1  ;;  %v3649_v15 = vsel %vm3630_vm8, %v3646_v55, %v3648_v50 }
 0x330   : > { %10306 = vmatmul.mubr.msk.bf16.gmra.mrb[104].mxu0 %vm614_vm2, %v3647_v2  ;;  %v3583_v57 = vadd.f32 %v3417_v21, %v12201_v30  ;;  %v10193_v6 = vpop.f32.mrb[1].mxu1 }
 0x331   : > { %10309 = vmatprep.mubr.msk.bf16.mxu0 %vm11148_vm0, %v14248_v46  ;;  %v3420_v59 = vpop.f32.mrb[2].mxu1 }
 0x332   : > { %v12913_v31 = vadd.f32 %v3583_v57, %v2938_v7  ;;  %v3584_v5 = vadd.f32 %v3420_v59, %v12203_v10  ;;  %v10194_v20 = vpop.f32.mrb[3].mxu1  ;;  %v11003_v10 = vld [vmem:[%s11344_s19 + $0x60] sm:$0xff]  }
 0x333   : > { %v2788_v41 = vpop.f32.mrb[0].mxu0 }
 0x334   : > { %v2942_v0 = vadd.f32 %v2788_v41, %v11858_v4  ;;  %v10115_v56 = vpop.f32.mrb[1].mxu0  ;;  %v12917_v2 = vadd.f32 %v3584_v5, %v2939_v43  ;;  %v3650_v4 = vrot.slane %v11003_v10, 3 }
 0x335   : > { %v2791_v30 = vpop.f32.mrb[2].mxu0 }
 0x336   : > { %v2943_v21 = vadd.f32 %v2791_v30, %v11861_v23  ;;  %v10116_v6 = vpop.f32.mrb[3].mxu0  ;;  %v3651_v30 = vsel %vm3630_vm8, %v3648_v50, %v3650_v4 }
 0x337   : > { %v3425_v7 = vpop.f32.mrb[4].mxu1 }
 0x338   : > { %10310 = vmatmul.mubr.msk.bf16.gmra.mrb[108].mxu0 %vm614_vm2, %v3649_v15  ;;  %v3585_v57 = vadd.f32 %v3425_v7, %v12214_v17  ;;  %v10197_v60 = vpop.f32.mrb[5].mxu1 }
 0x339   : > { %10313 = vmatprep.mubr.msk.bf16.mxu0 %vm11148_vm0, %v14248_v46  ;;  %v3428_v59 = vpop.f32.mrb[6].mxu1 }
 0x33a   : > { %v12926_v43 = vadd.f32 %v3585_v57, %v2940_v19  ;;  %v3586_v55 = vadd.f32 %v3428_v59, %v12216_v14  ;;  %v10198_v23 = vpop.f32.mrb[7].mxu1  ;;  %v11004_v14 = vld [vmem:[%s11344_s19 + $0x68] sm:$0xff]  }
 0x33b   : > { %v2796_v41 = vpop.f32.mrb[4].mxu0 }
 0x33c   : > { %v2944_v5 = vadd.f32 %v2796_v41, %v11880_v29  ;;  %v10119_v20 = vpop.f32.mrb[5].mxu0  ;;  %v12930_v56 = vadd.f32 %v3586_v55, %v2941_v40  ;;  %v3652_v29 = vrot.slane %v11004_v14, 3 }
 0x33d   : > { %v2799_v17 = vpop.f32.mrb[6].mxu0 }
 0x33e   : > { %v2945_v15 = vadd.f32 %v2799_v17, %v11883_v33  ;;  %v10120_v6 = vpop.f32.mrb[7].mxu0 }
 0x33f   : > { %v3433_v19 = vpop.f32.mrb[8].mxu1 }
 0x340   : > { %10314 = vmatmul.mubr.msk.bf16.gmra.mrb[112].mxu0 %vm614_vm2, %v3651_v30  ;;  %v3587_v7 = vadd.f32 %v3433_v19, %v12227_v11  ;;  %v10201_v57 = vpop.f32.mrb[9].mxu1  ;;  %v3653_v11 = vsel %vm3630_vm8, %v3650_v4, %v3652_v29 }
 0x341   : > { %10317 = vmatprep.mubr.msk.bf16.mxu0 %vm11148_vm0, %v14248_v46  ;;  %v3436_v60 = vpop.f32.mrb[10].mxu1 }
 0x342   : > { %v12939_v40 = vadd.f32 %v3587_v7, %v2942_v0  ;;  %v3588_v50 = vadd.f32 %v3436_v60, %v12229_v52  ;;  %v10202_v59 = vpop.f32.mrb[11].mxu1 }
 0x343   : > { %v2804_v10 = vpop.f32.mrb[8].mxu0 }
 0x344   : > { %v2946_v33 = vadd.f32 %v2804_v10, %v11902_v51  ;;  %v10123_v41 = vpop.f32.mrb[9].mxu0  ;;  %v12943_v55 = vadd.f32 %v3588_v50, %v2943_v21  ;;  %v3654_v51 = vrot.slane %v12532_v53, 3  ;;  %v14336_v10 = vld [vmem:[#allocation20_spill] sm:$0xff] }
 0x345   : > { %v2807_v23 = vpop.f32.mrb[10].mxu0 }
 0x346   : > { %v2947_v20 = vadd.f32 %v2807_v23, %v11905_v45  ;;  %v10124_v17 = vpop.f32.mrb[11].mxu0 }
 0x347   : > { %v3441_v30 = vpop.f32.mrb[12].mxu1 }
 0x348   : > { %10318 = vmatmul.mubr.msk.bf16.gmra.mrb[116].mxu0 %vm614_vm2, %v3653_v11  ;;  %v3589_v0 = vadd.f32 %v3441_v30, %v12240_v16  ;;  %v10205_v6 = vpop.f32.mrb[13].mxu1  ;;  %v3655_v16 = vsel %vm3630_vm8, %v3652_v29, %v3654_v51 }
 0x349   : > { %10321 = vmatprep.mubr.msk.bf16.mxu0 %vm11148_vm0, %v14248_v46  ;;  %v3444_v52 = vpop.f32.mrb[14].mxu1 }
 0x34a   : > { %v12952_v21 = vadd.f32 %v3589_v0, %v2944_v5  ;;  %v3590_v4 = vadd.f32 %v3444_v52, %v12242_v32  ;;  %v10206_v7 = vpop.f32.mrb[15].mxu1  ;;  %v11005_v52 = vld [vmem:[%s11344_s19 + $0x80] sm:$0xff]  }
 0x34b   : > { %v2812_v19 = vpop.f32.mrb[12].mxu0 }
 0x34c   : > { %v2948_v45 = vadd.f32 %v2812_v19, %v11924_v3  ;;  %v10127_v57 = vpop.f32.mrb[13].mxu0  ;;  %v12956_v14 = vadd.f32 %v3590_v4, %v2945_v15  ;;  %v3656_v3 = vrot.slane %v12550_v35, 3  ;;  %v3658_v19 = vrot.slane %v11005_v52, 3  ;;  %v14339_v52 = vld [vmem:[#allocation23_spill] sm:$0xff] }
 0x34d   : > { %v2815_v60 = vpop.f32.mrb[14].mxu0 }
 0x34e   : > { %v2949_v50 = vadd.f32 %v2815_v60, %v14336_v10  ;;  %v10128_v59 = vpop.f32.mrb[15].mxu0  ;;  %v3657_v6 = vsel %vm3630_vm8, %v3654_v51, %v3656_v3 }
 0x34f   : > { %v3449_v53 = vpop.f32.mrb[16].mxu1 }
 0x350   : > { %10322 = vmatmul.mubr.msk.bf16.gmra.mrb[120].mxu0 %vm614_vm2, %v3655_v16  ;;  %v3591_v5 = vadd.f32 %v3449_v53, %v12253_v25  ;;  %v10209_v41 = vpop.f32.mrb[17].mxu1 }
 0x351   : > { %10325 = vmatprep.mubr.msk.bf16.mxu0 %vm11148_vm0, %v14248_v46  ;;  %v3452_v32 = vpop.f32.mrb[18].mxu1  ;;  %v14338_v41 = vld [vmem:[#allocation22_spill] sm:$0xff] }
 0x352   : > { %v12965_v15 = vadd.f32 %v3591_v5, %v2946_v33  ;;  %v3592_v29 = vadd.f32 %v3452_v32, %v12255_v18  ;;  %v10210_v11 = vpop.f32.mrb[19].mxu1  ;;  %v3659_v5 = vsel %vm3630_vm8, %v3656_v3, %v3658_v19 }
 0x353   : > { %v2820_v23 = vpop.f32.mrb[16].mxu0 }
 0x354   : > { %v2950_v17 = vadd.f32 %v2820_v23, %v11946_v27  ;;  %v10131_v30 = vpop.f32.mrb[17].mxu0  ;;  %v12969_v0 = vadd.f32 %v3592_v29, %v2947_v20  ;;  %v14337_v27 = vld [vmem:[#allocation21_spill] sm:$0xff] }
 0x355   : > { %v2823_v25 = vpop.f32.mrb[18].mxu0  ;;  %v10846_v29 = vld [vmem:[%s14179_s4 + $0x30] sm:$0xff]  }
 0x356   : > { %v2951_v18 = vadd.f32 %v2823_v25, %v14337_v27  ;;  %v10132_v35 = vpop.f32.mrb[19].mxu0  ;;  %10361 = vmatprep.subr.bf16.mxu1 %v10846_v29 }
 0x357   : > { %v3457_v33 = vpop.f32.mrb[20].mxu1  ;;  %10362 = vmatpush3.bf16.msra.mxu1 %v10846_v29 }
 0x358   : > { %10326 = vmatmul.mubr.msk.bf16.gmra.mrb[124].mxu0 %vm614_vm2, %v3657_v6  ;;  %v3593_v20 = vadd.f32 %v3457_v33, %v12263_v38  ;;  %v10213_v51 = vpop.f32.mrb[21].mxu1 }
 0x359   : > { %10329 = vmatprep.mubr.msk.bf16.mxu0 %vm11148_vm0, %v14248_v46  ;;  %v3460_v4 = vpop.f32.mrb[22].mxu1 }
 0x35a   : > { %v13014_v7 = vadd.f32 %v3593_v20, %v2948_v45  ;;  %v3594_v60 = vadd.f32 %v3460_v4, %v12268_v26  ;;  %v10214_v16 = vpop.f32.mrb[23].mxu1 }
 0x35b   : > { %v2828_v57 = vpop.f32.mrb[20].mxu0 }
 0x35c   : > { %v2952_v10 = vadd.f32 %v2828_v57, %v11968_v42  ;;  %v10135_v59 = vpop.f32.mrb[21].mxu0  ;;  %v13018_v53 = vadd.f32 %v3594_v60, %v2949_v50  ;;  %v11006_v42 = vld [vmem:[%s11344_s19 + $0x88] sm:$0xff]  }
 0x35d   : > { %v2831_v38 = vpop.f32.mrb[22].mxu0  ;;  %v3660_v50 = vrot.slane %v11006_v42, 3 }
 0x35e   : > { %v2953_v32 = vadd.f32 %v2831_v38, %v14338_v41  ;;  %v10136_v23 = vpop.f32.mrb[23].mxu0 }
 0x35f   : > { %v3465_v45 = vpop.f32.mrb[24].mxu1  ;;  %v3661_v51 = vsel %vm3630_vm8, %v3658_v19, %v3660_v50 }
 0x360   : > { %10330 = vmatmul.mubr.msk.bf16.gmra.mrb[128].mxu0 %vm614_vm2, %v3659_v5  ;;  %v3595_v26 = vadd.f32 %v3465_v45, %v12276_v22  ;;  %v10217_v11 = vpop.f32.mrb[25].mxu1  ;;  %v14340_v5 = vld [vmem:[#allocation24_spill] sm:$0xff] }
 0x361   : > { %10333 = vmatprep.mubr.msk.bf16.mxu0 %vm11148_vm0, %v14248_v46  ;;  %v3468_v30 = vpop.f32.mrb[26].mxu1 }
 0x362   : > { %v13030_v3 = vadd.f32 %v3595_v26, %v2950_v17  ;;  %v3596_v6 = vadd.f32 %v3468_v30, %v12281_v34  ;;  %v10218_v27 = vpop.f32.mrb[27].mxu1 }
 0x363   : > { %v2836_v25 = vpop.f32.mrb[24].mxu0 }
 0x364   : > { %v2954_v35 = vadd.f32 %v2836_v25, %v11990_v37  ;;  %v10139_v33 = vpop.f32.mrb[25].mxu0  ;;  %v13034_v20 = vadd.f32 %v3596_v6, %v2951_v18  ;;  %v3662_v37 = vrot.slane %v12602_v48, 3  ;;  %v14341_v48 = vld [vmem:[#allocation25_spill] sm:$0xff] }
 0x365   : > { %v2839_v22 = vpop.f32.mrb[26].mxu0 }
 0x366   : > { %v2955_v4 = vadd.f32 %v2839_v22, %v14339_v52  ;;  %v10140_v57 = vpop.f32.mrb[27].mxu0  ;;  %v3663_v29 = vsel %vm3630_vm8, %v3660_v50, %v3662_v37 }
 0x367   : > { %v3473_v17 = vpop.f32.mrb[28].mxu1 }
 0x368   : > { %10334 = vmatmul.mubr.msk.bf16.gmra.mrb[132].mxu0 %vm614_vm2, %v3661_v51  ;;  %v3597_v60 = vadd.f32 %v3473_v17, %v12289_v24  ;;  %v10221_v16 = vpop.f32.mrb[29].mxu1 }
 0x369   : > { %10337 = vmatprep.mubr.msk.bf16.mxu0 %vm11148_vm0, %v14248_v46  ;;  %v3476_v34 = vpop.f32.mrb[30].mxu1 }
 0x36a   : > { %v13045_v18 = vadd.f32 %v3597_v60, %v2952_v10  ;;  %v3598_v59 = vadd.f32 %v3476_v34, %v12294_v8  ;;  %v10222_v38 = vpop.f32.mrb[31].mxu1  ;;  %v3664_v8 = vrot.slane %v12632_v28, 3  ;;  %v14342_v34 = vld [vmem:[#allocation45_spill] sm:$0xff] }
 0x36b   : > { %v2844_v19 = vpop.f32.mrb[28].mxu0 }
 0x36c   : > { %v2956_v41 = vadd.f32 %v2844_v19, %v14340_v5  ;;  %v10143_v24 = vpop.f32.mrb[29].mxu0  ;;  %v13049_v23 = vadd.f32 %v3598_v59, %v2953_v32 }
 0x36d   : > { %v2847_v45 = vpop.f32.mrb[30].mxu0 }
 0x36e   : > { %v2957_v26 = vadd.f32 %v2847_v45, %v14341_v48  ;;  %v10144_v11 = vpop.f32.mrb[31].mxu0  ;;  %v14344_v45 = vld [vmem:[#allocation27_spill] sm:$0xff] }
 0x36f   : > { %v3481_v42 = vpop.f32.mrb[32].mxu1 }
 0x370   : > { %10338 = vmatmul.mubr.msk.bf16.gmra.mrb[136].mxu0 %vm614_vm2, %v3663_v29  ;;  %v3599_v10 = vadd.f32 %v3481_v42, %v12302_v9  ;;  %v10225_v30 = vpop.f32.mrb[33].mxu1  ;;  %v3665_v9 = vsel %vm3630_vm8, %v3662_v37, %v3664_v8 }
 0x371   : > { %10341 = vmatprep.mubr.msk.bf16.mxu0 %vm11148_vm0, %v14248_v46  ;;  %v3484_v25 = vpop.f32.mrb[34].mxu1 }
 0x372   : > { %v13058_v32 = vadd.f32 %v3599_v10, %v2954_v35  ;;  %v3600_v50 = vadd.f32 %v3484_v25, %v12307_v44  ;;  %v10226_v27 = vpop.f32.mrb[35].mxu1  ;;  %v14346_v10 = vld [vmem:[#allocation88_spill] sm:$0xff] }
 0x373   : > { %v2852_v6 = vpop.f32.mrb[32].mxu0  ;;  %v3668_v30 = vrot.slane %v14346_v10, 3 }
 0x374   : > { %v2958_v33 = vadd.f32 %v2852_v6, %v12033_v54  ;;  %v10147_v22 = vpop.f32.mrb[33].mxu0  ;;  %v13062_v51 = vadd.f32 %v3600_v50, %v2955_v4  ;;  %v3666_v54 = vrot.slane %v12665_v61, 3  ;;  %v14347_v50 = vld [vmem:[#allocation47_spill] sm:$0xff] }
 0x375   : > { %v2855_v52 = vpop.f32.mrb[34].mxu0  ;;  %v14348_v22 = vld [vmem:[#allocation28_spill] sm:$0xff] }
 0x376   : > { %v2959_v57 = vadd.f32 %v2855_v52, %v12036_v63  ;;  %v10148_v17 = vpop.f32.mrb[35].mxu0  ;;  %v14343_v63 = vld [vmem:[#allocation26_spill] sm:$0xff] }
 0x377   : > { %v3489_v28 = vpop.f32.mrb[36].mxu1 }
 0x378   : > { %10342 = vmatmul.mubr.msk.bf16.gmra.mrb[140].mxu0 %vm614_vm2, %v3665_v9  ;;  %v3601_v35 = vadd.f32 %v3489_v28, %v12315_v49  ;;  %v10229_v60 = vpop.f32.mrb[37].mxu1  ;;  %v3667_v49 = vsel %vm3630_vm8, %v3664_v8, %v3666_v54 }
 0x379   : > { %10345 = vmatprep.mubr.msk.bf16.mxu0 %vm11148_vm0, %v14248_v46  ;;  %v3492_v44 = vpop.f32.mrb[38].mxu1  ;;  %v14349_v60 = vld [vmem:[#allocation29_spill] sm:$0xff] }
 0x37a   : > { %v13071_v4 = vadd.f32 %v3601_v35, %v2956_v41  ;;  %v3602_v37 = vadd.f32 %v3492_v44, %v14342_v34  ;;  %v10230_v19 = vpop.f32.mrb[39].mxu1  ;;  %v14345_v41 = vld [vmem:[#allocation46_spill] sm:$0xff]  ;;  %v3669_v35 = vsel %vm3630_vm8, %v3666_v54, %v3668_v30 }
 0x37b   : > { %v2860_v16 = vpop.f32.mrb[36].mxu0 }
 0x37c   : > { %v2960_v59 = vadd.f32 %v2860_v16, %v14343_v63  ;;  %v10151_v38 = vpop.f32.mrb[37].mxu0  ;;  %v13075_v5 = vadd.f32 %v3602_v37, %v2957_v26  ;;  %v3670_v63 = vrot.slane %v12731_v39, 3 }
 0x37d   : > { %v2863_v24 = vpop.f32.mrb[38].mxu0 }
 0x37e   : > { %v2961_v29 = vadd.f32 %v2863_v24, %v14344_v45  ;;  %v10152_v48 = vpop.f32.mrb[39].mxu0  ;;  %v3671_v10 = vsel %vm3630_vm8, %v3668_v30, %v3670_v63  ;;  %v14356_v30 = vld [vmem:[#allocation32_spill] sm:$0xff] }
 0x37f   : > { %v3497_v61 = vpop.f32.mrb[40].mxu1  ;;  %v14352_v48 = vld [vmem:[#allocation30_spill] sm:$0xff] }
 0x380   : > { %10346 = vmatmul.mubr.msk.bf16.gmra.mrb[144].mxu0 %vm614_vm2, %v3667_v49  ;;  %v3603_v11 = vadd.f32 %v3497_v61, %v14345_v41  ;;  %v10233_v42 = vpop.f32.mrb[41].mxu1  ;;  %v14351_v49 = vld [vmem:[#allocation49_spill] sm:$0xff] }
 0x381   : > { %10349 = vmatprep.mubr.msk.bf16.mxu0 %vm11148_vm0, %v14248_v46  ;;  %v3500_v25 = vpop.f32.mrb[42].mxu1 }
 0x382   : > { %v13084_v26 = vadd.f32 %v3603_v11, %v2958_v33  ;;  %v3604_v8 = vadd.f32 %v3500_v25, %v14347_v50  ;;  %v10234_v27 = vpop.f32.mrb[43].mxu1  ;;  %v14350_v33 = vld [vmem:[#allocation48_spill] sm:$0xff]  ;;  %v14353_v25 = vld [vmem:[#allocation31_spill] sm:$0xff] }
 0x383   : > { %v2868_v6 = vpop.f32.mrb[40].mxu0 }
 0x384   : > { %v2962_v52 = vadd.f32 %v2868_v6, %v14348_v22  ;;  %v10155_v9 = vpop.f32.mrb[41].mxu0  ;;  %v13088_v17 = vadd.f32 %v3604_v8, %v2959_v57 }
 0x385   : > { %v2871_v28 = vpop.f32.mrb[42].mxu0 }
 0x386   : > { %v2963_v44 = vadd.f32 %v2871_v28, %v14349_v60  ;;  %v10156_v16 = vpop.f32.mrb[43].mxu0  ;;  %v14355_v28 = vld [vmem:[#allocation51_spill] sm:$0xff] }
 0x387   : > { %v3505_v34 = vpop.f32.mrb[44].mxu1 }
 0x388   : > { %10350 = vmatmul.mubr.msk.bf16.gmra.mrb[148].mxu0 %vm614_vm2, %v3669_v35  ;;  %v3605_v37 = vadd.f32 %v3505_v34, %v14350_v33  ;;  %v10237_v19 = vpop.f32.mrb[45].mxu1 }
 0x389   : > { %10353 = vmatprep.mubr.msk.bf16.mxu0 %vm11148_vm0, %v14248_v46  ;;  %v3508_v38 = vpop.f32.mrb[46].mxu1  ;;  %v14357_v19 = vld [vmem:[#allocation33_spill] sm:$0xff] }
 0x38a   : > { %v13097_v57 = vadd.f32 %v3605_v37, %v2960_v59  ;;  %v3606_v54 = vadd.f32 %v3508_v38, %v14351_v49  ;;  %v10238_v45 = vpop.f32.mrb[47].mxu1  ;;  %v14354_v59 = vld [vmem:[#allocation50_spill] sm:$0xff] }
 0x38b   : > { %v2876_v24 = vpop.f32.mrb[44].mxu0  ;;  %v10847_v49 = vld [vmem:[%s14179_s4 + $0x38] sm:$0xff]  }
 0x38c   : > { %v2964_v61 = vadd.f32 %v2876_v24, %v14352_v48  ;;  %v10159_v41 = vpop.f32.mrb[45].mxu0  ;;  %v13101_v11 = vadd.f32 %v3606_v54, %v2961_v29  ;;  %10363 = vmatprep.subr.bf16.mxu1 %v10847_v49  ;;  %v14358_v54 = vld [vmem:[#allocation52_spill] sm:$0xff] }
 0x38d   : > { %v2879_v42 = vpop.f32.mrb[46].mxu0  ;;  %10364 = vmatpush3.bf16.msra.mxu1 %v10847_v49 }
 0x38e   : > { %v2965_v6 = vadd.f32 %v2879_v42, %v14353_v25  ;;  %v10160_v50 = vpop.f32.mrb[47].mxu0 }
 0x38f   : > { %v3513_v39 = vpop.f32.mrb[48].mxu1 }
 0x390   : > { %10354 = vmatmul.mubr.msk.bf16.gmra.mrb[152].mxu0 %vm614_vm2, %v3671_v10  ;;  %v3607_v8 = vadd.f32 %v3513_v39, %v14354_v59  ;;  %v10241_v27 = vpop.f32.mrb[49].mxu1  ;;  %v14359_v10 = vld [vmem:[#allocation53_spill] sm:$0xff]  ;;  %v14360_v39 = vld [vmem:[#allocation34_spill] sm:$0xff] }
 0x391   : > { %10357 = vmatprep.mubr.msk.bf16.mxu0 %vm11148_vm0, %v14248_v46  ;;  %v3516_v22 = vpop.f32.mrb[50].mxu1  ;;  %v14380_v46 = vld [vmem:[#allocation61_spill] sm:$0xff] }
 0x392   : > { %v13109_v9 = vadd.f32 %v3607_v8, %v2962_v52  ;;  %v3608_v35 = vadd.f32 %v3516_v22, %v14355_v28  ;;  %v10242_v60 = vpop.f32.mrb[51].mxu1 }
 0x393   : > { %v2884_v29 = vpop.f32.mrb[48].mxu0  ;;  %v14362_v60 = vld [vmem:[#allocation54_spill] sm:$0xff] }
 0x394   : > { %v2966_v16 = vadd.f32 %v2884_v29, %v14356_v30  ;;  %v10163_v34 = vpop.f32.mrb[49].mxu0  ;;  %v13113_v33 = vadd.f32 %v3608_v35, %v2963_v44 }
 0x395   : > { %v2887_v37 = vpop.f32.mrb[50].mxu0 }
 0x396   : > { %v2967_v38 = vadd.f32 %v2887_v37, %v14357_v19  ;;  %v10164_v24 = vpop.f32.mrb[51].mxu0 }
 0x397   : > { %v3521_v52 = vpop.f32.mrb[52].mxu1  ;;  %v14363_v24 = vld [vmem:[#allocation55_spill] sm:$0xff] }
 0x398   : > { %10358 = vmatmul.mubr.msk.bf16.gmra.mrb[156].mxu0 %vm614_vm2, %v3670_v63  ;;  %v3609_v45 = vadd.f32 %v3521_v52, %v14358_v54  ;;  %v10245_v48 = vpop.f32.mrb[53].mxu1  ;;  %v14361_v63 = vld [vmem:[#allocation35_spill] sm:$0xff]  ;;  %v14364_v54 = vld [vmem:[#allocation36_spill] sm:$0xff] }
 0x399   : > { %v3524_v41 = vpop.f32.mrb[54].mxu1 }
 0x39a   : > { %v13121_v42 = vadd.f32 %v3609_v45, %v2964_v61  ;;  %v3610_v25 = vadd.f32 %v3524_v41, %v14359_v10  ;;  %v10246_v50 = vpop.f32.mrb[55].mxu1 }
 0x39b   : > { %v2892_v44 = vpop.f32.mrb[52].mxu0 }
 0x39c   : > { %v2968_v59 = vadd.f32 %v2892_v44, %v14360_v39  ;;  %v10167_v8 = vpop.f32.mrb[53].mxu0  ;;  %v13125_v27 = vadd.f32 %v3610_v25, %v2965_v6  ;;  %v14365_v44 = vld [vmem:[#allocation37_spill] sm:$0xff]  ;;  %v14366_v39 = vld [vmem:[#allocation56_spill] sm:$0xff] }
 0x39d   : > { %v2895_v22 = vpop.f32.mrb[54].mxu0 }
 0x39e   : > { %v2969_v29 = vadd.f32 %v2895_v22, %v14361_v63  ;;  %v10168_v28 = vpop.f32.mrb[55].mxu0 }
 0x39f   : > { %v3529_v35 = vpop.f32.mrb[56].mxu1 }
 0x3a0   : > { %v3611_v30 = vadd.f32 %v3529_v35, %v14362_v60  ;;  %v10249_v34 = vpop.f32.mrb[57].mxu1  ;;  %v14368_v35 = vld [vmem:[#allocation57_spill] sm:$0xff] }
 0x3a1   : > { %v3532_v37 = vpop.f32.mrb[58].mxu1  ;;  %v14369_v34 = vld [vmem:[#allocation38_spill] sm:$0xff] }
 0x3a2   : > { %v13129_v61 = vadd.f32 %v3611_v30, %v2966_v16  ;;  %v3612_v49 = vadd.f32 %v3532_v37, %v14363_v24  ;;  %v10250_v52 = vpop.f32.mrb[59].mxu1 }
 0x3a3   : > { %v2900_v19 = vpop.f32.mrb[56].mxu0 }
 0x3a4   : > { %v2970_v45 = vadd.f32 %v2900_v19, %v14364_v54  ;;  %v10171_v48 = vpop.f32.mrb[57].mxu0  ;;  %v13133_v6 = vadd.f32 %v3612_v49, %v2967_v38  ;;  %v14371_v49 = vld [vmem:[#allocation39_spill] sm:$0xff] }
 0x3a5   : > { %v2903_v41 = vpop.f32.mrb[58].mxu0 }
 0x3a6   : > { %v2971_v10 = vadd.f32 %v2903_v41, %v14365_v44  ;;  %v10172_v25 = vpop.f32.mrb[59].mxu0  ;;  %v14372_v41 = vld [vmem:[#allocation58_spill] sm:$0xff] }
 0x3a7   : > { %v3537_v50 = vpop.f32.mrb[60].mxu1 }
 0x3a8   : > { %v3613_v8 = vadd.f32 %v3537_v50, %v14366_v39  ;;  %v10253_v22 = vpop.f32.mrb[61].mxu1 }
 0x3a9   : > { %v3540_v63 = vpop.f32.mrb[62].mxu1 }
 0x3aa   : > { %v13137_v16 = vadd.f32 %v3613_v8, %v2968_v59  ;;  %v3614_v60 = vadd.f32 %v3540_v63, %v14368_v35  ;;  %v10254_v30 = vpop.f32.mrb[63].mxu1  ;;  %v14374_v8 = vld [vmem:[#allocation59_spill] sm:$0xff]  ;;  %v14375_v35 = vld [vmem:[#allocation40_spill] sm:$0xff] }
 0x3ab   : > { %v2908_v28 = vpop.f32.mrb[60].mxu0 }
 0x3ac   : > { %14367 = vst [vmem:[#allocation20_spill] sm:$0xff] %v13137_v16  ;;  %v2972_v37 = vadd.f32 %v2908_v28, %v14369_v34  ;;  %v10175_v19 = vpop.f32.mrb[61].mxu0  ;;  %v13141_v38 = vadd.f32 %v3614_v60, %v2969_v29  ;;  %v14377_v34 = vld [vmem:[#allocation41_spill] sm:$0xff] }
 0x3ad   : > { %v2911_v24 = vpop.f32.mrb[62].mxu0 }
 0x3ae   : > { %14370 = vst [vmem:[#allocation21_spill] sm:$0xff] %v13141_v38  ;;  %v2973_v52 = vadd.f32 %v2911_v24, %v14371_v49  ;;  %v10176_v54 = vpop.f32.mrb[63].mxu0 }
 0x3af   : > { %v3545_v48 = vpop.f32.mrb[64].mxu1  ;;  %v14378_v54 = vld [vmem:[#allocation60_spill] sm:$0xff] }
 0x3b0   : > { %v3615_v44 = vadd.f32 %v3545_v48, %v14372_v41  ;;  %v10257_v25 = vpop.f32.mrb[65].mxu1 }
 0x3b1   : > { %v3548_v50 = vpop.f32.mrb[66].mxu1 }
 0x3b2   : > { %v13145_v59 = vadd.f32 %v3615_v44, %v2970_v45  ;;  %v3616_v22 = vadd.f32 %v3548_v50, %v14374_v8  ;;  %v10258_v63 = vpop.f32.mrb[67].mxu1 }
 0x3b3   : > { %v2916_v39 = vpop.f32.mrb[64].mxu0  ;;  %v14381_v63 = vld [vmem:[#allocation42_spill] sm:$0xff] }
 0x3b4   : > { %14373 = vst [vmem:[#allocation22_spill] sm:$0xff] %v13145_v59  ;;  %v2974_v28 = vadd.f32 %v2916_v39, %v14375_v35  ;;  %v10179_v30 = vpop.f32.mrb[65].mxu0  ;;  %v13149_v29 = vadd.f32 %v3616_v22, %v2971_v10 }
 0x3b5   : > { %v2919_v60 = vpop.f32.mrb[66].mxu0  ;;  %v14383_v30 = vld [vmem:[#allocation43_spill] sm:$0xff] }
 0x3b6   : > { %14376 = vst [vmem:[#allocation23_spill] sm:$0xff] %v13149_v29  ;;  %v2975_v19 = vadd.f32 %v2919_v60, %v14377_v34  ;;  %v10180_v24 = vpop.f32.mrb[67].mxu0 }
 0x3b7   : > { %v3553_v49 = vpop.f32.mrb[68].mxu1 }
 0x3b8   : > { %v3617_v48 = vadd.f32 %v3553_v49, %v14378_v54  ;;  %v10261_v41 = vpop.f32.mrb[69].mxu1 }
 0x3b9   : > { %v3556_v25 = vpop.f32.mrb[70].mxu1 }
 0x3ba   : > { %v13153_v45 = vadd.f32 %v3617_v48, %v2972_v37  ;;  %v3618_v50 = vadd.f32 %v3556_v25, %v14380_v46  ;;  %v10262_v8 = vpop.f32.mrb[71].mxu1 }
 0x3bb   : > { %v2924_v44 = vpop.f32.mrb[68].mxu0  ;;  %v14387_v8 = vld [vmem:[#allocation44_spill] sm:$0xff] }
 0x3bc   : > { %14379 = vst [vmem:[#allocation24_spill] sm:$0xff] %v13153_v45  ;;  %v2976_v39 = vadd.f32 %v2924_v44, %v14381_v63  ;;  %v10183_v35 = vpop.f32.mrb[69].mxu0  ;;  %v13157_v10 = vadd.f32 %v3618_v50, %v2973_v52 }
 0x3bd   : > { %v2927_v22 = vpop.f32.mrb[70].mxu0 }
 0x3be   : > { %14382 = vst [vmem:[#allocation25_spill] sm:$0xff] %v13157_v10  ;;  %v2977_v60 = vadd.f32 %v2927_v22, %v14383_v30  ;;  %v10184_v34 = vpop.f32.mrb[71].mxu0  ;;  %v14389_v30 = vld [vmem:[#allocation64_spill] sm:$0xff] }
 0x3bf   : > { %v3561_v24 = vpop.f32.mrb[72].mxu1 }
 0x3c0   : > { %v3619_v49 = vadd.f32 %v3561_v24, %v14384_v62  ;;  %v10265_v54 = vpop.f32.mrb[73].mxu1 }
 0x3c1   : > { %v3564_v41 = vpop.f32.mrb[74].mxu1 }
 0x3c2   : > { %v13161_v37 = vadd.f32 %v3619_v49, %v2974_v28  ;;  %v3620_v46 = vadd.f32 %v3564_v41, %v14386_v47  ;;  %v10266_v25 = vpop.f32.mrb[75].mxu1  ;;  %v14391_v49 = vld [vmem:[#allocation65_spill] sm:$0xff]  ;;  %v14392_v47 = vld [vmem:[#allocation67_spill] sm:$0xff] }
 0x3c3   : > { %v2932_v48 = vpop.f32.mrb[72].mxu0 }
 0x3c4   : > { %14385 = vst [vmem:[#allocation45_spill] sm:$0xff] %v13161_v37  ;;  %v2978_v44 = vadd.f32 %v2932_v48, %v14387_v8  ;;  %v10187_v63 = vpop.f32.mrb[73].mxu0  ;;  %v13165_v52 = vadd.f32 %v3620_v46, %v2975_v19  ;;  %v13175_v19 = vld [vmem:[%s14177_s2] ss:$0 sm:$0xff]  ;;  %v14394_v8 = vld [vmem:[#allocation68_spill] sm:$0xff] }
 0x3c5   : > { %v2935_v50 = vpop.f32.mrb[74].mxu0 }
 0x3c6   : > { %14388 = vst [vmem:[#allocation26_spill] sm:$0xff] %v13165_v52  ;;  %v10188_v35 = vpop.f32.mrb[75].mxu0 }
 0x3c7   : > { %v3569_v22 = vpop.f32.mrb[76].mxu1 }
 0x3c8   : > { %v3621_v34 = vadd.f32 %v3569_v22, %v14389_v30  ;;  %v10269_v12 = vpop.f32.mrb[77].mxu1  ;;  %v14395_v22 = vld [vmem:[#allocation66_spill] sm:$0xff] }
 0x3c9   : > { %v3572_v62 = vpop.f32.mrb[78].mxu1 }
 0x3ca   : > { %v13168_v24 = vadd.f32 %v3621_v34, %v2976_v39  ;;  %v3622_v54 = vadd.f32 %v3572_v62, %v14391_v49  ;;  %v10270_v37 = vpop.f32.mrb[79].mxu1  ;;  %v4194_v62 = vpop.permute.xlu0 %4193 }
 0x3cb   : > { %v3772_v28 = vpop.f32.mrb[76].mxu0 }
 0x3cc   : > { %14390 = vst [vmem:[#allocation27_spill] sm:$0xff] %v13168_v24  ;;  %v3938_v41 = vadd.f32 %v3772_v28, %v14392_v47  ;;  %v10279_v25 = vpop.f32.mrb[77].mxu0  ;;  %v13177_v48 = vadd.f32 %v3622_v54, %v2977_v60 }
 0x3cd   : > { %v3775_v46 = vpop.f32.mrb[78].mxu0 }
 0x3ce   : > { %14393 = vst [vmem:[#allocation46_spill] sm:$0xff] %v13177_v48  ;;  %v4020_v12 = vadd.f32 %v12913_v31, %v3938_v41  ;;  %v3939_v39 = vadd.f32 %v3775_v46, %v14394_v8  ;;  %v10280_v63 = vpop.f32.mrb[79].mxu0  ;;  %v14397_v46 = vld [vmem:[#allocation69_spill] sm:$0xff] }
 0x3cf   : > { %v3577_v35 = vpop.f32.mrb[80].mxu1  ;;  %v4199_v63 = vpop.permute.xlu1 %4198  ;;  %v14401_v48 = vld [vmem:[#allocation73_spill] sm:$0xff] }
 0x3d0   : > { %v4068_v50 = vadd.f32 %v13175_v19, %v4020_v12  ;;  %v4021_v37 = vadd.f32 %v12917_v2, %v3939_v39  ;;  %v3623_v30 = vadd.f32 %v3577_v35, %v14395_v22  ;;  %v10273_v34 = vpop.f32.mrb[81].mxu1 }
 0x3d1   : > { %v3580_v60 = vpop.f32.mrb[82].mxu1 }
 0x3d2   : > { %v4109_v28 = vmax.f32 %v4068_v50, 0.0  ;;  %v4069_v49 = vadd.f32 %v13175_v19, %v4021_v37  ;;  %v13185_v54 = vadd.f32 %v3623_v30, %v2978_v44  ;;  %v10274_v31 = vpop.f32.mrb[83].mxu1  ;;  %v14398_v50 = vld [vmem:[#allocation70_spill] sm:$0xff] }
 0x3d3   : > { %v3780_v47 = vpop.f32.mrb[80].mxu0  ;;  %v14399_v31 = vld [vmem:[#allocation71_spill] sm:$0xff] }
 0x3d4   : > { %14396 = vst [vmem:[#allocation88_spill] sm:$0xff] %v13185_v54  ;;  %v4396_v41 = vmul.f32 %v4194_v62, %v4109_v28  ;;  %v4110_v25 = vmax.f32 %v4069_v49, 0.0  ;;  %v3940_v8 = vadd.f32 %v3780_v47, %v14397_v46  ;;  %v10283_v12 = vpop.f32.mrb[81].mxu0  ;;  %v4204_v28 = vpop.permute.xlu0 %4203 }
 0x3d5   : > { %v3783_v2 = vpop.f32.mrb[82].mxu0 }
 0x3d6   : > { %4438 = vst.msk [vmem:[#allocation2] sm:$0xff] %vm4437_vm9, %v4396_v41  ;;  %v4397_v39 = vmul.f32 %v4199_v63, %v4110_v25  ;;  %v4022_v35 = vadd.f32 %v12926_v43, %v3940_v8  ;;  %v3941_v22 = vadd.f32 %v3783_v2, %v14398_v50  ;;  %v10284_v37 = vpop.f32.mrb[83].mxu0  ;;  %v4209_v43 = vpop.permute.xlu1 %4208 }
 0x3d8   : > { %4439 = vst.msk [vmem:[#allocation2 + $0x8] sm:$0xff] %vm4437_vm9, %v4397_v39  ;;  %v4070_v44 = vadd.f32 %v13175_v19, %v4022_v35  ;;  %v4023_v30 = vadd.f32 %v12930_v56, %v3941_v22 }
 0x3da   : > { %v4111_v34 = vmax.f32 %v4070_v44, 0.0  ;;  %v4071_v62 = vadd.f32 %v13175_v19, %v4023_v30  ;;  %v4214_v44 = vpop.permute.xlu0 %4213 }
 0x3db   : > { %v3788_v49 = vpop.f32.mrb[84].mxu0 }
 0x3dc   : > { %v4398_v60 = vmul.f32 %v4204_v28, %v4111_v34  ;;  %v4112_v47 = vmax.f32 %v4071_v62, 0.0  ;;  %v3942_v41 = vadd.f32 %v3788_v49, %v14399_v31  ;;  %v10287_v25 = vpop.f32.mrb[85].mxu0  ;;  %v14400_v62 = vld [vmem:[#allocation72_spill] sm:$0xff] }
 0x3dd   : > { %v4500_v12 = vld [vmem:[#allocation2] sm:$0x1]  ;;  %v4501_v63 = vld [vmem:[#allocation2 + $0x1] sm:$0x1]  ;;  %v4508_v2 = vld [vmem:[#allocation2 + $0x2] sm:$0x1] }
 0x3de   : > { %4440 = vst.msk [vmem:[#allocation2 + $0x10] sm:$0xff] %vm4437_vm9, %v4398_v60  ;;  %v4399_v46 = vmul.f32 %v4209_v43, %v4112_v47  ;;  %v4024_v8 = vadd.f32 %v12939_v40, %v3942_v41  ;;  %v4509_v39 = vld [vmem:[#allocation2 + $0x3] sm:$0x1]  ;;  %v4516_v35 = vld [vmem:[#allocation2 + $0x4] sm:$0x1]  ;;  %v3791_v37 = vpop.f32.mrb[86].mxu0  ;;  %v4504_v24 = vmax.f32 %v4500_v12, %v4501_v63 }
 0x3df   : > { %v4517_v50 = vld [vmem:[#allocation2 + $0x5] sm:$0x1]  ;;  %v4524_v30 = vld [vmem:[#allocation2 + $0x6] sm:$0x1]  ;;  %v4525_v34 = vld [vmem:[#allocation2 + $0x7] sm:$0x1]  ;;  %v3943_v28 = vadd.f32 %v3791_v37, %v14400_v62  ;;  %v4512_v52 = vmax.f32 %v4508_v2, %v4509_v39 }
 0x3e0   : > { %4441 = vst.msk [vmem:[#allocation2 + $0x18] sm:$0xff] %vm4437_vm9, %v4399_v46  ;;  %v4072_v56 = vadd.f32 %v13175_v19, %v4024_v8  ;;  %v10288_v49 = vpop.f32.mrb[87].mxu0  ;;  %v4532_v60 = vld [vmem:[#allocation2 + $0x8] sm:$0x1]  ;;  %v4533_v40 = vld [vmem:[#allocation2 + $0x9] sm:$0x1]  ;;  %v4520_v13 = vmax.f32 %v4516_v35, %v4517_v50 }
 0x3e1   : > { %v4540_v41 = vld [vmem:[#allocation2 + $0xa] sm:$0x1]  ;;  %v4541_v25 = vld [vmem:[#allocation2 + $0xb] sm:$0x1]  ;;  %v4025_v54 = vadd.f32 %v12943_v55, %v3943_v28  ;;  %v4528_v28 = vmax.f32 %v4524_v30, %v4525_v34  ;;  %v4557_v34 = vld [vmem:[#allocation2 + $0xf] sm:$0x1] }
 0x3e2   : > { %v4113_v22 = vmax.f32 %v4072_v56, 0.0 }
 0x3e3   : > { %v3796_v31 = vpop.f32.mrb[88].mxu0  ;;  %v4073_v38 = vadd.f32 %v13175_v19, %v4025_v54 }
 0x3e4   : > { %v4400_v47 = vmul.f32 %v4214_v44, %v4113_v22  ;;  %v3944_v56 = vadd.f32 %v3796_v31, %v14401_v48  ;;  %v4548_v22 = vld [vmem:[#allocation2 + $0xc] sm:$0x1]  ;;  %v4549_v44 = vld [vmem:[#allocation2 + $0xd] sm:$0x1]  ;;  %v4536_v48 = vmax.f32 %v4532_v60, %v4533_v40  ;;  %v10291_v30 = vpop.f32.mrb[89].mxu0  ;;  %v4219_v60 = vpop.permute.xlu1 %4218 }
 0x3e5   : > { %v4502_v43 = vld [vmem:[#allocation2 + $0x12] sm:$0x1]  ;;  %v4503_v46 = vld [vmem:[#allocation2 + $0x13] sm:$0x1]  ;;  %v4510_v8 = vld [vmem:[#allocation2 + $0x14] sm:$0x1] }
 0x3e6   : > { %v4505_v10 = vmax.f32 %v4502_v43, %v4503_v46  ;;  %v4511_v45 = vld [vmem:[#allocation2 + $0x15] sm:$0x1]  ;;  %v4518_v37 = vld [vmem:[#allocation2 + $0x16] sm:$0x1]  ;;  %v4519_v62 = vld [vmem:[#allocation2 + $0x17] sm:$0x1]  ;;  %v4026_v55 = vadd.f32 %v12952_v21, %v3944_v56 }
 0x3e7   : > { %4442 = vst.msk [vmem:[#allocation2 + $0x20] sm:$0xff] %vm4437_vm9, %v4400_v47  ;;  %v4513_v49 = vmax.f32 %v4510_v8, %v4511_v45  ;;  %v4521_v29 = vmax.f32 %v4518_v37, %v4519_v62  ;;  %v4526_v59 = vld [vmem:[#allocation2 + $0x18] sm:$0x1]  ;;  %v4527_v63 = vld [vmem:[#allocation2 + $0x19] sm:$0x1]  ;;  %v4544_v45 = vmax.f32 %v4540_v41, %v4541_v25  ;;  %v4114_v54 = vmax.f32 %v4073_v38, 0.0 }
 0x3e8   : > { %v4506_v12 = vmax.f32 %v4504_v24, %v4505_v10  ;;  %v4534_v2 = vld [vmem:[#allocation2 + $0x1a] sm:$0x1]  ;;  %v4535_v39 = vld [vmem:[#allocation2 + $0x1b] sm:$0x1]  ;;  %v4529_v31 = vmax.f32 %v4526_v59, %v4527_v63  ;;  %v4542_v47 = vld [vmem:[#allocation2 + $0x1c] sm:$0x1]  ;;  %v4074_v21 = vadd.f32 %v13175_v19, %v4026_v55  ;;  %v4552_v10 = vmax.f32 %v4548_v22, %v4549_v44  ;;  %v4224_v22 = vpop.permute.xlu0 %4223 }
 0x3e9   : > { %v4514_v35 = vmax.f32 %v4512_v52, %v4513_v49  ;;  %v4522_v50 = vmax.f32 %v4520_v13, %v4521_v29  ;;  %v4537_v43 = vmax.f32 %v4534_v2, %v4535_v39  ;;  %v4543_v46 = vld [vmem:[#allocation2 + $0x1d] sm:$0x1]  ;;  %v4550_v16 = vld [vmem:[#allocation2 + $0x1e] sm:$0x1]  ;;  %v4551_v37 = vld [vmem:[#allocation2 + $0x1f] sm:$0x1]  ;;  %v4401_v56 = vmul.f32 %v4219_v60, %v4114_v54 }
 0x3ea   : > { %v4545_v8 = vmax.f32 %v4542_v47, %v4543_v46  ;;  %4507 = vst.msk [vmem:[#allocation3 + $0x18] sm:$0x1] %vm4498_vm10, %v4506_v12  ;;  %v4556_v24 = vld [vmem:[#allocation2 + $0xe] sm:$0x1]  ;;  %v4530_v52 = vmax.f32 %v4528_v28, %v4529_v31  ;;  %v4553_v59 = vmax.f32 %v4550_v16, %v4551_v37  ;;  %v3799_v29 = vpop.f32.mrb[90].mxu0  ;;  %v4115_v38 = vmax.f32 %v4074_v21, 0.0 }
 0x3eb   : > { %v4538_v13 = vmax.f32 %v4536_v48, %v4537_v43  ;;  %4515 = vst.msk [vmem:[#allocation3 + $0x19] sm:$0x1] %vm4498_vm10, %v4514_v35  ;;  %4523 = vst.msk [vmem:[#allocation3 + $0x1a] sm:$0x1] %vm4498_vm10, %v4522_v50  ;;  %v4564_v40 = vld [vmem:[#allocation2 + $0x10] sm:$0x1]  ;;  %v4560_v12 = vmax.f32 %v4556_v24, %v4557_v34 }
 0x3ec   : > { %v4565_v41 = vld [vmem:[#allocation2 + $0x11] sm:$0x1]  ;;  %v4546_v25 = vmax.f32 %v4544_v45, %v4545_v8  ;;  %v14402_v62 = vld [vmem:[#allocation74_spill] sm:$0xff]  ;;  %v10292_v55 = vpop.f32.mrb[91].mxu0  ;;  %4531 = vst.msk [vmem:[#allocation3 + $0x1b] sm:$0x1] %vm4498_vm10, %v4530_v52  ;;  %v4554_v44 = vmax.f32 %v4552_v10, %v4553_v59  ;;  %v4402_v39 = vmul.f32 %v4224_v22, %v4115_v38 }
 0x3ed   : > { %v3945_v49 = vadd.f32 %v3799_v29, %v14402_v62  ;;  %4539 = vst.msk [vmem:[#allocation3 + $0x1c] sm:$0x1] %vm4498_vm10, %v4538_v13  ;;  %v4568_v50 = vmax.f32 %v4564_v40, %v4565_v41  ;;  %v3804_v43 = vpop.f32.mrb[92].mxu0  ;;  %v14403_v45 = vld [vmem:[#allocation75_spill] sm:$0xff]  ;;  %v5234_v54 = vld [vmem:[#allocation3 + $0xb] sm:$0xff]  ;;  %v4229_v13 = vpop.permute.xlu1 %4228 }
 0x3ee   : > { %v4558_v16 = vld [vmem:[#allocation2 + $0x20] sm:$0x1]  ;;  %v4559_v28 = vld [vmem:[#allocation2 + $0x21] sm:$0x1]  ;;  %v4566_v48 = vld [vmem:[#allocation2 + $0x22] sm:$0x1]  ;;  %v3946_v8 = vadd.f32 %v3804_v43, %v14403_v45  ;;  %v4234_v40 = vpop.permute.xlu0 %4233 }
 0x3ef   : > { %4547 = vst.msk [vmem:[#allocation3 + $0x1d] sm:$0x1] %vm4498_vm10, %v4546_v25  ;;  %v4561_v63 = vmax.f32 %v4558_v16, %v4559_v28  ;;  %v4567_v2 = vld [vmem:[#allocation2 + $0x23] sm:$0x1]  ;;  %v4027_v35 = vadd.f32 %v12956_v14, %v3945_v49  ;;  %4555 = vst.msk [vmem:[#allocation3 + $0x1e] sm:$0x1] %vm4498_vm10, %v4554_v44 }
 0x3f0   : > { %4443 = vst.msk [vmem:[#allocation2 + $0x28] sm:$0xff] %vm4437_vm9, %v4401_v56  ;;  %v4569_v31 = vmax.f32 %v4566_v48, %v4567_v2  ;;  %4444 = vst.msk [vmem:[#allocation2 + $0x30] sm:$0xff] %vm4437_vm9, %v4402_v39  ;;  %v10295_v37 = vpop.f32.mrb[93].mxu0  ;;  %v4028_v14 = vadd.f32 %v12965_v15, %v3946_v8  ;;  %v14404_v24 = vld [vmem:[#allocation76_spill] sm:$0xff]  ;;  %v14405_v56 = vld [vmem:[#allocation77_spill] sm:$0xff] }
 0x3f1   : > { %v4562_v47 = vmax.f32 %v4560_v12, %v4561_v63  ;;  %v4075_v46 = vadd.f32 %v13175_v19, %v4027_v35  ;;  %v3807_v30 = vpop.f32.mrb[94].mxu0  ;;  %v4572_v49 = vld [vmem:[#allocation2 + $0x24] sm:$0x1]  ;;  %v4573_v15 = vld [vmem:[#allocation2 + $0x25] sm:$0x1]  ;;  %v4239_v45 = vpop.permute.xlu1 %4238 }
 0x3f2   : > { %v4570_v21 = vmax.f32 %v4568_v50, %v4569_v31  ;;  %v3947_v34 = vadd.f32 %v3807_v30, %v14404_v24  ;;  %v10296_v60 = vpop.f32.mrb[95].mxu0  ;;  %v5235_v52 = vld [vmem:[#allocation3 + $0x13] sm:$0xff]  ;;  %v4076_v55 = vadd.f32 %v13175_v19, %v4028_v14  ;;  %v4580_v12 = vld [vmem:[#allocation2 + $0x26] sm:$0x1]  ;;  %v4581_v63 = vld [vmem:[#allocation2 + $0x27] sm:$0x1]  ;;  %v4244_v35 = vpop.permute.xlu0 %4243 }
 0x3f3   : > { %4563 = vst.msk [vmem:[#allocation3 + $0x1f] sm:$0x1] %vm4498_vm10, %v4562_v47  ;;  %v4116_v10 = vmax.f32 %v4075_v46, 0.0  ;;  %v3812_v59 = vpop.f32.mrb[96].mxu0  ;;  %v5250_v29 = vpack.c.bf16 %v5235_v52, %v5234_v54 }
 0x3f4   : > { %4571 = vst.msk [vmem:[#allocation3 + $0x20] sm:$0x1] %vm4498_vm10, %v4570_v21  ;;  %v4029_v25 = vadd.f32 %v12969_v0, %v3947_v34  ;;  %v3948_v38 = vadd.f32 %v3812_v59, %v14405_v56  ;;  %v10299_v62 = vpop.f32.mrb[97].mxu0  ;;  %v4576_v0 = vmax.f32 %v4572_v49, %v4573_v15  ;;  %v4117_v31 = vmax.f32 %v4076_v55, 0.0 }
 0x3f5   : > { %v4403_v41 = vmul.f32 %v4229_v13, %v4116_v10  ;;  %10365 = vmatprep.mubr.msk.bf16.mxu1 %vm4437_vm9, %v5250_v29  ;;  %v3815_v46 = vpop.f32.mrb[98].mxu0 }
 0x3f6   : > { %v4077_v22 = vadd.f32 %v13175_v19, %v4029_v25  ;;  %v4030_v44 = vadd.f32 %v13014_v7, %v3948_v38  ;;  %v14406_v7 = vld [vmem:[#allocation78_spill] sm:$0xff]  ;;  %v10300_v30 = vpop.f32.mrb[99].mxu0  ;;  %v4404_v24 = vmul.f32 %v4234_v40, %v4117_v31  ;;  %v14407_v25 = vld [vmem:[#allocation79_spill] sm:$0xff]  ;;  %v4584_v38 = vmax.f32 %v4580_v12, %v4581_v63 }
 0x3f7   : > { %4445 = vst.msk [vmem:[#allocation2 + $0x38] sm:$0xff] %vm4437_vm9, %v4403_v41  ;;  %v4574_v16 = vld [vmem:[#allocation2 + $0x36] sm:$0x1]  ;;  %v4575_v28 = vld [vmem:[#allocation2 + $0x37] sm:$0x1]  ;;  %v3949_v21 = vadd.f32 %v3815_v46, %v14406_v7 }
 0x3f8   : > { %v4078_v48 = vadd.f32 %v13175_v19, %v4030_v44  ;;  %v4588_v2 = vld [vmem:[#allocation2 + $0x28] sm:$0x1]  ;;  %v4577_v39 = vmax.f32 %v4574_v16, %v4575_v28  ;;  %v4589_v50 = vld [vmem:[#allocation2 + $0x29] sm:$0x1]  ;;  %v4118_v43 = vmax.f32 %v4077_v22, 0.0  ;;  %4446 = vst.msk [vmem:[#allocation2 + $0x40] sm:$0xff] %vm4437_vm9, %v4404_v24 }
 0x3f9   : > { %v4596_v8 = vld [vmem:[#allocation2 + $0x2a] sm:$0x1]  ;;  %v4597_v37 = vld [vmem:[#allocation2 + $0x2b] sm:$0x1]  ;;  %v4604_v10 = vld [vmem:[#allocation2 + $0x2c] sm:$0x1]  ;;  %v4031_v41 = vadd.f32 %v13018_v53, %v3949_v21  ;;  %v4592_v62 = vmax.f32 %v4588_v2, %v4589_v50 }
 0x3fa   : > { %v4119_v47 = vmax.f32 %v4078_v48, 0.0  ;;  %v4578_v54 = vmax.f32 %v4576_v0, %v4577_v39  ;;  %v4605_v14 = vld [vmem:[#allocation2 + $0x2d] sm:$0x1]  ;;  %v4405_v34 = vmul.f32 %v4239_v45, %v4118_v43  ;;  %v4600_v49 = vmax.f32 %v4596_v8, %v4597_v37  ;;  %v4612_v50 = vld [vmem:[#allocation2 + $0x2e] sm:$0x1]  ;;  %v4249_v8 = vpop.permute.xlu1 %4248 }
 0x3fb   : > { %v3820_v52 = vpop.f32.mrb[100].mxu0  ;;  %v4079_v53 = vadd.f32 %v13175_v19, %v4031_v41  ;;  %v4608_v63 = vmax.f32 %v4604_v10, %v4605_v14  ;;  %v4613_v37 = vld [vmem:[#allocation2 + $0x2f] sm:$0x1]  ;;  %v4621_v7 = vld [vmem:[#allocation2 + $0x31] sm:$0x1]  ;;  %v14409_v41 = vld [vmem:[#allocation81_spill] sm:$0xff] }
 0x3fc   : > { %v4406_v60 = vmul.f32 %v4244_v35, %v4119_v47  ;;  %4579 = vst.msk [vmem:[#allocation3 + $0x23] sm:$0x1] %vm4498_vm10, %v4578_v54  ;;  %v3950_v56 = vadd.f32 %v3820_v52, %v14407_v25  ;;  %v10303_v12 = vpop.f32.mrb[101].mxu0  ;;  %v4620_v54 = vld [vmem:[#allocation2 + $0x30] sm:$0x1]  ;;  %v4254_v52 = vpop.permute.xlu0 %4253 }
 0x3fd   : > { %4447 = vst.msk [vmem:[#allocation2 + $0x48] sm:$0xff] %vm4437_vm9, %v4405_v34  ;;  %v3823_v35 = vpop.f32.mrb[102].mxu0  ;;  %v4120_v47 = vmax.f32 %v4079_v53, 0.0  ;;  %v4628_v10 = vld [vmem:[#allocation2 + $0x32] sm:$0x1] }
 0x3fe   : > { %v4582_v13 = vld [vmem:[#allocation2 + $0x38] sm:$0x1]  ;;  %v4583_v59 = vld [vmem:[#allocation2 + $0x39] sm:$0x1]  ;;  %v4590_v29 = vld [vmem:[#allocation2 + $0x3a] sm:$0x1]  ;;  %v4032_v0 = vadd.f32 %v13030_v3, %v3950_v56 }
 0x3ff   : > { %v4585_v15 = vmax.f32 %v4582_v13, %v4583_v59  ;;  %v4591_v55 = vld [vmem:[#allocation2 + $0x3b] sm:$0x1]  ;;  %v4598_v22 = vld [vmem:[#allocation2 + $0x3c] sm:$0x1]  ;;  %v4599_v44 = vld [vmem:[#allocation2 + $0x3d] sm:$0x1]  ;;  %v4407_v24 = vmul.f32 %v4249_v8, %v4120_v47 }
 0x400   : > { %4448 = vst.msk [vmem:[#allocation2 + $0x50] sm:$0xff] %vm4437_vm9, %v4406_v60  ;;  %v4593_v40 = vmax.f32 %v4590_v29, %v4591_v55  ;;  %v4601_v16 = vmax.f32 %v4598_v22, %v4599_v44  ;;  %v4606_v28 = vld [vmem:[#allocation2 + $0x3e] sm:$0x1]  ;;  %v4607_v48 = vld [vmem:[#allocation2 + $0x3f] sm:$0x1]  ;;  %v4080_v46 = vadd.f32 %v13175_v19, %v4032_v0  ;;  %v10304_v45 = vpop.f32.mrb[103].mxu0  ;;  %v4616_v55 = vmax.f32 %v4612_v50, %v4613_v37 }
 0x401   : > { %v4586_v2 = vmax.f32 %v4584_v38, %v4585_v15  ;;  %v4609_v39 = vmax.f32 %v4606_v28, %v4607_v48  ;;  %v14408_v3 = vld [vmem:[#allocation80_spill] sm:$0xff]  ;;  %v4614_v38 = vld [vmem:[#allocation2 + $0x40] sm:$0x1]  ;;  %4449 = vst.msk [vmem:[#allocation2 + $0x58] sm:$0xff] %vm4437_vm9, %v4407_v24  ;;  %v4623_v44 = vld [vmem:[#allocation2 + $0x43] sm:$0x1]  ;;  %v4624_v48 = vmax.f32 %v4620_v54, %v4621_v7 }
 0x402   : > { %v4594_v31 = vmax.f32 %v4592_v62, %v4593_v40  ;;  %v4602_v43 = vmax.f32 %v4600_v49, %v4601_v16  ;;  %v3951_v30 = vadd.f32 %v3823_v35, %v14408_v3  ;;  %v4629_v14 = vld [vmem:[#allocation2 + $0x33] sm:$0x1]  ;;  %v4121_v34 = vmax.f32 %v4080_v46, 0.0  ;;  %v4636_v13 = vld [vmem:[#allocation2 + $0x34] sm:$0x1] }
 0x403   : > { %4587 = vst.msk [vmem:[#allocation3 + $0x24] sm:$0x1] %vm4498_vm10, %v4586_v2  ;;  %v4610_v21 = vmax.f32 %v4608_v63, %v4609_v39  ;;  %v3828_v60 = vpop.f32.mrb[104].mxu0  ;;  %v4637_v59 = vld [vmem:[#allocation2 + $0x35] sm:$0x1]  ;;  %v4632_v53 = vmax.f32 %v4628_v10, %v4629_v14  ;;  %v13256_v14 = vpop.permute.xlu0 %4268 }
 0x404   : > { %4595 = vst.msk [vmem:[#allocation3 + $0x25] sm:$0x1] %vm4498_vm10, %v4594_v31  ;;  %4603 = vst.msk [vmem:[#allocation3 + $0x26] sm:$0x1] %vm4498_vm10, %v4602_v43  ;;  %v4033_v29 = vadd.f32 %v13034_v20, %v3951_v30  ;;  %v3952_v25 = vadd.f32 %v3828_v60, %v14409_v41  ;;  %v10307_v56 = vpop.f32.mrb[105].mxu0  ;;  %v4408_v15 = vmul.f32 %v4254_v52, %v4121_v34 }
 0x405   : > { %4611 = vst.msk [vmem:[#allocation3 + $0x27] sm:$0x1] %vm4498_vm10, %v4610_v21  ;;  %v4615_v62 = vld [vmem:[#allocation2 + $0x41] sm:$0x1]  ;;  %v4622_v49 = vld [vmem:[#allocation2 + $0x42] sm:$0x1]  ;;  %v4640_v2 = vmax.f32 %v4636_v13, %v4637_v59 }
 0x406   : > { %v4617_v22 = vmax.f32 %v4614_v38, %v4615_v62  ;;  %v4630_v40 = vld [vmem:[#allocation2 + $0x44] sm:$0x1]  ;;  %v4631_v16 = vld [vmem:[#allocation2 + $0x45] sm:$0x1]  ;;  %v4034_v28 = vadd.f32 %v13045_v18, %v3952_v25  ;;  %v4625_v0 = vmax.f32 %v4622_v49, %v4623_v44  ;;  %v4638_v12 = vld [vmem:[#allocation2 + $0x46] sm:$0x1]  ;;  %v4081_v56 = vadd.f32 %v13175_v19, %v4033_v29 }
 0x407   : > { %v4633_v20 = vmax.f32 %v4630_v40, %v4631_v16  ;;  %v4639_v63 = vld [vmem:[#allocation2 + $0x47] sm:$0x1]  ;;  %4450 = vst.msk [vmem:[#allocation2 + $0x60] sm:$0xff] %vm4437_vm9, %v4408_v15  ;;  %v4644_v50 = vld [vmem:[#allocation2 + $0x48] sm:$0x1] }
 0x408   : > { %v4618_v39 = vmax.f32 %v4616_v55, %v4617_v22  ;;  %v4641_v35 = vmax.f32 %v4638_v12, %v4639_v63  ;;  %v4626_v31 = vmax.f32 %v4624_v48, %v4625_v0  ;;  %v4645_v47 = vld [vmem:[#allocation2 + $0x49] sm:$0x1]  ;;  %v4652_v45 = vld [vmem:[#allocation2 + $0x4a] sm:$0x1]  ;;  %v4653_v18 = vld [vmem:[#allocation2 + $0x4b] sm:$0x1]  ;;  %v4082_v38 = vadd.f32 %v13175_v19, %v4034_v28 }
 0x409   : > { %v4634_v43 = vmax.f32 %v4632_v53, %v4633_v20  ;;  %v4660_v8 = vld [vmem:[#allocation2 + $0x4c] sm:$0x1]  ;;  %v4661_v37 = vld [vmem:[#allocation2 + $0x4d] sm:$0x1]  ;;  %v4668_v54 = vld [vmem:[#allocation2 + $0x4e] sm:$0x1]  ;;  %v4648_v52 = vmax.f32 %v4644_v50, %v4645_v47  ;;  %v4656_v62 = vmax.f32 %v4652_v45, %v4653_v18 }
 0x40a   : > { %4619 = vst.msk [vmem:[#allocation3 + $0x28] sm:$0x1] %vm4498_vm10, %v4618_v39  ;;  %v4642_v46 = vmax.f32 %v4640_v2, %v4641_v35  ;;  %4627 = vst.msk [vmem:[#allocation3 + $0x29] sm:$0x1] %vm4498_vm10, %v4626_v31  ;;  %v4669_v7 = vld [vmem:[#allocation2 + $0x4f] sm:$0x1]  ;;  %v4664_v49 = vmax.f32 %v4660_v8, %v4661_v37  ;;  %v4259_v2 = vpop.permute.xlu1 %4258 }
 0x40b   : > { %4635 = vst.msk [vmem:[#allocation3 + $0x2a] sm:$0x1] %vm4498_vm10, %v4634_v43  ;;  %v4676_v21 = vld [vmem:[#allocation2 + $0x50] sm:$0x1]  ;;  %v4677_v3 = vld [vmem:[#allocation2 + $0x51] sm:$0x1]  ;;  %v4672_v16 = vmax.f32 %v4668_v54, %v4669_v7  ;;  %v4264_v7 = vpop.permute.xlu0 %4263 }
 0x40c   : > { %4643 = vst.msk [vmem:[#allocation3 + $0x2b] sm:$0x1] %vm4498_vm10, %v4642_v46  ;;  %v4684_v30 = vld [vmem:[#allocation2 + $0x52] sm:$0x1]  ;;  %v4685_v10 = vld [vmem:[#allocation2 + $0x53] sm:$0x1]  ;;  %v4680_v48 = vmax.f32 %v4676_v21, %v4677_v3 }
 0x40d   : > { %v4646_v24 = vld [vmem:[#allocation2 + $0x5a] sm:$0x1]  ;;  %v4647_v34 = vld [vmem:[#allocation2 + $0x5b] sm:$0x1]  ;;  %v4654_v60 = vld [vmem:[#allocation2 + $0x5c] sm:$0x1]  ;;  %v4688_v53 = vmax.f32 %v4684_v30, %v4685_v10 }
 0x40e   : > { %v4649_v13 = vmax.f32 %v4646_v24, %v4647_v34  ;;  %v4655_v59 = vld [vmem:[#allocation2 + $0x5d] sm:$0x1]  ;;  %v4662_v41 = vld [vmem:[#allocation2 + $0x5e] sm:$0x1]  ;;  %v4663_v25 = vld [vmem:[#allocation2 + $0x5f] sm:$0x1] }
 0x40f   : > { %v4692_v15 = vld [vmem:[#allocation2 + $0x54] sm:$0x1]  ;;  %v4693_v55 = vld [vmem:[#allocation2 + $0x55] sm:$0x1]  ;;  %v4657_v22 = vmax.f32 %v4654_v60, %v4655_v59  ;;  %v4665_v44 = vmax.f32 %v4662_v41, %v4663_v25  ;;  %v4670_v40 = vld [vmem:[#allocation2 + $0x60] sm:$0x1] }
 0x410   : > { %v4650_v0 = vmax.f32 %v4648_v52, %v4649_v13  ;;  %v4671_v20 = vld [vmem:[#allocation2 + $0x61] sm:$0x1]  ;;  %v4678_v12 = vld [vmem:[#allocation2 + $0x62] sm:$0x1]  ;;  %v4679_v63 = vld [vmem:[#allocation2 + $0x63] sm:$0x1]  ;;  %v4696_v47 = vmax.f32 %v4692_v15, %v4693_v55 }
 0x411   : > { %v4658_v39 = vmax.f32 %v4656_v62, %v4657_v22  ;;  %v4666_v35 = vmax.f32 %v4664_v49, %v4665_v44  ;;  %v4673_v29 = vmax.f32 %v4670_v40, %v4671_v20  ;;  %v4681_v31 = vmax.f32 %v4678_v12, %v4679_v63  ;;  %v4686_v28 = vld [vmem:[#allocation2 + $0x64] sm:$0x1]  ;;  %v4687_v43 = vld [vmem:[#allocation2 + $0x65] sm:$0x1]  ;;  %v4694_v50 = vld [vmem:[#allocation2 + $0x66] sm:$0x1]  ;;  %v4274_v40 = vpop.permute.xlu1 %4273 }
 0x412   : > { %4651 = vst.msk [vmem:[#allocation3 + $0x2e] sm:$0x1] %vm4498_vm10, %v4650_v0  ;;  %v4689_v46 = vmax.f32 %v4686_v28, %v4687_v43  ;;  %v4695_v45 = vld [vmem:[#allocation2 + $0x67] sm:$0x1]  ;;  %v4122_v18 = vmax.f32 %v4081_v56, 0.0  ;;  %v4123_v8 = vmax.f32 %v4082_v38, 0.0 }
 0x413   : > { %v3831_v37 = vpop.f32.mrb[106].mxu0  ;;  %v5237_v54 = vld [vmem:[#allocation3 + $0x23] sm:$0xff]  ;;  %4659 = vst.msk [vmem:[#allocation3 + $0x2f] sm:$0x1] %vm4498_vm10, %v4658_v39  ;;  %4667 = vst.msk [vmem:[#allocation3 + $0x30] sm:$0x1] %vm4498_vm10, %v4666_v35  ;;  %v4674_v21 = vmax.f32 %v4672_v16, %v4673_v29  ;;  %v4682_v3 = vmax.f32 %v4680_v48, %v4681_v31  ;;  %v4697_v30 = vmax.f32 %v4694_v50, %v4695_v45 }
 0x414   : > { %v14410_v10 = vld [vmem:[#allocation82_spill] sm:$0xff]  ;;  %v10308_v34 = vpop.f32.mrb[107].mxu0  ;;  %v4690_v52 = vmax.f32 %v4688_v53, %v4689_v46  ;;  %v4409_v13 = vmul.f32 %v4259_v2, %v4122_v18  ;;  %v4410_v59 = vmul.f32 %v4264_v7, %v4123_v8  ;;  %v13264_v56 = vld [vmem:[#allocation3 + $0x20] sm:$0xff]  ;;  %v4700_v63 = vld [vmem:[#allocation2 + $0x56] sm:$0x1] }
 0x415   : > { %v3953_v24 = vadd.f32 %v3831_v37, %v14410_v10  ;;  %v5236_v60 = vld [vmem:[#allocation3 + $0x1b] sm:$0xff]  ;;  %v3836_v41 = vpop.f32.mrb[108].mxu0  ;;  %v4698_v38 = vmax.f32 %v4696_v47, %v4697_v30  ;;  %4675 = vst.msk [vmem:[#allocation3 + $0x31] sm:$0x1] %vm4498_vm10, %v4674_v21  ;;  %4683 = vst.msk [vmem:[#allocation3 + $0x32] sm:$0x1] %vm4498_vm10, %v4682_v3  ;;  %v4279_v3 = vpop.permute.xlu1 %4278 }
 0x416   : > { %v5251_v25 = vpack.c.bf16 %v5237_v54, %v5236_v60  ;;  %v14411_v49 = vld [vmem:[#allocation83_spill] sm:$0xff]  ;;  %v10311_v55 = vpop.f32.mrb[109].mxu0  ;;  %4691 = vst.msk [vmem:[#allocation3 + $0x33] sm:$0x1] %vm4498_vm10, %v4690_v52  ;;  %v14412_v48 = vld [vmem:[#allocation84_spill] sm:$0xff]  ;;  %v14413_v29 = vld [vmem:[#allocation85_spill] sm:$0xff] }
 0x417   : > { %v4035_v62 = vadd.f32 %v13049_v23, %v3953_v24  ;;  %v3954_v15 = vadd.f32 %v3836_v41, %v14411_v49  ;;  %4451 = vst.msk [vmem:[#allocation2 + $0x68] sm:$0xff] %vm4437_vm9, %v4409_v13  ;;  %4452 = vst.msk [vmem:[#allocation2 + $0x70] sm:$0xff] %vm4437_vm9, %v4410_v59  ;;  %v3839_v22 = vpop.f32.mrb[110].mxu0  ;;  %v13274_v44 = vld [vmem:[#allocation3 + $0x18] sm:$0xff]  ;;  %v4701_v43 = vld [vmem:[#allocation2 + $0x57] sm:$0x1]  ;;  %v4284_v13 = vpop.permute.xlu0 %4283 }
 0x418   : > { %10366 = vmatmul.mubr.msk.bf16.vlgmr.msra.gmra.mrb[84].mxu1 %vm4437_vm9, %v5251_v25  ;;  %4699 = vst.msk [vmem:[#allocation3 + $0x34] sm:$0x1] %vm4498_vm10, %v4698_v38  ;;  %v3955_v53 = vadd.f32 %v3839_v22, %v14412_v48  ;;  %v10312_v0 = vpop.f32.mrb[111].mxu0  ;;  %v6491_v20 = vpack.c.bf16 %v13264_v56, %v13274_v44  ;;  %v10849_v47 = vld [vmem:[%s14179_s4 + $0x8] sm:$0xff]   ;;  %v4709_v37 = vld [vmem:[#allocation2 + $0x59] sm:$0x1]  ;;  %v4704_v30 = vmax.f32 %v4700_v63, %v4701_v43 }
 0x419   : > { %v4083_v16 = vadd.f32 %v13175_v19, %v4035_v62  ;;  %v4036_v23 = vadd.f32 %v13058_v32, %v3954_v15  ;;  %v3844_v12 = vpop.f32.mrb[112].mxu0  ;;  %v10848_v32 = vld [vmem:[%s14179_s4] sm:$0xff]   ;;  %v4289_v63 = vpop.permute.xlu1 %4288  ;;  %v6488_v44 = vld [vmem:[#allocation3 + $0x80] sm:$0xff] }
 0x41a   : > { %v4037_v35 = vadd.f32 %v13062_v51, %v3955_v53  ;;  %v3956_v31 = vadd.f32 %v3844_v12, %v14413_v29  ;;  %v10315_v28 = vpop.f32.mrb[113].mxu0  ;;  %v4708_v51 = vld [vmem:[#allocation2 + $0x58] sm:$0x1]  ;;  %v14414_v54 = vld [vmem:[#allocation86_spill] sm:$0xff]  ;;  %10381 = vmatprep.subr.bf16.mxu1 %v10848_v32  ;;  %v14415_v52 = vld [vmem:[#allocation87_spill] sm:$0xff] }
 0x41b   : > { %v4124_v2 = vmax.f32 %v4083_v16, 0.0  ;;  %v4084_v39 = vadd.f32 %v13175_v19, %v4036_v23  ;;  %v3847_v50 = vpop.f32.mrb[114].mxu0  ;;  %10382 = vmatpush3.bf16.msra.mxu1 %v10848_v32  ;;  %v4712_v62 = vmax.f32 %v4708_v51, %v4709_v37  ;;  %v4294_v29 = vpop.permute.xlu0 %4293 }
 0x41c   : > { %v4038_v18 = vadd.f32 %v13071_v4, %v3956_v31  ;;  %v10316_v8 = vpop.f32.mrb[115].mxu0  ;;  %v3957_v7 = vadd.f32 %v3847_v50, %v14414_v54  ;;  %v4085_v41 = vadd.f32 %v13175_v19, %v4037_v35  ;;  %10383 = vmatprep.subr.bf16.mxu1 %v10849_v47 }
 0x41d   : > { %v4411_v46 = vmul.f32 %v13256_v14, %v4124_v2  ;;  %v4125_v45 = vmax.f32 %v4084_v39, 0.0  ;;  %v3852_v21 = vpop.f32.mrb[116].mxu0 }
 0x41e   : > { %v4702_v10 = vld [vmem:[#allocation2 + $0x68] sm:$0x1]  ;;  %v4703_v24 = vld [vmem:[#allocation2 + $0x69] sm:$0x1]  ;;  %v4710_v34 = vld [vmem:[#allocation2 + $0x6a] sm:$0x1]  ;;  %v3958_v14 = vadd.f32 %v3852_v21, %v14415_v52  ;;  %v4086_v25 = vadd.f32 %v13175_v19, %v4038_v18  ;;  %v4039_v38 = vadd.f32 %v13075_v5, %v3957_v7 }
 0x41f   : > { %4453 = vst.msk [vmem:[#allocation2 + $0x78] sm:$0xff] %vm4437_vm9, %v4411_v46  ;;  %v4412_v60 = vmul.f32 %v4274_v40, %v4125_v45  ;;  %v4705_v4 = vmax.f32 %v4702_v10, %v4703_v24  ;;  %v4711_v59 = vld [vmem:[#allocation2 + $0x6b] sm:$0x1]  ;;  %v4716_v16 = vld [vmem:[#allocation2 + $0x6c] sm:$0x1]  ;;  %10384 = vmatpush3.bf16.msra.mxu1 %v10849_v47  ;;  %v4126_v53 = vmax.f32 %v4085_v41, 0.0 }
 0x420   : > { %v4713_v49 = vmax.f32 %v4710_v34, %v4711_v59  ;;  %v4040_v15 = vadd.f32 %v13084_v26, %v3958_v14  ;;  %v4087_v22 = vadd.f32 %v13175_v19, %v4039_v38  ;;  %v4717_v48 = vld [vmem:[#allocation2 + $0x6d] sm:$0x1]  ;;  %v4127_v5 = vmax.f32 %v4086_v25, 0.0  ;;  %v10319_v12 = vpop.f32.mrb[117].mxu0  ;;  %v4724_v2 = vld [vmem:[#allocation2 + $0x6e] sm:$0x1] }
 0x421   : > { %4454 = vst.msk [vmem:[#allocation2 + $0x80] sm:$0xff] %vm4437_vm9, %v4412_v60  ;;  %v4706_v55 = vmax.f32 %v4704_v30, %v4705_v4  ;;  %v4725_v39 = vld [vmem:[#allocation2 + $0x6f] sm:$0x1]  ;;  %v3855_v35 = vpop.f32.mrb[118].mxu0  ;;  %v4732_v31 = vld [vmem:[#allocation2 + $0x70] sm:$0x1]  ;;  %v4413_v50 = vmul.f32 %v4279_v3, %v4126_v53  ;;  %v4720_v18 = vmax.f32 %v4716_v16, %v4717_v48 }
 0x422   : > { %v4714_v40 = vmax.f32 %v4712_v62, %v4713_v49  ;;  %v4088_v23 = vadd.f32 %v13175_v19, %v4040_v15  ;;  %v4128_v0 = vmax.f32 %v4087_v22, 0.0  ;;  %v4414_v32 = vmul.f32 %v4284_v13, %v4127_v5  ;;  %v14416_v46 = vld [vmem:[#allocation89_spill] sm:$0xff]  ;;  %v4733_v8 = vld [vmem:[#allocation2 + $0x71] sm:$0x1]  ;;  %v4740_v51 = vld [vmem:[#allocation2 + $0x72] sm:$0x1] }
 0x423   : > { %4707 = vst.msk [vmem:[#allocation3 + $0x35] sm:$0x1] %vm4498_vm10, %v4706_v55  ;;  %v3959_v45 = vadd.f32 %v3855_v35, %v14416_v46  ;;  %v4741_v37 = vld [vmem:[#allocation2 + $0x73] sm:$0x1]  ;;  %v4748_v21 = vld [vmem:[#allocation2 + $0x74] sm:$0x1]  ;;  %v4728_v24 = vmax.f32 %v4724_v2, %v4725_v39  ;;  %v4736_v13 = vmax.f32 %v4732_v31, %v4733_v8  ;;  %v4299_v39 = vpop.permute.xlu1 %4298 }
 0x424   : > { %4715 = vst.msk [vmem:[#allocation3 + $0x36] sm:$0x1] %vm4498_vm10, %v4714_v40  ;;  %v4129_v26 = vmax.f32 %v4088_v23, 0.0  ;;  %v4415_v47 = vmul.f32 %v4289_v63, %v4128_v0  ;;  %v4749_v30 = vld [vmem:[#allocation2 + $0x75] sm:$0x1]  ;;  %v4744_v49 = vmax.f32 %v4740_v51, %v4741_v37  ;;  %v10320_v23 = vpop.f32.mrb[119].mxu0 }
 0x425   : > { %4455 = vst.msk [vmem:[#allocation2 + $0x88] sm:$0xff] %vm4437_vm9, %v4413_v50  ;;  %4456 = vst.msk [vmem:[#allocation2 + $0x90] sm:$0xff] %vm4437_vm9, %v4414_v32  ;;  %v4041_v3 = vadd.f32 %v13088_v17, %v3959_v45  ;;  %v4752_v15 = vmax.f32 %v4748_v21, %v4749_v30  ;;  %v4756_v55 = vld [vmem:[#allocation2 + $0x76] sm:$0x1]  ;;  %v4757_v22 = vld [vmem:[#allocation2 + $0x77] sm:$0x1] }
 0x426   : > { %v4718_v28 = vld [vmem:[#allocation2 + $0x7e] sm:$0x1]  ;;  %v4719_v43 = vld [vmem:[#allocation2 + $0x7f] sm:$0x1]  ;;  %v4416_v7 = vmul.f32 %v4294_v29, %v4129_v26  ;;  %4457 = vst.msk [vmem:[#allocation2 + $0x98] sm:$0xff] %vm4437_vm9, %v4415_v47  ;;  %v3860_v63 = vpop.f32.mrb[120].mxu0 }
 0x427   : > { %v4721_v54 = vmax.f32 %v4718_v28, %v4719_v43  ;;  %v4089_v62 = vadd.f32 %v13175_v19, %v4041_v3  ;;  %v4764_v17 = vld [vmem:[#allocation2 + $0x78] sm:$0x1]  ;;  %v4765_v48 = vld [vmem:[#allocation2 + $0x79] sm:$0x1]  ;;  %v10850_v19 = vld [vmem:[%s14179_s4 + $0x40] sm:$0xff]   ;;  %v10323_v43 = vpop.f32.mrb[121].mxu0 }
 0x428   : > { %v4726_v10 = vld [vmem:[#allocation2 + $0x80] sm:$0x1]  ;;  %v4727_v60 = vld [vmem:[#allocation2 + $0x81] sm:$0x1]  ;;  %v4734_v52 = vld [vmem:[#allocation2 + $0x82] sm:$0x1]  ;;  %10401 = vmatprep.subr.bf16.mxu1 %v10850_v19  ;;  %v4768_v3 = vmax.f32 %v4764_v17, %v4765_v48 }
 0x429   : > { %v4722_v34 = vmax.f32 %v4720_v18, %v4721_v54  ;;  %v4735_v14 = vld [vmem:[#allocation2 + $0x83] sm:$0x1]  ;;  %4458 = vst.msk [vmem:[#allocation2 + $0xa0] sm:$0xff] %vm4437_vm9, %v4416_v7  ;;  %v4729_v4 = vmax.f32 %v4726_v10, %v4727_v60  ;;  %v4742_v41 = vld [vmem:[#allocation2 + $0x84] sm:$0x1]  ;;  %v4130_v12 = vmax.f32 %v4089_v62, 0.0  ;;  %v4760_v10 = vmax.f32 %v4756_v55, %v4757_v22 }
 0x42a   : > { %v4737_v59 = vmax.f32 %v4734_v52, %v4735_v14  ;;  %v4743_v25 = vld [vmem:[#allocation2 + $0x85] sm:$0x1]  ;;  %v4750_v38 = vld [vmem:[#allocation2 + $0x86] sm:$0x1]  ;;  %v4751_v16 = vld [vmem:[#allocation2 + $0x87] sm:$0x1] }
 0x42b   : > { %4723 = vst.msk [vmem:[#allocation3 + $0x39] sm:$0x1] %vm4498_vm10, %v4722_v34  ;;  %v4745_v40 = vmax.f32 %v4742_v41, %v4743_v25  ;;  %v4730_v53 = vmax.f32 %v4728_v24, %v4729_v4  ;;  %v4753_v0 = vmax.f32 %v4750_v38, %v4751_v16  ;;  %v13316_v2 = vld [vmem:[#allocation3 + $0x28] sm:$0xff]  ;;  %v4772_v26 = vld [vmem:[#allocation2 + $0x7a] sm:$0x1]  ;;  %v14417_v31 = vld [vmem:[#allocation90_spill] sm:$0xff]  ;;  %v4417_v45 = vmul.f32 %v4299_v39, %v4130_v12 }
 0x42c   : > { %v4738_v5 = vmax.f32 %v4736_v13, %v4737_v59  ;;  %v4773_v35 = vld [vmem:[#allocation2 + $0x7b] sm:$0x1]  ;;  %v3960_v28 = vadd.f32 %v3860_v63, %v14417_v31  ;;  %v4780_v32 = vld [vmem:[#allocation2 + $0x7c] sm:$0x1]  ;;  %v4781_v47 = vld [vmem:[#allocation2 + $0x7d] sm:$0x1] }
 0x42d   : > { %v4746_v29 = vmax.f32 %v4744_v49, %v4745_v40  ;;  %v13319_v50 = vld [vmem:[#allocation3 + $0x30] sm:$0xff]  ;;  %v4754_v46 = vmax.f32 %v4752_v15, %v4753_v0  ;;  %4731 = vst.msk [vmem:[#allocation3 + $0x3a] sm:$0x1] %vm4498_vm10, %v4730_v53  ;;  %v3863_v18 = vpop.f32.mrb[122].mxu0  ;;  %v4758_v51 = vld [vmem:[#allocation2 + $0x88] sm:$0x1]  ;;  %v4776_v14 = vmax.f32 %v4772_v26, %v4773_v35 }
 0x42e   : > { %4739 = vst.msk [vmem:[#allocation3 + $0x3b] sm:$0x1] %vm4498_vm10, %v4738_v5  ;;  %v6492_v8 = vpack.c.bf16 %v13319_v50, %v13316_v2  ;;  %v4759_v37 = vld [vmem:[#allocation2 + $0x89] sm:$0x1]  ;;  %v4766_v54 = vld [vmem:[#allocation2 + $0x8a] sm:$0x1]  ;;  %v4042_v7 = vadd.f32 %v13097_v57, %v3960_v28  ;;  %v4784_v57 = vmax.f32 %v4780_v32, %v4781_v47 }
 0x42f   : > { %4747 = vst.msk [vmem:[#allocation3 + $0x3c] sm:$0x1] %vm4498_vm10, %v4746_v29  ;;  %v14418_v21 = vld [vmem:[#allocation91_spill] sm:$0xff]  ;;  %4755 = vst.msk [vmem:[#allocation3 + $0x3d] sm:$0x1] %vm4498_vm10, %v4754_v46  ;;  %v4761_v24 = vmax.f32 %v4758_v51, %v4759_v37  ;;  %v6489_v2 = vld [vmem:[#allocation3 + $0x88] sm:$0xff] }
 0x430   : > { %v3961_v30 = vadd.f32 %v3863_v18, %v14418_v21  ;;  %v4767_v34 = vld [vmem:[#allocation2 + $0x8b] sm:$0x1]  ;;  %v4774_v60 = vld [vmem:[#allocation2 + $0x8c] sm:$0x1]  ;;  %v4775_v52 = vld [vmem:[#allocation2 + $0x8d] sm:$0x1] }
 0x431   : > { %4459 = vst.msk [vmem:[#allocation2 + $0xa8] sm:$0xff] %vm4437_vm9, %v4417_v45  ;;  %v4769_v13 = vmax.f32 %v4766_v54, %v4767_v34  ;;  %v4777_v4 = vmax.f32 %v4774_v60, %v4775_v52  ;;  %v4782_v59 = vld [vmem:[#allocation2 + $0x8e] sm:$0x1]  ;;  %v4783_v41 = vld [vmem:[#allocation2 + $0x8f] sm:$0x1]  ;;  %v4762_v38 = vmax.f32 %v4760_v10, %v4761_v24 }
 0x432   : > { %v4043_v25 = vadd.f32 %v13101_v11, %v3961_v30  ;;  %v4785_v62 = vmax.f32 %v4782_v59, %v4783_v41  ;;  %v4788_v55 = vld [vmem:[#allocation2 + $0x90] sm:$0x1]  ;;  %v4789_v22 = vld [vmem:[#allocation2 + $0x91] sm:$0x1]  ;;  %v4796_v40 = vld [vmem:[#allocation2 + $0x92] sm:$0x1] }
 0x433   : > { %v4770_v49 = vmax.f32 %v4768_v3, %v4769_v13  ;;  %v4778_v15 = vmax.f32 %v4776_v14, %v4777_v4  ;;  %4763 = vst.msk [vmem:[#allocation3 + $0x3e] sm:$0x1] %vm4498_vm10, %v4762_v38  ;;  %v4797_v16 = vld [vmem:[#allocation2 + $0x93] sm:$0x1]  ;;  %v4804_v23 = vld [vmem:[#allocation2 + $0x94] sm:$0x1]  ;;  %v4792_v35 = vmax.f32 %v4788_v55, %v4789_v22 }
 0x434   : > { %v4786_v17 = vmax.f32 %v4784_v57, %v4785_v62  ;;  %v4805_v48 = vld [vmem:[#allocation2 + $0x95] sm:$0x1]  ;;  %v4812_v53 = vld [vmem:[#allocation2 + $0x96] sm:$0x1]  ;;  %v4813_v11 = vld [vmem:[#allocation2 + $0x97] sm:$0x1]  ;;  %v4800_v45 = vmax.f32 %v4796_v40, %v4797_v16  ;;  %v4309_v62 = vpop.permute.xlu1 %4308 }
 0x435   : > { %4779 = vst.msk [vmem:[#allocation3 + $0x40] sm:$0x1] %vm4498_vm10, %v4778_v15  ;;  %4771 = vst.msk [vmem:[#allocation3 + $0x3f] sm:$0x1] %vm4498_vm10, %v4770_v49  ;;  %v4820_v5 = vld [vmem:[#allocation2 + $0x98] sm:$0x1]  ;;  %v4808_v18 = vmax.f32 %v4804_v23, %v4805_v48  ;;  %v4816_v10 = vmax.f32 %v4812_v53, %v4813_v11  ;;  %v4304_v23 = vpop.permute.xlu0 %4303 }
 0x436   : > { %4787 = vst.msk [vmem:[#allocation3 + $0x41] sm:$0x1] %vm4498_vm10, %v4786_v17  ;;  %v4821_v0 = vld [vmem:[#allocation2 + $0x99] sm:$0x1]  ;;  %v4828_v12 = vld [vmem:[#allocation2 + $0x9a] sm:$0x1] }
 0x437   : > { %v4829_v63 = vld [vmem:[#allocation2 + $0x9b] sm:$0x1]  ;;  %v4790_v19 = vld [vmem:[#allocation2 + $0xa2] sm:$0x1]  ;;  %v4791_v39 = vld [vmem:[#allocation2 + $0xa3] sm:$0x1]  ;;  %v4824_v3 = vmax.f32 %v4820_v5, %v4821_v0 }
 0x438   : > { %v4798_v26 = vld [vmem:[#allocation2 + $0xa4] sm:$0x1]  ;;  %v4793_v29 = vmax.f32 %v4790_v19, %v4791_v39  ;;  %v4799_v31 = vld [vmem:[#allocation2 + $0xa5] sm:$0x1]  ;;  %v4806_v28 = vld [vmem:[#allocation2 + $0xa6] sm:$0x1]  ;;  %v4832_v24 = vmax.f32 %v4828_v12, %v4829_v63 }
 0x439   : > { %v4807_v43 = vld [vmem:[#allocation2 + $0xa7] sm:$0x1]  ;;  %v13338_v32 = vld [vmem:[%s14177_s2] ss:$0 sm:$0xff]  ;;  %v4836_v51 = vld [vmem:[#allocation2 + $0x9c] sm:$0x1]  ;;  %v4801_v54 = vmax.f32 %v4798_v26, %v4799_v31 }
 0x43a   : > { %v4090_v47 = vadd.f32 %v13338_v32, %v4042_v7  ;;  %v4091_v46 = vadd.f32 %v13338_v32, %v4043_v25  ;;  %v4837_v37 = vld [vmem:[#allocation2 + $0x9d] sm:$0x1]  ;;  %v4809_v21 = vmax.f32 %v4806_v28, %v4807_v43  ;;  %v4814_v30 = vld [vmem:[#allocation2 + $0xa8] sm:$0x1]  ;;  %v4794_v34 = vmax.f32 %v4792_v35, %v4793_v29  ;;  %v4815_v60 = vld [vmem:[#allocation2 + $0xa9] sm:$0x1] }
 0x43b   : > { %v4822_v52 = vld [vmem:[#allocation2 + $0xaa] sm:$0x1]  ;;  %v4823_v14 = vld [vmem:[#allocation2 + $0xab] sm:$0x1]  ;;  %v5238_v13 = vld [vmem:[#allocation3 + $0x2b] sm:$0xff]  ;;  %v4802_v4 = vmax.f32 %v4800_v45, %v4801_v54  ;;  %v4817_v7 = vmax.f32 %v4814_v30, %v4815_v60  ;;  %v4840_v49 = vmax.f32 %v4836_v51, %v4837_v37  ;;  %v10324_v40 = vpop.f32.mrb[123].mxu0  ;;  %v4314_v54 = vpop.permute.xlu0 %4313 }
 0x43c   : > { %v4810_v59 = vmax.f32 %v4808_v18, %v4809_v21  ;;  %v4825_v41 = vmax.f32 %v4822_v52, %v4823_v14  ;;  %v4830_v25 = vld [vmem:[#allocation2 + $0xac] sm:$0x1]  ;;  %v4831_v57 = vld [vmem:[#allocation2 + $0xad] sm:$0x1]  ;;  %v4838_v38 = vld [vmem:[#allocation2 + $0xae] sm:$0x1] }
 0x43d   : > { %4795 = vst.msk [vmem:[#allocation3 + $0x44] sm:$0x1] %vm4498_vm10, %v4794_v34  ;;  %v4833_v15 = vmax.f32 %v4830_v25, %v4831_v57  ;;  %v4839_v55 = vld [vmem:[#allocation2 + $0xaf] sm:$0x1]  ;;  %v4131_v22 = vmax.f32 %v4090_v47, 0.0  ;;  %v4132_v17 = vmax.f32 %v4091_v46, 0.0  ;;  %v4818_v48 = vmax.f32 %v4816_v10, %v4817_v7  ;;  %v4319_v47 = vpop.permute.xlu1 %4318 }
 0x43e   : > { %v5239_v16 = vld [vmem:[#allocation3 + $0x33] sm:$0xff]  ;;  %4803 = vst.msk [vmem:[#allocation3 + $0x45] sm:$0x1] %vm4498_vm10, %v4802_v4  ;;  %4811 = vst.msk [vmem:[#allocation3 + $0x46] sm:$0x1] %vm4498_vm10, %v4810_v59  ;;  %v4826_v53 = vmax.f32 %v4824_v3, %v4825_v41  ;;  %v4841_v11 = vmax.f32 %v4838_v38, %v4839_v55  ;;  %v3868_v5 = vpop.f32.mrb[124].mxu0 }
 0x43f   : > { %v5252_v0 = vpack.c.bf16 %v5239_v16, %v5238_v13  ;;  %v4834_v12 = vmax.f32 %v4832_v24, %v4833_v15  ;;  %v4418_v63 = vmul.f32 %v4304_v23, %v4131_v22  ;;  %v4419_v19 = vmul.f32 %v4309_v62, %v4132_v17  ;;  %v10327_v26 = vpop.f32.mrb[125].mxu0  ;;  %4819 = vst.msk [vmem:[#allocation3 + $0x47] sm:$0x1] %vm4498_vm10, %v4818_v48  ;;  %v4844_v21 = vld [vmem:[#allocation2 + $0x9e] sm:$0x1]  ;;  %v14419_v3 = vld [vmem:[#allocation92_spill] sm:$0xff] }
 0x440   : > { %v3962_v39 = vadd.f32 %v3868_v5, %v12754_v36  ;;  %4827 = vst.msk [vmem:[#allocation3 + $0x48] sm:$0x1] %vm4498_vm10, %v4826_v53  ;;  %v4842_v35 = vmax.f32 %v4840_v49, %v4841_v11  ;;  %v3871_v29 = vpop.f32.mrb[126].mxu0  ;;  %v4845_v30 = vld [vmem:[#allocation2 + $0x9f] sm:$0x1]  ;;  %v13362_v59 = vld [vmem:[#allocation3 + $0x38] sm:$0xff]  ;;  %v4324_v53 = vpop.permute.xlu0 %4323 }
 0x441   : > { %10369 = vmatprep.mubr.msk.bf16.mxu1 %vm4437_vm9, %v5252_v0  ;;  %4835 = vst.msk [vmem:[#allocation3 + $0x49] sm:$0x1] %vm4498_vm10, %v4834_v12  ;;  %v3963_v28 = vadd.f32 %v3871_v29, %v12760_v58  ;;  %v10328_v36 = vpop.f32.mrb[127].mxu0  ;;  %v4852_v60 = vld [vmem:[#allocation2 + $0xa0] sm:$0x1]  ;;  %v4848_v41 = vmax.f32 %v4844_v21, %v4845_v30  ;;  %v4329_v15 = vpop.permute.xlu1 %4328 }
 0x442   : > { %4460 = vst.msk [vmem:[#allocation2 + $0xb0] sm:$0xff] %vm4437_vm9, %v4418_v63  ;;  %4461 = vst.msk [vmem:[#allocation2 + $0xb8] sm:$0xff] %vm4437_vm9, %v4419_v19  ;;  %v4044_v31 = vadd.f32 %v13109_v9, %v3962_v39  ;;  %v3876_v43 = vpop.f32.mrb[128].mxu0  ;;  %v4853_v14 = vld [vmem:[#allocation2 + $0xa1] sm:$0x1]  ;;  %v5240_v39 = vld [vmem:[#allocation3 + $0x3b] sm:$0xff] }
 0x443   : > { %4843 = vst.msk [vmem:[#allocation3 + $0x4a] sm:$0x1] %vm4498_vm10, %v4842_v35  ;;  %v4045_v45 = vadd.f32 %v13113_v33, %v3963_v28  ;;  %v3964_v18 = vadd.f32 %v3876_v43, %v12779_v1  ;;  %v10331_v51 = vpop.f32.mrb[129].mxu0  ;;  %v4856_v16 = vmax.f32 %v4852_v60, %v4853_v14  ;;  %v6490_v50 = vld [vmem:[#allocation3 + $0x90] sm:$0x1] }
 0x444   : > { %v4092_v46 = vadd.f32 %v13338_v32, %v4044_v31  ;;  %v3879_v37 = vpop.f32.mrb[130].mxu0 }
 0x445   : > { %v4093_v9 = vadd.f32 %v13338_v32, %v4045_v45  ;;  %v4046_v58 = vadd.f32 %v13121_v42, %v3964_v18  ;;  %v3965_v24 = vadd.f32 %v3879_v37, %v14419_v3  ;;  %v10332_v34 = vpop.f32.mrb[131].mxu0  ;;  %v14420_v42 = vld [vmem:[#allocation93_spill] sm:$0xff] }
 0x446   : > { %v4133_v10 = vmax.f32 %v4092_v46, 0.0  ;;  %v3884_v52 = vpop.f32.mrb[132].mxu0  ;;  %v13364_v7 = vld [vmem:[#allocation3 + $0x40] sm:$0xff] }
 0x447   : > { %v4134_v33 = vmax.f32 %v4093_v9, 0.0  ;;  %v4047_v1 = vadd.f32 %v13125_v27, %v3965_v24  ;;  %v10335_v4 = vpop.f32.mrb[133].mxu0  ;;  %v3966_v62 = vadd.f32 %v3884_v52, %v14420_v42  ;;  %v6493_v49 = vpack.c.bf16 %v13364_v7, %v13362_v59  ;;  %v4339_v24 = vpop.permute.xlu0 %4338 }
 0x448   : > { %v4420_v13 = vmul.f32 %v4314_v54, %v4133_v10  ;;  %v4094_v17 = vadd.f32 %v13338_v32, %v4046_v58  ;;  %v3887_v19 = vpop.f32.mrb[134].mxu0  ;;  %v14422_v58 = vld [vmem:[#allocation95_spill] sm:$0xff] }
 0x449   : > { %v4846_v25 = vld [vmem:[#allocation2 + $0xb0] sm:$0x1]  ;;  %v4847_v57 = vld [vmem:[#allocation2 + $0xb1] sm:$0x1]  ;;  %v4854_v38 = vld [vmem:[#allocation2 + $0xb2] sm:$0x1]  ;;  %v4421_v27 = vmul.f32 %v4319_v47, %v4134_v33  ;;  %v4095_v40 = vadd.f32 %v13338_v32, %v4047_v1  ;;  %v4048_v48 = vadd.f32 %v13129_v61, %v3966_v62  ;;  %v4334_v47 = vpop.permute.xlu1 %4333 }
 0x44a   : > { %v4849_v55 = vmax.f32 %v4846_v25, %v4847_v57  ;;  %v4855_v22 = vld [vmem:[#allocation2 + $0xb3] sm:$0x1]  ;;  %4462 = vst.msk [vmem:[#allocation2 + $0xc0] sm:$0xff] %vm4437_vm9, %v4420_v13  ;;  %v4135_v12 = vmax.f32 %v4094_v17, 0.0  ;;  %v5241_v26 = vld [vmem:[#allocation3 + $0x43] sm:$0xff]  ;;  %v14421_v61 = vld [vmem:[#allocation94_spill] sm:$0xff] }
 0x44b   : > { %v4857_v23 = vmax.f32 %v4854_v38, %v4855_v22  ;;  %4463 = vst.msk [vmem:[#allocation2 + $0xc8] sm:$0xff] %vm4437_vm9, %v4421_v27  ;;  %v4096_v0 = vadd.f32 %v13338_v32, %v4048_v48  ;;  %v4136_v63 = vmax.f32 %v4095_v40, 0.0  ;;  %v4860_v35 = vld [vmem:[#allocation2 + $0xb4] sm:$0x1]  ;;  %v4861_v29 = vld [vmem:[#allocation2 + $0xb5] sm:$0x1]  ;;  %v3967_v28 = vadd.f32 %v3887_v19, %v14421_v61 }
 0x44c   : > { %v4850_v11 = vmax.f32 %v4848_v41, %v4849_v55  ;;  %v10336_v36 = vpop.f32.mrb[135].mxu0  ;;  %v5253_v43 = vpack.c.bf16 %v5241_v26, %v5240_v39  ;;  %v4868_v46 = vld [vmem:[#allocation2 + $0xb6] sm:$0x1]  ;;  %v4869_v45 = vld [vmem:[#allocation2 + $0xb7] sm:$0x1]  ;;  %v4422_v18 = vmul.f32 %v4324_v53, %v4135_v12  ;;  %v4864_v34 = vmax.f32 %v4860_v35, %v4861_v29 }
 0x44d   : > { %v4858_v5 = vmax.f32 %v4856_v16, %v4857_v23  ;;  %v4137_v31 = vmax.f32 %v4096_v0, 0.0  ;;  %v4423_v51 = vmul.f32 %v4329_v15, %v4136_v63  ;;  %v3892_v37 = vpop.f32.mrb[136].mxu0  ;;  %v4876_v54 = vld [vmem:[#allocation2 + $0xb8] sm:$0x1]  ;;  %v4049_v9 = vadd.f32 %v13133_v6, %v3967_v28  ;;  %v4877_v60 = vld [vmem:[#allocation2 + $0xb9] sm:$0x1] }
 0x44e   : > { %4851 = vst.msk [vmem:[#allocation3 + $0x4b] sm:$0x1] %vm4498_vm10, %v4850_v11  ;;  %10370 = vmatmul.mubr.msk.bf16.gmra.mrb[88].mxu1 %vm4437_vm9, %v5253_v43  ;;  %v3968_v3 = vadd.f32 %v3892_v37, %v14422_v58  ;;  %v4884_v52 = vld [vmem:[#allocation2 + $0xba] sm:$0x1]  ;;  %v4885_v14 = vld [vmem:[#allocation2 + $0xbb] sm:$0x1]  ;;  %v4872_v57 = vmax.f32 %v4868_v46, %v4869_v45  ;;  %v4880_v55 = vmax.f32 %v4876_v54, %v4877_v60 }
 0x44f   : > { %4859 = vst.msk [vmem:[#allocation3 + $0x4c] sm:$0x1] %vm4498_vm10, %v4858_v5  ;;  %v4424_v10 = vmul.f32 %v4334_v47, %v4137_v31  ;;  %v4892_v33 = vld [vmem:[#allocation2 + $0xbc] sm:$0x1]  ;;  %v4893_v1 = vld [vmem:[#allocation2 + $0xbd] sm:$0x1]  ;;  %v4097_v6 = vadd.f32 %v13338_v32, %v4049_v9  ;;  %v4888_v11 = vmax.f32 %v4884_v52, %v4885_v14  ;;  %v4344_v47 = vpop.permute.xlu0 %4343 }
 0x450   : > { %4464 = vst.msk [vmem:[#allocation2 + $0xd0] sm:$0xff] %vm4437_vm9, %v4422_v18  ;;  %4465 = vst.msk [vmem:[#allocation2 + $0xd8] sm:$0xff] %vm4437_vm9, %v4423_v51  ;;  %v14423_v41 = vld [vmem:[#allocation20_spill] sm:$0xff]  ;;  %v4900_v22 = vld [vmem:[#allocation2 + $0xbe] sm:$0x1]  ;;  %v4896_v5 = vmax.f32 %v4892_v33, %v4893_v1  ;;  %v10339_v26 = vpop.f32.mrb[137].mxu0 }
 0x451   : > { %v4862_v21 = vld [vmem:[#allocation2 + $0xc6] sm:$0x1]  ;;  %v4863_v30 = vld [vmem:[#allocation2 + $0xc7] sm:$0x1]  ;;  %4466 = vst.msk [vmem:[#allocation2 + $0xe0] sm:$0xff] %vm4437_vm9, %v4424_v10  ;;  %v4050_v25 = vadd.f32 %v14423_v41, %v3968_v3  ;;  %v4138_v39 = vmax.f32 %v4097_v6, 0.0 }
 0x452   : > { %v4865_v13 = vmax.f32 %v4862_v21, %v4863_v30  ;;  %v4870_v4 = vld [vmem:[#allocation2 + $0xc8] sm:$0x1]  ;;  %v4871_v42 = vld [vmem:[#allocation2 + $0xc9] sm:$0x1]  ;;  %v4878_v62 = vld [vmem:[#allocation2 + $0xca] sm:$0x1] }
 0x453   : > { %v4879_v15 = vld [vmem:[#allocation2 + $0xcb] sm:$0x1]  ;;  %v4901_v27 = vld [vmem:[#allocation2 + $0xbf] sm:$0x1]  ;;  %v4873_v17 = vmax.f32 %v4870_v4, %v4871_v42  ;;  %v4886_v16 = vld [vmem:[#allocation2 + $0xcc] sm:$0x1]  ;;  %v4098_v53 = vadd.f32 %v13338_v32, %v4050_v25  ;;  %v4425_v51 = vmul.f32 %v4339_v24, %v4138_v39 }
 0x454   : > { %v4866_v38 = vmax.f32 %v4864_v34, %v4865_v13  ;;  %v4881_v40 = vmax.f32 %v4878_v62, %v4879_v15  ;;  %v4887_v23 = vld [vmem:[#allocation2 + $0xcd] sm:$0x1]  ;;  %v4894_v48 = vld [vmem:[#allocation2 + $0xce] sm:$0x1]  ;;  %v4908_v0 = vld [vmem:[#allocation2 + $0xc0] sm:$0x1]  ;;  %v4904_v34 = vmax.f32 %v4900_v22, %v4901_v27 }
 0x455   : > { %v4909_v12 = vld [vmem:[#allocation2 + $0xc1] sm:$0x1]  ;;  %v4889_v63 = vmax.f32 %v4886_v16, %v4887_v23  ;;  %v4895_v19 = vld [vmem:[#allocation2 + $0xcf] sm:$0x1]  ;;  %v4916_v35 = vld [vmem:[#allocation2 + $0xc2] sm:$0x1]  ;;  %v4874_v31 = vmax.f32 %v4872_v57, %v4873_v17 }
 0x456   : > { %4867 = vst.msk [vmem:[#allocation3 + $0x4f] sm:$0x1] %vm4498_vm10, %v4866_v38  ;;  %v4917_v29 = vld [vmem:[#allocation2 + $0xc3] sm:$0x1]  ;;  %v4882_v61 = vmax.f32 %v4880_v55, %v4881_v40  ;;  %v4897_v28 = vmax.f32 %v4894_v48, %v4895_v19  ;;  %v4139_v36 = vmax.f32 %v4098_v53, 0.0  ;;  %v3895_v43 = vpop.f32.mrb[138].mxu0  ;;  %v4912_v1 = vmax.f32 %v4908_v0, %v4909_v12 }
 0x457   : > { %v4924_v46 = vld [vmem:[#allocation2 + $0xc4] sm:$0x1]  ;;  %v4925_v45 = vld [vmem:[#allocation2 + $0xc5] sm:$0x1]  ;;  %v4890_v18 = vmax.f32 %v4888_v11, %v4889_v63  ;;  %v14424_v37 = vld [vmem:[#allocation96_spill] sm:$0xff]  ;;  %v10340_v21 = vpop.f32.mrb[139].mxu0  ;;  %v4920_v4 = vmax.f32 %v4916_v35, %v4917_v29 }
 0x458   : > { %v3969_v54 = vadd.f32 %v3895_v43, %v14424_v37  ;;  %v4898_v30 = vmax.f32 %v4896_v5, %v4897_v28  ;;  %4875 = vst.msk [vmem:[#allocation3 + $0x50] sm:$0x1] %vm4498_vm10, %v4874_v31  ;;  %4883 = vst.msk [vmem:[#allocation3 + $0x51] sm:$0x1] %vm4498_vm10, %v4882_v61  ;;  %v4902_v10 = vld [vmem:[#allocation2 + $0xd0] sm:$0x1]  ;;  %v4426_v3 = vmul.f32 %v4344_v47, %v4139_v36 }
 0x459   : > { %v4903_v9 = vld [vmem:[#allocation2 + $0xd1] sm:$0x1]  ;;  %v4910_v58 = vld [vmem:[#allocation2 + $0xd2] sm:$0x1]  ;;  %4891 = vst.msk [vmem:[#allocation3 + $0x52] sm:$0x1] %vm4498_vm10, %v4890_v18  ;;  %v4928_v38 = vmax.f32 %v4924_v46, %v4925_v45 }
 0x45a   : > { %v4905_v60 = vmax.f32 %v4902_v10, %v4903_v9  ;;  %v4911_v52 = vld [vmem:[#allocation2 + $0xd3] sm:$0x1]  ;;  %v4918_v14 = vld [vmem:[#allocation2 + $0xd4] sm:$0x1]  ;;  %v4919_v13 = vld [vmem:[#allocation2 + $0xd5] sm:$0x1] }
 0x45b   : > { %4467 = vst.msk [vmem:[#allocation2 + $0xe8] sm:$0xff] %vm4437_vm9, %v4425_v51  ;;  %v14425_v24 = vld [vmem:[#allocation21_spill] sm:$0xff]  ;;  %v4913_v6 = vmax.f32 %v4910_v58, %v4911_v52  ;;  %v4921_v41 = vmax.f32 %v4918_v14, %v4919_v13  ;;  %v4926_v25 = vld [vmem:[#allocation2 + $0xd6] sm:$0x1]  ;;  %4468 = vst.msk [vmem:[#allocation2 + $0xf0] sm:$0xff] %vm4437_vm9, %v4426_v3 }
 0x45c   : > { %v4051_v33 = vadd.f32 %v14425_v24, %v3969_v54  ;;  %4899 = vst.msk [vmem:[#allocation3 + $0x53] sm:$0x1] %vm4498_vm10, %v4898_v30  ;;  %v4927_v57 = vld [vmem:[#allocation2 + $0xd7] sm:$0x1]  ;;  %v4906_v42 = vmax.f32 %v4904_v34, %v4905_v60  ;;  %v4932_v22 = vld [vmem:[#allocation2 + $0xd8] sm:$0x1] }
 0x45d   : > { %v4929_v62 = vmax.f32 %v4926_v25, %v4927_v57  ;;  %v4914_v15 = vmax.f32 %v4912_v1, %v4913_v6  ;;  %v4922_v55 = vmax.f32 %v4920_v4, %v4921_v41  ;;  %v4933_v17 = vld [vmem:[#allocation2 + $0xd9] sm:$0x1]  ;;  %v4940_v40 = vld [vmem:[#allocation2 + $0xda] sm:$0x1]  ;;  %v4941_v16 = vld [vmem:[#allocation2 + $0xdb] sm:$0x1]  ;;  %v4349_v57 = vpop.permute.xlu1 %4348 }
 0x45e   : > { %4907 = vst.msk [vmem:[#allocation3 + $0x54] sm:$0x1] %vm4498_vm10, %v4906_v42  ;;  %v4948_v23 = vld [vmem:[#allocation2 + $0xdc] sm:$0x1]  ;;  %v4949_v48 = vld [vmem:[#allocation2 + $0xdd] sm:$0x1]  ;;  %v4936_v35 = vmax.f32 %v4932_v22, %v4933_v17  ;;  %v4099_v36 = vadd.f32 %v13338_v32, %v4051_v33  ;;  %v4944_v43 = vmax.f32 %v4940_v40, %v4941_v16 }
 0x45f   : > { %v4930_v27 = vmax.f32 %v4928_v38, %v4929_v62  ;;  %4915 = vst.msk [vmem:[#allocation3 + $0x55] sm:$0x1] %vm4498_vm10, %v4914_v15  ;;  %4923 = vst.msk [vmem:[#allocation3 + $0x56] sm:$0x1] %vm4498_vm10, %v4922_v55  ;;  %v4956_v53 = vld [vmem:[#allocation2 + $0xde] sm:$0x1]  ;;  %v4952_v47 = vmax.f32 %v4948_v23, %v4949_v48 }
 0x460   : > { %v4957_v11 = vld [vmem:[#allocation2 + $0xdf] sm:$0x1]  ;;  %v4964_v5 = vld [vmem:[#allocation2 + $0xe0] sm:$0x1]  ;;  %v4965_v0 = vld [vmem:[#allocation2 + $0xe1] sm:$0x1] }
 0x461   : > { %4931 = vst.msk [vmem:[#allocation3 + $0x57] sm:$0x1] %vm4498_vm10, %v4930_v27  ;;  %v4972_v12 = vld [vmem:[#allocation2 + $0xe2] sm:$0x1]  ;;  %v4973_v63 = vld [vmem:[#allocation2 + $0xe3] sm:$0x1]  ;;  %v4960_v54 = vmax.f32 %v4956_v53, %v4957_v11  ;;  %v4968_v21 = vmax.f32 %v4964_v5, %v4965_v0 }
 0x462   : > { %v4934_v19 = vld [vmem:[#allocation2 + $0xea] sm:$0x1]  ;;  %v4935_v39 = vld [vmem:[#allocation2 + $0xeb] sm:$0x1]  ;;  %v4942_v26 = vld [vmem:[#allocation2 + $0xec] sm:$0x1]  ;;  %v4976_v33 = vmax.f32 %v4972_v12, %v4973_v63 }
 0x463   : > { %v4937_v29 = vmax.f32 %v4934_v19, %v4935_v39  ;;  %v4943_v31 = vld [vmem:[#allocation2 + $0xed] sm:$0x1]  ;;  %v4950_v61 = vld [vmem:[#allocation2 + $0xee] sm:$0x1]  ;;  %v4951_v28 = vld [vmem:[#allocation2 + $0xef] sm:$0x1]  ;;  %v4354_v39 = vpop.permute.xlu0 %4353 }
 0x464   : > { %v4980_v46 = vld [vmem:[#allocation2 + $0xe4] sm:$0x1]  ;;  %v4981_v45 = vld [vmem:[#allocation2 + $0xe5] sm:$0x1]  ;;  %v4945_v18 = vmax.f32 %v4942_v26, %v4943_v31  ;;  %v4953_v51 = vmax.f32 %v4950_v61, %v4951_v28  ;;  %v4958_v37 = vld [vmem:[#allocation2 + $0xf0] sm:$0x1] }
 0x465   : > { %v4938_v30 = vmax.f32 %v4936_v35, %v4937_v29  ;;  %v4959_v10 = vld [vmem:[#allocation2 + $0xf1] sm:$0x1]  ;;  %v4966_v9 = vld [vmem:[#allocation2 + $0xf2] sm:$0x1]  ;;  %v4967_v58 = vld [vmem:[#allocation2 + $0xf3] sm:$0x1]  ;;  %v4984_v1 = vmax.f32 %v4980_v46, %v4981_v45 }
 0x466   : > { %v4946_v3 = vmax.f32 %v4944_v43, %v4945_v18  ;;  %v4954_v34 = vmax.f32 %v4952_v47, %v4953_v51  ;;  %v4961_v60 = vmax.f32 %v4958_v37, %v4959_v10  ;;  %v4969_v52 = vmax.f32 %v4966_v9, %v4967_v58  ;;  %v4974_v14 = vld [vmem:[#allocation2 + $0xf4] sm:$0x1]  ;;  %v4975_v13 = vld [vmem:[#allocation2 + $0xf5] sm:$0x1]  ;;  %v4982_v24 = vld [vmem:[#allocation2 + $0xf6] sm:$0x1] }
 0x467   : > { %4939 = vst.msk [vmem:[#allocation3 + $0x5a] sm:$0x1] %vm4498_vm10, %v4938_v30  ;;  %v4977_v4 = vmax.f32 %v4974_v14, %v4975_v13  ;;  %v4983_v6 = vld [vmem:[#allocation2 + $0xf7] sm:$0x1]  ;;  %v4140_v41 = vmax.f32 %v4099_v36, 0.0  ;;  %v3900_v25 = vpop.f32.mrb[140].mxu0  ;;  %v4359_v30 = vpop.permute.xlu1 %4358 }
 0x468   : > { %4947 = vst.msk [vmem:[#allocation3 + $0x5b] sm:$0x1] %vm4498_vm10, %v4946_v3  ;;  %4955 = vst.msk [vmem:[#allocation3 + $0x5c] sm:$0x1] %vm4498_vm10, %v4954_v34  ;;  %v4962_v38 = vmax.f32 %v4960_v54, %v4961_v60  ;;  %v4970_v42 = vmax.f32 %v4968_v21, %v4969_v52  ;;  %v4985_v62 = vmax.f32 %v4982_v24, %v4983_v6  ;;  %v14426_v15 = vld [vmem:[#allocation97_spill] sm:$0xff]  ;;  %v10343_v22 = vpop.f32.mrb[141].mxu0 }
 0x469   : > { %v3970_v55 = vadd.f32 %v3900_v25, %v14426_v15  ;;  %v13405_v27 = vld [vmem:[#allocation3 + $0x48] sm:$0xff]  ;;  %v13407_v17 = vld [vmem:[#allocation3 + $0x50] sm:$0xff]  ;;  %v4978_v40 = vmax.f32 %v4976_v33, %v4977_v4  ;;  %v4427_v16 = vmul.f32 %v4349_v57, %v4140_v41  ;;  %v3903_v23 = vpop.f32.mrb[142].mxu0  ;;  %v14429_v35 = vld [vmem:[#allocation23_spill] sm:$0xff]  ;;  %v4364_v25 = vpop.permute.xlu0 %4363 }
 0x46a   : > { %v6494_v48 = vpack.c.bf16 %v13407_v17, %v13405_v27  ;;  %v4986_v53 = vmax.f32 %v4984_v1, %v4985_v62  ;;  %4963 = vst.msk [vmem:[#allocation3 + $0x5d] sm:$0x1] %vm4498_vm10, %v4962_v38  ;;  %4971 = vst.msk [vmem:[#allocation3 + $0x5e] sm:$0x1] %vm4498_vm10, %v4970_v42  ;;  %v14427_v11 = vld [vmem:[#allocation22_spill] sm:$0xff]  ;;  %v10344_v63 = vpop.f32.mrb[143].mxu0 }
 0x46b   : > { %v4052_v5 = vadd.f32 %v14427_v11, %v3970_v55  ;;  %v14428_v0 = vld [vmem:[#allocation98_spill] sm:$0xff]  ;;  %4979 = vst.msk [vmem:[#allocation3 + $0x5f] sm:$0x1] %vm4498_vm10, %v4978_v40  ;;  %v3908_v19 = vpop.f32.mrb[144].mxu0  ;;  %v14430_v31 = vld [vmem:[#allocation99_spill] sm:$0xff]  ;;  %v14431_v46 = vld [vmem:[#allocation24_spill] sm:$0xff] }
 0x46c   : > { %v3971_v12 = vadd.f32 %v3903_v23, %v14428_v0  ;;  %4469 = vst.msk [vmem:[#allocation2 + $0xf8] sm:$0xff] %vm4437_vm9, %v4427_v16  ;;  %v3972_v61 = vadd.f32 %v3908_v19, %v14430_v31  ;;  %v10347_v28 = vpop.f32.mrb[145].mxu0  ;;  %v14432_v18 = vld [vmem:[#allocation100_spill] sm:$0xff]  ;;  %v4988_v58 = vld [vmem:[#allocation2 + $0xe6] sm:$0x1]  ;;  %v14433_v14 = vld [vmem:[#allocation25_spill] sm:$0xff]  ;;  %v4369_v19 = vpop.permute.xlu1 %4368 }
 0x46d   : > { %4987 = vst.msk [vmem:[#allocation3 + $0x60] sm:$0x1] %vm4498_vm10, %v4986_v53  ;;  %v4100_v26 = vadd.f32 %v13338_v32, %v4052_v5  ;;  %v3911_v36 = vpop.f32.mrb[146].mxu0  ;;  %v5242_v54 = vld [vmem:[#allocation3 + $0x4b] sm:$0xff]  ;;  %v4989_v3 = vld [vmem:[#allocation2 + $0xe7] sm:$0x1] }
 0x46e   : > { %v4053_v29 = vadd.f32 %v14429_v35, %v3971_v12  ;;  %v4054_v45 = vadd.f32 %v14431_v46, %v3972_v61  ;;  %v3973_v51 = vadd.f32 %v3911_v36, %v14432_v18  ;;  %v10348_v37 = vpop.f32.mrb[147].mxu0  ;;  %v5243_v21 = vld [vmem:[#allocation3 + $0x53] sm:$0xff]  ;;  %v4996_v33 = vld [vmem:[#allocation2 + $0xe8] sm:$0x1]  ;;  %v4997_v1 = vld [vmem:[#allocation2 + $0xe9] sm:$0x1]  ;;  %v4992_v40 = vmax.f32 %v4988_v58, %v4989_v3 }
 0x46f   : > { %v4141_v43 = vmax.f32 %v4100_v26, 0.0  ;;  %v3916_v10 = vpop.f32.mrb[148].mxu0  ;;  %v5254_v9 = vpack.c.bf16 %v5243_v21, %v5242_v54  ;;  %v14434_v4 = vld [vmem:[#allocation101_spill] sm:$0xff]  ;;  %v14435_v55 = vld [vmem:[#allocation102_spill] sm:$0xff]  ;;  %v5000_v5 = vmax.f32 %v4996_v33, %v4997_v1  ;;  %v14438_v46 = vld [vmem:[#allocation103_spill] sm:$0xff] }
 0x470   : > { %v4101_v47 = vadd.f32 %v13338_v32, %v4053_v29  ;;  %v4102_v52 = vadd.f32 %v13338_v32, %v4054_v45  ;;  %v4055_v13 = vadd.f32 %v14433_v14, %v3973_v51  ;;  %v10351_v24 = vpop.f32.mrb[149].mxu0  ;;  %v3974_v6 = vadd.f32 %v3916_v10, %v14434_v4  ;;  %v14436_v53 = vld [vmem:[#allocation45_spill] sm:$0xff]  ;;  %v14437_v35 = vld [vmem:[#allocation26_spill] sm:$0xff]  ;;  %v4374_v51 = vpop.permute.xlu0 %4373  ;;  %v14439_v10 = vld [vmem:[#allocation27_spill] sm:$0xff] }
 0x471   : > { %v4428_v34 = vmul.f32 %v4354_v39, %v4141_v43  ;;  %v3919_v41 = vpop.f32.mrb[150].mxu0  ;;  %10373 = vmatprep.mubr.msk.bf16.mxu1 %vm4437_vm9, %v5254_v9  ;;  %v14440_v58 = vld [vmem:[#allocation104_spill] sm:$0xff] }
 0x472   : > { %v4142_v60 = vmax.f32 %v4101_v47, 0.0  ;;  %v4103_v15 = vadd.f32 %v13338_v32, %v4055_v13  ;;  %v3975_v22 = vadd.f32 %v3919_v41, %v14435_v55  ;;  %v4056_v11 = vadd.f32 %v14436_v53, %v3974_v6  ;;  %v10352_v31 = vpop.f32.mrb[151].mxu0  ;;  %v14441_v6 = vld [vmem:[#allocation46_spill] sm:$0xff] }
 0x473   : > { %v4990_v57 = vld [vmem:[#allocation2 + $0xf8] sm:$0x1]  ;;  %v4991_v38 = vld [vmem:[#allocation2 + $0xf9] sm:$0x1]  ;;  %v4998_v42 = vld [vmem:[#allocation2 + $0xfa] sm:$0x1] }
 0x474   : > { %4470 = vst.msk [vmem:[#allocation2 + $0x100] sm:$0xff] %vm4437_vm9, %v4428_v34  ;;  %v4429_v62 = vmul.f32 %v4359_v30, %v4142_v60  ;;  %v4993_v16 = vmax.f32 %v4990_v57, %v4991_v38  ;;  %v4999_v23 = vld [vmem:[#allocation2 + $0xfb] sm:$0x1]  ;;  %v4143_v12 = vmax.f32 %v4102_v52, 0.0  ;;  %v4144_v63 = vmax.f32 %v4103_v15, 0.0  ;;  %v3924_v43 = vpop.f32.mrb[152].mxu0 }
 0x475   : > { %v5001_v0 = vmax.f32 %v4998_v42, %v4999_v23  ;;  %v4104_v26 = vadd.f32 %v13338_v32, %v4056_v11  ;;  %v4057_v29 = vadd.f32 %v14437_v35, %v3975_v22  ;;  %v3976_v45 = vadd.f32 %v3924_v43, %v14438_v46  ;;  %v10355_v18 = vpop.f32.mrb[153].mxu0  ;;  %v5004_v54 = vld [vmem:[#allocation2 + $0xfc] sm:$0x1]  ;;  %v5005_v21 = vld [vmem:[#allocation2 + $0xfd] sm:$0x1]  ;;  %v4384_v11 = vpop.permute.xlu0 %4383 }
 0x476   : > { %4471 = vst.msk [vmem:[#allocation2 + $0x108] sm:$0xff] %vm4437_vm9, %v4429_v62  ;;  %v4994_v39 = vmax.f32 %v4992_v40, %v4993_v16  ;;  %v4430_v28 = vmul.f32 %v4364_v25, %v4143_v12  ;;  %v4431_v36 = vmul.f32 %v4369_v19, %v4144_v63  ;;  %v3927_v37 = vpop.f32.mrb[154].mxu0  ;;  %v5012_v34 = vld [vmem:[#allocation2 + $0xfe] sm:$0x1]  ;;  %v5013_v60 = vld [vmem:[#allocation2 + $0xff] sm:$0x1]  ;;  %v5008_v42 = vmax.f32 %v5004_v54, %v5005_v21 }
 0x477   : > { %v5002_v61 = vmax.f32 %v5000_v5, %v5001_v0  ;;  %v4145_v47 = vmax.f32 %v4104_v26, 0.0  ;;  %v4058_v9 = vadd.f32 %v14439_v10, %v3976_v45  ;;  %v3977_v3 = vadd.f32 %v3927_v37, %v14440_v58  ;;  %v10356_v53 = vpop.f32.mrb[155].mxu0  ;;  %v4379_v5 = vpop.permute.xlu1 %4378 }
 0x478   : > { %4995 = vst.msk [vmem:[#allocation3 + $0x61] sm:$0x1] %vm4498_vm10, %v4994_v39  ;;  %v4105_v13 = vadd.f32 %v13338_v32, %v4057_v29  ;;  %v5016_v0 = vmax.f32 %v5012_v34, %v5013_v60 }
 0x479   : > { %5003 = vst.msk [vmem:[#allocation3 + $0x62] sm:$0x1] %vm4498_vm10, %v5002_v61  ;;  %v4432_v30 = vmul.f32 %v4374_v51, %v4145_v47  ;;  %v4106_v4 = vadd.f32 %v13338_v32, %v4058_v9  ;;  %v4059_v41 = vadd.f32 %v14441_v6, %v3977_v3 }
 0x47a   : > { %4472 = vst.msk [vmem:[#allocation2 + $0x110] sm:$0xff] %vm4437_vm9, %v4430_v28  ;;  %4473 = vst.msk [vmem:[#allocation2 + $0x118] sm:$0xff] %vm4437_vm9, %v4431_v36  ;;  %v4146_v16 = vmax.f32 %v4105_v13, 0.0 }
 0x47b   : > { %v5020_v52 = vld [vmem:[#allocation2 + $0x100] sm:$0x1]  ;;  %v5021_v14 = vld [vmem:[#allocation2 + $0x101] sm:$0x1]  ;;  %v5028_v24 = vld [vmem:[#allocation2 + $0x102] sm:$0x1]  ;;  %v4107_v13 = vadd.f32 %v13338_v32, %v4059_v41 }
 0x47c   : > { %v5029_v33 = vld [vmem:[#allocation2 + $0x103] sm:$0x1]  ;;  %4474 = vst.msk [vmem:[#allocation2 + $0x120] sm:$0xff] %vm4437_vm9, %v4432_v30  ;;  %v5036_v25 = vld [vmem:[#allocation2 + $0x104] sm:$0x1]  ;;  %v4147_v23 = vmax.f32 %v4106_v4, 0.0  ;;  %v5024_v12 = vmax.f32 %v5020_v52, %v5021_v14  ;;  %v4433_v45 = vmul.f32 %v4379_v5, %v4146_v16  ;;  %v4389_v5 = vpop.permute.xlu1 %4388 }
 0x47d   : > { %v5006_v1 = vld [vmem:[#allocation2 + $0x10e] sm:$0x1]  ;;  %v5037_v57 = vld [vmem:[#allocation2 + $0x105] sm:$0x1]  ;;  %v5007_v38 = vld [vmem:[#allocation2 + $0x10f] sm:$0x1]  ;;  %v5032_v31 = vmax.f32 %v5028_v24, %v5029_v33 }
 0x47e   : > { %v5044_v62 = vld [vmem:[#allocation2 + $0x106] sm:$0x1]  ;;  %v5045_v15 = vld [vmem:[#allocation2 + $0x107] sm:$0x1]  ;;  %v5009_v55 = vmax.f32 %v5006_v1, %v5007_v38  ;;  %v5052_v22 = vld [vmem:[#allocation2 + $0x108] sm:$0x1]  ;;  %v4434_v18 = vmul.f32 %v4384_v11, %v4147_v23  ;;  %v5040_v51 = vmax.f32 %v5036_v25, %v5037_v57 }
 0x47f   : > { %v5053_v40 = vld [vmem:[#allocation2 + $0x109] sm:$0x1]  ;;  %v5060_v19 = vld [vmem:[#allocation2 + $0x10a] sm:$0x1]  ;;  %v5061_v39 = vld [vmem:[#allocation2 + $0x10b] sm:$0x1]  ;;  %v5048_v37 = vmax.f32 %v5044_v62, %v5045_v15 }
 0x480   : > { %v5010_v63 = vmax.f32 %v5008_v42, %v5009_v55  ;;  %v5068_v61 = vld [vmem:[#allocation2 + $0x10c] sm:$0x1]  ;;  %v5069_v28 = vld [vmem:[#allocation2 + $0x10d] sm:$0x1]  ;;  %v5056_v58 = vmax.f32 %v5052_v22, %v5053_v40  ;;  %4475 = vst.msk [vmem:[#allocation2 + $0x128] sm:$0xff] %vm4437_vm9, %v4433_v45  ;;  %4476 = vst.msk [vmem:[#allocation2 + $0x130] sm:$0xff] %vm4437_vm9, %v4434_v18  ;;  %v5064_v38 = vmax.f32 %v5060_v19, %v5061_v39 }
 0x481   : > { %v5014_v26 = vld [vmem:[#allocation2 + $0x110] sm:$0x1]  ;;  %v5015_v35 = vld [vmem:[#allocation2 + $0x111] sm:$0x1]  ;;  %v5022_v29 = vld [vmem:[#allocation2 + $0x112] sm:$0x1]  ;;  %v5072_v55 = vmax.f32 %v5068_v61, %v5069_v28 }
 0x482   : > { %v5017_v36 = vmax.f32 %v5014_v26, %v5015_v35  ;;  %v5023_v43 = vld [vmem:[#allocation2 + $0x113] sm:$0x1]  ;;  %v5030_v47 = vld [vmem:[#allocation2 + $0x114] sm:$0x1]  ;;  %v5031_v46 = vld [vmem:[#allocation2 + $0x115] sm:$0x1] }
 0x483   : > { %5011 = vst.msk [vmem:[#allocation3 + $0x65] sm:$0x1] %vm4498_vm10, %v5010_v63  ;;  %v5025_v54 = vmax.f32 %v5022_v29, %v5023_v43  ;;  %v5033_v21 = vmax.f32 %v5030_v47, %v5031_v46  ;;  %v5038_v30 = vld [vmem:[#allocation2 + $0x116] sm:$0x1]  ;;  %v5039_v10 = vld [vmem:[#allocation2 + $0x117] sm:$0x1] }
 0x484   : > { %v5046_v9 = vld [vmem:[#allocation2 + $0x118] sm:$0x1]  ;;  %v5018_v3 = vmax.f32 %v5016_v0, %v5017_v36  ;;  %v5041_v34 = vmax.f32 %v5038_v30, %v5039_v10  ;;  %v5047_v60 = vld [vmem:[#allocation2 + $0x119] sm:$0x1]  ;;  %v5054_v52 = vld [vmem:[#allocation2 + $0x11a] sm:$0x1] }
 0x485   : > { %v5055_v14 = vld [vmem:[#allocation2 + $0x11b] sm:$0x1]  ;;  %v5026_v24 = vmax.f32 %v5024_v12, %v5025_v54  ;;  %v5034_v33 = vmax.f32 %v5032_v31, %v5033_v21  ;;  %v5049_v1 = vmax.f32 %v5046_v9, %v5047_v60  ;;  %v5062_v6 = vld [vmem:[#allocation2 + $0x11c] sm:$0x1]  ;;  %v5063_v25 = vld [vmem:[#allocation2 + $0x11d] sm:$0x1] }
 0x486   : > { %v5057_v4 = vmax.f32 %v5054_v52, %v5055_v14  ;;  %v5070_v57 = vld [vmem:[#allocation2 + $0x11e] sm:$0x1]  ;;  %5019 = vst.msk [vmem:[#allocation3 + $0x66] sm:$0x1] %vm4498_vm10, %v5018_v3  ;;  %v5042_v42 = vmax.f32 %v5040_v51, %v5041_v34  ;;  %v5065_v62 = vmax.f32 %v5062_v6, %v5063_v25  ;;  %v5071_v15 = vld [vmem:[#allocation2 + $0x11f] sm:$0x1] }
 0x487   : > { %5027 = vst.msk [vmem:[#allocation3 + $0x67] sm:$0x1] %vm4498_vm10, %v5026_v24  ;;  %5035 = vst.msk [vmem:[#allocation3 + $0x68] sm:$0x1] %vm4498_vm10, %v5034_v33  ;;  %v5050_v22 = vmax.f32 %v5048_v37, %v5049_v1  ;;  %v5073_v40 = vmax.f32 %v5070_v57, %v5071_v15  ;;  %v4148_v53 = vmax.f32 %v4107_v13, 0.0  ;;  %v3932_v11 = vpop.f32.mrb[156].mxu0  ;;  %v4394_v13 = vpop.permute.xlu0 %4393 }
 0x488   : > { %v5058_v41 = vmax.f32 %v5056_v58, %v5057_v4  ;;  %5043 = vst.msk [vmem:[#allocation3 + $0x69] sm:$0x1] %vm4498_vm10, %v5042_v42  ;;  %v5066_v16 = vmax.f32 %v5064_v38, %v5065_v62  ;;  %v14442_v0 = vld [vmem:[#allocation105_spill] sm:$0xff]  ;;  %v10359_v63 = vpop.f32.mrb[157].mxu0  ;;  %v5076_v19 = vld [vmem:[#allocation2 + $0x120] sm:$0x1] }
 0x489   : > { %5051 = vst.msk [vmem:[#allocation3 + $0x6a] sm:$0x1] %vm4498_vm10, %v5050_v22  ;;  %v5074_v23 = vmax.f32 %v5072_v55, %v5073_v40  ;;  %v3978_v12 = vadd.f32 %v3932_v11, %v14442_v0  ;;  %v4435_v39 = vmul.f32 %v4389_v5, %v4148_v53  ;;  %v5077_v26 = vld [vmem:[#allocation2 + $0x121] sm:$0x1]  ;;  %v5084_v35 = vld [vmem:[#allocation2 + $0x122] sm:$0x1] }
 0x48a   : > { %5059 = vst.msk [vmem:[#allocation3 + $0x6b] sm:$0x1] %vm4498_vm10, %v5058_v41  ;;  %5067 = vst.msk [vmem:[#allocation3 + $0x6c] sm:$0x1] %vm4498_vm10, %v5066_v16  ;;  %v5085_v29 = vld [vmem:[#allocation2 + $0x123] sm:$0x1]  ;;  %v5080_v51 = vmax.f32 %v5076_v19, %v5077_v26 }
 0x48b   : > { %5075 = vst.msk [vmem:[#allocation3 + $0x6d] sm:$0x1] %vm4498_vm10, %v5074_v23  ;;  %v14443_v31 = vld [vmem:[#allocation88_spill] sm:$0xff]  ;;  %v5092_v28 = vld [vmem:[#allocation2 + $0x124] sm:$0x1]  ;;  %v5088_v37 = vmax.f32 %v5084_v35, %v5085_v29  ;;  %v3935_v34 = vpop.f32.mrb[158].mxu0 }
 0x48c   : > { %v4060_v61 = vadd.f32 %v14443_v31, %v3978_v12  ;;  %v5093_v36 = vld [vmem:[#allocation2 + $0x125] sm:$0x1]  ;;  %v5078_v43 = vld [vmem:[#allocation2 + $0x132] sm:$0x1]  ;;  %4477 = vst.msk [vmem:[#allocation2 + $0x138] sm:$0xff] %vm4437_vm9, %v4435_v39  ;;  %v10360_v4 = vpop.f32.mrb[159].mxu0 }
 0x48d   : > { %v5079_v47 = vld [vmem:[#allocation2 + $0x133] sm:$0x1]  ;;  %v5086_v46 = vld [vmem:[#allocation2 + $0x134] sm:$0x1]  ;;  %v5087_v45 = vld [vmem:[#allocation2 + $0x135] sm:$0x1]  ;;  %v5096_v9 = vmax.f32 %v5092_v28, %v5093_v36 }
 0x48e   : > { %v4108_v18 = vadd.f32 %v13338_v32, %v4060_v61  ;;  %v5081_v54 = vmax.f32 %v5078_v43, %v5079_v47  ;;  %v5089_v21 = vmax.f32 %v5086_v46, %v5087_v45  ;;  %v5094_v30 = vld [vmem:[#allocation2 + $0x136] sm:$0x1]  ;;  %v5095_v10 = vld [vmem:[#allocation2 + $0x137] sm:$0x1]  ;;  %v5244_v60 = vld [vmem:[#allocation3 + $0x5b] sm:$0xff] }
 0x48f   : > { %v5097_v58 = vmax.f32 %v5094_v30, %v5095_v10  ;;  %v13462_v14 = vld [vmem:[#allocation3 + $0x60] sm:$0xff]  ;;  %v5100_v24 = vld [vmem:[#allocation2 + $0x126] sm:$0x1]  ;;  %v5101_v33 = vld [vmem:[#allocation2 + $0x127] sm:$0x1] }
 0x490   : > { %v4149_v3 = vmax.f32 %v4108_v18, 0.0  ;;  %v5245_v52 = vld [vmem:[#allocation3 + $0x63] sm:$0xff]  ;;  %v5082_v1 = vmax.f32 %v5080_v51, %v5081_v54  ;;  %v5090_v32 = vmax.f32 %v5088_v37, %v5089_v21  ;;  %v13464_v25 = vld [vmem:[#allocation3 + $0x58] sm:$0xff]  ;;  %v5108_v57 = vld [vmem:[#allocation2 + $0x128] sm:$0x1]  ;;  %v5104_v11 = vmax.f32 %v5100_v24, %v5101_v33 }
 0x491   : > { %v5255_v6 = vpack.c.bf16 %v5245_v52, %v5244_v60  ;;  %v5109_v38 = vld [vmem:[#allocation2 + $0x129] sm:$0x1]  ;;  %v5116_v42 = vld [vmem:[#allocation2 + $0x12a] sm:$0x1]  ;;  %v5098_v62 = vmax.f32 %v5096_v9, %v5097_v58  ;;  %v6495_v55 = vpack.c.bf16 %v13462_v14, %v13464_v25  ;;  %v5117_v22 = vld [vmem:[#allocation2 + $0x12b] sm:$0x1] }
 0x492   : > { %v4436_v15 = vmul.f32 %v4394_v13, %v4149_v3  ;;  %v5124_v41 = vld [vmem:[#allocation2 + $0x12c] sm:$0x1]  ;;  %v5125_v40 = vld [vmem:[#allocation2 + $0x12d] sm:$0x1]  ;;  %5083 = vst.msk [vmem:[#allocation3 + $0x70] sm:$0x1] %vm4498_vm10, %v5082_v1  ;;  %v5112_v19 = vmax.f32 %v5108_v57, %v5109_v38  ;;  %v5120_v39 = vmax.f32 %v5116_v42, %v5117_v22 }
 0x493   : > { %5091 = vst.msk [vmem:[#allocation3 + $0x71] sm:$0x1] %vm4498_vm10, %v5090_v32  ;;  %10374 = vmatmul.mubr.msk.bf16.gmra.mrb[92].mxu1 %vm4437_vm9, %v5255_v6  ;;  %5099 = vst.msk [vmem:[#allocation3 + $0x72] sm:$0x1] %vm4498_vm10, %v5098_v62  ;;  %v5102_v16 = vld [vmem:[#allocation2 + $0x138] sm:$0x1]  ;;  %v5128_v61 = vmax.f32 %v5124_v41, %v5125_v40 }
 0x494   : > { %v5103_v23 = vld [vmem:[#allocation2 + $0x139] sm:$0x1]  ;;  %v5110_v53 = vld [vmem:[#allocation2 + $0x13a] sm:$0x1]  ;;  %4479 = vst.msk [vmem:[#allocation2 + $0x140] sm:$0xf] %vm4478_vm11, %v4436_v15 }
 0x495   : > { %v5105_v5 = vmax.f32 %v5102_v16, %v5103_v23  ;;  %v5111_v0 = vld [vmem:[#allocation2 + $0x13b] sm:$0x1]  ;;  %v5118_v12 = vld [vmem:[#allocation2 + $0x13c] sm:$0x1]  ;;  %v5119_v63 = vld [vmem:[#allocation2 + $0x13d] sm:$0x1] }
 0x496   : > { %v5113_v26 = vmax.f32 %v5110_v53, %v5111_v0  ;;  %v5121_v35 = vmax.f32 %v5118_v12, %v5119_v63  ;;  %v5126_v29 = vld [vmem:[#allocation2 + $0x13e] sm:$0x1]  ;;  %v5127_v31 = vld [vmem:[#allocation2 + $0x13f] sm:$0x1]  ;;  %v5132_v46 = vld [vmem:[#allocation2 + $0x12e] sm:$0x1] }
 0x497   : > { %v5106_v28 = vmax.f32 %v5104_v11, %v5105_v5  ;;  %v5129_v36 = vmax.f32 %v5126_v29, %v5127_v31  ;;  %v5133_v45 = vld [vmem:[#allocation2 + $0x12f] sm:$0x1]  ;;  %v5140_v51 = vld [vmem:[#allocation2 + $0x130] sm:$0x1]  ;;  %v5141_v37 = vld [vmem:[#allocation2 + $0x131] sm:$0x1] }
 0x498   : > { %v5114_v43 = vmax.f32 %v5112_v19, %v5113_v26  ;;  %v5122_v47 = vmax.f32 %v5120_v39, %v5121_v35  ;;  %v5136_v10 = vmax.f32 %v5132_v46, %v5133_v45  ;;  %v5144_v3 = vmax.f32 %v5140_v51, %v5141_v37  ;;  %v5248_v13 = vld [vmem:[#allocation3 + $0x7b] sm:$0xff]  ;;  %v5249_v24 = vld [vmem:[#allocation3 + $0x83] sm:$0x1]  ;;  %v5149_v1 = vld [vmem:[#allocation3 + $0x8] sm:$0xff] }
 0x499   : > { %v5130_v18 = vmax.f32 %v5128_v61, %v5129_v36  ;;  %5107 = vst.msk [vmem:[#allocation3 + $0x73] sm:$0x1] %vm4498_vm10, %v5106_v28  ;;  %v5148_v33 = vld [vmem:[#allocation3] sm:$0xff]  ;;  %v13479_v32 = vld [vmem:[#allocation3 + $0x68] sm:$0xff]  ;;  %v5257_v38 = vpack.c.bf16 %v5249_v24, %v5248_v13  ;;  %v5150_v22 = vld [vmem:[#allocation3 + $0x10] sm:$0xff]  ;;  %v5168_v19 = vpack.c.bf16 %v13405_v27, %v13364_v7  ;;  %v5169_v39 = vpack.c.bf16 %v13464_v25, %v13407_v17 }
 0x49a   : > { %5115 = vst.msk [vmem:[#allocation3 + $0x74] sm:$0x1] %vm4498_vm10, %v5114_v43  ;;  %5123 = vst.msk [vmem:[#allocation3 + $0x75] sm:$0x1] %vm4498_vm10, %v5122_v47  ;;  %v5246_v6 = vld [vmem:[#allocation3 + $0x6b] sm:$0xff]  ;;  %v5164_v15 = vpack.c.bf16 %v5149_v1, %v5148_v33  ;;  %v11008_v41 = vld [vmem:[#allocation3 + $0x18] sm:$0xff]  ;;  %v5170_v26 = vpack.c.bf16 %v13479_v32, %v13462_v14 }
 0x49b   : > { %5131 = vst.msk [vmem:[#allocation3 + $0x76] sm:$0x1] %vm4498_vm10, %v5130_v18  ;;  %v5134_v54 = vld [vmem:[#allocation2 + $0x140] sm:$0x1]  ;;  %v5135_v21 = vld [vmem:[#allocation2 + $0x141] sm:$0x1]  ;;  %v5165_v40 = vpack.c.bf16 %v11008_v41, %v5150_v22 }
 0x49c   : > { %v5142_v30 = vld [vmem:[#allocation2 + $0x142] sm:$0x1]  ;;  %v5137_v9 = vmax.f32 %v5134_v54, %v5135_v21  ;;  %v5143_v58 = vld [vmem:[#allocation2 + $0x143] sm:$0x1]  ;;  %v10851_v16 = vld [vmem:[%s14179_s4 + $0x48] sm:$0xff]  }
 0x49d   : > { %v5145_v34 = vmax.f32 %v5142_v30, %v5143_v58  ;;  %v11009_v23 = vld [vmem:[#allocation3 + $0x20] sm:$0xff]  ;;  %v11010_v53 = vld [vmem:[#allocation3 + $0x28] sm:$0xff]  ;;  %v11011_v5 = vld [vmem:[%s14179_s4 + $0x40] sm:$0xff]  }
 0x49e   : > { %v5138_v60 = vmax.f32 %v5136_v10, %v5137_v9  ;;  %v5166_v11 = vpack.c.bf16 %v11010_v53, %v11009_v23  ;;  %v10852_v0 = vld [vmem:[%s14179_s4 + $0x10] sm:$0xff]   ;;  %v11012_v12 = vld [vmem:[#allocation3 + $0x30] sm:$0xff]  ;;  %v5531_v47 = vld [vmem:[#allocation3 + $0x1c] sm:$0xff] }
 0x49f   : > { %v5146_v52 = vmax.f32 %v5144_v3, %v5145_v34  ;;  %v5167_v63 = vpack.c.bf16 %v13362_v59, %v11012_v12  ;;  %v5529_v29 = vld [vmem:[#allocation3 + $0xc] sm:$0xff]  ;;  %v5530_v31 = vld [vmem:[#allocation3 + $0x14] sm:$0xff]  ;;  %v5532_v36 = vld [vmem:[#allocation3 + $0x24] sm:$0xff] }
 0x4a0   : > { %5139 = vst.msk [vmem:[#allocation3 + $0x77] sm:$0x1] %vm4498_vm10, %v5138_v60  ;;  %v5545_v28 = vpack.c.bf16 %v5530_v31, %v5529_v29  ;;  %v5534_v43 = vld [vmem:[#allocation3 + $0x34] sm:$0xff]  ;;  %v5546_v46 = vpack.c.bf16 %v5532_v36, %v5531_v47  ;;  %v5533_v45 = vld [vmem:[#allocation3 + $0x2c] sm:$0xff]  ;;  %v5536_v54 = vld [vmem:[#allocation3 + $0x44] sm:$0xff] }
 0x4a1   : > { %5147 = vst.msk [vmem:[#allocation3 + $0x78] sm:$0x1] %vm4498_vm10, %v5146_v52  ;;  %v10853_v18 = vld [vmem:[%s14179_s4 + $0x18] sm:$0xff]   ;;  %v5547_v51 = vpack.c.bf16 %v5534_v43, %v5533_v45  ;;  %v10854_v37 = vld [vmem:[%s14179_s4 + $0x50] sm:$0xff]   ;;  %v5535_v30 = vld [vmem:[#allocation3 + $0x3c] sm:$0xff] }
 0x4a2   : > { %v5538_v21 = vld [vmem:[#allocation3 + $0x54] sm:$0xff]  ;;  %v5548_v10 = vpack.c.bf16 %v5536_v54, %v5535_v30  ;;  %v5537_v9 = vld [vmem:[#allocation3 + $0x4c] sm:$0xff]  ;;  %v5540_v3 = vld [vmem:[#allocation3 + $0x64] sm:$0xff] }
 0x4a3   : > { %v5549_v58 = vpack.c.bf16 %v5538_v21, %v5537_v9  ;;  %v5539_v60 = vld [vmem:[#allocation3 + $0x5c] sm:$0xff]  ;;  %v5541_v13 = vld [vmem:[#allocation3 + $0x6c] sm:$0xff]  ;;  %v5544_v1 = vld [vmem:[#allocation3 + $0x84] sm:$0x1] }
 0x4a4   : > { %v5550_v52 = vpack.c.bf16 %v5540_v3, %v5539_v60  ;;  %v5543_v33 = vld [vmem:[#allocation3 + $0x7c] sm:$0xff]  ;;  %v5181_v22 = vld [vmem:[#allocation3 + $0x29] sm:$0xff]  ;;  %v5178_v41 = vld [vmem:[#allocation3 + $0x11] sm:$0xff] }
 0x4a5   : > { %v10855_v23 = vld [vmem:[%s14179_s4 + $0x58] sm:$0xff]   ;;  %v5191_v43 = vld [vmem:[#allocation3 + $0x79] sm:$0x1]  ;;  %v5826_v54 = vld [vmem:[#allocation3 + $0x1d] sm:$0xff] }
 0x4a6   : > { %v5182_v12 = vld [vmem:[#allocation3 + $0x31] sm:$0xff]  ;;  %v5831_v3 = vld [vmem:[#allocation3 + $0x45] sm:$0xff]  ;;  %v5830_v60 = vld [vmem:[#allocation3 + $0x3d] sm:$0xff] }
 0x4a7   : > { %v13481_v4 = vld [vmem:[#allocation3 + $0x70] sm:$0xff]  ;;  %v10864_v59 = vld [vmem:[%s14182_s7 + $0x40] sm:$0xff]   ;;  %v10867_v27 = vld [vmem:[%s14182_s7 + $0x8] sm:$0xff]  }
 0x4a8   : > { %v5247_v57 = vld [vmem:[#allocation3 + $0x73] sm:$0xff]  ;;  %v6496_v42 = vpack.c.bf16 %v13481_v4, %v13479_v32  ;;  %9441 = vmatprep.subr.bf16.mxu0 %v10864_v59  ;;  %v10868_v17 = vld [vmem:[%s14182_s7 + $0x50] sm:$0xff]  }
 0x4a9   : > { %v5256_v62 = vpack.c.bf16 %v5247_v57, %v5246_v6  ;;  %v5163_v35 = vld [vmem:[#allocation3 + $0x78] sm:$0x1]  ;;  %v5176_v6 = vld [vmem:[#allocation3 + $0x1] sm:$0xff]  ;;  %v5177_v57 = vld [vmem:[#allocation3 + $0x9] sm:$0xff] }
 0x4aa   : > { %v5171_v61 = vpack.c.bf16 %v5163_v35, %v13481_v4  ;;  %v5542_v34 = vld [vmem:[#allocation3 + $0x74] sm:$0xff]  ;;  %v5189_v35 = vld [vmem:[#allocation3 + $0x69] sm:$0xff]  ;;  %v6743_v4 = vpop.permute.xlu1 %6742 }
 0x4ab   : > { %10377 = vmatprep.mubr.msk.bf16.mxu1 %vm4437_vm9, %v5256_v62  ;;  %v5551_v24 = vpack.c.bf16 %v5542_v34, %v5541_v13  ;;  %v5192_v62 = vpack.c.bf16 %v5177_v57, %v5176_v6  ;;  %v5186_v29 = vld [vmem:[#allocation3 + $0x51] sm:$0xff]  ;;  %v5834_v6 = vld [vmem:[#allocation3 + $0x5d] sm:$0xff] }
 0x4ac   : > { %10378 = vmatmul.mubr.msk.bf16.gmra.mrb[96].mxu1 %vm4437_vm9, %v5257_v38  ;;  %v5552_v38 = vpack.c.bf16 %v5544_v1, %v5543_v33  ;;  %v5190_v36 = vld [vmem:[#allocation3 + $0x71] sm:$0xff]  ;;  %v5835_v33 = vld [vmem:[#allocation3 + $0x65] sm:$0xff] }
 0x4ad   : > { %10385 = vmatprep.mubr.msk.bf16.mxu1 %vm4437_vm9, %v5164_v15  ;;  %v5179_v15 = vld [vmem:[#allocation3 + $0x19] sm:$0xff]  ;;  %v5824_v47 = vld [vmem:[#allocation3 + $0xd] sm:$0xff]  ;;  %v5199_v45 = vpack.c.bf16 %v5191_v43, %v5190_v36  ;;  %v5845_v57 = vpack.c.bf16 %v5835_v33, %v5834_v6 }
 0x4ae   : > { %v5828_v30 = vld [vmem:[#allocation3 + $0x2d] sm:$0xff]  ;;  %v5833_v34 = vld [vmem:[#allocation3 + $0x55] sm:$0xff] }
 0x4af   : > { %v5832_v13 = vld [vmem:[#allocation3 + $0x4d] sm:$0xff]  ;;  %v5837_v1 = vld [vmem:[#allocation3 + $0x75] sm:$0xff] }
 0x4b0   : > { %v5216_v36 = vld [vmem:[#allocation3 + $0x5a] sm:$0xff]  ;;  %v5218_v43 = vld [vmem:[#allocation3 + $0x6a] sm:$0xff] }
 0x4b1   : > { %v6126_v33 = vld [vmem:[#allocation3 + $0x4e] sm:$0xff]  ;;  %v6125_v6 = vld [vmem:[#allocation3 + $0x46] sm:$0xff]  ;;  %v6487_v56 = vld [vmem:[#allocation3 + $0x78] sm:$0xff] }
 0x4b2   : > { %v10865_v7 = vld [vmem:[%s14182_s7] sm:$0xff]   ;;  %v10870_v14 = vld [vmem:[%s14182_s7 + $0x58] sm:$0xff]  }
 0x4b3   : > { %9442 = vmatpush3.bf16.msra.mxu0 %v10865_v7  ;;  %v10871_v25 = vld [vmem:[%s14182_s7 + $0x18] sm:$0xff]   ;;  %v10873_v32 = vld [vmem:[%s14182_s7 + $0x20] sm:$0xff]  }
 0x4b4   : > { %10386 = vmatmul.mubr.msk.bf16.vlgmr.msra.gmra.mrb[84].mxu1 %vm4437_vm9, %v5165_v40  ;;  %v5193_v40 = vpack.c.bf16 %v5179_v15, %v5178_v41  ;;  %v5838_v15 = vld [vmem:[#allocation3 + $0x7d] sm:$0xff] }
 0x4b5   : > { %10402 = vmatpush3.bf16.msra.mxu1 %v11011_v5  ;;  %10389 = vmatprep.mubr.msk.bf16.mxu1 %vm4437_vm9, %v5166_v11  ;;  %v10856_v11 = vld [vmem:[%s14179_s4 + $0x20] sm:$0xff]   ;;  %v5205_v41 = vld [vmem:[#allocation3 + $0x2] sm:$0xff] }
 0x4b6   : > { %10403 = vmatprep.subr.bf16.mxu1 %v10851_v16  ;;  %v5183_v5 = vld [vmem:[#allocation3 + $0x39] sm:$0xff] }
 0x4b9   : > { %10404 = vmatpush3.bf16.msra.mxu1 %v10851_v16  ;;  %v5180_v16 = vld [vmem:[#allocation3 + $0x21] sm:$0xff] }
 0x4ba   : > { %10421 = vmatprep.subr.bf16.mxu1 %v10852_v0  ;;  %v5194_v53 = vpack.c.bf16 %v5181_v22, %v5180_v16  ;;  %v5839_v22 = vld [vmem:[#allocation3 + $0x85] sm:$0x1] }
 0x4bb   : > { %v5847_v16 = vpack.c.bf16 %v5839_v22, %v5838_v15  ;;  %v6130_v15 = vld [vmem:[#allocation3 + $0x6e] sm:$0xff]  ;;  %v6131_v22 = vld [vmem:[#allocation3 + $0x76] sm:$0xff] }
 0x4bc   : > { %10390 = vmatmul.mubr.msk.bf16.gmra.mrb[88].mxu1 %vm4437_vm9, %v5167_v63  ;;  %v5195_v63 = vpack.c.bf16 %v5183_v5, %v5182_v12  ;;  %v5207_v5 = vld [vmem:[#allocation3 + $0x12] sm:$0xff]  ;;  %v5209_v12 = vld [vmem:[#allocation3 + $0x22] sm:$0xff] }
 0x4bd   : > { %10393 = vmatprep.mubr.msk.bf16.mxu1 %vm4437_vm9, %v5168_v19  ;;  %v5184_v19 = vld [vmem:[#allocation3 + $0x41] sm:$0xff] }
 0x4c4   : > { %10394 = vmatmul.mubr.msk.bf16.gmra.mrb[92].mxu1 %vm4437_vm9, %v5169_v39 }
 0x4c5   : > { %10397 = vmatprep.mubr.msk.bf16.mxu1 %vm4437_vm9, %v5170_v26  ;;  %v5187_v26 = vld [vmem:[#allocation3 + $0x59] sm:$0xff] }
 0x4c6   : > { %v5197_v31 = vpack.c.bf16 %v5187_v26, %v5186_v29  ;;  %v5212_v26 = vld [vmem:[#allocation3 + $0x3a] sm:$0xff]  ;;  %v5211_v29 = vld [vmem:[#allocation3 + $0x32] sm:$0xff] }
 0x4cc   : > { %10398 = vmatmul.mubr.msk.bf16.gmra.mrb[96].mxu1 %vm4437_vm9, %v5171_v61  ;;  %v5188_v61 = vld [vmem:[#allocation3 + $0x61] sm:$0xff] }
 0x4cd   : > { %10405 = vmatprep.mubr.msk.bf16.mxu1 %vm4437_vm9, %v5545_v28  ;;  %v5198_v28 = vpack.c.bf16 %v5189_v35, %v5188_v61  ;;  %v5214_v35 = vld [vmem:[#allocation3 + $0x4a] sm:$0xff]  ;;  %v5213_v61 = vld [vmem:[#allocation3 + $0x42] sm:$0xff] }
 0x4d4   : > { %10406 = vmatmul.mubr.msk.bf16.vlgmr.msra.gmra.mrb[84].mxu1 %vm4437_vm9, %v5546_v46  ;;  %v5825_v46 = vld [vmem:[#allocation3 + $0x15] sm:$0xff] }
 0x4d5   : > { %10422 = vmatpush3.bf16.msra.mxu1 %v10852_v0  ;;  %10409 = vmatprep.mubr.msk.bf16.mxu1 %vm4437_vm9, %v5547_v51  ;;  %v5185_v0 = vld [vmem:[#allocation3 + $0x49] sm:$0xff] }
 0x4d6   : > { %10423 = vmatprep.subr.bf16.mxu1 %v10853_v18  ;;  %v5196_v39 = vpack.c.bf16 %v5185_v0, %v5184_v19  ;;  %v5827_v51 = vld [vmem:[#allocation3 + $0x25] sm:$0xff] }
 0x4d7   : > { %v5841_v21 = vpack.c.bf16 %v5827_v51, %v5826_v54  ;;  %v5219_v51 = vld [vmem:[#allocation3 + $0x72] sm:$0xff]  ;;  %v6120_v54 = vld [vmem:[#allocation3 + $0x1e] sm:$0xff] }
 0x4d9   : > { %10424 = vmatpush3.bf16.msra.mxu1 %v10853_v18  ;;  %v5840_v18 = vpack.c.bf16 %v5825_v46, %v5824_v47  ;;  %v5215_v47 = vld [vmem:[#allocation3 + $0x52] sm:$0xff] }
 0x4da   : > { %10441 = vmatprep.subr.bf16.mxu1 %v10854_v37  ;;  %v5226_v46 = vpack.c.bf16 %v5216_v36, %v5215_v47  ;;  %v6306_v36 = vld [vmem:[#allocation3 + $0x5f] sm:$0xff] }
 0x4dc   : > { %10410 = vmatmul.mubr.msk.bf16.gmra.mrb[88].mxu1 %vm4437_vm9, %v5548_v10  ;;  %v10857_v10 = vld [vmem:[%s14179_s4 + $0x28] sm:$0xff]  }
 0x4dd   : > { %10413 = vmatprep.mubr.msk.bf16.mxu1 %vm4437_vm9, %v5549_v58  ;;  %v10858_v58 = vld [vmem:[%s14179_s4 + $0x60] sm:$0xff]  }
 0x4e4   : > { %10414 = vmatmul.mubr.msk.bf16.gmra.mrb[92].mxu1 %vm4437_vm9, %v5550_v52  ;;  %v5843_v52 = vpack.c.bf16 %v5831_v3, %v5830_v60  ;;  %v6121_v3 = vld [vmem:[#allocation3 + $0x26] sm:$0xff]  ;;  %v6123_v60 = vld [vmem:[#allocation3 + $0x36] sm:$0xff] }
 0x4e5   : > { %10417 = vmatprep.mubr.msk.bf16.mxu1 %vm4437_vm9, %v5551_v24  ;;  %v5844_v24 = vpack.c.bf16 %v5833_v34, %v5832_v13 }
 0x4ec   : > { %10418 = vmatmul.mubr.msk.bf16.gmra.mrb[96].mxu1 %vm4437_vm9, %v5552_v38  ;;  %v5836_v38 = vld [vmem:[#allocation3 + $0x6d] sm:$0xff] }
 0x4ed   : > { %10425 = vmatprep.mubr.msk.bf16.mxu1 %vm4437_vm9, %v5192_v62  ;;  %v5846_v62 = vpack.c.bf16 %v5837_v1, %v5836_v38  ;;  %v6128_v1 = vld [vmem:[#allocation3 + $0x5e] sm:$0xff]  ;;  %v6127_v38 = vld [vmem:[#allocation3 + $0x56] sm:$0xff] }
 0x4f4   : > { %10426 = vmatmul.mubr.msk.bf16.vlgmr.msra.gmra.mrb[84].mxu1 %vm4437_vm9, %v5193_v40  ;;  %v5206_v40 = vld [vmem:[#allocation3 + $0xa] sm:$0xff] }
 0x4f5   : > { %10442 = vmatpush3.bf16.msra.mxu1 %v10854_v37  ;;  %10429 = vmatprep.mubr.msk.bf16.mxu1 %vm4437_vm9, %v5194_v53  ;;  %v5829_v37 = vld [vmem:[#allocation3 + $0x35] sm:$0xff] }
 0x4f6   : > { %10443 = vmatprep.subr.bf16.mxu1 %v10855_v23  ;;  %v5842_v9 = vpack.c.bf16 %v5829_v37, %v5828_v30  ;;  %v5208_v53 = vld [vmem:[#allocation3 + $0x1a] sm:$0xff] }
 0x4f7   : > { %v5222_v0 = vpack.c.bf16 %v5208_v53, %v5207_v5  ;;  %v5220_v37 = vld [vmem:[#allocation3 + $0x7a] sm:$0x1]  ;;  %v6133_v53 = vld [vmem:[#allocation3 + $0x86] sm:$0xff] }
 0x4f8   : > { %v6119_v30 = vld [vmem:[#allocation3 + $0x16] sm:$0xff] }
 0x4f9   : > { %10444 = vmatpush3.bf16.msra.mxu1 %v10855_v23  ;;  %v5221_v23 = vpack.c.bf16 %v5206_v40, %v5205_v41  ;;  %v6132_v41 = vld [vmem:[#allocation3 + $0x7e] sm:$0xff]  ;;  %v6129_v40 = vld [vmem:[#allocation3 + $0x66] sm:$0xff] }
 0x4fa   : > { %10461 = vmatprep.subr.bf16.mxu1 %v10856_v11 }
 0x4fc   : > { %10430 = vmatmul.mubr.msk.bf16.gmra.mrb[88].mxu1 %vm4437_vm9, %v5195_v63  ;;  %v10859_v63 = vld [vmem:[%s14179_s4 + $0x68] sm:$0xff]  }
 0x4fd   : > { %10433 = vmatprep.mubr.msk.bf16.mxu1 %vm4437_vm9, %v5196_v39  ;;  %v10860_v39 = vld [vmem:[%s14179_s4 + $0x70] sm:$0xff]  }
 0x504   : > { %10434 = vmatmul.mubr.msk.bf16.gmra.mrb[92].mxu1 %vm4437_vm9, %v5197_v31  ;;  %v5224_v31 = vpack.c.bf16 %v5212_v26, %v5211_v29  ;;  %v6299_v26 = vld [vmem:[#allocation3 + $0x27] sm:$0xff]  ;;  %v6301_v29 = vld [vmem:[#allocation3 + $0x37] sm:$0xff] }
 0x505   : > { %10437 = vmatprep.mubr.msk.bf16.mxu1 %vm4437_vm9, %v5198_v28  ;;  %v5225_v28 = vpack.c.bf16 %v5214_v35, %v5213_v61 }
 0x50c   : > { %10438 = vmatmul.mubr.msk.bf16.gmra.mrb[96].mxu1 %vm4437_vm9, %v5199_v45  ;;  %v5217_v45 = vld [vmem:[#allocation3 + $0x62] sm:$0xff] }
 0x50d   : > { %10445 = vmatprep.mubr.msk.bf16.mxu1 %vm4437_vm9, %v5840_v18  ;;  %v5227_v18 = vpack.c.bf16 %v5218_v43, %v5217_v45  ;;  %v6303_v43 = vld [vmem:[#allocation3 + $0x47] sm:$0xff] }
 0x514   : > { %10446 = vmatmul.mubr.msk.bf16.vlgmr.msra.gmra.mrb[84].mxu1 %vm4437_vm9, %v5841_v21  ;;  %v5228_v21 = vpack.c.bf16 %v5220_v37, %v5219_v51  ;;  %v6309_v51 = vld [vmem:[#allocation3 + $0x77] sm:$0xff]  ;;  %v6310_v37 = vld [vmem:[#allocation3 + $0x7f] sm:$0xff] }
 0x515   : > { %10462 = vmatpush3.bf16.msra.mxu1 %v10856_v11  ;;  %10449 = vmatprep.mubr.msk.bf16.mxu1 %vm4437_vm9, %v5842_v9  ;;  %v5210_v11 = vld [vmem:[#allocation3 + $0x2a] sm:$0xff] }
 0x516   : > { %10463 = vmatprep.subr.bf16.mxu1 %v10857_v10  ;;  %v5223_v19 = vpack.c.bf16 %v5210_v11, %v5209_v12  ;;  %v6122_v9 = vld [vmem:[#allocation3 + $0x2e] sm:$0xff]  ;;  %v6297_v12 = vld [vmem:[#allocation3 + $0x17] sm:$0xff] }
 0x517   : > { %v6136_v34 = vpack.c.bf16 %v6122_v9, %v6121_v3  ;;  %v6134_v11 = vld [vmem:[#allocation3 + $0x8e] sm:$0x1]  ;;  %v6312_v9 = vld [vmem:[#allocation3 + $0x8f] sm:$0x1]  ;;  %v13652_v3 = vld [vmem:[%s14180_s5] ss:$0 sm:$0xff] }
 0x518   : > { %v6142_v5 = vpack.c.bf16 %v6134_v11, %v6133_v53 }
 0x519   : > { %10464 = vmatpush3.bf16.msra.mxu1 %v10857_v10  ;;  %v6135_v10 = vpack.c.bf16 %v6120_v54, %v6119_v30  ;;  %v6307_v54 = vld [vmem:[#allocation3 + $0x67] sm:$0xff]  ;;  %v6319_v30 = vpack.c.bf16 %v6310_v37, %v6309_v51 }
 0x51a   : > { %10481 = vmatprep.subr.bf16.mxu1 %v10858_v58  ;;  %v10874_v37 = vld [vmem:[%s14182_s7 + $0x68] sm:$0xff]  }
 0x51c   : > { %10450 = vmatmul.mubr.msk.bf16.gmra.mrb[88].mxu1 %vm4437_vm9, %v5843_v52  ;;  %v10861_v52 = vld [vmem:[%s14179_s4 + $0x78] sm:$0xff]  }
 0x51d   : > { %10453 = vmatprep.mubr.msk.bf16.mxu1 %vm4437_vm9, %v5844_v24  ;;  %v10862_v24 = vld [vmem:[%s14179_s4 + $0x80] sm:$0xff]  }
 0x524   : > { %10454 = vmatmul.mubr.msk.bf16.gmra.mrb[92].mxu1 %vm4437_vm9, %v5845_v57  ;;  %v6138_v57 = vpack.c.bf16 %v6126_v33, %v6125_v6 }
 0x525   : > { %10457 = vmatprep.mubr.msk.bf16.mxu1 %vm4437_vm9, %v5846_v62  ;;  %v6139_v62 = vpack.c.bf16 %v6128_v1, %v6127_v38 }
 0x52c   : > { %10458 = vmatmul.mubr.msk.bf16.gmra.mrb[96].mxu1 %vm4437_vm9, %v5847_v16  ;;  %v6140_v16 = vpack.c.bf16 %v6130_v15, %v6129_v40 }
 0x52d   : > { %10465 = vmatprep.mubr.msk.bf16.mxu1 %vm4437_vm9, %v5221_v23  ;;  %v6141_v23 = vpack.c.bf16 %v6132_v41, %v6131_v22 }
 0x534   : > { %10466 = vmatmul.mubr.msk.bf16.vlgmr.msra.gmra.mrb[84].mxu1 %vm4437_vm9, %v5222_v0  ;;  %v6298_v0 = vld [vmem:[#allocation3 + $0x1f] sm:$0xff] }
 0x535   : > { %10482 = vmatpush3.bf16.msra.mxu1 %v10858_v58  ;;  %10469 = vmatprep.mubr.msk.bf16.mxu1 %vm4437_vm9, %v5223_v19  ;;  %v6124_v58 = vld [vmem:[#allocation3 + $0x3e] sm:$0xff]  ;;  %v6300_v19 = vld [vmem:[#allocation3 + $0x2f] sm:$0xff] }
 0x536   : > { %10483 = vmatprep.subr.bf16.mxu1 %v10859_v63  ;;  %v6137_v13 = vpack.c.bf16 %v6124_v58, %v6123_v60  ;;  %v6314_v35 = vpack.c.bf16 %v6300_v19, %v6299_v26 }
 0x539   : > { %10484 = vmatpush3.bf16.msra.mxu1 %v10859_v63  ;;  %v6313_v63 = vpack.c.bf16 %v6298_v0, %v6297_v12  ;;  %v6861_v12 = vlaneseq }
 0x53a   : > { %10501 = vmatprep.subr.bf16.mxu1 %v10860_v39 }
 0x53b   : > { %vm13702_vm13 = vcmp.lt.s32.totalorder %v6861_v12, 64  ;;  %vm6891_vm14 = vcmp.ge.s32.totalorder %v6861_v12, 64  ;;  %vm6892_vm15 = vcmp.lt.s32.totalorder %v6861_v12, 128 }
 0x53c   : > { %10470 = vmatmul.mubr.msk.bf16.gmra.mrb[88].mxu1 %vm4437_vm9, %v5224_v31  ;;  %v10863_v31 = vld [vmem:[%s14179_s4 + $0x88] sm:$0xff]   ;;  %vm13760_vm1 = vmand %vm6891_vm14, %vm6892_vm15 }
 0x53d   : > { %10473 = vmatprep.mubr.msk.bf16.mxu1 %vm4437_vm9, %v5225_v28  ;;  %v6304_v28 = vld [vmem:[#allocation3 + $0x4f] sm:$0xff] }
 0x53e   : > { %v6316_v47 = vpack.c.bf16 %v6304_v28, %v6303_v43 }
 0x544   : > { %10474 = vmatmul.mubr.msk.bf16.gmra.mrb[92].mxu1 %vm4437_vm9, %v5226_v46  ;;  %v6305_v46 = vld [vmem:[#allocation3 + $0x57] sm:$0xff] }
 0x545   : > { %10477 = vmatprep.mubr.msk.bf16.mxu1 %vm4437_vm9, %v5227_v18  ;;  %v6317_v45 = vpack.c.bf16 %v6306_v36, %v6305_v46  ;;  %v6308_v18 = vld [vmem:[#allocation3 + $0x6f] sm:$0xff] }
 0x54c   : > { %10478 = vmatmul.mubr.msk.bf16.gmra.mrb[96].mxu1 %vm4437_vm9, %v5228_v21  ;;  %v6318_v21 = vpack.c.bf16 %v6308_v18, %v6307_v54  ;;  %v10875_v54 = vld [vmem:[%s14182_s7 + $0x28] sm:$0xff]  }
 0x54d   : > { %10485 = vmatprep.mubr.msk.bf16.mxu1 %vm4437_vm9, %v6135_v10  ;;  %v6311_v10 = vld [vmem:[#allocation3 + $0x87] sm:$0xff] }
 0x54e   : > { %v6320_v58 = vpack.c.bf16 %v6312_v9, %v6311_v10 }
 0x554   : > { %10486 = vmatmul.mubr.msk.bf16.vlgmr.msra.gmra.mrb[84].mxu1 %vm4437_vm9, %v6136_v34  ;;  %v6753_v34 = vpop.permute.xlu1 %6752 }
 0x555   : > { %10502 = vmatpush3.bf16.msra.mxu1 %v10860_v39  ;;  %10489 = vmatprep.mubr.msk.bf16.mxu1 %vm4437_vm9, %v6137_v13  ;;  %v6302_v39 = vld [vmem:[#allocation3 + $0x3f] sm:$0xff] }
 0x556   : > { %10503 = vmatprep.subr.bf16.mxu1 %v10861_v52  ;;  %v6315_v61 = vpack.c.bf16 %v6302_v39, %v6301_v29 }
 0x558   : > { %v6763_v40 = vpop.permute.xlu1 %6762 }
 0x559   : > { %10504 = vmatpush3.bf16.msra.mxu1 %v10861_v52 }
 0x55a   : > { %10521 = vmatprep.subr.bf16.mxu1 %v10862_v24 }
 0x55c   : > { %10490 = vmatmul.mubr.msk.bf16.gmra.mrb[88].mxu1 %vm4437_vm9, %v6138_v57  ;;  %v6773_v36 = vpop.permute.xlu1 %6772 }
 0x55d   : > { %10493 = vmatprep.mubr.msk.bf16.mxu1 %vm4437_vm9, %v6139_v62 }
 0x564   : > { %10494 = vmatmul.mubr.msk.bf16.gmra.mrb[92].mxu1 %vm4437_vm9, %v6140_v16 }
 0x565   : > { %10497 = vmatprep.mubr.msk.bf16.mxu1 %vm4437_vm9, %v6141_v23 }
 0x56c   : > { %10498 = vmatmul.mubr.msk.bf16.gmra.mrb[96].mxu1 %vm4437_vm9, %v6142_v5 }
 0x56d   : > { %10505 = vmatprep.mubr.msk.bf16.mxu1 %vm4437_vm9, %v6313_v63  ;;  %v11150_v63 = vmov 1966171168  }
 0x56e   : > { %v6875_v19 = vunpack.c.l.s4 %v11150_v63 }
 0x570   : > { %v6876_v46 = vunpack.c.0.s8 %v6875_v19 }
 0x574   : > { %10506 = vmatmul.mubr.msk.bf16.vlgmr.msra.gmra.mrb[84].mxu1 %vm4437_vm9, %v6314_v35 }
 0x575   : > { %10522 = vmatpush3.bf16.msra.mxu1 %v10862_v24  ;;  %10509 = vmatprep.mubr.msk.bf16.mxu1 %vm4437_vm9, %v6315_v61 }
 0x576   : > { %10523 = vmatprep.subr.bf16.mxu1 %v10863_v31 }
 0x579   : > { %10524 = vmatpush3.bf16.msra.mxu1 %v10863_v31 }
 0x57c   : > { %10510 = vmatmul.mubr.msk.bf16.gmra.mrb[88].mxu1 %vm4437_vm9, %v6316_v47 }
 0x57d   : > { %10513 = vmatprep.mubr.msk.bf16.mxu1 %vm4437_vm9, %v6317_v45  ;;  %v13667_v45 = vshrl.u32 %v6861_v12, 7  ;;  %v10932_v12 = vld [vmem:[%s14182_s7 + $0x248] sm:$0xff]  }
 0x57f   : > { %v13678_v7 = vsub.s32 %v6876_v46, %v13667_v45 }
 0x584   : > { %10514 = vmatmul.mubr.msk.bf16.gmra.mrb[92].mxu1 %vm4437_vm9, %v6318_v21 }
 0x585   : > { %10517 = vmatprep.mubr.msk.bf16.mxu1 %vm4437_vm9, %v6319_v30 }
 0x58c   : > { %10518 = vmatmul.mubr.msk.bf16.gmra.mrb[96].mxu1 %vm4437_vm9, %v6320_v58 }
 0x58d   : > { %10525 = vmatprep.mubr.msk.bf16.mxu1 %vm4437_vm9, %v6491_v20  ;;  %v6497_v20 = vpack.c.bf16 %v6488_v44, %v6487_v56 }
 0x594   : > { %10526 = vmatmul.mubr.msk.bf16.vlgmr.msra.gmra.mrb[84].mxu1 %vm4437_vm9, %v6492_v8  ;;  %v6498_v8 = vpack.c.bf16 %v6490_v50, %v6489_v2 }
 0x595   : > { %10529 = vmatprep.mubr.msk.bf16.mxu1 %vm4437_vm9, %v6493_v49  ;;  %v10866_v49 = vld [vmem:[%s14182_s7 + $0x48] sm:$0xff]  }
 0x596   : > { %9443 = vmatprep.subr.bf16.mxu0 %v10866_v49 }
 0x597   : > { %9444 = vmatpush3.bf16.msra.mxu0 %v10867_v27 }
 0x598   : > { %9445 = vmatprep.subr.bf16.mxu0 %v10868_v17 }
 0x59c   : > { %10530 = vmatmul.mubr.msk.bf16.gmra.mrb[88].mxu1 %vm4437_vm9, %v6494_v48  ;;  %v10869_v48 = vld [vmem:[%s14182_s7 + $0x10] sm:$0xff]  }
 0x59d   : > { %10533 = vmatprep.mubr.msk.bf16.mxu1 %vm4437_vm9, %v6495_v55  ;;  %9446 = vmatpush3.bf16.msra.mxu0 %v10869_v48  ;;  %v10872_v55 = vld [vmem:[%s14182_s7 + $0x60] sm:$0xff]  }
 0x59e   : > { %9447 = vmatprep.subr.bf16.mxu0 %v10870_v14 }
 0x5a1   : > { %9448 = vmatpush3.bf16.msra.mxu0 %v10871_v25 }
 0x5a2   : > { %9449 = vmatprep.subr.bf16.mxu0 %v10872_v55 }
 0x5a4   : > { %10534 = vmatmul.mubr.msk.bf16.gmra.mrb[92].mxu1 %vm4437_vm9, %v6496_v42  ;;  %v6748_v42 = vpop.permute.xlu0 %6747 }
 0x5a5   : > { %10537 = vmatprep.mubr.msk.bf16.mxu1 %vm4437_vm9, %v6497_v20  ;;  %9450 = vmatpush3.bf16.msra.mxu0 %v10873_v32 }
 0x5a6   : > { %9451 = vmatprep.subr.bf16.mxu0 %v10874_v37 }
 0x5a8   : > { %v6758_v24 = vpop.permute.xlu0 %6757 }
 0x5a9   : > { %9452 = vmatpush3.bf16.msra.mxu0 %v10875_v54 }
 0x5ac   : > { %10538 = vmatmul.mubr.msk.bf16.gmra.mrb[96].mxu1 %vm4437_vm9, %v6498_v8  ;;  %v6768_v11 = vpop.permute.xlu0 %6767 }
 0x5b0   : > { %v6778_v21 = vpop.permute.xlu0 %6777 }
 0x667   : > { %v10527_v60 = vpop.f32.mrb[84].mxu1 }
 0x668   : > { %v6694_v52 = vadd.f32 %v10527_v60, %v13652_v3  ;;  %v6574_v13 = vpop.f32.mrb[85].mxu1 }
 0x669   : > { %v6692_v33 = vadd.f32 %v13652_v3, %v6574_v13  ;;  %v10528_v1 = vpop.f32.mrb[86].mxu1 }
 0x66a   : > { %v6710_v6 = vmax.f32 %v6694_v52, 0.0  ;;  %v6695_v57 = vadd.f32 %v10528_v1, %v13652_v3  ;;  %v6577_v38 = vpop.f32.mrb[87].mxu1 }
 0x66b   : > { %v6708_v62 = vmax.f32 %v6692_v33, 0.0  ;;  %v6693_v15 = vadd.f32 %v13652_v3, %v6577_v38 }
 0x66c   : > { %v6822_v22 = vmul.f32 %v6753_v34, %v6710_v6  ;;  %v6711_v41 = vmax.f32 %v6695_v57, 0.0  ;;  %v6783_v6 = vpop.permute.xlu1 %6782 }
 0x66d   : > { %v6820_v16 = vmul.f32 %v6743_v4, %v6708_v62  ;;  %v6709_v23 = vmax.f32 %v6693_v15, 0.0 }
 0x66e   : > { %6839 = vst.msk [vmem:[#allocation4 + $0x10] sm:$0xff] %vm6836_vm12, %v6822_v22  ;;  %v6823_v53 = vmul.f32 %v6758_v24, %v6711_v41 }
 0x66f   : > { %6837 = vst.msk [vmem:[#allocation4] sm:$0xff] %vm6836_vm12, %v6820_v16  ;;  %v6821_v5 = vmul.f32 %v6748_v42, %v6709_v23  ;;  %v10531_v0 = vpop.f32.mrb[88].mxu1  ;;  %v6788_v23 = vpop.permute.xlu0 %6787 }
 0x670   : > { %6840 = vst.msk [vmem:[#allocation4 + $0x18] sm:$0xff] %vm6836_vm12, %v6823_v53  ;;  %v6698_v39 = vadd.f32 %v10531_v0, %v13652_v3  ;;  %v6590_v26 = vpop.f32.mrb[89].mxu1 }
 0x671   : > { %6838 = vst.msk [vmem:[#allocation4 + $0x8] sm:$0xff] %vm6836_vm12, %v6821_v5  ;;  %v6696_v35 = vadd.f32 %v13652_v3, %v6590_v26  ;;  %v10532_v29 = vpop.f32.mrb[90].mxu1 }
 0x672   : > { %v6714_v31 = vmax.f32 %v6698_v39, 0.0  ;;  %v6699_v61 = vadd.f32 %v10532_v29, %v13652_v3  ;;  %v6593_v28 = vpop.f32.mrb[91].mxu1 }
 0x673   : > { %v6712_v43 = vmax.f32 %v6696_v35, 0.0  ;;  %v6697_v47 = vadd.f32 %v13652_v3, %v6593_v28 }
 0x674   : > { %v6826_v18 = vmul.f32 %v6773_v36, %v6714_v31  ;;  %v6715_v51 = vmax.f32 %v6699_v61, 0.0 }
 0x675   : > { %v6824_v30 = vmul.f32 %v6763_v40, %v6712_v43  ;;  %v6713_v10 = vmax.f32 %v6697_v47, 0.0  ;;  %v6905_v9 = vld [vmem:[#allocation4 + $0x11] sm:$0x1]  ;;  %v6906_v58 = vld [vmem:[#allocation4 + $0x12] sm:$0x1] }
 0x676   : > { %6843 = vst.msk [vmem:[#allocation4 + $0x30] sm:$0xff] %vm6836_vm12, %v6826_v18  ;;  %v6827_v56 = vmul.f32 %v6778_v21, %v6715_v51  ;;  %v6903_v44 = vld [vmem:[#allocation4 + $0x6] sm:$0x1]  ;;  %v6904_v20 = vld [vmem:[#allocation4 + $0x7] sm:$0x1]  ;;  %v6908_v2 = vmax.f32 %v6905_v9, %v6906_v58 }
 0x677   : > { %v6866_v50 = vld [vmem:[#allocation4 + $0x2] sm:$0x1]  ;;  %6841 = vst.msk [vmem:[#allocation4 + $0x20] sm:$0xff] %vm6836_vm12, %v6824_v30  ;;  %v6825_v8 = vmul.f32 %v6768_v11, %v6713_v10  ;;  %v10535_v59 = vpop.f32.mrb[92].mxu1  ;;  %v6907_v49 = vmax.f32 %v6903_v44, %v6904_v20  ;;  %v6867_v27 = vld [vmem:[#allocation4 + $0x3] sm:$0x1] }
 0x678   : > { %6844 = vst.msk [vmem:[#allocation4 + $0x38] sm:$0xff] %vm6836_vm12, %v6827_v56  ;;  %v13682_v17 = vadd.f32 %v10535_v59, %v13652_v3  ;;  %v6606_v48 = vpop.f32.mrb[93].mxu1  ;;  %v6868_v14 = vld [vmem:[#allocation4 + $0xd] sm:$0x1]  ;;  %v6869_v25 = vld [vmem:[#allocation4 + $0xe] sm:$0x1]  ;;  %v6870_v42 = vmax.f32 %v6866_v50, %v6867_v27 }
 0x679   : > { %6842 = vst.msk [vmem:[#allocation4 + $0x28] sm:$0xff] %vm6836_vm12, %v6825_v8  ;;  %v6700_v55 = vadd.f32 %v13652_v3, %v6606_v48  ;;  %v10536_v32 = vpop.f32.mrb[94].mxu1  ;;  %v6909_v4 = vmax.f32 %v6907_v49, %v6908_v2  ;;  %v6871_v34 = vmax.f32 %v6868_v14, %v6869_v25  ;;  %v6971_v57 = vld [vmem:[#allocation4 + $0x1a] sm:$0x1]  ;;  %v6972_v38 = vld [vmem:[#allocation4 + $0x1b] sm:$0x1] }
 0x67a   : > { %v13687_v60 = vadd.f32 %v10536_v32, %v13652_v3  ;;  %v6609_v52 = vpop.f32.mrb[95].mxu1  ;;  %v6937_v40 = vld [vmem:[#allocation4 + $0x16] sm:$0x1]  ;;  %v6938_v16 = vld [vmem:[#allocation4 + $0x17] sm:$0x1]  ;;  %v6975_v35 = vmax.f32 %v6971_v57, %v6972_v38 }
 0x67b   : > { %v6716_v13 = vmax.f32 %v6700_v55, 0.0  ;;  %v6701_v24 = vadd.f32 %v13652_v3, %v6609_v52  ;;  %v6917_v33 = vrot.slane %v6909_v4, %v13678_v7  ;;  %v6872_v1 = vmax.f32 %v6870_v42, %v6871_v34  ;;  %v7005_v0 = vld [vmem:[#allocation4 + $0x1e] sm:$0x1]  ;;  %v7006_v63 = vld [vmem:[#allocation4 + $0x1f] sm:$0x1] }
 0x67c   : > { %v6941_v47 = vmax.f32 %v6937_v40, %v6938_v16  ;;  %v6895_v37 = vld [vmem:[#allocation4 + $0x4] sm:$0x1]  ;;  %v6896_v54 = vld [vmem:[#allocation4 + $0x5] sm:$0x1]  ;;  %v7009_v48 = vmax.f32 %v7005_v0, %v7006_v63  ;;  %v6898_v55 = vld [vmem:[#allocation4 + $0x10] sm:$0x1] }
 0x67d   : > { %v6828_v62 = vmul.f32 %v6783_v6, %v6716_v13  ;;  %v6717_v15 = vmax.f32 %v6701_v24, 0.0  ;;  %v6924_v22 = vrot.slane %v6917_v33, %v13678_v7  ;;  %v6880_v41 = vrot.slane %v6872_v1, %v13678_v7  ;;  %v7073_v28 = vld [vmem:[#allocation4 + $0x32] sm:$0x1]  ;;  %v7074_v36 = vld [vmem:[#allocation4 + $0x33] sm:$0x1] }
 0x67e   : > { %v6973_v53 = vld [vmem:[#allocation4 + $0x25] sm:$0x1]  ;;  %v6974_v11 = vld [vmem:[#allocation4 + $0x26] sm:$0x1]  ;;  %v6939_v5 = vld [vmem:[#allocation4 + $0x21] sm:$0x1]  ;;  %v7077_v34 = vmax.f32 %v7073_v28, %v7074_v36  ;;  %v6899_v6 = vmax.f32 %v6895_v37, %v6896_v54 }
 0x67f   : > { %6845 = vst.msk [vmem:[#allocation4 + $0x40] sm:$0xff] %vm6836_vm12, %v6828_v62  ;;  %v6829_v19 = vmul.f32 %v6788_v23, %v6717_v15  ;;  %6925 = vrot.lane.b32.xlu0 %v6924_v22, %s11151_s16  ;;  %v10539_v39 = vpop.f32.mrb[96].mxu1  ;;  %v6887_v26 = vrot.slane %v6880_v41, %v13678_v7  ;;  %v6976_v29 = vmax.f32 %v6973_v53, %v6974_v11  ;;  %v6940_v31 = vld [vmem:[#allocation4 + $0x22] sm:$0x1]  ;;  %v7041_v61 = vld [vmem:[#allocation4 + $0x39] sm:$0x1] }
 0x680   : > { %v6622_v43 = vpop.f32.mrb[97].mxu1  ;;  %v6942_v46 = vmax.f32 %v6939_v5, %v6940_v31  ;;  %v7039_v18 = vld [vmem:[#allocation4 + $0x2e] sm:$0x1]  ;;  %v7040_v51 = vld [vmem:[#allocation4 + $0x2f] sm:$0x1]  ;;  %v10876_v33 = vld [vmem:[%s14182_s7 + $0x70] sm:$0xff]  }
 0x681   : > { %6846 = vst.msk [vmem:[#allocation4 + $0x48] sm:$0xff] %vm6836_vm12, %v6829_v19  ;;  %v13698_v21 = vadd.f32 %v13652_v3, %v6622_v43  ;;  %6888 = vrot.lane.b32.xlu1 %v6887_v26, %s11151_s16  ;;  %v10540_v30 = vpop.f32.mrb[98].mxu1  ;;  %v6977_v10 = vmax.f32 %v6975_v35, %v6976_v29  ;;  %v7042_v9 = vld [vmem:[#allocation4 + $0x3a] sm:$0x1]  ;;  %v7043_v58 = vmax.f32 %v7039_v18, %v7040_v51  ;;  %v7007_v56 = vld [vmem:[#allocation4 + $0x29] sm:$0x1] }
 0x682   : > { %v6625_v44 = vpop.f32.mrb[99].mxu1  ;;  %v6943_v20 = vmax.f32 %v6941_v47, %v6942_v46  ;;  %v7044_v2 = vmax.f32 %v7041_v61, %v7042_v9  ;;  %v7008_v50 = vld [vmem:[#allocation4 + $0x2a] sm:$0x1]  ;;  %v7075_v8 = vld [vmem:[#allocation4 + $0x3d] sm:$0x1]  ;;  %v10877_v15 = vld [vmem:[%s14182_s7 + $0x30] sm:$0xff]   ;;  %9453 = vmatprep.subr.bf16.mxu0 %v10876_v33 }
 0x683   : > { %v13707_v49 = vadd.f32 %v13652_v3, %v6625_v44  ;;  %v6985_v27 = vrot.slane %v6977_v10, %v13678_v7  ;;  %v7010_v14 = vmax.f32 %v7007_v56, %v7008_v50  ;;  %v7076_v25 = vld [vmem:[#allocation4 + $0x3e] sm:$0x1]  ;;  %v6897_v32 = vld [vmem:[#allocation4 + $0xf] sm:$0x1]  ;;  %v6854_v13 = vld [vmem:[#allocation4] sm:$0x1]  ;;  %9454 = vmatpush3.bf16.msra.mxu0 %v10877_v15 }
 0x684   : > { %v6951_v4 = vrot.slane %v6943_v20, %v13678_v7  ;;  %v7045_v42 = vmax.f32 %v7043_v58, %v7044_v2  ;;  %v7078_v52 = vmax.f32 %v7075_v8, %v7076_v25  ;;  %v6855_v24 = vld [vmem:[#allocation4 + $0x1] sm:$0x1]  ;;  %v6900_v57 = vmax.f32 %v6897_v32, %v6898_v55  ;;  %v6856_v38 = vld [vmem:[#allocation4 + $0xb] sm:$0x1]  ;;  %v6857_v62 = vld [vmem:[#allocation4 + $0xc] sm:$0x1] }
 0x685   : > { %v6992_v3 = vrot.slane %v6985_v27, %v13678_v7  ;;  %v7011_v1 = vmax.f32 %v7009_v48, %v7010_v14  ;;  %v6963_v53 = vld [vmem:[#allocation4 + $0x18] sm:$0x1]  ;;  %v6858_v0 = vmax.f32 %v6854_v13, %v6855_v24  ;;  %v6859_v63 = vmax.f32 %v6856_v38, %v6857_v62  ;;  %v6964_v19 = vld [vmem:[#allocation4 + $0x19] sm:$0x1]  ;;  %v6965_v39 = vld [vmem:[#allocation4 + $0x23] sm:$0x1] }
 0x686   : > { %v6958_v22 = vrot.slane %v6951_v4, %v13678_v7  ;;  %v7053_v41 = vrot.slane %v7045_v42, %v13678_v7  ;;  %v7079_v40 = vmax.f32 %v7077_v34, %v7078_v52  ;;  %v7107_v16 = vld [vmem:[#allocation4 + $0x42] sm:$0x1]  ;;  %v7108_v23 = vld [vmem:[#allocation4 + $0x43] sm:$0x1]  ;;  %v6901_v5 = vmax.f32 %v6899_v6, %v6900_v57  ;;  %v6966_v26 = vld [vmem:[#allocation4 + $0x24] sm:$0x1] }
 0x687   : > { %6993 = vrot.lane.b32.xlu0 %v6992_v3, %s11151_s16  ;;  %v7019_v11 = vrot.slane %v7011_v1, %v13678_v7  ;;  %v7111_v31 = vmax.f32 %v7107_v16, %v7108_v23  ;;  %v6967_v61 = vmax.f32 %v6963_v53, %v6964_v19  ;;  %v6968_v28 = vmax.f32 %v6965_v39, %v6966_v26  ;;  %v6929_v36 = vld [vmem:[#allocation4 + $0x8] sm:$0x1]  ;;  %v6930_v51 = vld [vmem:[#allocation4 + $0x9] sm:$0x1]  ;;  %v6931_v37 = vld [vmem:[#allocation4 + $0x13] sm:$0x1] }
 0x688   : > { %6959 = vrot.lane.b32.xlu1 %v6958_v22, %s11151_s16  ;;  %v7109_v35 = vld [vmem:[#allocation4 + $0x4d] sm:$0x1]  ;;  %v7110_v29 = vld [vmem:[#allocation4 + $0x4e] sm:$0x1]  ;;  %v7060_v43 = vrot.slane %v7053_v41, %v13678_v7  ;;  %v7087_v47 = vrot.slane %v7079_v40, %v13678_v7  ;;  %6902 = vst.msk [vmem:[#allocation5 + $0x1] sm:$0x1] %vm13702_vm13, %v6901_v5  ;;  %v6860_v18 = vmax.f32 %v6858_v0, %v6859_v63 }
 0x689   : > { %v7112_v46 = vmax.f32 %v7109_v35, %v7110_v29  ;;  %v6932_v54 = vld [vmem:[#allocation4 + $0x14] sm:$0x1]  ;;  %v7026_v30 = vrot.slane %v7019_v11, %v13678_v7  ;;  %v6969_v10 = vmax.f32 %v6967_v61, %v6968_v28  ;;  %v6933_v9 = vmax.f32 %v6929_v36, %v6930_v51  ;;  %v7033_v56 = vld [vmem:[#allocation4 + $0x37] sm:$0x1]  ;;  %v7034_v44 = vld [vmem:[#allocation4 + $0x38] sm:$0x1] }
 0x68a   : > { %v6934_v58 = vmax.f32 %v6931_v37, %v6932_v54  ;;  %v7031_v20 = vld [vmem:[#allocation4 + $0x2c] sm:$0x1]  ;;  %6865 = vst.msk [vmem:[#allocation5] sm:$0x1] %vm13702_vm13, %v6860_v18  ;;  %v7036_v50 = vmax.f32 %v7033_v56, %v7034_v44  ;;  %v7032_v8 = vld [vmem:[#allocation4 + $0x2d] sm:$0x1]  ;;  %v7094_v3 = vrot.slane %v7087_v47, %v13678_v7 }
 0x68b   : > { %7061 = vrot.lane.b32.xlu0 %v7060_v43, %s11151_s16  ;;  %v7113_v2 = vmax.f32 %v7111_v31, %v7112_v46  ;;  %v6997_v27 = vld [vmem:[#allocation4 + $0x1c] sm:$0x1]  ;;  %v6998_v48 = vld [vmem:[#allocation4 + $0x1d] sm:$0x1]  ;;  %6970 = vst.msk [vmem:[#allocation5 + $0x3] sm:$0x1] %vm13702_vm13, %v6969_v10  ;;  %v7035_v25 = vmax.f32 %v7031_v20, %v7032_v8 }
 0x68c   : > { %7027 = vrot.lane.b32.xlu1 %v7026_v30, %s11151_s16  ;;  %v6935_v14 = vmax.f32 %v6933_v9, %v6934_v58  ;;  %v6999_v55 = vld [vmem:[#allocation4 + $0x27] sm:$0x1]  ;;  %v7000_v32 = vld [vmem:[#allocation4 + $0x28] sm:$0x1]  ;;  %v7065_v4 = vld [vmem:[#allocation4 + $0x30] sm:$0x1]  ;;  %v7001_v34 = vmax.f32 %v6997_v27, %v6998_v48 }
 0x68d   : > { %v7121_v42 = vrot.slane %v7113_v2, %v13678_v7  ;;  %v7002_v52 = vmax.f32 %v6999_v55, %v7000_v32  ;;  %v7066_v13 = vld [vmem:[#allocation4 + $0x31] sm:$0x1]  ;;  %v7067_v24 = vld [vmem:[#allocation4 + $0x3b] sm:$0x1]  ;;  %v7068_v33 = vld [vmem:[#allocation4 + $0x3c] sm:$0x1]  ;;  %v7037_v1 = vmax.f32 %v7035_v25, %v7036_v50 }
 0x68e   : > { %6936 = vst.msk [vmem:[#allocation5 + $0x2] sm:$0x1] %vm13702_vm13, %v6935_v14  ;;  %v7069_v6 = vmax.f32 %v7065_v4, %v7066_v13  ;;  %v7070_v57 = vmax.f32 %v7067_v24, %v7068_v33  ;;  %v7099_v38 = vld [vmem:[#allocation4 + $0x34] sm:$0x1]  ;;  %v7100_v62 = vld [vmem:[#allocation4 + $0x35] sm:$0x1] }
 0x68f   : > { %v7101_v15 = vld [vmem:[#allocation4 + $0x3f] sm:$0x1]  ;;  %v7128_v22 = vrot.slane %v7121_v42, %v13678_v7  ;;  %v7003_v41 = vmax.f32 %v7001_v34, %v7002_v52  ;;  %v7102_v40 = vld [vmem:[#allocation4 + $0x40] sm:$0x1]  ;;  %7038 = vst.msk [vmem:[#allocation5 + $0x5] sm:$0x1] %vm13702_vm13, %v7037_v1  ;;  %v7103_v11 = vmax.f32 %v7099_v38, %v7100_v62 }
 0x690   : > { %v10878_v16 = vld [vmem:[%s14182_s7 + $0x78] sm:$0xff]   ;;  %7095 = vrot.lane.b32.xlu1 %v7094_v3, %s11151_s16  ;;  %v7071_v53 = vmax.f32 %v7069_v6, %v7070_v57  ;;  %v7104_v5 = vmax.f32 %v7101_v15, %v7102_v40  ;;  %v10880_v0 = vld [vmem:[%s14182_s7 + $0xc0] sm:$0xff]   ;;  %v6736_v26 = vld [vmem:[#allocation6 + $0x60] sm:$0xff]  ;;  %v7283_v56 = vsub.s32 0, %v13667_v45  ;;  %v7287_v44 = vsub.s32 1, %v13667_v45 }
 0x691   : > { %v10879_v23 = vld [vmem:[%s14182_s7 + $0x38] sm:$0xff]   ;;  %7129 = vrot.lane.b32.xlu0 %v7128_v22, %s11151_s16  ;;  %7004 = vst.msk [vmem:[#allocation5 + $0x4] sm:$0x1] %vm13702_vm13, %v7003_v41  ;;  %9455 = vmatprep.subr.bf16.mxu0 %v10878_v16  ;;  %v6735_v19 = vld [vmem:[#allocation6 + $0x58] sm:$0xff]  ;;  %v10936_v47 = vld [vmem:[%s14182_s7 + $0x250] sm:$0xff]   ;;  %v7295_v20 = vsub.s32 3, %v13667_v45 }
 0x692   : > { %v6734_v63 = vld [vmem:[#allocation6 + $0x50] sm:$0xff]  ;;  %7072 = vst.msk [vmem:[#allocation5 + $0x6] sm:$0x1] %vm13702_vm13, %v7071_v53  ;;  %v7105_v39 = vmax.f32 %v7103_v11, %v7104_v5  ;;  %9456 = vmatpush3.bf16.msra.mxu0 %v10879_v23  ;;  %v6737_v35 = vld [vmem:[#allocation6 + $0x68] sm:$0xff]  ;;  %v10933_v43 = vld [vmem:[%s14182_s7 + $0x208] sm:$0xff]   ;;  %v6718_v4 = vmax.f32 %v13682_v17, 0.0 }
 0x693   : > { %9463 = vmatprep.subr.bf16.mxu0 %v10880_v0  ;;  %v10928_v61 = vld [vmem:[%s14182_s7 + $0x240] sm:$0xff]   ;;  %v10937_v46 = vld [vmem:[%s14182_s7 + $0x210] sm:$0xff]   ;;  %v10940_v37 = vld [vmem:[%s14182_s7 + $0x258] sm:$0xff]   ;;  %v6719_v34 = vmax.f32 %v13687_v60, 0.0  ;;  %v6720_v1 = vmax.f32 %v13698_v21, 0.0  ;;  %v6721_v60 = vmax.f32 %v13707_v49, 0.0 }
 0x694   : > { %6792 = vperm.xlu1 %10774, %v6734_v63   ;;  %7106 = vst.msk [vmem:[#allocation5 + $0x7] sm:$0x1] %vm13702_vm13, %v7105_v39  ;;  %v10929_v28 = vld [vmem:[%s14182_s7 + $0x200] sm:$0xff]   ;;  %9529 = vmatprep.subr.bf16.mxu1 %v10928_v61  ;;  %v10941_v54 = vld [vmem:[%s14182_s7 + $0x218] sm:$0xff]   ;;  %v10882_v55 = vld [vmem:[%s14182_s7 + $0xc8] sm:$0xff]  }
 0x695   : > { %6797 = vperm.xlu0 %10773, %v6735_v19   ;;  %9530 = vmatpush3.bf16.msra.mxu1 %v10929_v28  ;;  %v10881_v25 = vld [vmem:[%s14182_s7 + $0x80] sm:$0xff]   ;;  %v10883_v42 = vld [vmem:[%s14182_s7 + $0x88] sm:$0xff]   ;;  %v10884_v13 = vld [vmem:[%s14182_s7 + $0xd0] sm:$0xff]  }
 0x696   : > { %9531 = vmatprep.subr.bf16.mxu1 %v10932_v12  ;;  %v10885_v17 = vld [vmem:[%s14182_s7 + $0x90] sm:$0xff]   ;;  %v10886_v57 = vld [vmem:[%s14182_s7 + $0xd8] sm:$0xff]   ;;  %v7141_v15 = vld [vmem:[#allocation4 + $0x46] sm:$0x1] }
 0x697   : > { %v7142_v22 = vld [vmem:[#allocation4 + $0x47] sm:$0x1]  ;;  %v10887_v49 = vld [vmem:[%s14182_s7 + $0x98] sm:$0xff]   ;;  %v7175_v41 = vld [vmem:[#allocation4 + $0x4a] sm:$0x1] }
 0x698   : > { %6802 = vperm.xlu1 %10774, %v6736_v26   ;;  %v7176_v40 = vld [vmem:[#allocation4 + $0x4b] sm:$0x1]  ;;  %v10944_v16 = vld [vmem:[%s14182_s7 + $0x260] sm:$0xff]   ;;  %v7167_v63 = vld [vmem:[#allocation4 + $0x48] sm:$0x1]  ;;  %v7145_v28 = vmax.f32 %v7141_v15, %v7142_v22 }
 0x699   : > { %6807 = vperm.xlu0 %10773, %v6737_v35   ;;  %9532 = vmatpush3.bf16.msra.mxu1 %v10933_v43  ;;  %v10945_v23 = vld [vmem:[%s14182_s7 + $0x220] sm:$0xff]   ;;  %v7168_v19 = vld [vmem:[#allocation4 + $0x49] sm:$0x1]  ;;  %v7135_v61 = vld [vmem:[#allocation4 + $0x4f] sm:$0x1] }
 0x69a   : > { %9533 = vmatprep.subr.bf16.mxu1 %v10936_v47  ;;  %v10888_v53 = vld [vmem:[%s14182_s7 + $0xe0] sm:$0xff]   ;;  %v10890_v39 = vld [vmem:[%s14182_s7 + $0xe8] sm:$0xff]   ;;  %v10893_v22 = vld [vmem:[%s14182_s7 + $0xb0] sm:$0xff]  }
 0x69b   : > { %v7133_v11 = vld [vmem:[#allocation4 + $0x44] sm:$0x1]  ;;  %v7134_v5 = vld [vmem:[#allocation4 + $0x45] sm:$0x1] }
 0x69c   : > { %v10889_v0 = vld [vmem:[%s14182_s7 + $0xa0] sm:$0xff]  }
 0x69d   : > { %9534 = vmatpush3.bf16.msra.mxu1 %v10937_v46  ;;  %v7179_v46 = vmax.f32 %v7175_v41, %v7176_v40  ;;  %v10960_v29 = vld [vmem:[%s14182_s7 + $0x300] sm:$0xff]  }
 0x69e   : > { %9535 = vmatprep.subr.bf16.mxu1 %v10940_v37 }
 0x6a1   : > { %9536 = vmatpush3.bf16.msra.mxu1 %v10941_v54 }
 0x6a2   : > { %9537 = vmatprep.subr.bf16.mxu1 %v10944_v16 }
 0x6a5   : > { %9538 = vmatpush3.bf16.msra.mxu1 %v10945_v23 }
 0x6f1   : > { %v6926_v31 = vpop.permute.xlu0 %6925 }
 0x6f2   : > { %6928 = vst.msk [vmem:[#allocation5 + $0x1] sm:$0x1] %vm13760_vm1, %v6926_v31 }
 0x6f3   : > { %v6889_v36 = vpop.permute.xlu1 %6888 }
 0x6f4   : > { %6894 = vst.msk [vmem:[#allocation5] sm:$0x1] %vm13760_vm1, %v6889_v36 }
 0x6f9   : > { %v6994_v18 = vpop.permute.xlu0 %6993 }
 0x6fa   : > { %6996 = vst.msk [vmem:[#allocation5 + $0x3] sm:$0x1] %vm13760_vm1, %v6994_v18  ;;  %v6960_v51 = vpop.permute.xlu1 %6959 }
 0x6fb   : > { %6962 = vst.msk [vmem:[#allocation5 + $0x2] sm:$0x1] %vm13760_vm1, %v6960_v51 }
 0x6fd   : > { %v7062_v30 = vpop.permute.xlu0 %7061 }
 0x6fe   : > { %7064 = vst.msk [vmem:[#allocation5 + $0x5] sm:$0x1] %vm13760_vm1, %v7062_v30  ;;  %v7028_v10 = vpop.permute.xlu1 %7027 }
 0x6ff   : > { %7030 = vst.msk [vmem:[#allocation5 + $0x4] sm:$0x1] %vm13760_vm1, %v7028_v10  ;;  %v10891_v10 = vld [vmem:[%s14182_s7 + $0xa8] sm:$0xff]  }
 0x702   : > { %v7096_v9 = vpop.permute.xlu1 %7095 }
 0x703   : > { %7098 = vst.msk [vmem:[#allocation5 + $0x6] sm:$0x1] %vm13760_vm1, %v7096_v9  ;;  %v7130_v58 = vpop.permute.xlu0 %7129  ;;  %v7137_v9 = vmax.f32 %v7133_v11, %v7134_v5 }
 0x704   : > { %7132 = vst.msk [vmem:[#allocation5 + $0x7] sm:$0x1] %vm13760_vm1, %v7130_v58 }
 0x70b   : > { %v13807_v2 = vld [vmem:[#allocation5] sm:$0xff] }
 0x70c   : > { %v7284_v50 = vrot.slane %v13807_v2, %v7283_v56  ;;  %v7288_v8 = vrot.slane %v13807_v2, %v7287_v44  ;;  %v7296_v27 = vrot.slane %v13807_v2, %v7295_v20 }
 0x70e   : > { %v7346_v48 = vpack.c.bf16 %v7284_v50, %v7284_v50  ;;  %v7347_v14 = vpack.c.bf16 %v7288_v8, %v7288_v8  ;;  %v7349_v32 = vpack.c.bf16 %v7296_v27, %v7296_v27 }
 0x710   : > { %8195 = vmatprep.mubr.bf16.mxu0 %v7347_v14 }
 0x711   : > { %8196 = vmatmul.mubr.bf16.vlgmr.msra.gmra.mrb[160].mxu0 %v7346_v48 }
 0x712   : > { %9464 = vmatpush3.bf16.msra.mxu0 %v10881_v25  ;;  %8235 = vmatprep.mubr.bf16.mxu0 %v7349_v32 }
 0x713   : > { %v6793_v52 = vpop.permute.xlu1 %6792  ;;  %9465 = vmatprep.subr.bf16.mxu0 %v10882_v55  ;;  %v10892_v55 = vld [vmem:[%s14182_s7 + $0xf0] sm:$0xff]  }
 0x714   : > { %v6830_v24 = vmul.f32 %v6793_v52, %v6718_v4  ;;  %v6798_v33 = vpop.permute.xlu0 %6797  ;;  %v7171_v4 = vmax.f32 %v7167_v63, %v7168_v19 }
 0x715   : > { %v6831_v3 = vmul.f32 %v6798_v33, %v6719_v34 }
 0x716   : > { %6847 = vst.msk [vmem:[#allocation4 + $0x50] sm:$0xff] %vm6836_vm12, %v6830_v24  ;;  %9466 = vmatpush3.bf16.msra.mxu0 %v10883_v42 }
 0x717   : > { %6848 = vst.msk [vmem:[#allocation4 + $0x58] sm:$0xff] %vm6836_vm12, %v6831_v3  ;;  %v6803_v6 = vpop.permute.xlu1 %6802  ;;  %9467 = vmatprep.subr.bf16.mxu0 %v10884_v13 }
 0x718   : > { %v6832_v38 = vmul.f32 %v6803_v6, %v6720_v1  ;;  %v6808_v62 = vpop.permute.xlu0 %6807 }
 0x719   : > { %v6833_v21 = vmul.f32 %v6808_v62, %v6721_v60 }
 0x71a   : > { %6849 = vst.msk [vmem:[#allocation4 + $0x60] sm:$0xff] %vm6836_vm12, %v6832_v38  ;;  %9468 = vmatpush3.bf16.msra.mxu0 %v10885_v17 }
 0x71b   : > { %6850 = vst.msk [vmem:[#allocation4 + $0x68] sm:$0xff] %vm6836_vm12, %v6833_v21  ;;  %9469 = vmatprep.subr.bf16.mxu0 %v10886_v57 }
 0x71d   : > { %v7143_v26 = vld [vmem:[#allocation4 + $0x51] sm:$0x1]  ;;  %v7144_v35 = vld [vmem:[#allocation4 + $0x52] sm:$0x1]  ;;  %v7177_v31 = vld [vmem:[#allocation4 + $0x55] sm:$0x1] }
 0x71e   : > { %9470 = vmatpush3.bf16.msra.mxu0 %v10887_v49  ;;  %v7146_v12 = vmax.f32 %v7143_v26, %v7144_v35  ;;  %v7178_v36 = vld [vmem:[#allocation4 + $0x56] sm:$0x1]  ;;  %v7209_v43 = vld [vmem:[#allocation4 + $0x5a] sm:$0x1]  ;;  %v7210_v47 = vld [vmem:[#allocation4 + $0x5b] sm:$0x1] }
 0x71f   : > { %9471 = vmatprep.subr.bf16.mxu0 %v10888_v53  ;;  %v7180_v18 = vmax.f32 %v7177_v31, %v7178_v36  ;;  %v7243_v51 = vld [vmem:[#allocation4 + $0x5e] sm:$0x1]  ;;  %v7244_v37 = vld [vmem:[#allocation4 + $0x5f] sm:$0x1]  ;;  %v7136_v54 = vld [vmem:[#allocation4 + $0x50] sm:$0x1]  ;;  %v7213_v3 = vmax.f32 %v7209_v43, %v7210_v47 }
 0x720   : > { %v7147_v30 = vmax.f32 %v7145_v28, %v7146_v12  ;;  %v7138_v58 = vmax.f32 %v7135_v61, %v7136_v54  ;;  %v7169_v50 = vld [vmem:[#allocation4 + $0x53] sm:$0x1]  ;;  %v7170_v8 = vld [vmem:[#allocation4 + $0x54] sm:$0x1]  ;;  %v7201_v27 = vld [vmem:[#allocation4 + $0x58] sm:$0x1]  ;;  %v7247_v49 = vmax.f32 %v7243_v51, %v7244_v37 }
 0x721   : > { %v7269_v48 = vld [vmem:[#allocation4 + $0x60] sm:$0x1]  ;;  %v7270_v14 = vld [vmem:[#allocation4 + $0x61] sm:$0x1]  ;;  %v7181_v25 = vmax.f32 %v7179_v46, %v7180_v18  ;;  %v7211_v32 = vld [vmem:[#allocation4 + $0x65] sm:$0x1]  ;;  %v7172_v42 = vmax.f32 %v7169_v50, %v7170_v8 }
 0x722   : > { %v7273_v34 = vmax.f32 %v7269_v48, %v7270_v14  ;;  %v7271_v52 = vld [vmem:[#allocation4 + $0x6b] sm:$0x1]  ;;  %v7272_v13 = vld [vmem:[#allocation4 + $0x6c] sm:$0x1]  ;;  %9472 = vmatpush3.bf16.msra.mxu0 %v10889_v0  ;;  %v7155_v24 = vrot.slane %v7147_v30, %v13678_v7  ;;  %v7212_v33 = vld [vmem:[#allocation4 + $0x66] sm:$0x1]  ;;  %v7139_v1 = vmax.f32 %v7137_v9, %v7138_v58 }
 0x723   : > { %v7274_v17 = vmax.f32 %v7271_v52, %v7272_v13  ;;  %9473 = vmatprep.subr.bf16.mxu0 %v10890_v39  ;;  %v7189_v60 = vrot.slane %v7181_v25, %v13678_v7  ;;  %v7214_v6 = vmax.f32 %v7211_v32, %v7212_v33  ;;  %v7245_v57 = vld [vmem:[#allocation4 + $0x69] sm:$0x1]  ;;  %v7246_v38 = vld [vmem:[#allocation4 + $0x6a] sm:$0x1]  ;;  %v7173_v62 = vmax.f32 %v7171_v4, %v7172_v42  ;;  %v7202_v21 = vld [vmem:[#allocation4 + $0x59] sm:$0x1] }
 0x724   : > { %v7162_v15 = vrot.slane %v7155_v24, %v13678_v7  ;;  %v7248_v41 = vmax.f32 %v7245_v57, %v7246_v38  ;;  %7140 = vst.msk [vmem:[#allocation5 + $0x8] sm:$0x1] %vm13702_vm13, %v7139_v1  ;;  %v7205_v40 = vmax.f32 %v7201_v27, %v7202_v21  ;;  %v7203_v16 = vld [vmem:[#allocation4 + $0x63] sm:$0x1]  ;;  %v7204_v23 = vld [vmem:[#allocation4 + $0x64] sm:$0x1] }
 0x725   : > { %v7275_v53 = vmax.f32 %v7273_v34, %v7274_v17  ;;  %v7196_v11 = vrot.slane %v7189_v60, %v13678_v7  ;;  %v7215_v5 = vmax.f32 %v7213_v3, %v7214_v6  ;;  %7174 = vst.msk [vmem:[#allocation5 + $0x9] sm:$0x1] %vm13702_vm13, %v7173_v62  ;;  %v7206_v0 = vmax.f32 %v7203_v16, %v7204_v23  ;;  %v7235_v63 = vld [vmem:[#allocation4 + $0x5c] sm:$0x1]  ;;  %v7236_v19 = vld [vmem:[#allocation4 + $0x5d] sm:$0x1] }
 0x726   : > { %v7237_v39 = vld [vmem:[#allocation4 + $0x67] sm:$0x1]  ;;  %7163 = vrot.lane.b32.xlu1 %v7162_v15, %s11151_s16  ;;  %9474 = vmatpush3.bf16.msra.mxu0 %v10891_v10  ;;  %v7249_v26 = vmax.f32 %v7247_v49, %v7248_v41  ;;  %v7239_v35 = vmax.f32 %v7235_v63, %v7236_v19  ;;  %v7238_v31 = vld [vmem:[#allocation4 + $0x68] sm:$0x1]  ;;  %v10894_v36 = vld [vmem:[%s14182_s7 + $0xf8] sm:$0xff]   ;;  %v7291_v43 = vsub.s32 2, %v13667_v45 }
 0x727   : > { %v10948_v61 = vld [vmem:[%s14182_s7 + $0x268] sm:$0xff]   ;;  %7276 = vst.msk [vmem:[#allocation5 + $0xc] sm:$0x1] %vm13702_vm13, %v7275_v53  ;;  %7197 = vrot.lane.b32.xlu0 %v7196_v11, %s11151_s16  ;;  %9475 = vmatprep.subr.bf16.mxu0 %v10892_v55  ;;  %v7223_v12 = vrot.slane %v7215_v5, %v13678_v7  ;;  %v7207_v47 = vmax.f32 %v7205_v40, %v7206_v0  ;;  %v10952_v18 = vld [vmem:[%s14182_s7 + $0x270] sm:$0xff]   ;;  %v7303_v37 = vsub.s32 5, %v13667_v45  ;;  %v10895_v58 = vld [vmem:[%s14182_s7 + $0xb8] sm:$0xff]  }
 0x728   : > { %v10949_v28 = vld [vmem:[%s14182_s7 + $0x228] sm:$0xff]   ;;  %v7240_v46 = vmax.f32 %v7237_v39, %v7238_v31  ;;  %v7257_v51 = vrot.slane %v7249_v26, %v13678_v7  ;;  %9539 = vmatprep.subr.bf16.mxu1 %v10948_v61  ;;  %v10953_v10 = vld [vmem:[%s14182_s7 + $0x230] sm:$0xff]   ;;  %v10956_v50 = vld [vmem:[%s14182_s7 + $0x278] sm:$0xff]   ;;  %v7292_v8 = vrot.slane %v13807_v2, %v7291_v43  ;;  %v14448_v52 = vmov 0.0  }
 0x729   : > { %v7230_v54 = vrot.slane %v7223_v12, %v13678_v7  ;;  %7208 = vst.msk [vmem:[#allocation5 + $0xa] sm:$0x1] %vm13702_vm13, %v7207_v47  ;;  %9540 = vmatpush3.bf16.msra.mxu1 %v10949_v28  ;;  %v6738_v27 = vld [vmem:[#allocation6 + $0x70] sm:$0xff]  ;;  %v7304_v48 = vrot.slane %v13807_v2, %v7303_v37  ;;  %v6739_v14 = vld [vmem:[#allocation6 + $0x78] sm:$0x1]  ;;  %v10898_v32 = vld [vmem:[%s14182_s7 + $0x148] sm:$0xff]  }
 0x72a   : > { %v7241_v30 = vmax.f32 %v7239_v35, %v7240_v46  ;;  %9476 = vmatpush3.bf16.msra.mxu0 %v10893_v22  ;;  %v7264_v9 = vrot.slane %v7257_v51, %v13678_v7  ;;  %9541 = vmatprep.subr.bf16.mxu1 %v10952_v18  ;;  %v10896_v7 = vld [vmem:[%s14182_s7 + $0x140] sm:$0xff]   ;;  %v10957_v25 = vld [vmem:[%s14182_s7 + $0x238] sm:$0xff]   ;;  %v7348_v59 = vpack.c.bf16 %v7292_v8, %v7292_v8  ;;  %v10899_v42 = vld [vmem:[%s14182_s7 + $0x108] sm:$0xff]   ;;  %v7299_v62 = vsub.s32 4, %v13667_v45 }
 0x72b   : > { %7231 = vrot.lane.b32.xlu1 %v7230_v54, %s11151_s16  ;;  %9477 = vmatprep.subr.bf16.mxu0 %v10894_v36  ;;  %v10897_v55 = vld [vmem:[%s14182_s7 + $0x100] sm:$0xff]   ;;  %v7351_v4 = vpack.c.bf16 %v7304_v48, %v7304_v48  ;;  %v10900_v34 = vld [vmem:[%s14182_s7 + $0x150] sm:$0xff]   ;;  %v10902_v24 = vld [vmem:[%s14182_s7 + $0x158] sm:$0xff]   ;;  %v7311_v21 = vsub.s32 7, %v13667_v45  ;;  %v7307_v36 = vsub.s32 6, %v13667_v45 }
 0x72c   : > { %7242 = vst.msk [vmem:[#allocation5 + $0xb] sm:$0x1] %vm13702_vm13, %v7241_v30  ;;  %7265 = vrot.lane.b32.xlu0 %v7264_v9, %s11151_s16  ;;  %v10901_v13 = vld [vmem:[%s14182_s7 + $0x110] sm:$0xff]   ;;  %v10903_v33 = vld [vmem:[%s14182_s7 + $0x118] sm:$0xff]   ;;  %v10904_v3 = vld [vmem:[%s14182_s7 + $0x160] sm:$0xff]   ;;  %v7300_v22 = vrot.slane %v13807_v2, %v7299_v62  ;;  %s408_s16 = scalar_lea.vmem [#allocation11], %s407_s22 }
 0x72d   : > { %9542 = vmatpush3.bf16.msra.mxu1 %v10953_v10  ;;  %v10905_v1 = vld [vmem:[%s14182_s7 + $0x120] sm:$0xff]   ;;  %v10906_v17 = vld [vmem:[%s14182_s7 + $0x168] sm:$0xff]   ;;  %v10908_v6 = vld [vmem:[%s14182_s7 + $0x170] sm:$0xff]   ;;  %v7312_v41 = vrot.slane %v13807_v2, %v7311_v21  ;;  %v7308_v46 = vrot.slane %v13807_v2, %v7307_v36  ;;  %s8563_s30 = sshll.u32 %s408_s16, 4  ;;  %s14135_s30 = int_to_ptr.vmem [resolvable:$true] %s8563_s30 }
 0x72e   : > { %9478 = vmatpush3.bf16.msra.mxu0 %v10895_v58  ;;  %9543 = vmatprep.subr.bf16.mxu1 %v10956_v50  ;;  %v10907_v60 = vld [vmem:[%s14182_s7 + $0x128] sm:$0xff]   ;;  %v10909_v57 = vld [vmem:[%s14182_s7 + $0x130] sm:$0xff]   ;;  %v10910_v38 = vld [vmem:[%s14182_s7 + $0x178] sm:$0xff]   ;;  %v7350_v16 = vpack.c.bf16 %v7300_v22, %v7300_v22  ;;  %s11069_s21 = scalar_lea.vmem %s14135_s30, 16  ;;  %p11076_p4 = scmp.lt.s32.totalorder %s14135_s30, %s11074_s28 }
 0x72f   : > { %6812 = vperm.xlu1 %10774, %v6738_v27   ;;  %9485 = vmatprep.subr.bf16.mxu0 %v10896_v7  ;;  %v10911_v15 = vld [vmem:[%s14182_s7 + $0x138] sm:$0xff]   ;;  %v10912_v49 = vld [vmem:[%s14182_s7 + $0x1c0] sm:$0xff]   ;;  %v10914_v23 = vld [vmem:[%s14182_s7 + $0x1c8] sm:$0xff]   ;;  %v7353_v53 = vpack.c.bf16 %v7312_v41, %v7312_v41  ;;  %v7352_v37 = vpack.c.bf16 %v7308_v46, %v7308_v46  ;;  %p11070_p12 = scmp.ne.s32.totalorder %s14135_s30, %s11069_s21  ;;  %p11077_p7 = scmp.lt.s32.totalorder %s11075_s29, %s11069_s21 }
 0x730   : > { %6817 = vperm.xlu0 %10773, %v6739_v14   ;;  %v10913_v40 = vld [vmem:[%s14182_s7 + $0x180] sm:$0xff]   ;;  %v10915_v11 = vld [vmem:[%s14182_s7 + $0x188] sm:$0xff]   ;;  %v10916_v5 = vld [vmem:[%s14182_s7 + $0x1d0] sm:$0xff]  }
 0x731   : > { %8236 = vmatmul.mubr.bf16.vlgmr.msra.gmra.mrb[164].mxu0 %v7348_v59  ;;  %9544 = vmatpush3.bf16.msra.mxu1 %v10957_v25  ;;  %v10917_v0 = vld [vmem:[%s14182_s7 + $0x190] sm:$0xff]   ;;  %v10918_v63 = vld [vmem:[%s14182_s7 + $0x1d8] sm:$0xff]   ;;  %v10920_v39 = vld [vmem:[%s14182_s7 + $0x1e0] sm:$0xff]   ;;  %p11071_p2 = pnand %p11070_p12, %p14449_p1  ;;  %p11078_p8 = por %p11077_p7, %p11076_p4 }
 0x732   : > { %9486 = vmatpush3.bf16.msra.mxu0 %v10897_v55  ;;  %8275 = vmatprep.mubr.bf16.mxu0 %v7351_v4  ;;  %v10919_v19 = vld [vmem:[%s14182_s7 + $0x198] sm:$0xff]   ;;  %v10921_v26 = vld [vmem:[%s14182_s7 + $0x1a0] sm:$0xff]   ;;  %v10922_v35 = vld [vmem:[%s14182_s7 + $0x1e8] sm:$0xff]  }
 0x733   : > { %9487 = vmatprep.subr.bf16.mxu0 %v10898_v32  ;;  %10541 = vmatprep.subr.bf16.mxu1 %v14448_v52  ;;  %v10923_v31 = vld [vmem:[%s14182_s7 + $0x1a8] sm:$0xff]   ;;  %v10924_v61 = vld [vmem:[%s14182_s7 + $0x1f0] sm:$0xff]   ;;  %v10926_v12 = vld [vmem:[%s14182_s7 + $0x1f8] sm:$0xff]   ;;  %p11072_p3 = pneg %p11071_p2 }
 0x734   : > { %v10925_v28 = vld [vmem:[%s14182_s7 + $0x1b0] sm:$0xff]   ;;  %v10927_v47 = vld [vmem:[%s14182_s7 + $0x1b8] sm:$0xff]   ;;  %v10930_v18 = vld [vmem:[%s14182_s7 + $0x2c0] sm:$0xff]  }
 0x735   : > { %v10931_v51 = vld [vmem:[%s14182_s7 + $0x280] sm:$0xff]   ;;  %v10934_v54 = vld [vmem:[%s14182_s7 + $0x2c8] sm:$0xff]   ;;  %v10938_v30 = vld [vmem:[%s14182_s7 + $0x2d0] sm:$0xff]   ;;  %p11079_p11 = pnand %p11078_p8, %p11072_p3 }
 0x736   : > { %9488 = vmatpush3.bf16.msra.mxu0 %v10899_v42  ;;  %v10935_v2 = vld [vmem:[%s14182_s7 + $0x288] sm:$0xff]   ;;  %v10939_v10 = vld [vmem:[%s14182_s7 + $0x290] sm:$0xff]   ;;  %v10942_v9 = vld [vmem:[%s14182_s7 + $0x2d8] sm:$0xff]  }
 0x737   : > { %9489 = vmatprep.subr.bf16.mxu0 %v10900_v34  ;;  %v10943_v58 = vld [vmem:[%s14182_s7 + $0x298] sm:$0xff]   ;;  %v10946_v50 = vld [vmem:[%s14182_s7 + $0x2e0] sm:$0xff]   ;;  %v10950_v7 = vld [vmem:[%s14182_s7 + $0x2e8] sm:$0xff]  }
 0x738   : > { %v10947_v8 = vld [vmem:[%s14182_s7 + $0x2a0] sm:$0xff]   ;;  %v10951_v27 = vld [vmem:[%s14182_s7 + $0x2a8] sm:$0xff]   ;;  %v10954_v48 = vld [vmem:[%s14182_s7 + $0x2f0] sm:$0xff]  }
 0x739   : > { %v10955_v14 = vld [vmem:[%s14182_s7 + $0x2b0] sm:$0xff]   ;;  %v10958_v25 = vld [vmem:[%s14182_s7 + $0x2f8] sm:$0xff]  }
 0x73a   : > { %9490 = vmatpush3.bf16.msra.mxu0 %v10901_v13  ;;  %v10959_v55 = vld [vmem:[%s14182_s7 + $0x2b8] sm:$0xff]  }
 0x73b   : > { %9491 = vmatprep.subr.bf16.mxu0 %v10902_v24  ;;  %v10965_v22 = vld [vmem:[#allocation9 + $0x8] sm:$0xff]  }
 0x73e   : > { %9492 = vmatpush3.bf16.msra.mxu0 %v10903_v33 }
 0x73f   : > { %9493 = vmatprep.subr.bf16.mxu0 %v10904_v3 }
 0x742   : > { %9494 = vmatpush3.bf16.msra.mxu0 %v10905_v1 }
 0x743   : > { %9495 = vmatprep.subr.bf16.mxu0 %v10906_v17 }
 0x746   : > { %9496 = vmatpush3.bf16.msra.mxu0 %v10907_v60 }
 0x747   : > { %9497 = vmatprep.subr.bf16.mxu0 %v10908_v6 }
 0x74a   : > { %9498 = vmatpush3.bf16.msra.mxu0 %v10909_v57  ;;  %v10963_v57 = vld [vmem:[%s14182_s7 + $0x318] sm:$0xff]  }
 0x74b   : > { %9499 = vmatprep.subr.bf16.mxu0 %v10910_v38 }
 0x74e   : > { %9500 = vmatpush3.bf16.msra.mxu0 %v10911_v15  ;;  %v10964_v15 = vld [vmem:[#allocation9] sm:$0xff]  }
 0x74f   : > { %9507 = vmatprep.subr.bf16.mxu0 %v10912_v49  ;;  %v10966_v49 = vld [vmem:[#allocation9 + $0x10] sm:$0xff]  }
 0x751   : > { %8276 = vmatmul.mubr.bf16.vlgmr.msra.gmra.mrb[168].mxu0 %v7350_v16 }
 0x752   : > { %9508 = vmatpush3.bf16.msra.mxu0 %v10913_v40  ;;  %8315 = vmatprep.mubr.bf16.mxu0 %v7353_v53  ;;  %v10967_v53 = vld [vmem:[#allocation9 + $0x18] sm:$0xff]  }
 0x753   : > { %9509 = vmatprep.subr.bf16.mxu0 %v10914_v23  ;;  %v7559_v23 = vld [vmem:[%s14183_s8] sm:$0x1] }
 0x756   : > { %9510 = vmatpush3.bf16.msra.mxu0 %v10915_v11 }
 0x757   : > { %9511 = vmatprep.subr.bf16.mxu0 %v10916_v5 }
 0x75a   : > { %9512 = vmatpush3.bf16.msra.mxu0 %v10917_v0  ;;  %v10968_v0 = vld [vmem:[#allocation9 + $0x20] sm:$0xff]  }
 0x75b   : > { %9513 = vmatprep.subr.bf16.mxu0 %v10918_v63 }
 0x75e   : > { %9514 = vmatpush3.bf16.msra.mxu0 %v10919_v19 }
 0x75f   : > { %9515 = vmatprep.subr.bf16.mxu0 %v10920_v39 }
 0x762   : > { %9516 = vmatpush3.bf16.msra.mxu0 %v10921_v26 }
 0x763   : > { %9517 = vmatprep.subr.bf16.mxu0 %v10922_v35 }
 0x766   : > { %9518 = vmatpush3.bf16.msra.mxu0 %v10923_v31  ;;  %v10969_v31 = vld [vmem:[#allocation9 + $0x28] sm:$0xff]  }
 0x767   : > { %9519 = vmatprep.subr.bf16.mxu0 %v10924_v61  ;;  %v10970_v61 = vld [vmem:[#allocation9 + $0x30] sm:$0xff]  }
 0x76a   : > { %9520 = vmatpush3.bf16.msra.mxu0 %v10925_v28  ;;  %v10971_v28 = vld [vmem:[#allocation9 + $0x38] sm:$0xff]  }
 0x76b   : > { %9521 = vmatprep.subr.bf16.mxu0 %v10926_v12 }
 0x76e   : > { %9522 = vmatpush3.bf16.msra.mxu0 %v10927_v47 }
 0x76f   : > { %9551 = vmatprep.subr.bf16.mxu0 %v10930_v18 }
 0x771   : > { %8316 = vmatmul.mubr.bf16.vlgmr.msra.gmra.mrb[172].mxu0 %v7352_v37 }
 0x772   : > { %9552 = vmatpush3.bf16.msra.mxu0 %v10931_v51 }
 0x773   : > { %9553 = vmatprep.subr.bf16.mxu0 %v10934_v54 }
 0x776   : > { %9554 = vmatpush3.bf16.msra.mxu0 %v10935_v2 }
 0x777   : > { %9555 = vmatprep.subr.bf16.mxu0 %v10938_v30 }
 0x77a   : > { %9556 = vmatpush3.bf16.msra.mxu0 %v10939_v10 }
 0x77b   : > { %9557 = vmatprep.subr.bf16.mxu0 %v10942_v9 }
 0x77e   : > { %9558 = vmatpush3.bf16.msra.mxu0 %v10943_v58 }
 0x77f   : > { %9559 = vmatprep.subr.bf16.mxu0 %v10946_v50 }
 0x782   : > { %9560 = vmatpush3.bf16.msra.mxu0 %v10947_v8 }
 0x783   : > { %9561 = vmatprep.subr.bf16.mxu0 %v10950_v7 }
 0x786   : > { %9562 = vmatpush3.bf16.msra.mxu0 %v10951_v27 }
 0x787   : > { %9563 = vmatprep.subr.bf16.mxu0 %v10954_v48 }
 0x78a   : > { %9564 = vmatpush3.bf16.msra.mxu0 %v10955_v14 }
 0x78b   : > { %9565 = vmatprep.subr.bf16.mxu0 %v10958_v25 }
 0x78e   : > { %9566 = vmatpush3.bf16.msra.mxu0 %v10959_v55 }
 0x78f   : > { %10553 = vmatprep.subr.bf16.mxu0 %v14448_v52 }
 0x798   : > { %v7164_v59 = vpop.permute.xlu1 %7163 }
 0x799   : > { %7166 = vst.msk [vmem:[#allocation5 + $0x8] sm:$0x1] %vm13760_vm1, %v7164_v59  ;;  %v7198_v32 = vpop.permute.xlu0 %7197 }
 0x79a   : > { %7200 = vst.msk [vmem:[#allocation5 + $0x9] sm:$0x1] %vm13760_vm1, %v7198_v32 }
 0x79d   : > { %v7232_v4 = vpop.permute.xlu1 %7231 }
 0x79e   : > { %7234 = vst.msk [vmem:[#allocation5 + $0xa] sm:$0x1] %vm13760_vm1, %v7232_v4  ;;  %v7266_v42 = vpop.permute.xlu0 %7265 }
 0x79f   : > { %7268 = vst.msk [vmem:[#allocation5 + $0xb] sm:$0x1] %vm13760_vm1, %v7266_v42 }
 0x7a6   : > { %v7278_v34 = vld [vmem:[#allocation5 + $0x8] sm:$0x1f] }
 0x7a7   : > { %v7316_v13 = vrot.slane %v7278_v34, %v7283_v56  ;;  %v7320_v24 = vrot.slane %v7278_v34, %v7287_v44  ;;  %v7324_v33 = vrot.slane %v7278_v34, %v7291_v43  ;;  %v7328_v3 = vrot.slane %v7278_v34, %v7295_v20  ;;  %v10961_v56 = vld [vmem:[%s14182_s7 + $0x308] sm:$0xff]   ;;  %v10962_v43 = vld [vmem:[%s14182_s7 + $0x310] sm:$0xff]  }
 0x7a8   : > { %v7332_v38 = vrot.slane %v7278_v34, %v7299_v62 }
 0x7a9   : > { %v7354_v1 = vpack.c.bf16 %v7316_v13, %v7316_v13  ;;  %v7355_v17 = vpack.c.bf16 %v7320_v24, %v7320_v24  ;;  %v7356_v60 = vpack.c.bf16 %v7324_v33, %v7324_v33  ;;  %v7357_v6 = vpack.c.bf16 %v7328_v3, %v7328_v3  ;;  %v8460_v3 = vld [vmem:[%s14185_s10] sm:$0x1] }
 0x7aa   : > { %v7358_v21 = vpack.c.bf16 %v7332_v38, %v7332_v38 }
 0x7ab   : > { %8355 = vmatprep.mubr.bf16.mxu1 %v7355_v17  ;;  %8395 = vmatprep.mubr.bf16.mxu0 %v7357_v6 }
 0x7ac   : > { %8356 = vmatmul.mubr.bf16.vlgmr.msra.gmra.mrb[100].mxu1 %v7354_v1  ;;  %8396 = vmatmul.mubr.bf16.vlgmr.msra.gmra.mrb[176].mxu0 %v7356_v60 }
 0x7ad   : > { %10542 = vmatpush3.bf16.msra.mxu1 %v10960_v29  ;;  %10549 = vmatprep.mubr.msk.bf16.mxu1 %vm11148_vm0, %v14448_v52 }
 0x7ae   : > { %v6813_v44 = vpop.permute.xlu1 %6812  ;;  %10543 = vmatprep.subr.bf16.mxu1 %v14448_v52  ;;  %10569 = vmatprep.mubr.msk.bf16.mxu0 %vm11148_vm0, %v14448_v52 }
 0x7af   : > { %v6818_v20 = vpop.permute.xlu0 %6817  ;;  %10554 = vmatpush3.bf16.msra.mxu0 %v10964_v15 }
 0x7b0   : > { %10555 = vmatprep.subr.bf16.mxu0 %v14448_v52 }
 0x7b1   : > { %10544 = vmatpush3.bf16.msra.mxu1 %v10961_v56 }
 0x7b2   : > { %10545 = vmatprep.subr.bf16.mxu1 %v14448_v52 }
 0x7b3   : > { %10556 = vmatpush3.bf16.msra.mxu0 %v10965_v22 }
 0x7b4   : > { %10557 = vmatprep.subr.bf16.mxu0 %v14448_v52 }
 0x7b5   : > { %10546 = vmatpush3.bf16.msra.mxu1 %v10962_v43 }
 0x7b6   : > { %10547 = vmatprep.subr.bf16.mxu1 %v14448_v52 }
 0x7b7   : > { %10558 = vmatpush3.bf16.msra.mxu0 %v10966_v49 }
 0x7b8   : > { %10559 = vmatprep.subr.bf16.mxu0 %v14448_v52 }
 0x7b9   : > { %10548 = vmatpush3.bf16.msra.mxu1 %v10963_v57 }
 0x7bb   : > { %10560 = vmatpush3.bf16.msra.mxu0 %v10967_v53 }
 0x7bc   : > { %10550 = vmatmul.mubr.msk.bf16.vlgmr.msra.gmra.mrb[104].mxu1 %vm6836_vm12, %v7358_v21  ;;  %10561 = vmatprep.subr.bf16.mxu0 %v14448_v52 }
 0x7bf   : > { %10562 = vmatpush3.bf16.msra.mxu0 %v10968_v0 }
 0x7c0   : > { %10563 = vmatprep.subr.bf16.mxu0 %v14448_v52 }
 0x7c3   : > { %10564 = vmatpush3.bf16.msra.mxu0 %v10969_v31 }
 0x7c4   : > { %10565 = vmatprep.subr.bf16.mxu0 %v14448_v52 }
 0x7c7   : > { %10566 = vmatpush3.bf16.msra.mxu0 %v10970_v61 }
 0x7c8   : > { %10567 = vmatprep.subr.bf16.mxu0 %v14448_v52 }
 0x7cb   : > { %10568 = vmatpush3.bf16.msra.mxu0 %v10971_v28 }
 0x7e4   : > { %v9457_v45 = vpop.f32.mrb[160].mxu0 }
 0x7e5   : > { %v9458_v62 = vpop.f32.mrb[161].mxu0 }
 0x7e6   : > { %v9459_v41 = vadd.f32 %v9458_v62, %v9457_v45  ;;  %v9460_v40 = vpop.f32.mrb[162].mxu0 }
 0x7e7   : > { %v9461_v16 = vpop.f32.mrb[163].mxu0 }
 0x7e8   : > { %v8198_v63 = vadd.f32 %v9459_v41, %v7559_v23 }
 0x804   : > { %v9479_v11 = vpop.f32.mrb[164].mxu0 }
 0x805   : > { %v9480_v5 = vpop.f32.mrb[165].mxu0 }
 0x806   : > { %v9481_v19 = vadd.f32 %v9480_v5, %v9479_v11  ;;  %v9482_v39 = vpop.f32.mrb[166].mxu0 }
 0x807   : > { %v9483_v26 = vpop.f32.mrb[167].mxu0 }
 0x808   : > { %v8238_v35 = vadd.f32 %v9481_v19, %v8198_v63 }
 0x824   : > { %v9501_v12 = vpop.f32.mrb[168].mxu0 }
 0x825   : > { %v9502_v36 = vpop.f32.mrb[169].mxu0 }
 0x826   : > { %v9503_v47 = vadd.f32 %v9502_v36, %v9501_v12  ;;  %v9504_v46 = vpop.f32.mrb[170].mxu0 }
 0x827   : > { %v9505_v18 = vpop.f32.mrb[171].mxu0 }
 0x828   : > { %v8278_v51 = vadd.f32 %v9503_v47, %v8238_v35 }
 0x844   : > { %v9523_v37 = vpop.f32.mrb[172].mxu0 }
 0x845   : > { %v9524_v54 = vpop.f32.mrb[173].mxu0 }
 0x846   : > { %v9525_v2 = vadd.f32 %v9524_v54, %v9523_v37  ;;  %v9526_v30 = vpop.f32.mrb[174].mxu0 }
 0x847   : > { %v9527_v10 = vpop.f32.mrb[175].mxu0 }
 0x848   : > { %v8318_v9 = vadd.f32 %v9525_v2, %v8278_v51 }
 0x87f   : > { %v9545_v58 = vpop.f32.mrb[100].mxu1  ;;  %v9567_v50 = vpop.f32.mrb[176].mxu0 }
 0x880   : > { %v9546_v8 = vpop.f32.mrb[101].mxu1  ;;  %v9568_v52 = vpop.f32.mrb[177].mxu0 }
 0x881   : > { %v9547_v7 = vadd.f32 %v9546_v8, %v9545_v58  ;;  %v9548_v27 = vpop.f32.mrb[102].mxu1  ;;  %v9569_v48 = vadd.f32 %v9568_v52, %v9567_v50  ;;  %v9570_v14 = vpop.f32.mrb[178].mxu0 }
 0x882   : > { %v9549_v25 = vpop.f32.mrb[103].mxu1  ;;  %v9571_v59 = vpop.f32.mrb[179].mxu0 }
 0x883   : > { %v8358_v55 = vadd.f32 %v9547_v7, %v8318_v9 }
 0x885   : > { %v8398_v32 = vadd.f32 %v9569_v48, %v8358_v55 }
 0x88f   : > { %v8437_v4 = vpop.f32.mrb[104].mxu1 }
 0x890   : > { %v8438_v42 = vadd.f32 %v8437_v4, %v8398_v32  ;;  %v10551_v34 = vpop.f32.mrb[105].mxu1 }
 0x891   : > { %v8440_v13 = vpop.f32.mrb[106].mxu1 }
 0x892   : > { %v8443_v24 = vpack.c.bf16 %v8438_v42, %v8438_v42  ;;  %v10552_v33 = vpop.f32.mrb[107].mxu1 }
 0x894   : > { %10570 = vmatmul.mubr.bf16.vlgmr.msra.gmra.mrb[180].mxu0 %v8443_v24 }
 0x967   : > { %v8543_v1 = vpop.f32.mrb[180].mxu0 }
 0x968   : > { %v8544_v17 = vadd.f32 %v8543_v1, %v8460_v3  ;;  %v10571_v60 = vpop.f32.mrb[181].mxu0 }
 0x969   : > { %v8546_v29 = vpop.f32.mrb[182].mxu0 }
 0x96a   : > { %8549 = vst [vmem:[%s408_s16] sm:$0x1] %v8544_v17  ;;  %v10572_v6 = vpop.f32.mrb[183].mxu0 }
 0x96b   : > { %11082 = shalt.err (!%p11079_p11)
}
 0x96c   : > { %s11083_s13 = scalar_lea.hbm %s14133_s12, 16  ;;  %s11087_s26 = scalar_lea.hbm %s14186_s11, 32 }
 0x96d   : > { %p11084_p13 = scmp.ne.s32.totalorder %s14133_s12, %s11083_s13  ;;  %p11088_p6 = scmp.lt.u32.totalorder %s14133_s12, %s14186_s11 }
 0x96e   : > { %p11089_p9 = scmp.lt.u32.totalorder %s11087_s26, %s11083_s13  ;;  %p11091_p12 = scmp.lt.u32.totalorder %s11083_s13, %s14133_s12 }
 0x96f   : > { %p11085_p0 = pnand %p11084_p13, %p14449_p1 }
 0x970   : > { %p11090_p10 = por %p11089_p9, %p11088_p6 }
 0x971   : > { %p11086_p5 = pneg %p11085_p0 }
 0x972   : > { %p11092_p2 = por %p11091_p12, %p11090_p10 }
 0x974   : > { %p11093_p3 = pnand %p11092_p2, %p11086_p5 }
 0x976   : > { %11096 = shalt.err (!%p11093_p3)
}
 0x977   : > { %10712 = dma.vmem_to_hbm [thread:$0]  (%p14449_p1), %s14135_s30, 16, %s14133_s12, %s8551_s17  }
 0x978 PF: > { %s14450_s16 = sld [smem:[#allocation15_spill]]  ;;  %s14451_s19 = sld [smem:[#allocation19_spill]] }
 0x979   : > { %p10729_p4 = scmp.ge.s32.totalorder %s11139_s20, 2 }
 0x97e   : > { %s8575_s14 = sand.u32 1, %s14450_s16   ;;  %p14452_p7 = scmp.ne.s32.totalorder %s14451_s19, 0 }
 0x97f   : > { %s8576_s21 = scalar_lea.sflag [#allocation8], %s8575_s14 }
 0x980   : > { %p10722_p8 = pnand %p10729_p4, %p14452_p7 }
 0x982   : > { %11122 = dma.done.wait (!%p10722_p8), %s8576_s21, 16  }
 0x983   : > { %11124 = vsyncadd (!%p10722_p8), %s8576_s21, 4294967280  ;;  %s14453_s20 = sld [smem:[#allocation17_spill]]  ;;  %s14454_s23 = sld [smem:[#allocation16_spill]] }
 0x984   : > { %s14455_s19 = sld [smem:[#allocation18_spill]]  ;;  %s14456_s17 = smov %s11131_s18 }
 0x989   : > { %p23_p11 = scmp.ge.s32.totalorder %s14453_s20, 4   ;;  %s14457_s18 = smov %s14454_s23 }
 0x98b   :  { %25 = sbr.rel (!%p23_p11) target bundleno = 5 (0x5), region = 124 }
 0x992   :  { %8580 = vsyncpa [#allocation7], 1 }
 0x993   :  { %8582 = vsyncpa [#allocation7 + $0x1], 1 }
 0x994   :  { %8583 = vsyncpa [#allocation10], 1 }
 0x995   :  { %8584 = vsyncpa [#allocation8], 1 }
 0x996   :  { %8586 = vsyncpa [#allocation8 + $0x1], 1 }

</bundles_post_ra>
